<compile_context>
chip_gen: v5e
topology: v5e:2x2
jax: 0.10.0
libtpu: 0.0.40
codegen_flags: <defaults>
</compile_context>

<pallas_src>
import functools
import math

import jax
import jax.numpy as jnp
from jax import lax
from jax.experimental import pallas as pl
from jax.experimental.pallas import tpu as pltpu


def _layer_norm(y, gamma, beta, eps):
    mean = jnp.mean(y, axis=-1, keepdims=True)
    centered = y - mean
    var = jnp.mean(centered * centered, axis=-1, keepdims=True)
    inv = lax.rsqrt(var + eps)
    return centered * inv * gamma + beta


def _layout_layer_kernel(x_ref, mask_ref, rel_ref,
                         w_qkv_ref, b_qkv_ref,
                         w_ao_ref, b_ao_ref, ln1_g_ref, ln1_b_ref,
                         w_int_ref, b_int_ref,
                         w_out_ref, b_out_ref, ln2_g_ref, ln2_b_ref,
                         o_ref, ctx_ref, *, num_heads, eps):
    x_f32 = x_ref[0].astype(jnp.float32)            # [S, H] residual path (f32)
    x_bf = x_ref[0].astype(jnp.bfloat16)            # MXU operand (bf16)
    H = x_f32.shape[-1]
    dh = H // num_heads

    # --- fused QKV projection: one bf16 MXU pass -> [S, 3H] f32; 1/sqrt(dh) folded
    #     into Wq/bq at parameter-prep time ---
    qkv = (jnp.dot(x_bf, w_qkv_ref[...], preferred_element_type=jnp.float32)
           + b_qkv_ref[...])

    # Mask bias hoisted out of the head loop: one compare+select, reused NH times.
    # Finite -1e30 instead of -inf so a fully-masked query row cannot NaN.
    mask_bias = jnp.where(mask_ref[0, 0] != 0,
                          jnp.float32(-1e30), jnp.float32(0.0))

    # --- per-head attention; context written straight into a VMEM scratch slab ---
    for h in range(num_heads):                      # static unroll over NH heads
        q = qkv[:, h * dh:(h + 1) * dh].astype(jnp.bfloat16)
        k = qkv[:, H + h * dh:H + (h + 1) * dh].astype(jnp.bfloat16)
        v = qkv[:, 2 * H + h * dh:2 * H + (h + 1) * dh].astype(jnp.bfloat16)
        rel = rel_ref[0, h].astype(jnp.float32)     # [S, S]
        # q @ k^T with bf16 operands, f32 accumulation; no materialized k.T
        scores = lax.dot_general(q, k, (((1,), (1,)), ((), ())),
                                 preferred_element_type=jnp.float32)
        scores = scores + rel + mask_bias
        m = jnp.max(scores, axis=-1, keepdims=True)
        e = jnp.exp(scores - m)
        s = jnp.sum(e, axis=-1, keepdims=True)
        probs = (e * pl.reciprocal(s, approx=True)).astype(jnp.bfloat16)
        ctx_ref[:, h * dh:(h + 1) * dh] = jnp.dot(
            probs, v, preferred_element_type=jnp.float32)

    ctx = ctx_ref[...]                              # lane-dense [S, H] f32

    # --- LayoutSelfOutput: dense + residual + LayerNorm (f32 statistics) ---
    attn = (jnp.dot(ctx.astype(jnp.bfloat16), w_ao_ref[...],
                    preferred_element_type=jnp.float32) + b_ao_ref[...])
    h1 = _layer_norm(attn + x_f32, ln1_g_ref[...], ln1_b_ref[...], eps)

    # --- LayoutIntermediate: dense + ReLU ---
    inter = jnp.maximum(
        jnp.dot(h1.astype(jnp.bfloat16), w_int_ref[...],
                preferred_element_type=jnp.float32) + b_int_ref[...], 0.0)

    # --- LayoutOutput: dense + residual + LayerNorm ---
    ffn = (jnp.dot(inter.astype(jnp.bfloat16), w_out_ref[...],
                   preferred_element_type=jnp.float32) + b_out_ref[...])
    out = _layer_norm(ffn + h1, ln2_g_ref[...], ln2_b_ref[...], eps)

    o_ref[0] = out.astype(o_ref.dtype)


def prepare_layout_params(params, num_heads):
    """One-time parameter prep (do this at load time, NOT per forward call):
    fuse wq|wk|wv -> [H, 3H], fold 1/sqrt(dh) into Wq/bq, cast weight matrices to
    bf16 (MXU operands); biases and LayerNorm params stay f32."""
    H = params["wq"].shape[0]
    dh = H // num_heads
    scale = 1.0 / math.sqrt(dh)
    bf, f32 = jnp.bfloat16, jnp.float32
    return {
        "w_qkv": jnp.concatenate(
            [params["wq"] * scale, params["wk"], params["wv"]], axis=1).astype(bf),
        "b_qkv": jnp.concatenate(
            [params["bq"] * scale, params["bk"], params["bv"]], axis=1).astype(f32),
        "w_ao": params["w_ao"].astype(bf), "b_ao": params["b_ao"].astype(f32),
        "ln1_g": params["ln1_g"].astype(f32), "ln1_b": params["ln1_b"].astype(f32),
        "w_int": params["w_int"].astype(bf), "b_int": params["b_int"].astype(f32),
        "w_out": params["w_out"].astype(bf), "b_out": params["b_out"].astype(f32),
        "ln2_g": params["ln2_g"].astype(f32), "ln2_b": params["ln2_b"].astype(f32),
    }


def _const_spec(shape, single_buffer):
    """BlockSpec for a grid-constant operand (index_map always 0): single-buffered
    so Pallas doesn't allocate 2 VMEM copies of a block that never changes."""
    index_map = lambda b: (0,) * len(shape)
    if single_buffer:
        return pl.BlockSpec(shape, index_map, pipeline_mode=pl.Buffered(1))
    return pl.BlockSpec(shape, index_map)


def layout_layer(hidden_states, attention_mask, rel_2d_pos, prepped, num_heads,
                 eps=1e-6, *, single_buffer_weights=True):
    """Pallas implementation of LayoutLayer.forward (eval mode).
    `prepped` must come from prepare_layout_params()."""
    B, S, H = hidden_states.shape
    NH = num_heads
    inter_size = prepped["w_int"].shape[1]

    cs = functools.partial(_const_spec, single_buffer=single_buffer_weights)
    kernel = functools.partial(_layout_layer_kernel, num_heads=NH, eps=eps)

    # TODO(synk): production-S tiling (KV "arbitrary" axis + query "parallel" axis),
    #             int8/folded mask and bf16 rel_2d_pos -- see header.
    return pl.pallas_call(
        kernel,
        out_shape=jax.ShapeDtypeStruct((B, S, H), hidden_states.dtype),
        grid_spec=pltpu.PrefetchScalarGridSpec(
            num_scalar_prefetch=0,
            grid=(B,),
            in_specs=[
                pl.BlockSpec((1, S, H), lambda b: (b, 0, 0)),         # hidden_states
                pl.BlockSpec((1, 1, S, S), lambda b: (b, 0, 0, 0)),   # attention_mask
                pl.BlockSpec((1, NH, S, S), lambda b: (b, 0, 0, 0)),  # rel_2d_pos
                cs((H, 3 * H)), cs((1, 3 * H)),                       # fused QKV (bf16 W)
                cs((H, H)), cs((1, H)),                               # self-output dense
                cs((1, H)), cs((1, H)),                               # LN1 gamma/beta
                cs((H, inter_size)), cs((1, inter_size)),             # intermediate
                cs((inter_size, H)), cs((1, H)),                      # output dense
                cs((1, H)), cs((1, H)),                               # LN2 gamma/beta
            ],
            out_specs=pl.BlockSpec((1, S, H), lambda b: (b, 0, 0)),
            scratch_shapes=[pltpu.VMEM((S, H), jnp.float32)],         # ctx accumulator
        ),
        compiler_params=pltpu.CompilerParams(
            dimension_semantics=("parallel",)),
    )(hidden_states, attention_mask, rel_2d_pos,
      prepped["w_qkv"], prepped["b_qkv"],
      prepped["w_ao"], prepped["b_ao"], prepped["ln1_g"], prepped["ln1_b"],
      prepped["w_int"], prepped["b_int"],
      prepped["w_out"], prepped["b_out"], prepped["ln2_g"], prepped["ln2_b"])


# ------------------------------ Pure-JAX reference --------------------------- #
def reference(hidden_states, attention_mask, rel_2d_pos, params, num_heads,
              eps=1e-6):
    B, S, H = hidden_states.shape
    dh = H // num_heads
    x = hidden_states
    q = x @ params["wq"] + params["bq"][0]
    k = x @ params["wk"] + params["bk"][0]
    v = x @ params["wv"] + params["bv"][0]

    def split(t):
        return t.reshape(B, S, num_heads, dh).transpose(0, 2, 1, 3)

    qh, kh, vh = split(q), split(k), split(v)
    qh = qh / math.sqrt(dh)
    scores = jnp.einsum("bhqd,bhkd->bhqk", qh, kh) + rel_2d_pos
    scores = jnp.where(attention_mask != 0, -jnp.inf,
                       scores.astype(jnp.float32))
    probs = jax.nn.softmax(scores, axis=-1)
    ctx = jnp.einsum("bhqk,bhkd->bhqd", probs, vh)
    ctx = ctx.transpose(0, 2, 1, 3).reshape(B, S, H)

    def ln(y, g, b):
        mu = jnp.mean(y, axis=-1, keepdims=True)
        var = jnp.mean((y - mu) ** 2, axis=-1, keepdims=True)
        return (y - mu) / jnp.sqrt(var + eps) * g + b

    attn = ctx @ params["w_ao"] + params["b_ao"][0]
    h1 = ln(attn + x, params["ln1_g"][0], params["ln1_b"][0])
    inter = jax.nn.relu(h1 @ params["w_int"] + params["b_int"][0])
    ffn = inter @ params["w_out"] + params["b_out"][0]
    return ln(ffn + h1, params["ln2_g"][0], params["ln2_b"][0])


# ----------------------------------- Main ------------------------------------ #
if __name__ == "__main__":
    # Config-consistent small shapes: hidden=256, 4 heads (dh=64), intermediate=512.
    B, S, H, NH, I = 2, 16, 256, 4, 512
    eps = 1e-6
    init = 0.02

    key = jax.random.PRNGKey(0)
    ks = jax.random.split(key, 20)

    hidden_states = jax.random.normal(ks[0], (B, S, H), dtype=jnp.float32)
    rel_2d_pos = 0.1 * jax.random.normal(ks[1], (B, NH, S, S), dtype=jnp.float32)

    # attention_mask: nonzero == masked. Mask out last 3 key positions for batch 1.
    mask = jnp.zeros((B, 1, S, S), dtype=jnp.int32)
    mask = mask.at[1, :, :, S - 3:].set(1)

    def nrm(k_, shape):
        return init * jax.random.normal(k_, shape, dtype=jnp.float32)

    params = {
        "wq": nrm(ks[2], (H, H)), "bq": nrm(ks[3], (1, H)),
        "wk": nrm(ks[4], (H, H)), "bk": nrm(ks[5], (1, H)),
        "wv": nrm(ks[6], (H, H)), "bv": nrm(ks[7], (1, H)),
        "w_ao": nrm(ks[8], (H, H)), "b_ao": nrm(ks[9], (1, H)),
        "ln1_g": 1.0 + nrm(ks[10], (1, H)), "ln1_b": nrm(ks[11], (1, H)),
        "w_int": nrm(ks[12], (H, I)), "b_int": nrm(ks[13], (1, I)),
        "w_out": nrm(ks[14], (I, H)), "b_out": nrm(ks[15], (1, H)),
        "ln2_g": 1.0 + nrm(ks[16], (1, H)), "ln2_b": nrm(ks[17], (1, H)),
    }

    # One-time parameter prep (fused scaled QKV + bf16 weight casts), not per forward.
    prepped = jax.tree_util.tree_map(
        jax.block_until_ready, prepare_layout_params(params, NH))

    try:
        out = jax.block_until_ready(
            layout_layer(hidden_states, mask, rel_2d_pos, prepped, NH, eps))
    except Exception:
        # Fallback for JAX builds that reject pl.Buffered(1) on pallas_call inputs:
        # identical kernel, default (double-buffered) weight BlockSpecs.
        out = jax.block_until_ready(
            layout_layer(hidden_states, mask, rel_2d_pos, prepped, NH, eps,
                         single_buffer_weights=False))

    ref = reference(hidden_states, mask, rel_2d_pos, params, NH, eps)
    assert out.shape == (B, S, H), out.shape
    assert not bool(jnp.any(jnp.isnan(out))), "NaN in kernel output"
    max_err = float(jnp.max(jnp.abs(out - ref)))
    mean_err = float(jnp.mean(jnp.abs(out - ref)))
    # bf16 MXU operands (f32 accumulation) + approx softmax reciprocal vs pure-f32
    # reference => looser tolerance than the all-f32 kernel; still catches real bugs
    # (LayerNorm output is ~unit-scale).
    assert max_err < 6e-2, (max_err, mean_err)
    assert mean_err < 1e-2, (max_err, mean_err)

    print("KERNEL_OK")
</pallas_src>

<mosaic_0001>
module attributes {stable_mosaic.version = 11 : i64} {
  func.func @_layout_layer_kernel(%arg0: i32, %arg1: memref<1x16x256xf32, #tpu.memory_space<vmem>>, %arg2: memref<1x1x16x16xi32, #tpu.memory_space<vmem>>, %arg3: memref<1x4x16x16xf32, #tpu.memory_space<vmem>>, %arg4: memref<256x768xbf16, #tpu.memory_space<vmem>>, %arg5: memref<1x768xf32, #tpu.memory_space<vmem>>, %arg6: memref<256x256xbf16, #tpu.memory_space<vmem>>, %arg7: memref<1x256xf32, #tpu.memory_space<vmem>>, %arg8: memref<1x256xf32, #tpu.memory_space<vmem>>, %arg9: memref<1x256xf32, #tpu.memory_space<vmem>>, %arg10: memref<256x512xbf16, #tpu.memory_space<vmem>>, %arg11: memref<1x512xf32, #tpu.memory_space<vmem>>, %arg12: memref<512x256xbf16, #tpu.memory_space<vmem>>, %arg13: memref<1x256xf32, #tpu.memory_space<vmem>>, %arg14: memref<1x256xf32, #tpu.memory_space<vmem>>, %arg15: memref<1x256xf32, #tpu.memory_space<vmem>>, %arg16: memref<1x16x256xf32, #tpu.memory_space<vmem>>, %arg17: memref<16x256xf32, #tpu.memory_space<vmem>>) attributes {dimension_semantics = [#tpu.dimension_semantics<parallel>], iteration_bounds = array<i64: 2>, scalar_prefetch = 0 : i64, scratch_operands = 1 : i64, tpu.core_type = #tpu.core_type<tc>, window_params = [{transform_indices = @transform_0, window_bounds = array<i64: 1, 16, 256>}, {transform_indices = @transform_1, window_bounds = array<i64: 1, 1, 16, 16>}, {transform_indices = @transform_2, window_bounds = array<i64: 1, 4, 16, 16>}, {pipeline_mode = #tpu.pipeline_mode<synchronous>, transform_indices = @transform_3, window_bounds = array<i64: 256, 768>}, {pipeline_mode = #tpu.pipeline_mode<synchronous>, transform_indices = @transform_4, window_bounds = array<i64: 1, 768>}, {pipeline_mode = #tpu.pipeline_mode<synchronous>, transform_indices = @transform_5, window_bounds = array<i64: 256, 256>}, {pipeline_mode = #tpu.pipeline_mode<synchronous>, transform_indices = @transform_6, window_bounds = array<i64: 1, 256>}, {pipeline_mode = #tpu.pipeline_mode<synchronous>, transform_indices = @transform_7, window_bounds = array<i64: 1, 256>}, {pipeline_mode = #tpu.pipeline_mode<synchronous>, transform_indices = @transform_8, window_bounds = array<i64: 1, 256>}, {pipeline_mode = #tpu.pipeline_mode<synchronous>, transform_indices = @transform_9, window_bounds = array<i64: 256, 512>}, {pipeline_mode = #tpu.pipeline_mode<synchronous>, transform_indices = @transform_10, window_bounds = array<i64: 1, 512>}, {pipeline_mode = #tpu.pipeline_mode<synchronous>, transform_indices = @transform_11, window_bounds = array<i64: 512, 256>}, {pipeline_mode = #tpu.pipeline_mode<synchronous>, transform_indices = @transform_12, window_bounds = array<i64: 1, 256>}, {pipeline_mode = #tpu.pipeline_mode<synchronous>, transform_indices = @transform_13, window_bounds = array<i64: 1, 256>}, {pipeline_mode = #tpu.pipeline_mode<synchronous>, transform_indices = @transform_14, window_bounds = array<i64: 1, 256>}, {transform_indices = @transform_15, window_bounds = array<i64: 1, 16, 256>}]} {
    %c0 = arith.constant 0 : index
    %c0_0 = arith.constant 0 : index
    %c0_1 = arith.constant 0 : index
    %0 = vector.load %arg1[%c0, %c0_0, %c0_1] : memref<1x16x256xf32, #tpu.memory_space<vmem>>, vector<1x16x256xf32>
    %1 = vector.shape_cast %0 : vector<1x16x256xf32> to vector<16x256xf32>
    %c0_2 = arith.constant 0 : index
    %c0_3 = arith.constant 0 : index
    %c0_4 = arith.constant 0 : index
    %2 = vector.load %arg1[%c0_2, %c0_3, %c0_4] : memref<1x16x256xf32, #tpu.memory_space<vmem>>, vector<1x16x256xf32>
    %3 = vector.shape_cast %2 : vector<1x16x256xf32> to vector<16x256xf32>
    %4 = arith.truncf %3 : vector<16x256xf32> to vector<16x256xbf16>
    %c0_5 = arith.constant 0 : index
    %c0_6 = arith.constant 0 : index
    %5 = vector.load %arg4[%c0_5, %c0_6] : memref<256x768xbf16, #tpu.memory_space<vmem>>, vector<256x768xbf16>
    %cst = arith.constant dense<0.000000e+00> : vector<16x768xf32>
    %6 = tpu.matmul %4, %5, %cst {dimension_numbers = #tpu.dot_dimension_numbers<[1], [0], [0], [1], [0, 0, 1, 1], [], []>} : vector<16x256xbf16>, vector<256x768xbf16>, vector<16x768xf32> -> vector<16x768xf32>
    %c0_7 = arith.constant 0 : index
    %c0_8 = arith.constant 0 : index
    %7 = vector.load %arg5[%c0_7, %c0_8] : memref<1x768xf32, #tpu.memory_space<vmem>>, vector<1x768xf32>
    %8 = vector.broadcast %7 : vector<1x768xf32> to vector<16x768xf32>
    %9 = arith.addf %6, %8 : vector<16x768xf32>
    %c0_9 = arith.constant 0 : index
    %c0_10 = arith.constant 0 : index
    %c0_11 = arith.constant 0 : index
    %c0_12 = arith.constant 0 : index
    %10 = vector.load %arg2[%c0_9, %c0_10, %c0_11, %c0_12] : memref<1x1x16x16xi32, #tpu.memory_space<vmem>>, vector<1x1x16x16xi32>
    %11 = vector.shape_cast %10 : vector<1x1x16x16xi32> to vector<16x16xi32>
    %c0_i32 = arith.constant 0 : i32
    %12 = vector.broadcast %c0_i32 : i32 to vector<16x16xi32>
    %13 = arith.cmpi ne, %11, %12 : vector<16x16xi32>
    %cst_13 = arith.constant -1.000000e+30 : f32
    %cst_14 = arith.constant 0.000000e+00 : f32
    %14 = vector.broadcast %cst_13 : f32 to vector<16x16xf32>
    %15 = vector.broadcast %cst_14 : f32 to vector<16x16xf32>
    %16 = arith.select %13, %14, %15 : vector<16x16xi1>, vector<16x16xf32>
    %17 = vector.extract_strided_slice %9 {offsets = [0, 0], sizes = [16, 64], strides = [1, 1]} : vector<16x768xf32> to vector<16x64xf32>
    %18 = arith.truncf %17 : vector<16x64xf32> to vector<16x64xbf16>
    %19 = vector.extract_strided_slice %9 {offsets = [0, 256], sizes = [16, 64], strides = [1, 1]} : vector<16x768xf32> to vector<16x64xf32>
    %20 = arith.truncf %19 : vector<16x64xf32> to vector<16x64xbf16>
    %21 = vector.extract_strided_slice %9 {offsets = [0, 512], sizes = [16, 64], strides = [1, 1]} : vector<16x768xf32> to vector<16x64xf32>
    %22 = arith.truncf %21 : vector<16x64xf32> to vector<16x64xbf16>
    %c0_15 = arith.constant 0 : index
    %c0_16 = arith.constant 0 : index
    %c0_17 = arith.constant 0 : index
    %c0_18 = arith.constant 0 : index
    %23 = vector.load %arg3[%c0_15, %c0_16, %c0_17, %c0_18] : memref<1x4x16x16xf32, #tpu.memory_space<vmem>>, vector<1x1x16x16xf32>
    %24 = vector.shape_cast %23 : vector<1x1x16x16xf32> to vector<16x16xf32>
    %cst_19 = arith.constant dense<0.000000e+00> : vector<16x16xf32>
    %25 = tpu.matmul %18, %20, %cst_19 {dimension_numbers = #tpu.dot_dimension_numbers<[1], [1], [0], [0], [0, 0, 1, 0], [], []>} : vector<16x64xbf16>, vector<16x64xbf16>, vector<16x16xf32> -> vector<16x16xf32>
    %26 = arith.addf %25, %24 : vector<16x16xf32>
    %27 = arith.addf %26, %16 : vector<16x16xf32>
    %cst_20 = arith.constant dense<0xFF800000> : vector<16xf32>
    %28 = vector.multi_reduction <maximumf>, %27, %cst_20 [1] : vector<16x16xf32> to vector<16xf32>
    %29 = vector.shape_cast %28 : vector<16xf32> to vector<16x1xf32>
    %30 = vector.broadcast %29 : vector<16x1xf32> to vector<16x16xf32>
    %31 = arith.subf %27, %30 : vector<16x16xf32>
    %32 = math.exp %31 : vector<16x16xf32>
    %cst_21 = arith.constant dense<0.000000e+00> : vector<16xf32>
    %33 = vector.multi_reduction <add>, %32, %cst_21 [1] : vector<16x16xf32> to vector<16xf32>
    %34 = vector.shape_cast %33 : vector<16xf32> to vector<16x1xf32>
    %35 = tpu.reciprocal %34 {approx = true} : vector<16x1xf32> -> vector<16x1xf32>
    %36 = vector.broadcast %35 : vector<16x1xf32> to vector<16x16xf32>
    %37 = arith.mulf %32, %36 : vector<16x16xf32>
    %38 = arith.truncf %37 : vector<16x16xf32> to vector<16x16xbf16>
    %cst_22 = arith.constant dense<0.000000e+00> : vector<16x64xf32>
    %39 = tpu.matmul %38, %22, %cst_22 {dimension_numbers = #tpu.dot_dimension_numbers<[1], [0], [0], [1], [0, 0, 1, 1], [], []>} : vector<16x16xbf16>, vector<16x64xbf16>, vector<16x64xf32> -> vector<16x64xf32>
    %c0_23 = arith.constant 0 : index
    %c0_24 = arith.constant 0 : index
    %40 = vector.load %arg17[%c0_23, %c0_24] : memref<16x256xf32, #tpu.memory_space<vmem>>, vector<16x64xf32>
    tpu.vector_store %arg17[%c0_23, %c0_24], %39 {strides = array<i32>} : memref<16x256xf32, #tpu.memory_space<vmem>>, vector<16x64xf32>,
    %41 = vector.extract_strided_slice %9 {offsets = [0, 64], sizes = [16, 64], strides = [1, 1]} : vector<16x768xf32> to vector<16x64xf32>
    %42 = arith.truncf %41 : vector<16x64xf32> to vector<16x64xbf16>
    %43 = vector.extract_strided_slice %9 {offsets = [0, 320], sizes = [16, 64], strides = [1, 1]} : vector<16x768xf32> to vector<16x64xf32>
    %44 = arith.truncf %43 : vector<16x64xf32> to vector<16x64xbf16>
    %45 = vector.extract_strided_slice %9 {offsets = [0, 576], sizes = [16, 64], strides = [1, 1]} : vector<16x768xf32> to vector<16x64xf32>
    %46 = arith.truncf %45 : vector<16x64xf32> to vector<16x64xbf16>
    %c0_25 = arith.constant 0 : index
    %c1 = arith.constant 1 : index
    %c0_26 = arith.constant 0 : index
    %c0_27 = arith.constant 0 : index
    %47 = vector.load %arg3[%c0_25, %c1, %c0_26, %c0_27] : memref<1x4x16x16xf32, #tpu.memory_space<vmem>>, vector<1x1x16x16xf32>
    %48 = vector.shape_cast %47 : vector<1x1x16x16xf32> to vector<16x16xf32>
    %cst_28 = arith.constant dense<0.000000e+00> : vector<16x16xf32>
    %49 = tpu.matmul %42, %44, %cst_28 {dimension_numbers = #tpu.dot_dimension_numbers<[1], [1], [0], [0], [0, 0, 1, 0], [], []>} : vector<16x64xbf16>, vector<16x64xbf16>, vector<16x16xf32> -> vector<16x16xf32>
    %50 = arith.addf %49, %48 : vector<16x16xf32>
    %51 = arith.addf %50, %16 : vector<16x16xf32>
    %cst_29 = arith.constant dense<0xFF800000> : vector<16xf32>
    %52 = vector.multi_reduction <maximumf>, %51, %cst_29 [1] : vector<16x16xf32> to vector<16xf32>
    %53 = vector.shape_cast %52 : vector<16xf32> to vector<16x1xf32>
    %54 = vector.broadcast %53 : vector<16x1xf32> to vector<16x16xf32>
    %55 = arith.subf %51, %54 : vector<16x16xf32>
    %56 = math.exp %55 : vector<16x16xf32>
    %cst_30 = arith.constant dense<0.000000e+00> : vector<16xf32>
    %57 = vector.multi_reduction <add>, %56, %cst_30 [1] : vector<16x16xf32> to vector<16xf32>
    %58 = vector.shape_cast %57 : vector<16xf32> to vector<16x1xf32>
    %59 = tpu.reciprocal %58 {approx = true} : vector<16x1xf32> -> vector<16x1xf32>
    %60 = vector.broadcast %59 : vector<16x1xf32> to vector<16x16xf32>
    %61 = arith.mulf %56, %60 : vector<16x16xf32>
    %62 = arith.truncf %61 : vector<16x16xf32> to vector<16x16xbf16>
    %cst_31 = arith.constant dense<0.000000e+00> : vector<16x64xf32>
    %63 = tpu.matmul %62, %46, %cst_31 {dimension_numbers = #tpu.dot_dimension_numbers<[1], [0], [0], [1], [0, 0, 1, 1], [], []>} : vector<16x16xbf16>, vector<16x64xbf16>, vector<16x64xf32> -> vector<16x64xf32>
    %c0_32 = arith.constant 0 : index
    %c64 = arith.constant 64 : index
    %64 = vector.load %arg17[%c0_32, %c64] : memref<16x256xf32, #tpu.memory_space<vmem>>, vector<16x64xf32>
    tpu.vector_store %arg17[%c0_32, %c64], %63 {strides = array<i32>} : memref<16x256xf32, #tpu.memory_space<vmem>>, vector<16x64xf32>,
    %65 = vector.extract_strided_slice %9 {offsets = [0, 128], sizes = [16, 64], strides = [1, 1]} : vector<16x768xf32> to vector<16x64xf32>
    %66 = arith.truncf %65 : vector<16x64xf32> to vector<16x64xbf16>
    %67 = vector.extract_strided_slice %9 {offsets = [0, 384], sizes = [16, 64], strides = [1, 1]} : vector<16x768xf32> to vector<16x64xf32>
    %68 = arith.truncf %67 : vector<16x64xf32> to vector<16x64xbf16>
    %69 = vector.extract_strided_slice %9 {offsets = [0, 640], sizes = [16, 64], strides = [1, 1]} : vector<16x768xf32> to vector<16x64xf32>
    %70 = arith.truncf %69 : vector<16x64xf32> to vector<16x64xbf16>
    %c0_33 = arith.constant 0 : index
    %c2 = arith.constant 2 : index
    %c0_34 = arith.constant 0 : index
    %c0_35 = arith.constant 0 : index
    %71 = vector.load %arg3[%c0_33, %c2, %c0_34, %c0_35] : memref<1x4x16x16xf32, #tpu.memory_space<vmem>>, vector<1x1x16x16xf32>
    %72 = vector.shape_cast %71 : vector<1x1x16x16xf32> to vector<16x16xf32>
    %cst_36 = arith.constant dense<0.000000e+00> : vector<16x16xf32>
    %73 = tpu.matmul %66, %68, %cst_36 {dimension_numbers = #tpu.dot_dimension_numbers<[1], [1], [0], [0], [0, 0, 1, 0], [], []>} : vector<16x64xbf16>, vector<16x64xbf16>, vector<16x16xf32> -> vector<16x16xf32>
    %74 = arith.addf %73, %72 : vector<16x16xf32>
    %75 = arith.addf %74, %16 : vector<16x16xf32>
    %cst_37 = arith.constant dense<0xFF800000> : vector<16xf32>
    %76 = vector.multi_reduction <maximumf>, %75, %cst_37 [1] : vector<16x16xf32> to vector<16xf32>
    %77 = vector.shape_cast %76 : vector<16xf32> to vector<16x1xf32>
    %78 = vector.broadcast %77 : vector<16x1xf32> to vector<16x16xf32>
    %79 = arith.subf %75, %78 : vector<16x16xf32>
    %80 = math.exp %79 : vector<16x16xf32>
    %cst_38 = arith.constant dense<0.000000e+00> : vector<16xf32>
    %81 = vector.multi_reduction <add>, %80, %cst_38 [1] : vector<16x16xf32> to vector<16xf32>
    %82 = vector.shape_cast %81 : vector<16xf32> to vector<16x1xf32>
    %83 = tpu.reciprocal %82 {approx = true} : vector<16x1xf32> -> vector<16x1xf32>
    %84 = vector.broadcast %83 : vector<16x1xf32> to vector<16x16xf32>
    %85 = arith.mulf %80, %84 : vector<16x16xf32>
    %86 = arith.truncf %85 : vector<16x16xf32> to vector<16x16xbf16>
    %cst_39 = arith.constant dense<0.000000e+00> : vector<16x64xf32>
    %87 = tpu.matmul %86, %70, %cst_39 {dimension_numbers = #tpu.dot_dimension_numbers<[1], [0], [0], [1], [0, 0, 1, 1], [], []>} : vector<16x16xbf16>, vector<16x64xbf16>, vector<16x64xf32> -> vector<16x64xf32>
    %c0_40 = arith.constant 0 : index
    %c128 = arith.constant 128 : index
    %88 = vector.load %arg17[%c0_40, %c128] : memref<16x256xf32, #tpu.memory_space<vmem>>, vector<16x64xf32>
    tpu.vector_store %arg17[%c0_40, %c128], %87 {strides = array<i32>} : memref<16x256xf32, #tpu.memory_space<vmem>>, vector<16x64xf32>,
    %89 = vector.extract_strided_slice %9 {offsets = [0, 192], sizes = [16, 64], strides = [1, 1]} : vector<16x768xf32> to vector<16x64xf32>
    %90 = arith.truncf %89 : vector<16x64xf32> to vector<16x64xbf16>
    %91 = vector.extract_strided_slice %9 {offsets = [0, 448], sizes = [16, 64], strides = [1, 1]} : vector<16x768xf32> to vector<16x64xf32>
    %92 = arith.truncf %91 : vector<16x64xf32> to vector<16x64xbf16>
    %93 = vector.extract_strided_slice %9 {offsets = [0, 704], sizes = [16, 64], strides = [1, 1]} : vector<16x768xf32> to vector<16x64xf32>
    %94 = arith.truncf %93 : vector<16x64xf32> to vector<16x64xbf16>
    %c0_41 = arith.constant 0 : index
    %c3 = arith.constant 3 : index
    %c0_42 = arith.constant 0 : index
    %c0_43 = arith.constant 0 : index
    %95 = vector.load %arg3[%c0_41, %c3, %c0_42, %c0_43] : memref<1x4x16x16xf32, #tpu.memory_space<vmem>>, vector<1x1x16x16xf32>
    %96 = vector.shape_cast %95 : vector<1x1x16x16xf32> to vector<16x16xf32>
    %cst_44 = arith.constant dense<0.000000e+00> : vector<16x16xf32>
    %97 = tpu.matmul %90, %92, %cst_44 {dimension_numbers = #tpu.dot_dimension_numbers<[1], [1], [0], [0], [0, 0, 1, 0], [], []>} : vector<16x64xbf16>, vector<16x64xbf16>, vector<16x16xf32> -> vector<16x16xf32>
    %98 = arith.addf %97, %96 : vector<16x16xf32>
    %99 = arith.addf %98, %16 : vector<16x16xf32>
    %cst_45 = arith.constant dense<0xFF800000> : vector<16xf32>
    %100 = vector.multi_reduction <maximumf>, %99, %cst_45 [1] : vector<16x16xf32> to vector<16xf32>
    %101 = vector.shape_cast %100 : vector<16xf32> to vector<16x1xf32>
    %102 = vector.broadcast %101 : vector<16x1xf32> to vector<16x16xf32>
    %103 = arith.subf %99, %102 : vector<16x16xf32>
    %104 = math.exp %103 : vector<16x16xf32>
    %cst_46 = arith.constant dense<0.000000e+00> : vector<16xf32>
    %105 = vector.multi_reduction <add>, %104, %cst_46 [1] : vector<16x16xf32> to vector<16xf32>
    %106 = vector.shape_cast %105 : vector<16xf32> to vector<16x1xf32>
    %107 = tpu.reciprocal %106 {approx = true} : vector<16x1xf32> -> vector<16x1xf32>
    %108 = vector.broadcast %107 : vector<16x1xf32> to vector<16x16xf32>
    %109 = arith.mulf %104, %108 : vector<16x16xf32>
    %110 = arith.truncf %109 : vector<16x16xf32> to vector<16x16xbf16>
    %cst_47 = arith.constant dense<0.000000e+00> : vector<16x64xf32>
    %111 = tpu.matmul %110, %94, %cst_47 {dimension_numbers = #tpu.dot_dimension_numbers<[1], [0], [0], [1], [0, 0, 1, 1], [], []>} : vector<16x16xbf16>, vector<16x64xbf16>, vector<16x64xf32> -> vector<16x64xf32>
    %c0_48 = arith.constant 0 : index
    %c192 = arith.constant 192 : index
    %112 = vector.load %arg17[%c0_48, %c192] : memref<16x256xf32, #tpu.memory_space<vmem>>, vector<16x64xf32>
    tpu.vector_store %arg17[%c0_48, %c192], %111 {strides = array<i32>} : memref<16x256xf32, #tpu.memory_space<vmem>>, vector<16x64xf32>,
    %c0_49 = arith.constant 0 : index
    %c0_50 = arith.constant 0 : index
    %113 = vector.load %arg17[%c0_49, %c0_50] : memref<16x256xf32, #tpu.memory_space<vmem>>, vector<16x256xf32>
    %114 = arith.truncf %113 : vector<16x256xf32> to vector<16x256xbf16>
    %c0_51 = arith.constant 0 : index
    %c0_52 = arith.constant 0 : index
    %115 = vector.load %arg6[%c0_51, %c0_52] : memref<256x256xbf16, #tpu.memory_space<vmem>>, vector<256x256xbf16>
    %cst_53 = arith.constant dense<0.000000e+00> : vector<16x256xf32>
    %116 = tpu.matmul %114, %115, %cst_53 {dimension_numbers = #tpu.dot_dimension_numbers<[1], [0], [0], [1], [0, 0, 1, 1], [], []>} : vector<16x256xbf16>, vector<256x256xbf16>, vector<16x256xf32> -> vector<16x256xf32>
    %c0_54 = arith.constant 0 : index
    %c0_55 = arith.constant 0 : index
    %117 = vector.load %arg7[%c0_54, %c0_55] : memref<1x256xf32, #tpu.memory_space<vmem>>, vector<1x256xf32>
    %118 = vector.broadcast %117 : vector<1x256xf32> to vector<16x256xf32>
    %119 = arith.addf %116, %118 : vector<16x256xf32>
    %120 = arith.addf %119, %1 : vector<16x256xf32>
    %c0_56 = arith.constant 0 : index
    %c0_57 = arith.constant 0 : index
    %121 = vector.load %arg8[%c0_56, %c0_57] : memref<1x256xf32, #tpu.memory_space<vmem>>, vector<1x256xf32>
    %c0_58 = arith.constant 0 : index
    %c0_59 = arith.constant 0 : index
    %122 = vector.load %arg9[%c0_58, %c0_59] : memref<1x256xf32, #tpu.memory_space<vmem>>, vector<1x256xf32>
    %cst_60 = arith.constant dense<0.000000e+00> : vector<16xf32>
    %123 = vector.multi_reduction <add>, %120, %cst_60 [1] : vector<16x256xf32> to vector<16xf32>
    %124 = vector.shape_cast %123 : vector<16xf32> to vector<16x1xf32>
    %cst_61 = arith.constant 2.560000e+02 : f32
    %125 = vector.broadcast %cst_61 : f32 to vector<16x1xf32>
    %126 = arith.divf %124, %125 : vector<16x1xf32>
    %127 = vector.broadcast %126 : vector<16x1xf32> to vector<16x256xf32>
    %128 = arith.subf %120, %127 : vector<16x256xf32>
    %129 = arith.mulf %128, %128 : vector<16x256xf32>
    %cst_62 = arith.constant dense<0.000000e+00> : vector<16xf32>
    %130 = vector.multi_reduction <add>, %129, %cst_62 [1] : vector<16x256xf32> to vector<16xf32>
    %131 = vector.shape_cast %130 : vector<16xf32> to vector<16x1xf32>
    %cst_63 = arith.constant 2.560000e+02 : f32
    %132 = vector.broadcast %cst_63 : f32 to vector<16x1xf32>
    %133 = arith.divf %131, %132 : vector<16x1xf32>
    %cst_64 = arith.constant 9.99999997E-7 : f32
    %134 = vector.broadcast %cst_64 : f32 to vector<16x1xf32>
    %135 = arith.addf %133, %134 : vector<16x1xf32>
    %136 = math.rsqrt %135 : vector<16x1xf32>
    %137 = vector.broadcast %136 : vector<16x1xf32> to vector<16x256xf32>
    %138 = arith.mulf %128, %137 : vector<16x256xf32>
    %139 = vector.broadcast %121 : vector<1x256xf32> to vector<16x256xf32>
    %140 = arith.mulf %138, %139 : vector<16x256xf32>
    %141 = vector.broadcast %122 : vector<1x256xf32> to vector<16x256xf32>
    %142 = arith.addf %140, %141 : vector<16x256xf32>
    %143 = arith.truncf %142 : vector<16x256xf32> to vector<16x256xbf16>
    %c0_65 = arith.constant 0 : index
    %c0_66 = arith.constant 0 : index
    %144 = vector.load %arg10[%c0_65, %c0_66] : memref<256x512xbf16, #tpu.memory_space<vmem>>, vector<256x512xbf16>
    %cst_67 = arith.constant dense<0.000000e+00> : vector<16x512xf32>
    %145 = tpu.matmul %143, %144, %cst_67 {dimension_numbers = #tpu.dot_dimension_numbers<[1], [0], [0], [1], [0, 0, 1, 1], [], []>} : vector<16x256xbf16>, vector<256x512xbf16>, vector<16x512xf32> -> vector<16x512xf32>
    %c0_68 = arith.constant 0 : index
    %c0_69 = arith.constant 0 : index
    %146 = vector.load %arg11[%c0_68, %c0_69] : memref<1x512xf32, #tpu.memory_space<vmem>>, vector<1x512xf32>
    %147 = vector.broadcast %146 : vector<1x512xf32> to vector<16x512xf32>
    %148 = arith.addf %145, %147 : vector<16x512xf32>
    %cst_70 = arith.constant 0.000000e+00 : f32
    %149 = vector.broadcast %cst_70 : f32 to vector<16x512xf32>
    %150 = arith.maximumf %148, %149 : vector<16x512xf32>
    %151 = arith.truncf %150 : vector<16x512xf32> to vector<16x512xbf16>
    %c0_71 = arith.constant 0 : index
    %c0_72 = arith.constant 0 : index
    %152 = vector.load %arg12[%c0_71, %c0_72] : memref<512x256xbf16, #tpu.memory_space<vmem>>, vector<512x256xbf16>
    %cst_73 = arith.constant dense<0.000000e+00> : vector<16x256xf32>
    %153 = tpu.matmul %151, %152, %cst_73 {dimension_numbers = #tpu.dot_dimension_numbers<[1], [0], [0], [1], [0, 0, 1, 1], [], []>} : vector<16x512xbf16>, vector<512x256xbf16>, vector<16x256xf32> -> vector<16x256xf32>
    %c0_74 = arith.constant 0 : index
    %c0_75 = arith.constant 0 : index
    %154 = vector.load %arg13[%c0_74, %c0_75] : memref<1x256xf32, #tpu.memory_space<vmem>>, vector<1x256xf32>
    %155 = vector.broadcast %154 : vector<1x256xf32> to vector<16x256xf32>
    %156 = arith.addf %153, %155 : vector<16x256xf32>
    %157 = arith.addf %156, %142 : vector<16x256xf32>
    %c0_76 = arith.constant 0 : index
    %c0_77 = arith.constant 0 : index
    %158 = vector.load %arg14[%c0_76, %c0_77] : memref<1x256xf32, #tpu.memory_space<vmem>>, vector<1x256xf32>
    %c0_78 = arith.constant 0 : index
    %c0_79 = arith.constant 0 : index
    %159 = vector.load %arg15[%c0_78, %c0_79] : memref<1x256xf32, #tpu.memory_space<vmem>>, vector<1x256xf32>
    %cst_80 = arith.constant dense<0.000000e+00> : vector<16xf32>
    %160 = vector.multi_reduction <add>, %157, %cst_80 [1] : vector<16x256xf32> to vector<16xf32>
    %161 = vector.shape_cast %160 : vector<16xf32> to vector<16x1xf32>
    %cst_81 = arith.constant 2.560000e+02 : f32
    %162 = vector.broadcast %cst_81 : f32 to vector<16x1xf32>
    %163 = arith.divf %161, %162 : vector<16x1xf32>
    %164 = vector.broadcast %163 : vector<16x1xf32> to vector<16x256xf32>
    %165 = arith.subf %157, %164 : vector<16x256xf32>
    %166 = arith.mulf %165, %165 : vector<16x256xf32>
    %cst_82 = arith.constant dense<0.000000e+00> : vector<16xf32>
    %167 = vector.multi_reduction <add>, %166, %cst_82 [1] : vector<16x256xf32> to vector<16xf32>
    %168 = vector.shape_cast %167 : vector<16xf32> to vector<16x1xf32>
    %cst_83 = arith.constant 2.560000e+02 : f32
    %169 = vector.broadcast %cst_83 : f32 to vector<16x1xf32>
    %170 = arith.divf %168, %169 : vector<16x1xf32>
    %cst_84 = arith.constant 9.99999997E-7 : f32
    %171 = vector.broadcast %cst_84 : f32 to vector<16x1xf32>
    %172 = arith.addf %170, %171 : vector<16x1xf32>
    %173 = math.rsqrt %172 : vector<16x1xf32>
    %174 = vector.broadcast %173 : vector<16x1xf32> to vector<16x256xf32>
    %175 = arith.mulf %165, %174 : vector<16x256xf32>
    %176 = vector.broadcast %158 : vector<1x256xf32> to vector<16x256xf32>
    %177 = arith.mulf %175, %176 : vector<16x256xf32>
    %178 = vector.broadcast %159 : vector<1x256xf32> to vector<16x256xf32>
    %179 = arith.addf %177, %178 : vector<16x256xf32>
    %c0_85 = arith.constant 0 : index
    %c0_86 = arith.constant 0 : index
    %c0_87 = arith.constant 0 : index
    %180 = vector.load %arg16[%c0_85, %c0_86, %c0_87] : memref<1x16x256xf32, #tpu.memory_space<vmem>>, vector<1x16x256xf32>
    %181 = vector.shape_cast %180 : vector<1x16x256xf32> to vector<16x256xf32>
    %182 = vector.shape_cast %179 : vector<16x256xf32> to vector<1x16x256xf32>
    tpu.vector_store %arg16[%c0_85, %c0_86, %c0_87], %182 {strides = array<i32>} : memref<1x16x256xf32, #tpu.memory_space<vmem>>, vector<1x16x256xf32>,
    return
  }
  func.func @transform_0(%arg0: i32) -> (i32, i32, i32) {
    %c0_i32 = arith.constant 0 : i32
    %c0_i32_0 = arith.constant 0 : i32
    %c0_i32_1 = arith.constant 0 : i32
    return %arg0, %c0_i32, %c0_i32_0 : i32, i32, i32
  }
  func.func @transform_1(%arg0: i32) -> (i32, i32, i32, i32) {
    %c0_i32 = arith.constant 0 : i32
    %c0_i32_0 = arith.constant 0 : i32
    %c0_i32_1 = arith.constant 0 : i32
    %c0_i32_2 = arith.constant 0 : i32
    return %arg0, %c0_i32, %c0_i32_0, %c0_i32_1 : i32, i32, i32, i32
  }
  func.func @transform_2(%arg0: i32) -> (i32, i32, i32, i32) {
    %c0_i32 = arith.constant 0 : i32
    %c0_i32_0 = arith.constant 0 : i32
    %c0_i32_1 = arith.constant 0 : i32
    %c0_i32_2 = arith.constant 0 : i32
    return %arg0, %c0_i32, %c0_i32_0, %c0_i32_1 : i32, i32, i32, i32
  }
  func.func @transform_3(%arg0: i32) -> (i32, i32) {
    %c0_i32 = arith.constant 0 : i32
    %c0_i32_0 = arith.constant 0 : i32
    %c0_i32_1 = arith.constant 0 : i32
    return %c0_i32, %c0_i32_0 : i32, i32
  }
  func.func @transform_4(%arg0: i32) -> (i32, i32) {
    %c0_i32 = arith.constant 0 : i32
    %c0_i32_0 = arith.constant 0 : i32
    %c0_i32_1 = arith.constant 0 : i32
    return %c0_i32, %c0_i32_0 : i32, i32
  }
  func.func @transform_5(%arg0: i32) -> (i32, i32) {
    %c0_i32 = arith.constant 0 : i32
    %c0_i32_0 = arith.constant 0 : i32
    %c0_i32_1 = arith.constant 0 : i32
    return %c0_i32, %c0_i32_0 : i32, i32
  }
  func.func @transform_6(%arg0: i32) -> (i32, i32) {
    %c0_i32 = arith.constant 0 : i32
    %c0_i32_0 = arith.constant 0 : i32
    %c0_i32_1 = arith.constant 0 : i32
    return %c0_i32, %c0_i32_0 : i32, i32
  }
  func.func @transform_7(%arg0: i32) -> (i32, i32) {
    %c0_i32 = arith.constant 0 : i32
    %c0_i32_0 = arith.constant 0 : i32
    %c0_i32_1 = arith.constant 0 : i32
    return %c0_i32, %c0_i32_0 : i32, i32
  }
  func.func @transform_8(%arg0: i32) -> (i32, i32) {
    %c0_i32 = arith.constant 0 : i32
    %c0_i32_0 = arith.constant 0 : i32
    %c0_i32_1 = arith.constant 0 : i32
    return %c0_i32, %c0_i32_0 : i32, i32
  }
  func.func @transform_9(%arg0: i32) -> (i32, i32) {
    %c0_i32 = arith.constant 0 : i32
    %c0_i32_0 = arith.constant 0 : i32
    %c0_i32_1 = arith.constant 0 : i32
    return %c0_i32, %c0_i32_0 : i32, i32
  }
  func.func @transform_10(%arg0: i32) -> (i32, i32) {
    %c0_i32 = arith.constant 0 : i32
    %c0_i32_0 = arith.constant 0 : i32
    %c0_i32_1 = arith.constant 0 : i32
    return %c0_i32, %c0_i32_0 : i32, i32
  }
  func.func @transform_11(%arg0: i32) -> (i32, i32) {
    %c0_i32 = arith.constant 0 : i32
    %c0_i32_0 = arith.constant 0 : i32
    %c0_i32_1 = arith.constant 0 : i32
    return %c0_i32, %c0_i32_0 : i32, i32
  }
  func.func @transform_12(%arg0: i32) -> (i32, i32) {
    %c0_i32 = arith.constant 0 : i32
    %c0_i32_0 = arith.constant 0 : i32
    %c0_i32_1 = arith.constant 0 : i32
    return %c0_i32, %c0_i32_0 : i32, i32
  }
  func.func @transform_13(%arg0: i32) -> (i32, i32) {
    %c0_i32 = arith.constant 0 : i32
    %c0_i32_0 = arith.constant 0 : i32
    %c0_i32_1 = arith.constant 0 : i32
    return %c0_i32, %c0_i32_0 : i32, i32
  }
  func.func @transform_14(%arg0: i32) -> (i32, i32) {
    %c0_i32 = arith.constant 0 : i32
    %c0_i32_0 = arith.constant 0 : i32
    %c0_i32_1 = arith.constant 0 : i32
    return %c0_i32, %c0_i32_0 : i32, i32
  }
  func.func @transform_15(%arg0: i32) -> (i32, i32, i32) {
    %c0_i32 = arith.constant 0 : i32
    %c0_i32_0 = arith.constant 0 : i32
    %c0_i32_1 = arith.constant 0 : i32
    return %arg0, %c0_i32, %c0_i32_0 : i32, i32, i32
  }
}

module attributes {stable_mosaic.version = 11 : i64} {
  func.func @_layout_layer_kernel(%arg0: i32, %arg1: memref<1x16x256xf32, #tpu.memory_space<vmem>>, %arg2: memref<1x1x16x16xi32, #tpu.memory_space<vmem>>, %arg3: memref<1x4x16x16xf32, #tpu.memory_space<vmem>>, %arg4: memref<256x768xbf16, #tpu.memory_space<vmem>>, %arg5: memref<1x768xf32, #tpu.memory_space<vmem>>, %arg6: memref<256x256xbf16, #tpu.memory_space<vmem>>, %arg7: memref<1x256xf32, #tpu.memory_space<vmem>>, %arg8: memref<1x256xf32, #tpu.memory_space<vmem>>, %arg9: memref<1x256xf32, #tpu.memory_space<vmem>>, %arg10: memref<256x512xbf16, #tpu.memory_space<vmem>>, %arg11: memref<1x512xf32, #tpu.memory_space<vmem>>, %arg12: memref<512x256xbf16, #tpu.memory_space<vmem>>, %arg13: memref<1x256xf32, #tpu.memory_space<vmem>>, %arg14: memref<1x256xf32, #tpu.memory_space<vmem>>, %arg15: memref<1x256xf32, #tpu.memory_space<vmem>>, %arg16: memref<1x16x256xf32, #tpu.memory_space<vmem>>, %arg17: memref<16x256xf32, #tpu.memory_space<vmem>>) attributes {dimension_semantics = [#tpu.dimension_semantics<parallel>], iteration_bounds = array<i64: 2>, scalar_prefetch = 0 : i64, scratch_operands = 1 : i64, tpu.core_type = #tpu.core_type<tc>, window_params = [{transform_indices = @transform_0, window_bounds = array<i64: 1, 16, 256>}, {transform_indices = @transform_1, window_bounds = array<i64: 1, 1, 16, 16>}, {transform_indices = @transform_2, window_bounds = array<i64: 1, 4, 16, 16>}, {pipeline_mode = #tpu.pipeline_mode<synchronous>, transform_indices = @transform_3, window_bounds = array<i64: 256, 768>}, {pipeline_mode = #tpu.pipeline_mode<synchronous>, transform_indices = @transform_4, window_bounds = array<i64: 1, 768>}, {pipeline_mode = #tpu.pipeline_mode<synchronous>, transform_indices = @transform_5, window_bounds = array<i64: 256, 256>}, {pipeline_mode = #tpu.pipeline_mode<synchronous>, transform_indices = @transform_6, window_bounds = array<i64: 1, 256>}, {pipeline_mode = #tpu.pipeline_mode<synchronous>, transform_indices = @transform_7, window_bounds = array<i64: 1, 256>}, {pipeline_mode = #tpu.pipeline_mode<synchronous>, transform_indices = @transform_8, window_bounds = array<i64: 1, 256>}, {pipeline_mode = #tpu.pipeline_mode<synchronous>, transform_indices = @transform_9, window_bounds = array<i64: 256, 512>}, {pipeline_mode = #tpu.pipeline_mode<synchronous>, transform_indices = @transform_10, window_bounds = array<i64: 1, 512>}, {pipeline_mode = #tpu.pipeline_mode<synchronous>, transform_indices = @transform_11, window_bounds = array<i64: 512, 256>}, {pipeline_mode = #tpu.pipeline_mode<synchronous>, transform_indices = @transform_12, window_bounds = array<i64: 1, 256>}, {pipeline_mode = #tpu.pipeline_mode<synchronous>, transform_indices = @transform_13, window_bounds = array<i64: 1, 256>}, {pipeline_mode = #tpu.pipeline_mode<synchronous>, transform_indices = @transform_14, window_bounds = array<i64: 1, 256>}, {transform_indices = @transform_15, window_bounds = array<i64: 1, 16, 256>}]} {
    %c0 = arith.constant 0 : index
    %c0_0 = arith.constant 0 : index
    %c0_1 = arith.constant 0 : index
    %0 = vector.load %arg1[%c0, %c0_0, %c0_1] : memref<1x16x256xf32, #tpu.memory_space<vmem>>, vector<1x16x256xf32>
    %1 = vector.shape_cast %0 : vector<1x16x256xf32> to vector<16x256xf32>
    %c0_2 = arith.constant 0 : index
    %c0_3 = arith.constant 0 : index
    %c0_4 = arith.constant 0 : index
    %2 = vector.load %arg1[%c0_2, %c0_3, %c0_4] : memref<1x16x256xf32, #tpu.memory_space<vmem>>, vector<1x16x256xf32>
    %3 = vector.shape_cast %2 : vector<1x16x256xf32> to vector<16x256xf32>
    %4 = arith.truncf %3 : vector<16x256xf32> to vector<16x256xbf16>
    %c0_5 = arith.constant 0 : index
    %c0_6 = arith.constant 0 : index
    %5 = vector.load %arg4[%c0_5, %c0_6] : memref<256x768xbf16, #tpu.memory_space<vmem>>, vector<256x768xbf16>
    %cst = arith.constant dense<0.000000e+00> : vector<16x768xf32>
    %6 = tpu.matmul %4, %5, %cst {dimension_numbers = #tpu.dot_dimension_numbers<[1], [0], [0], [1], [0, 0, 1, 1], [], []>} : vector<16x256xbf16>, vector<256x768xbf16>, vector<16x768xf32> -> vector<16x768xf32>
    %c0_7 = arith.constant 0 : index
    %c0_8 = arith.constant 0 : index
    %7 = vector.load %arg5[%c0_7, %c0_8] : memref<1x768xf32, #tpu.memory_space<vmem>>, vector<1x768xf32>
    %8 = vector.broadcast %7 : vector<1x768xf32> to vector<16x768xf32>
    %9 = arith.addf %6, %8 : vector<16x768xf32>
    %c0_9 = arith.constant 0 : index
    %c0_10 = arith.constant 0 : index
    %c0_11 = arith.constant 0 : index
    %c0_12 = arith.constant 0 : index
    %10 = vector.load %arg2[%c0_9, %c0_10, %c0_11, %c0_12] : memref<1x1x16x16xi32, #tpu.memory_space<vmem>>, vector<1x1x16x16xi32>
    %11 = vector.shape_cast %10 : vector<1x1x16x16xi32> to vector<16x16xi32>
    %c0_i32 = arith.constant 0 : i32
    %12 = vector.broadcast %c0_i32 : i32 to vector<16x16xi32>
    %13 = arith.cmpi ne, %11, %12 : vector<16x16xi32>
    %cst_13 = arith.constant -1.000000e+30 : f32
    %cst_14 = arith.constant 0.000000e+00 : f32
    %14 = vector.broadcast %cst_13 : f32 to vector<16x16xf32>
    %15 = vector.broadcast %cst_14 : f32 to vector<16x16xf32>
    %16 = arith.select %13, %14, %15 : vector<16x16xi1>, vector<16x16xf32>
    %17 = vector.extract_strided_slice %9 {offsets = [0, 0], sizes = [16, 64], strides = [1, 1]} : vector<16x768xf32> to vector<16x64xf32>
    %18 = arith.truncf %17 : vector<16x64xf32> to vector<16x64xbf16>
    %19 = vector.extract_strided_slice %9 {offsets = [0, 256], sizes = [16, 64], strides = [1, 1]} : vector<16x768xf32> to vector<16x64xf32>
    %20 = arith.truncf %19 : vector<16x64xf32> to vector<16x64xbf16>
    %21 = vector.extract_strided_slice %9 {offsets = [0, 512], sizes = [16, 64], strides = [1, 1]} : vector<16x768xf32> to vector<16x64xf32>
    %22 = arith.truncf %21 : vector<16x64xf32> to vector<16x64xbf16>
    %c0_15 = arith.constant 0 : index
    %c0_16 = arith.constant 0 : index
    %c0_17 = arith.constant 0 : index
    %c0_18 = arith.constant 0 : index
    %23 = vector.load %arg3[%c0_15, %c0_16, %c0_17, %c0_18] : memref<1x4x16x16xf32, #tpu.memory_space<vmem>>, vector<1x1x16x16xf32>
    %24 = vector.shape_cast %23 : vector<1x1x16x16xf32> to vector<16x16xf32>
    %cst_19 = arith.constant dense<0.000000e+00> : vector<16x16xf32>
    %25 = tpu.matmul %18, %20, %cst_19 {dimension_numbers = #tpu.dot_dimension_numbers<[1], [1], [0], [0], [0, 0, 1, 0], [], []>} : vector<16x64xbf16>, vector<16x64xbf16>, vector<16x16xf32> -> vector<16x16xf32>
    %26 = arith.addf %25, %24 : vector<16x16xf32>
    %27 = arith.addf %26, %16 : vector<16x16xf32>
    %cst_20 = arith.constant dense<0xFF800000> : vector<16xf32>
    %28 = vector.multi_reduction <maximumf>, %27, %cst_20 [1] : vector<16x16xf32> to vector<16xf32>
    %29 = vector.shape_cast %28 : vector<16xf32> to vector<16x1xf32>
    %30 = vector.broadcast %29 : vector<16x1xf32> to vector<16x16xf32>
    %31 = arith.subf %27, %30 : vector<16x16xf32>
    %32 = math.exp %31 : vector<16x16xf32>
    %cst_21 = arith.constant dense<0.000000e+00> : vector<16xf32>
    %33 = vector.multi_reduction <add>, %32, %cst_21 [1] : vector<16x16xf32> to vector<16xf32>
    %34 = vector.shape_cast %33 : vector<16xf32> to vector<16x1xf32>
    %35 = tpu.reciprocal %34 {approx = true} : vector<16x1xf32> -> vector<16x1xf32>
    %36 = vector.broadcast %35 : vector<16x1xf32> to vector<16x16xf32>
    %37 = arith.mulf %32, %36 : vector<16x16xf32>
    %38 = arith.truncf %37 : vector<16x16xf32> to vector<16x16xbf16>
    %cst_22 = arith.constant dense<0.000000e+00> : vector<16x64xf32>
    %39 = tpu.matmul %38, %22, %cst_22 {dimension_numbers = #tpu.dot_dimension_numbers<[1], [0], [0], [1], [0, 0, 1, 1], [], []>} : vector<16x16xbf16>, vector<16x64xbf16>, vector<16x64xf32> -> vector<16x64xf32>
    %c0_23 = arith.constant 0 : index
    %c0_24 = arith.constant 0 : index
    %40 = vector.load %arg17[%c0_23, %c0_24] : memref<16x256xf32, #tpu.memory_space<vmem>>, vector<16x64xf32>
    tpu.vector_store %arg17[%c0_23, %c0_24], %39 {strides = array<i32>} : memref<16x256xf32, #tpu.memory_space<vmem>>, vector<16x64xf32>,
    %41 = vector.extract_strided_slice %9 {offsets = [0, 64], sizes = [16, 64], strides = [1, 1]} : vector<16x768xf32> to vector<16x64xf32>
    %42 = arith.truncf %41 : vector<16x64xf32> to vector<16x64xbf16>
    %43 = vector.extract_strided_slice %9 {offsets = [0, 320], sizes = [16, 64], strides = [1, 1]} : vector<16x768xf32> to vector<16x64xf32>
    %44 = arith.truncf %43 : vector<16x64xf32> to vector<16x64xbf16>
    %45 = vector.extract_strided_slice %9 {offsets = [0, 576], sizes = [16, 64], strides = [1, 1]} : vector<16x768xf32> to vector<16x64xf32>
    %46 = arith.truncf %45 : vector<16x64xf32> to vector<16x64xbf16>
    %c0_25 = arith.constant 0 : index
    %c1 = arith.constant 1 : index
    %c0_26 = arith.constant 0 : index
    %c0_27 = arith.constant 0 : index
    %47 = vector.load %arg3[%c0_25, %c1, %c0_26, %c0_27] : memref<1x4x16x16xf32, #tpu.memory_space<vmem>>, vector<1x1x16x16xf32>
    %48 = vector.shape_cast %47 : vector<1x1x16x16xf32> to vector<16x16xf32>
    %cst_28 = arith.constant dense<0.000000e+00> : vector<16x16xf32>
    %49 = tpu.matmul %42, %44, %cst_28 {dimension_numbers = #tpu.dot_dimension_numbers<[1], [1], [0], [0], [0, 0, 1, 0], [], []>} : vector<16x64xbf16>, vector<16x64xbf16>, vector<16x16xf32> -> vector<16x16xf32>
    %50 = arith.addf %49, %48 : vector<16x16xf32>
    %51 = arith.addf %50, %16 : vector<16x16xf32>
    %cst_29 = arith.constant dense<0xFF800000> : vector<16xf32>
    %52 = vector.multi_reduction <maximumf>, %51, %cst_29 [1] : vector<16x16xf32> to vector<16xf32>
    %53 = vector.shape_cast %52 : vector<16xf32> to vector<16x1xf32>
    %54 = vector.broadcast %53 : vector<16x1xf32> to vector<16x16xf32>
    %55 = arith.subf %51, %54 : vector<16x16xf32>
    %56 = math.exp %55 : vector<16x16xf32>
    %cst_30 = arith.constant dense<0.000000e+00> : vector<16xf32>
    %57 = vector.multi_reduction <add>, %56, %cst_30 [1] : vector<16x16xf32> to vector<16xf32>
    %58 = vector.shape_cast %57 : vector<16xf32> to vector<16x1xf32>
    %59 = tpu.reciprocal %58 {approx = true} : vector<16x1xf32> -> vector<16x1xf32>
    %60 = vector.broadcast %59 : vector<16x1xf32> to vector<16x16xf32>
    %61 = arith.mulf %56, %60 : vector<16x16xf32>
    %62 = arith.truncf %61 : vector<16x16xf32> to vector<16x16xbf16>
    %cst_31 = arith.constant dense<0.000000e+00> : vector<16x64xf32>
    %63 = tpu.matmul %62, %46, %cst_31 {dimension_numbers = #tpu.dot_dimension_numbers<[1], [0], [0], [1], [0, 0, 1, 1], [], []>} : vector<16x16xbf16>, vector<16x64xbf16>, vector<16x64xf32> -> vector<16x64xf32>
    %c0_32 = arith.constant 0 : index
    %c64 = arith.constant 64 : index
    %64 = vector.load %arg17[%c0_32, %c64] : memref<16x256xf32, #tpu.memory_space<vmem>>, vector<16x64xf32>
    tpu.vector_store %arg17[%c0_32, %c64], %63 {strides = array<i32>} : memref<16x256xf32, #tpu.memory_space<vmem>>, vector<16x64xf32>,
    %65 = vector.extract_strided_slice %9 {offsets = [0, 128], sizes = [16, 64], strides = [1, 1]} : vector<16x768xf32> to vector<16x64xf32>
    %66 = arith.truncf %65 : vector<16x64xf32> to vector<16x64xbf16>
    %67 = vector.extract_strided_slice %9 {offsets = [0, 384], sizes = [16, 64], strides = [1, 1]} : vector<16x768xf32> to vector<16x64xf32>
    %68 = arith.truncf %67 : vector<16x64xf32> to vector<16x64xbf16>
    %69 = vector.extract_strided_slice %9 {offsets = [0, 640], sizes = [16, 64], strides = [1, 1]} : vector<16x768xf32> to vector<16x64xf32>
    %70 = arith.truncf %69 : vector<16x64xf32> to vector<16x64xbf16>
    %c0_33 = arith.constant 0 : index
    %c2 = arith.constant 2 : index
    %c0_34 = arith.constant 0 : index
    %c0_35 = arith.constant 0 : index
    %71 = vector.load %arg3[%c0_33, %c2, %c0_34, %c0_35] : memref<1x4x16x16xf32, #tpu.memory_space<vmem>>, vector<1x1x16x16xf32>
    %72 = vector.shape_cast %71 : vector<1x1x16x16xf32> to vector<16x16xf32>
    %cst_36 = arith.constant dense<0.000000e+00> : vector<16x16xf32>
    %73 = tpu.matmul %66, %68, %cst_36 {dimension_numbers = #tpu.dot_dimension_numbers<[1], [1], [0], [0], [0, 0, 1, 0], [], []>} : vector<16x64xbf16>, vector<16x64xbf16>, vector<16x16xf32> -> vector<16x16xf32>
    %74 = arith.addf %73, %72 : vector<16x16xf32>
    %75 = arith.addf %74, %16 : vector<16x16xf32>
    %cst_37 = arith.constant dense<0xFF800000> : vector<16xf32>
    %76 = vector.multi_reduction <maximumf>, %75, %cst_37 [1] : vector<16x16xf32> to vector<16xf32>
    %77 = vector.shape_cast %76 : vector<16xf32> to vector<16x1xf32>
    %78 = vector.broadcast %77 : vector<16x1xf32> to vector<16x16xf32>
    %79 = arith.subf %75, %78 : vector<16x16xf32>
    %80 = math.exp %79 : vector<16x16xf32>
    %cst_38 = arith.constant dense<0.000000e+00> : vector<16xf32>
    %81 = vector.multi_reduction <add>, %80, %cst_38 [1] : vector<16x16xf32> to vector<16xf32>
    %82 = vector.shape_cast %81 : vector<16xf32> to vector<16x1xf32>
    %83 = tpu.reciprocal %82 {approx = true} : vector<16x1xf32> -> vector<16x1xf32>
    %84 = vector.broadcast %83 : vector<16x1xf32> to vector<16x16xf32>
    %85 = arith.mulf %80, %84 : vector<16x16xf32>
    %86 = arith.truncf %85 : vector<16x16xf32> to vector<16x16xbf16>
    %cst_39 = arith.constant dense<0.000000e+00> : vector<16x64xf32>
    %87 = tpu.matmul %86, %70, %cst_39 {dimension_numbers = #tpu.dot_dimension_numbers<[1], [0], [0], [1], [0, 0, 1, 1], [], []>} : vector<16x16xbf16>, vector<16x64xbf16>, vector<16x64xf32> -> vector<16x64xf32>
    %c0_40 = arith.constant 0 : index
    %c128 = arith.constant 128 : index
    %88 = vector.load %arg17[%c0_40, %c128] : memref<16x256xf32, #tpu.memory_space<vmem>>, vector<16x64xf32>
    tpu.vector_store %arg17[%c0_40, %c128], %87 {strides = array<i32>} : memref<16x256xf32, #tpu.memory_space<vmem>>, vector<16x64xf32>,
    %89 = vector.extract_strided_slice %9 {offsets = [0, 192], sizes = [16, 64], strides = [1, 1]} : vector<16x768xf32> to vector<16x64xf32>
    %90 = arith.truncf %89 : vector<16x64xf32> to vector<16x64xbf16>
    %91 = vector.extract_strided_slice %9 {offsets = [0, 448], sizes = [16, 64], strides = [1, 1]} : vector<16x768xf32> to vector<16x64xf32>
    %92 = arith.truncf %91 : vector<16x64xf32> to vector<16x64xbf16>
    %93 = vector.extract_strided_slice %9 {offsets = [0, 704], sizes = [16, 64], strides = [1, 1]} : vector<16x768xf32> to vector<16x64xf32>
    %94 = arith.truncf %93 : vector<16x64xf32> to vector<16x64xbf16>
    %c0_41 = arith.constant 0 : index
    %c3 = arith.constant 3 : index
    %c0_42 = arith.constant 0 : index
    %c0_43 = arith.constant 0 : index
    %95 = vector.load %arg3[%c0_41, %c3, %c0_42, %c0_43] : memref<1x4x16x16xf32, #tpu.memory_space<vmem>>, vector<1x1x16x16xf32>
    %96 = vector.shape_cast %95 : vector<1x1x16x16xf32> to vector<16x16xf32>
    %cst_44 = arith.constant dense<0.000000e+00> : vector<16x16xf32>
    %97 = tpu.matmul %90, %92, %cst_44 {dimension_numbers = #tpu.dot_dimension_numbers<[1], [1], [0], [0], [0, 0, 1, 0], [], []>} : vector<16x64xbf16>, vector<16x64xbf16>, vector<16x16xf32> -> vector<16x16xf32>
    %98 = arith.addf %97, %96 : vector<16x16xf32>
    %99 = arith.addf %98, %16 : vector<16x16xf32>
    %cst_45 = arith.constant dense<0xFF800000> : vector<16xf32>
    %100 = vector.multi_reduction <maximumf>, %99, %cst_45 [1] : vector<16x16xf32> to vector<16xf32>
    %101 = vector.shape_cast %100 : vector<16xf32> to vector<16x1xf32>
    %102 = vector.broadcast %101 : vector<16x1xf32> to vector<16x16xf32>
    %103 = arith.subf %99, %102 : vector<16x16xf32>
    %104 = math.exp %103 : vector<16x16xf32>
    %cst_46 = arith.constant dense<0.000000e+00> : vector<16xf32>
    %105 = vector.multi_reduction <add>, %104, %cst_46 [1] : vector<16x16xf32> to vector<16xf32>
    %106 = vector.shape_cast %105 : vector<16xf32> to vector<16x1xf32>
    %107 = tpu.reciprocal %106 {approx = true} : vector<16x1xf32> -> vector<16x1xf32>
    %108 = vector.broadcast %107 : vector<16x1xf32> to vector<16x16xf32>
    %109 = arith.mulf %104, %108 : vector<16x16xf32>
    %110 = arith.truncf %109 : vector<16x16xf32> to vector<16x16xbf16>
    %cst_47 = arith.constant dense<0.000000e+00> : vector<16x64xf32>
    %111 = tpu.matmul %110, %94, %cst_47 {dimension_numbers = #tpu.dot_dimension_numbers<[1], [0], [0], [1], [0, 0, 1, 1], [], []>} : vector<16x16xbf16>, vector<16x64xbf16>, vector<16x64xf32> -> vector<16x64xf32>
    %c0_48 = arith.constant 0 : index
    %c192 = arith.constant 192 : index
    %112 = vector.load %arg17[%c0_48, %c192] : memref<16x256xf32, #tpu.memory_space<vmem>>, vector<16x64xf32>
    tpu.vector_store %arg17[%c0_48, %c192], %111 {strides = array<i32>} : memref<16x256xf32, #tpu.memory_space<vmem>>, vector<16x64xf32>,
    %c0_49 = arith.constant 0 : index
    %c0_50 = arith.constant 0 : index
    %113 = vector.load %arg17[%c0_49, %c0_50] : memref<16x256xf32, #tpu.memory_space<vmem>>, vector<16x256xf32>
    %114 = arith.truncf %113 : vector<16x256xf32> to vector<16x256xbf16>
    %c0_51 = arith.constant 0 : index
    %c0_52 = arith.constant 0 : index
    %115 = vector.load %arg6[%c0_51, %c0_52] : memref<256x256xbf16, #tpu.memory_space<vmem>>, vector<256x256xbf16>
    %cst_53 = arith.constant dense<0.000000e+00> : vector<16x256xf32>
    %116 = tpu.matmul %114, %115, %cst_53 {dimension_numbers = #tpu.dot_dimension_numbers<[1], [0], [0], [1], [0, 0, 1, 1], [], []>} : vector<16x256xbf16>, vector<256x256xbf16>, vector<16x256xf32> -> vector<16x256xf32>
    %c0_54 = arith.constant 0 : index
    %c0_55 = arith.constant 0 : index
    %117 = vector.load %arg7[%c0_54, %c0_55] : memref<1x256xf32, #tpu.memory_space<vmem>>, vector<1x256xf32>
    %118 = vector.broadcast %117 : vector<1x256xf32> to vector<16x256xf32>
    %119 = arith.addf %116, %118 : vector<16x256xf32>
    %120 = arith.addf %119, %1 : vector<16x256xf32>
    %c0_56 = arith.constant 0 : index
    %c0_57 = arith.constant 0 : index
    %121 = vector.load %arg8[%c0_56, %c0_57] : memref<1x256xf32, #tpu.memory_space<vmem>>, vector<1x256xf32>
    %c0_58 = arith.constant 0 : index
    %c0_59 = arith.constant 0 : index
    %122 = vector.load %arg9[%c0_58, %c0_59] : memref<1x256xf32, #tpu.memory_space<vmem>>, vector<1x256xf32>
    %cst_60 = arith.constant dense<0.000000e+00> : vector<16xf32>
    %123 = vector.multi_reduction <add>, %120, %cst_60 [1] : vector<16x256xf32> to vector<16xf32>
    %124 = vector.shape_cast %123 : vector<16xf32> to vector<16x1xf32>
    %cst_61 = arith.constant 2.560000e+02 : f32
    %125 = vector.broadcast %cst_61 : f32 to vector<16x1xf32>
    %126 = arith.divf %124, %125 : vector<16x1xf32>
    %127 = vector.broadcast %126 : vector<16x1xf32> to vector<16x256xf32>
    %128 = arith.subf %120, %127 : vector<16x256xf32>
    %129 = arith.mulf %128, %128 : vector<16x256xf32>
    %cst_62 = arith.constant dense<0.000000e+00> : vector<16xf32>
    %130 = vector.multi_reduction <add>, %129, %cst_62 [1] : vector<16x256xf32> to vector<16xf32>
    %131 = vector.shape_cast %130 : vector<16xf32> to vector<16x1xf32>
    %cst_63 = arith.constant 2.560000e+02 : f32
    %132 = vector.broadcast %cst_63 : f32 to vector<16x1xf32>
    %133 = arith.divf %131, %132 : vector<16x1xf32>
    %cst_64 = arith.constant 9.99999997E-7 : f32
    %134 = vector.broadcast %cst_64 : f32 to vector<16x1xf32>
    %135 = arith.addf %133, %134 : vector<16x1xf32>
    %136 = math.rsqrt %135 : vector<16x1xf32>
    %137 = vector.broadcast %136 : vector<16x1xf32> to vector<16x256xf32>
    %138 = arith.mulf %128, %137 : vector<16x256xf32>
    %139 = vector.broadcast %121 : vector<1x256xf32> to vector<16x256xf32>
    %140 = arith.mulf %138, %139 : vector<16x256xf32>
    %141 = vector.broadcast %122 : vector<1x256xf32> to vector<16x256xf32>
    %142 = arith.addf %140, %141 : vector<16x256xf32>
    %143 = arith.truncf %142 : vector<16x256xf32> to vector<16x256xbf16>
    %c0_65 = arith.constant 0 : index
    %c0_66 = arith.constant 0 : index
    %144 = vector.load %arg10[%c0_65, %c0_66] : memref<256x512xbf16, #tpu.memory_space<vmem>>, vector<256x512xbf16>
    %cst_67 = arith.constant dense<0.000000e+00> : vector<16x512xf32>
    %145 = tpu.matmul %143, %144, %cst_67 {dimension_numbers = #tpu.dot_dimension_numbers<[1], [0], [0], [1], [0, 0, 1, 1], [], []>} : vector<16x256xbf16>, vector<256x512xbf16>, vector<16x512xf32> -> vector<16x512xf32>
    %c0_68 = arith.constant 0 : index
    %c0_69 = arith.constant 0 : index
    %146 = vector.load %arg11[%c0_68, %c0_69] : memref<1x512xf32, #tpu.memory_space<vmem>>, vector<1x512xf32>
    %147 = vector.broadcast %146 : vector<1x512xf32> to vector<16x512xf32>
    %148 = arith.addf %145, %147 : vector<16x512xf32>
    %cst_70 = arith.constant 0.000000e+00 : f32
    %149 = vector.broadcast %cst_70 : f32 to vector<16x512xf32>
    %150 = arith.maximumf %148, %149 : vector<16x512xf32>
    %151 = arith.truncf %150 : vector<16x512xf32> to vector<16x512xbf16>
    %c0_71 = arith.constant 0 : index
    %c0_72 = arith.constant 0 : index
    %152 = vector.load %arg12[%c0_71, %c0_72] : memref<512x256xbf16, #tpu.memory_space<vmem>>, vector<512x256xbf16>
    %cst_73 = arith.constant dense<0.000000e+00> : vector<16x256xf32>
    %153 = tpu.matmul %151, %152, %cst_73 {dimension_numbers = #tpu.dot_dimension_numbers<[1], [0], [0], [1], [0, 0, 1, 1], [], []>} : vector<16x512xbf16>, vector<512x256xbf16>, vector<16x256xf32> -> vector<16x256xf32>
    %c0_74 = arith.constant 0 : index
    %c0_75 = arith.constant 0 : index
    %154 = vector.load %arg13[%c0_74, %c0_75] : memref<1x256xf32, #tpu.memory_space<vmem>>, vector<1x256xf32>
    %155 = vector.broadcast %154 : vector<1x256xf32> to vector<16x256xf32>
    %156 = arith.addf %153, %155 : vector<16x256xf32>
    %157 = arith.addf %156, %142 : vector<16x256xf32>
    %c0_76 = arith.constant 0 : index
    %c0_77 = arith.constant 0 : index
    %158 = vector.load %arg14[%c0_76, %c0_77] : memref<1x256xf32, #tpu.memory_space<vmem>>, vector<1x256xf32>
    %c0_78 = arith.constant 0 : index
    %c0_79 = arith.constant 0 : index
    %159 = vector.load %arg15[%c0_78, %c0_79] : memref<1x256xf32, #tpu.memory_space<vmem>>, vector<1x256xf32>
    %cst_80 = arith.constant dense<0.000000e+00> : vector<16xf32>
    %160 = vector.multi_reduction <add>, %157, %cst_80 [1] : vector<16x256xf32> to vector<16xf32>
    %161 = vector.shape_cast %160 : vector<16xf32> to vector<16x1xf32>
    %cst_81 = arith.constant 2.560000e+02 : f32
    %162 = vector.broadcast %cst_81 : f32 to vector<16x1xf32>
    %163 = arith.divf %161, %162 : vector<16x1xf32>
    %164 = vector.broadcast %163 : vector<16x1xf32> to vector<16x256xf32>
    %165 = arith.subf %157, %164 : vector<16x256xf32>
    %166 = arith.mulf %165, %165 : vector<16x256xf32>
    %cst_82 = arith.constant dense<0.000000e+00> : vector<16xf32>
    %167 = vector.multi_reduction <add>, %166, %cst_82 [1] : vector<16x256xf32> to vector<16xf32>
    %168 = vector.shape_cast %167 : vector<16xf32> to vector<16x1xf32>
    %cst_83 = arith.constant 2.560000e+02 : f32
    %169 = vector.broadcast %cst_83 : f32 to vector<16x1xf32>
    %170 = arith.divf %168, %169 : vector<16x1xf32>
    %cst_84 = arith.constant 9.99999997E-7 : f32
    %171 = vector.broadcast %cst_84 : f32 to vector<16x1xf32>
    %172 = arith.addf %170, %171 : vector<16x1xf32>
    %173 = math.rsqrt %172 : vector<16x1xf32>
    %174 = vector.broadcast %173 : vector<16x1xf32> to vector<16x256xf32>
    %175 = arith.mulf %165, %174 : vector<16x256xf32>
    %176 = vector.broadcast %158 : vector<1x256xf32> to vector<16x256xf32>
    %177 = arith.mulf %175, %176 : vector<16x256xf32>
    %178 = vector.broadcast %159 : vector<1x256xf32> to vector<16x256xf32>
    %179 = arith.addf %177, %178 : vector<16x256xf32>
    %c0_85 = arith.constant 0 : index
    %c0_86 = arith.constant 0 : index
    %c0_87 = arith.constant 0 : index
    %180 = vector.load %arg16[%c0_85, %c0_86, %c0_87] : memref<1x16x256xf32, #tpu.memory_space<vmem>>, vector<1x16x256xf32>
    %181 = vector.shape_cast %180 : vector<1x16x256xf32> to vector<16x256xf32>
    %182 = vector.shape_cast %179 : vector<16x256xf32> to vector<1x16x256xf32>
    tpu.vector_store %arg16[%c0_85, %c0_86, %c0_87], %182 {strides = array<i32>} : memref<1x16x256xf32, #tpu.memory_space<vmem>>, vector<1x16x256xf32>,
    return
  }
  func.func @transform_0(%arg0: i32) -> (i32, i32, i32) {
    %c0_i32 = arith.constant 0 : i32
    %c0_i32_0 = arith.constant 0 : i32
    %c0_i32_1 = arith.constant 0 : i32
    return %arg0, %c0_i32, %c0_i32_0 : i32, i32, i32
  }
  func.func @transform_1(%arg0: i32) -> (i32, i32, i32, i32) {
    %c0_i32 = arith.constant 0 : i32
    %c0_i32_0 = arith.constant 0 : i32
    %c0_i32_1 = arith.constant 0 : i32
    %c0_i32_2 = arith.constant 0 : i32
    return %arg0, %c0_i32, %c0_i32_0, %c0_i32_1 : i32, i32, i32, i32
  }
  func.func @transform_2(%arg0: i32) -> (i32, i32, i32, i32) {
    %c0_i32 = arith.constant 0 : i32
    %c0_i32_0 = arith.constant 0 : i32
    %c0_i32_1 = arith.constant 0 : i32
    %c0_i32_2 = arith.constant 0 : i32
    return %arg0, %c0_i32, %c0_i32_0, %c0_i32_1 : i32, i32, i32, i32
  }
  func.func @transform_3(%arg0: i32) -> (i32, i32) {
    %c0_i32 = arith.constant 0 : i32
    %c0_i32_0 = arith.constant 0 : i32
    %c0_i32_1 = arith.constant 0 : i32
    return %c0_i32, %c0_i32_0 : i32, i32
  }
  func.func @transform_4(%arg0: i32) -> (i32, i32) {
    %c0_i32 = arith.constant 0 : i32
    %c0_i32_0 = arith.constant 0 : i32
    %c0_i32_1 = arith.constant 0 : i32
    return %c0_i32, %c0_i32_0 : i32, i32
  }
  func.func @transform_5(%arg0: i32) -> (i32, i32) {
    %c0_i32 = arith.constant 0 : i32
    %c0_i32_0 = arith.constant 0 : i32
    %c0_i32_1 = arith.constant 0 : i32
    return %c0_i32, %c0_i32_0 : i32, i32
  }
  func.func @transform_6(%arg0: i32) -> (i32, i32) {
    %c0_i32 = arith.constant 0 : i32
    %c0_i32_0 = arith.constant 0 : i32
    %c0_i32_1 = arith.constant 0 : i32
    return %c0_i32, %c0_i32_0 : i32, i32
  }
  func.func @transform_7(%arg0: i32) -> (i32, i32) {
    %c0_i32 = arith.constant 0 : i32
    %c0_i32_0 = arith.constant 0 : i32
    %c0_i32_1 = arith.constant 0 : i32
    return %c0_i32, %c0_i32_0 : i32, i32
  }
  func.func @transform_8(%arg0: i32) -> (i32, i32) {
    %c0_i32 = arith.constant 0 : i32
    %c0_i32_0 = arith.constant 0 : i32
    %c0_i32_1 = arith.constant 0 : i32
    return %c0_i32, %c0_i32_0 : i32, i32
  }
  func.func @transform_9(%arg0: i32) -> (i32, i32) {
    %c0_i32 = arith.constant 0 : i32
    %c0_i32_0 = arith.constant 0 : i32
    %c0_i32_1 = arith.constant 0 : i32
    return %c0_i32, %c0_i32_0 : i32, i32
  }
  func.func @transform_10(%arg0: i32) -> (i32, i32) {
    %c0_i32 = arith.constant 0 : i32
    %c0_i32_0 = arith.constant 0 : i32
    %c0_i32_1 = arith.constant 0 : i32
    return %c0_i32, %c0_i32_0 : i32, i32
  }
  func.func @transform_11(%arg0: i32) -> (i32, i32) {
    %c0_i32 = arith.constant 0 : i32
    %c0_i32_0 = arith.constant 0 : i32
    %c0_i32_1 = arith.constant 0 : i32
    return %c0_i32, %c0_i32_0 : i32, i32
  }
  func.func @transform_12(%arg0: i32) -> (i32, i32) {
    %c0_i32 = arith.constant 0 : i32
    %c0_i32_0 = arith.constant 0 : i32
    %c0_i32_1 = arith.constant 0 : i32
    return %c0_i32, %c0_i32_0 : i32, i32
  }
  func.func @transform_13(%arg0: i32) -> (i32, i32) {
    %c0_i32 = arith.constant 0 : i32
    %c0_i32_0 = arith.constant 0 : i32
    %c0_i32_1 = arith.constant 0 : i32
    return %c0_i32, %c0_i32_0 : i32, i32
  }
  func.func @transform_14(%arg0: i32) -> (i32, i32) {
    %c0_i32 = arith.constant 0 : i32
    %c0_i32_0 = arith.constant 0 : i32
    %c0_i32_1 = arith.constant 0 : i32
    return %c0_i32, %c0_i32_0 : i32, i32
  }
  func.func @transform_15(%arg0: i32) -> (i32, i32, i32) {
    %c0_i32 = arith.constant 0 : i32
    %c0_i32_0 = arith.constant 0 : i32
    %c0_i32_1 = arith.constant 0 : i32
    return %arg0, %c0_i32, %c0_i32_0 : i32, i32, i32
  }
}

</mosaic_0001>

<bundles_post_ra>
// kernel: tpu_custom_call.1
= control target key start
LH: loop header
LB: loop body
LE: loop exit
PB: predicated region body
PF: predicated region fallthrough
CT: control target
= control target key end

     0   :  { %s5883_s0 = inlined_call_operand.hbm [shape: f32[2,16,256], index: 0, kind: input, shape index: {}]   ;;  %s5884_s1 = inlined_call_operand.hbm [shape: s32[2,1,16,16], index: 1, kind: input, shape index: {}]   ;;  %s5885_s2 = inlined_call_operand.hbm [shape: f32[2,4,16,16], index: 2, kind: input, shape index: {}]   ;;  %s5886_s3 = inlined_call_operand.hbm [shape: bf16[256,768], index: 3, kind: input, shape index: {}]   ;;  %s5887_s4 = inlined_call_operand.hbm [shape: f32[1,768], index: 4, kind: input, shape index: {}]   ;;  %s5888_s5 = inlined_call_operand.hbm [shape: bf16[256,256], index: 5, kind: input, shape index: {}]   ;;  %s5889_s6 = inlined_call_operand.vmem [shape: f32[1,256], index: 6, kind: input, shape index: {}]   ;;  %s5890_s7 = inlined_call_operand.hbm [shape: f32[1,256], index: 7, kind: input, shape index: {}]   ;;  %s5891_s8 = inlined_call_operand.hbm [shape: f32[1,256], index: 8, kind: input, shape index: {}]   ;;  %s5892_s9 = inlined_call_operand.hbm [shape: bf16[256,512], index: 9, kind: input, shape index: {}]   ;;  %s5893_s10 = inlined_call_operand.vmem [shape: f32[1,512], index: 10, kind: input, shape index: {}]   ;;  %s5894_s11 = inlined_call_operand.hbm [shape: bf16[512,256], index: 11, kind: input, shape index: {}]   ;;  %s5895_s12 = inlined_call_operand.vmem [shape: f32[1,256], index: 12, kind: input, shape index: {}]   ;;  %s5896_s13 = inlined_call_operand.vmem [shape: f32[1,256], index: 13, kind: input, shape index: {}]   ;;  %s5897_s14 = inlined_call_operand.vmem [shape: f32[1,256], index: 14, kind: input, shape index: {}]   ;;  %s5898_s15 = inlined_call_operand.hbm [shape: f32[2,16,256], index: 15, kind: output, shape index: {}]  }
   0x1   :  { %5914 = sst [smem:[#allocation34_spill]] %s5883_s0 }
   0x2   :  { %5915 = sst [smem:[#allocation35_spill]] %s5884_s1 }
   0x3   :  { %5916 = sst [smem:[#allocation36_spill]] %s5886_s3 }
   0x4   :  { %5917 = sst [smem:[#allocation37_spill]] %s5888_s5 }
   0x5   :  { %5918 = sst [smem:[#allocation38_spill]] %s5891_s8 }
   0x6   :  { %5919 = sst [smem:[#allocation39_spill]] %s5893_s10 }
   0x7   :  { %5920 = sst [smem:[#allocation40_spill]] %s5895_s12 }
   0x8   :  { %5921 = sst [smem:[#allocation41_spill]] %s5896_s13 }
   0x9   :  { %5922 = sst [smem:[#allocation42_spill]] %s5897_s14 }
   0xa   :  { %5923 = sst [smem:[#allocation43_spill]] %s5898_s15 }
   0xb   :  { %20 = vsyncpa [#allocation4], 0 }
   0xc   :  { %22 = vsyncpa [#allocation4 + $0x1], 0 }
   0xd   :  { %23 = vsyncpa [#allocation7], 0 }
   0xe   :  { %25 = vsyncpa [#allocation7 + $0x1], 0 }
   0xf   :  { %26 = vsyncpa [#allocation10], 0 }
  0x10   :  { %27 = vsyncpa [#allocation13], 0 }
  0x11   :  { %28 = vsyncpa [#allocation16], 0 }
  0x12   :  { %29 = vsyncpa [#allocation19], 0 }
  0x13   :  { %30 = vsyncpa [#allocation5], 0 }
  0x14   :  { %32 = vsyncpa [#allocation5 + $0x1], 0  ;;  %s5433_s18 = smov 0   ;;  %s5435_s19 = smov 0  }
  0x15   :  { %s5437_s20 = smov 0   ;;  %s5439_s21 = smov 0  }
  0x16 LB: > { %5924 = sst [smem:[#allocation28_spill]] %s5321_s18  ;;  %s5457_s25 = sadd.s32 4294967295, %s5333_s21   ;;  %s5333_s21 = sphi %s5439_s21, %s5962_s21   ;;  %s5329_s20 = sphi %s5437_s20, %s5964_s20   ;;  %s5325_s19 = sphi %s5435_s19, %s5966_s19   ;;  %s5321_s18 = sphi %s5433_s18, %s5965_s18  }
  0x17   : > { %5925 = sst [smem:[#allocation29_spill]] %s5329_s20  ;;  %p3430_p0 = scmp.ge.s32.totalorder %s5333_s21, 1 }
  0x18   : > { %s5926_s3 = sld [smem:[#allocation36_spill]]  ;;  %p5911_p1 = scmp.eq.s32.totalorder %s5457_s25, 0 }
  0x19   : > { %p399_p2 = scmp.lt.s32.totalorder %s5333_s21, 3  ;;  %s5335_s27 = smov [#allocation9]  }
  0x1a   : > { %s412_s28 = sshll.u32 %s5335_s27, 4  ;;  %s5928_s5 = sld [smem:[#allocation37_spill]]  ;;  %s413_s28 = int_to_ptr.vmem [resolvable:$true] %s412_s28 }
  0x1b   : > { %p5462_p3 = pnand %p3430_p0, %p399_p2  ;;  %s5336_s22 = smov [#allocation12]  }
  0x1c   : > { %s438_s23 = sshll.u32 %s5336_s22, 4  ;;  %s5337_s27 = smov 384   ;;  %s439_s23 = int_to_ptr.vmem [resolvable:$true] %s438_s23 }
  0x1d   : > { %p4799_p4 = pneg %p5462_p3  ;;  %s5900_s29 = smov 128  }
  0x1e   : > { %s410_s24 = sshll.u32 %s5926_s3, 4  ;;  %s5338_s3 = smov 24   ;;  %s411_s24 = int_to_ptr.hbm [resolvable:$true] %s410_s24 }
  0x1f   : > { %p5474_p6 = pnand %p4799_p4, %p5911_p1  ;;  %s5902_s30 = smov 8  }
  0x20   : > { %s436_s16 = sshll.u32 %s5928_s5, 4  ;;  %s5930_s8 = sld [smem:[#allocation38_spill]]  ;;  %s437_s16 = int_to_ptr.hbm [resolvable:$true] %s436_s16 }
  0x21   : > { %4802 = dma.hbm_to_vmem [thread:$0]  (!%p5474_p6), %s411_s24, 12288, %s413_s28, [#allocation10], %s5337_s27, %s5337_s27, %s5338_s3  }
  0x22   : > { %4808 = dma.hbm_to_vmem [thread:$0]  (!%p5474_p6), %s437_s16, 4096, %s439_s23, [#allocation13], %s5900_s29, %s5900_s29, %s5902_s30  }
  0x23   : > { %s5341_s3 = smov [#allocation15]   ;;  %s3429_s28 = sadd.s32 4294967294, %s5333_s21  }
  0x24   : > { %s468_s24 = sshll.u32 %s5341_s3, 4  ;;  %s5492_s27 = sadd.s32 1, %s5333_s21   ;;  %s469_s24 = int_to_ptr.vmem [resolvable:$true] %s468_s24 }
  0x25   : > { %5931 = sst [smem:[#allocation30_spill]] %s5492_s27  ;;  %s45_s16 = sadd.s32 1, %s5329_s20 }
  0x26   : > { %s466_s15 = sshll.u32 %s5930_s8, 4  ;;  %s42_s23 = ssub.s32 %s5333_s21, %s5492_s27  ;;  %s467_s15 = int_to_ptr.hbm [resolvable:$true] %s466_s15 }
  0x27   : > { %4814 = dma.hbm_to_vmem [thread:$0]  (!%p5474_p6), %s467_s15, 32, %s469_s24, [#allocation16]  }
  0x28   : > { %p52_p7 = scmp.ne.s32.totalorder %s5329_s20, %s5325_s19  ;;  %p43_p8 = scmp.eq.s32.totalorder %s42_s23, 0 }
  0x29   : > { %p53_p9 = scmp.eq.s32.totalorder %s5333_s21, 0  ;;  %p58_p10 = scmp.ne.s32.totalorder %s5325_s19, %s5321_s18 }
  0x2a   : > { %p386_p11 = scmp.eq.s32.totalorder %s5457_s25, 1  ;;  %p392_p2 = scmp.eq.s32.totalorder %s3429_s28, 1 }
  0x2b   : > { %s5504_s5 = scalar_select %p43_p8, %s5329_s20, %s45_s16  }
  0x2c   : > { %p54_p12 = por %p53_p9, %p52_p7  ;;  %p5508_p13 = por %p5911_p1, %p58_p10 }
  0x2d   : > { %5932 = sst [smem:[#allocation31_spill]] %s5504_s5  ;;  %p5512_p0 = por %p386_p11, %p52_p7 }
  0x2e   : > { %p4842_p4 = scmp.lt.s32.totalorder %s5333_s21, 2  ;;  %s5518_s3 = sand.u32 1, %s5329_s20  }
  0x2f   : > { %s5934_s22 = scalar_select %p5512_p0, 1, 0 }
  0x30   : > { %p5520_p5 = por %p392_p2, %p58_p10  ;;  %s541_s16 = sand.u32 1, %s5333_s21  }
  0x31   : > { %5935 = sst [smem:[#allocation32_spill]] %s5934_s22  ;;  %p5525_p8 = pnand %p4842_p4, %p54_p12 }
  0x32   : > { %s5936_s24 = scalar_select %p5520_p5, 1, 0 }
  0x33   : > { %s3442_s29 = sshll.u32 %s5518_s3, 4  ;;  %s4504_s30 = sshll.u32 %s5333_s21, 4 }
  0x34   : > { %5937 = sst [smem:[#allocation33_spill]] %s5936_s24  ;;  %s545_s20 = scalar_lea.vmem [#allocation6], %s3442_s29 }
  0x35   : > { %s5939_s1 = sld [smem:[#allocation35_spill]]  ;;  %s553_s27 = sshll.u32 %s545_s20, 4  ;;  %s554_s27 = int_to_ptr.vmem [resolvable:$true] %s553_s27 }
  0x36   : > { %s425_s14 = sshll.u32 %s5887_s4, 4  ;;  %s5537_s13 = scalar_lea.sflag [#allocation7], %s541_s16  ;;  %s426_s14 = int_to_ptr.hbm [resolvable:$true] %s425_s14 }
  0x37   : > { %p5041_p9 = pneg %p5525_p8 }
  0x3b   : > { %s550_s28 = scalar_lea.hbm %s5939_s1, %s4504_s30  ;;  %s5044_s29 = scalar_lea.hbm %s5939_s1, 32 }
  0x3c   : > { %s551_s18 = sshll.u32 %s550_s28, 4  ;;  %s552_s18 = int_to_ptr.hbm [resolvable:$true] %s551_s18 }
  0x3d   : > { %s5037_s12 = sshra.s32 %s552_s18, 4  ;;  %s5038_s12 = int_to_ptr.hbm [resolvable:$true] %s5037_s12 }
  0x3e   : > { %s5039_s10 = scalar_lea.hbm %s5038_s12, 16  ;;  %p5045_p12 = scmp.lt.s32.totalorder %s5038_s12, %s5939_s1 }
  0x3f   : > { %p5040_p7 = scmp.ne.s32.totalorder %s5038_s12, %s5039_s10  ;;  %p5046_p2 = scmp.lt.s32.totalorder %s5044_s29, %s5039_s10 }
  0x41   : > { %p5042_p10 = pnand %p5041_p9, %p5040_p7  ;;  %p5047_p4 = por %p5046_p2, %p5045_p12 }
  0x43   : > { %p5043_p11 = pneg %p5042_p10 }
  0x45   : > { %p5048_p1 = pnand %p5047_p4, %p5043_p11 }
  0x47   : > { %5051 = shalt.err (!%p5048_p1)
}
  0x48   : > { %s5940_s22 = smov 8   ;;  %s5941_s24 = smov 128  }
  0x49   : > { %4827 = dma.hbm_to_vmem [thread:$0]  (!%p5525_p8), %s552_s18, 256, %s554_s27, %s5537_s13, %s5941_s24, %s5941_s24, %s5940_s22  }
  0x4a   : > { %s5342_s16 = smov [#allocation11]   ;;  %s454_s10 = sshll.u32 %s5890_s7, 4  ;;  %s455_s10 = int_to_ptr.hbm [resolvable:$true] %s454_s10 }
  0x4b   : > { %s427_s28 = sshll.u32 %s5342_s16, 4  ;;  %s477_s30 = sshll.u32 %s5892_s9, 4  ;;  %s428_s28 = int_to_ptr.vmem [resolvable:$true] %s427_s28  ;;  %s478_s30 = int_to_ptr.hbm [resolvable:$true] %s477_s30 }
  0x4c   : > { %4805 = dma.hbm_to_vmem [thread:$0]  (!%p5474_p6), %s426_s14, 96, %s428_s28, [#allocation10]  }
  0x4d   : > { %s5343_s5 = smov [#allocation14]   ;;  %s5344_s18 = smov [#allocation17]  }
  0x4e   : > { %s456_s1 = sshll.u32 %s5343_s5, 4  ;;  %s479_s27 = sshll.u32 %s5344_s18, 4  ;;  %s457_s1 = int_to_ptr.vmem [resolvable:$true] %s456_s1  ;;  %s480_s27 = int_to_ptr.vmem [resolvable:$true] %s479_s27 }
  0x4f   : > { %4811 = dma.hbm_to_vmem [thread:$0]  (!%p5474_p6), %s455_s10, 32, %s457_s1, [#allocation13]  }
  0x50   : > { %s5912_s16 = smov 256   ;;  %s5913_s8 = smov 16  }
  0x51   : > { %4817 = dma.hbm_to_vmem [thread:$0]  (!%p5474_p6), %s478_s30, 8192, %s480_s27, [#allocation16], %s5912_s16, %s5912_s16, %s5913_s8  }
  0x52   : > { %s494_s20 = sshll.u32 %s5894_s11, 4  ;;  %s5347_s12 = smov [#allocation18]   ;;  %s495_s20 = int_to_ptr.hbm [resolvable:$true] %s494_s20 }
  0x53   : > { %s496_s29 = sshll.u32 %s5347_s12, 4  ;;  %s3439_s1 = sshll.u32 %s5518_s3, 5  ;;  %s497_s29 = int_to_ptr.vmem [resolvable:$true] %s496_s29 }
  0x54   : > { %4820 = dma.hbm_to_vmem [thread:$0]  (!%p5474_p6), %s495_s20, 8192, %s497_s29, [#allocation19], %s5941_s24, %s5941_s24, %s5940_s22  }
  0x55   : > { %s4503_s10 = sshll.u32 %s5333_s21, 5  ;;  %s5942_s0 = sld [smem:[#allocation34_spill]] }
  0x56   : > { %s523_s16 = scalar_lea.vmem [#allocation3], %s3439_s1  ;;  %s520_s28 = scalar_lea.sflag [#allocation4], %s5518_s3 }
  0x57   : > { %s531_s14 = sshll.u32 %s523_s16, 4  ;;  %s532_s14 = int_to_ptr.vmem [resolvable:$true] %s531_s14 }
  0x5b   : > { %s528_s30 = scalar_lea.hbm %s5942_s0, %s4503_s10  ;;  %s5194_s29 = scalar_lea.hbm %s5942_s0, 64 }
  0x5c   : > { %s529_s27 = sshll.u32 %s528_s30, 4  ;;  %s530_s27 = int_to_ptr.hbm [resolvable:$true] %s529_s27 }
  0x5d   : > { %s5187_s12 = sshra.s32 %s530_s27, 4  ;;  %s5188_s12 = int_to_ptr.hbm [resolvable:$true] %s5187_s12 }
  0x5e   : > { %s5189_s8 = scalar_lea.hbm %s5188_s12, 32  ;;  %p5195_p10 = scmp.lt.s32.totalorder %s5188_s12, %s5942_s0 }
  0x5f   : > { %p5190_p1 = scmp.ne.s32.totalorder %s5188_s12, %s5189_s8  ;;  %p5196_p11 = scmp.lt.s32.totalorder %s5194_s29, %s5189_s8 }
  0x61   : > { %p5192_p7 = pnand %p5190_p1, %p5041_p9  ;;  %p5197_p12 = por %p5196_p11, %p5195_p10 }
  0x63   : > { %p5193_p6 = pneg %p5192_p7 }
  0x65   : > { %p5198_p2 = pnand %p5197_p12, %p5193_p6 }
  0x67   : > { %5201 = shalt.err (!%p5198_p2)
}
  0x68   : > { %s5943_s16 = smov 16   ;;  %s5944_s1 = smov 256  }
  0x69   : > { %4824 = dma.hbm_to_vmem [thread:$0]  (!%p5525_p8), %s530_s27, 512, %s532_s14, %s520_s28, %s5944_s1, %s5944_s1, %s5943_s16  }
  0x6a   : > { %s3445_s18 = sshll.u32 %s5518_s3, 6  ;;  %s4505_s30 = sshll.u32 %s5333_s21, 6 }
  0x6b   : > { %s572_s5 = scalar_lea.hbm %s5885_s2, %s4505_s30  ;;  %s567_s8 = scalar_lea.vmem [#allocation8], %s3445_s18 }
  0x6c   : > { %s573_s12 = sshll.u32 %s572_s5, 4  ;;  %s575_s29 = sshll.u32 %s567_s8, 4  ;;  %s574_s12 = int_to_ptr.hbm [resolvable:$true] %s573_s12  ;;  %s576_s29 = int_to_ptr.vmem [resolvable:$true] %s575_s29 }
  0x6d   : > { %s5217_s10 = sshra.s32 %s574_s12, 4  ;;  %s5224_s14 = scalar_lea.hbm %s5885_s2, 128  ;;  %s5218_s10 = int_to_ptr.hbm [resolvable:$true] %s5217_s10 }
  0x6e   : > { %s5219_s0 = scalar_lea.hbm %s5218_s10, 64  ;;  %p5225_p6 = scmp.lt.s32.totalorder %s5218_s10, %s5885_s2 }
  0x6f   : > { %p5220_p4 = scmp.ne.s32.totalorder %s5218_s10, %s5219_s0  ;;  %p5226_p10 = scmp.lt.s32.totalorder %s5224_s14, %s5219_s0 }
  0x71   : > { %p5222_p1 = pnand %p5220_p4, %p5041_p9  ;;  %p5227_p11 = por %p5226_p10, %p5225_p6 }
  0x73   : > { %p5223_p7 = pneg %p5222_p1 }
  0x75   : > { %p5228_p12 = pnand %p5227_p11, %p5223_p7 }
  0x77   : > { %5231 = shalt.err (!%p5228_p12)
}
  0x78   : > { %4830 = dma.hbm_to_vmem [thread:$0]  (!%p5525_p8), %s574_s12, 1024, %s576_s29, %s5537_s13, %s5941_s24, %s5941_s24, %s5940_s22  }
  0x79   : > { %587 = sbr.rel (%p5462_p3) target bundleno = 2177 (0x881), region = 80  ;;  %s5622_s1 = sand.u32 (!%p5462_p3), 1, %s5325_s19  }
  0x7a   : > { %s3449_s0 = sshll.u32 (!%p5462_p3), %s5622_s1, 5  ;;  %s590_s18 = scalar_lea.sflag (!%p5462_p3), [#allocation4], %s5622_s1 }
  0x7b   : > { %s5628_s30 = scalar_lea.vmem (!%p5462_p3), [#allocation3], %s3449_s0 }
  0x7e   : > { %5292 = dma.done.wait (%p5508_p13), %s590_s18, 512  }
  0x7f   : > { %5294 = vsyncadd (%p5508_p13), %s590_s18, 4294966784  ;;  %s599_s13 = sand.u32 1, %s5457_s25   ;;  %s3450_s26 = sshll.u32 %s5622_s1, 4 }
  0x80   : > { %s600_s23 = scalar_lea.sflag [#allocation7], %s599_s13  ;;  %s5636_s22 = scalar_lea.vmem [#allocation6], %s3450_s26 }
  0x81   : > { %5296 = dma.done.wait (%p5508_p13), %s600_s23, 1280  }
  0x82   : > { %5298 = vsyncadd (%p5508_p13), %s600_s23, 4294966016  ;;  %s3451_s24 = sshll.u32 %s5622_s1, 6  ;;  %p5945_p3 = scmp.eq.s32.totalorder %s5457_s25, 0 }
  0x83   : > { %s5643_s17 = scalar_lea.vmem [#allocation8], %s3451_s24 }
  0x84   : > { %5300 = dma.done.wait (%p5945_p3), [#allocation10], 12384   ;;  %p5946_p8 = pmov %p5945_p3 }
  0x85   : > { %p5947_p9 = pmov %p5945_p3 }
  0x86   : > { %5302 = vsyncadd (%p5946_p8), [#allocation10], 4294954912 }
  0x87   : > { %5304 = dma.done.wait (%p5947_p9), [#allocation13], 4128   ;;  %p5948_p2 = pmov %p5945_p3 }
  0x89   : > { %5306 = vsyncadd (%p5948_p2), [#allocation13], 4294963168  ;;  %p5949_p4 = pmov %p5948_p2 }
  0x8a   : > { %p5950_p13 = pmov %p5948_p2 }
  0x8b   : > { %5308 = dma.done.wait (%p5949_p4), [#allocation16], 8224  }
  0x8c   : > { %5310 = vsyncadd (%p5950_p13), [#allocation16], 4294959072  ;;  %p5951_p1 = pmov %p5948_p2 }
  0x8e   : > { %5312 = dma.done.wait (%p5951_p1), [#allocation19], 8192   ;;  %p5952_p7 = pmov %p5951_p1 }
  0x8f   : > { %v3630_v0 = vld [vmem:[#allocation9 + $0x150] sm:$0xf]  ;;  %v4551_v1 = vld [vmem:[#allocation9 + $0x164] sm:$0xf0]  ;;  %v4548_v5 = vld [vmem:[#allocation9 + $0x154] sm:$0xf] }
  0x90   : > { %5314 = vsyncadd (%p5952_p7), [#allocation19], 4294959104  ;;  %v3822_v2 = vld [vmem:[#allocation9 + $0x2d0] sm:$0xf]  ;;  %v3631_v3 = vor.u32 %v4551_v1, %v3630_v0  ;;  %v4599_v4 = vld [vmem:[#allocation9 + $0x2e4] sm:$0xf0] }
  0x91   : > { %v3632_v6 = vld [vmem:[#allocation9 + $0x168] sm:$0xf0]  ;;  %v3823_v7 = vor.u32 %v4599_v4, %v3822_v2  ;;  %v4596_v9 = vld [vmem:[#allocation9 + $0x2d4] sm:$0xf]  ;;  %v3606_v11 = vld [vmem:[#allocation9 + $0x120] sm:$0xf] }
  0x92   : > { %v3635_v8 = vor.u32 %v4548_v5, %v3632_v6  ;;  %v3824_v10 = vld [vmem:[#allocation9 + $0x2e8] sm:$0xf0]  ;;  %1303 = vmatpush.bf16.msra.mxu0 %v3631_v3  ;;  %v4545_v13 = vld [vmem:[#allocation9 + $0x134] sm:$0xf0]  ;;  %v3798_v14 = vld [vmem:[#allocation9 + $0x2a0] sm:$0xf] }
  0x93   : > { %v3827_v12 = vor.u32 %v4596_v9, %v3824_v10  ;;  %v4593_v15 = vld [vmem:[#allocation9 + $0x2b4] sm:$0xf0]  ;;  %1317 = vmatpush.bf16.msra.mxu1 %v3823_v7  ;;  %v3607_v16 = vor.u32 %v4545_v13, %v3606_v11  ;;  %v4542_v18 = vld [vmem:[#allocation9 + $0x124] sm:$0xf]  ;;  %v3608_v19 = vld [vmem:[#allocation9 + $0x138] sm:$0xf0] }
  0x94   : > { %1331 = vmatpush.bf16.msra.mxu2 %v3635_v8  ;;  %v3799_v17 = vor.u32 %v4593_v15, %v3798_v14  ;;  %v4590_v20 = vld [vmem:[#allocation9 + $0x2a4] sm:$0xf]  ;;  %v3611_v21 = vor.u32 %v4542_v18, %v3608_v19  ;;  %v3800_v22 = vld [vmem:[#allocation9 + $0x2b8] sm:$0xf0]  ;;  %v3582_v23 = vld [vmem:[#allocation9 + $0xf0] sm:$0xf] }
  0x95   : > { %1345 = vmatpush.bf16.msra.mxu3 %v3827_v12  ;;  %v4539_v24 = vld [vmem:[#allocation9 + $0x104] sm:$0xf0]  ;;  %v3803_v25 = vor.u32 %v4590_v20, %v3800_v22  ;;  %v3774_v26 = vld [vmem:[#allocation9 + $0x270] sm:$0xf]  ;;  %v4536_v28 = vld [vmem:[#allocation9 + $0xf4] sm:$0xf] }
  0x96   : > { %v4587_v27 = vld [vmem:[#allocation9 + $0x284] sm:$0xf0]  ;;  %1304 = vmatpush.bf16.msra.mxu0 %v3607_v16  ;;  %v3583_v29 = vor.u32 %v4539_v24, %v3582_v23  ;;  %v3584_v30 = vld [vmem:[#allocation9 + $0x108] sm:$0xf0]  ;;  %v4584_v31 = vld [vmem:[#allocation9 + $0x274] sm:$0xf] }
  0x97   : > { %v3776_v32 = vld [vmem:[#allocation9 + $0x288] sm:$0xf0]  ;;  %1318 = vmatpush.bf16.msra.mxu1 %v3799_v17  ;;  %v3775_v33 = vor.u32 %v4587_v27, %v3774_v26  ;;  %v3587_v34 = vor.u32 %v4536_v28, %v3584_v30  ;;  %v3558_v35 = vld [vmem:[#allocation9 + $0xc0] sm:$0xf]  ;;  %v4533_v36 = vld [vmem:[#allocation9 + $0xd4] sm:$0xf0] }
  0x98   : > { %1332 = vmatpush.bf16.msra.mxu2 %v3611_v21  ;;  %v3750_v37 = vld [vmem:[#allocation9 + $0x240] sm:$0xf]  ;;  %v3779_v38 = vor.u32 %v4584_v31, %v3776_v32  ;;  %v4581_v39 = vld [vmem:[#allocation9 + $0x254] sm:$0xf0]  ;;  %v4530_v40 = vld [vmem:[#allocation9 + $0xc4] sm:$0xf]  ;;  %v3559_v44 = vor.u32 %v4533_v36, %v3558_v35 }
  0x99   : > { %1346 = vmatpush.bf16.msra.mxu3 %v3803_v25  ;;  %v3560_v41 = vld [vmem:[#allocation9 + $0xd8] sm:$0xf0]  ;;  %v4578_v42 = vld [vmem:[#allocation9 + $0x244] sm:$0xf]  ;;  %v3751_v45 = vor.u32 %v4581_v39, %v3750_v37  ;;  %v3534_v47 = vld [vmem:[#allocation9 + $0x90] sm:$0xf] }
  0x9a   : > { %v3752_v43 = vld [vmem:[#allocation9 + $0x258] sm:$0xf0]  ;;  %1305 = vmatpush.bf16.msra.mxu0 %v3583_v29  ;;  %v3563_v46 = vor.u32 %v4530_v40, %v3560_v41  ;;  %v4527_v48 = vld [vmem:[#allocation9 + $0xa4] sm:$0xf0]  ;;  %v3726_v49 = vld [vmem:[#allocation9 + $0x210] sm:$0xf] }
  0x9b   : > { %1319 = vmatpush.bf16.msra.mxu1 %v3775_v33  ;;  %v3755_v50 = vor.u32 %v4578_v42, %v3752_v43  ;;  %v4575_v51 = vld [vmem:[#allocation9 + $0x224] sm:$0xf0]  ;;  %v4524_v52 = vld [vmem:[#allocation9 + $0x94] sm:$0xf]  ;;  %v3536_v53 = vld [vmem:[#allocation9 + $0xa8] sm:$0xf0]  ;;  %v3535_v56 = vor.u32 %v4527_v48, %v3534_v47 }
  0x9c   : > { %1333 = vmatpush.bf16.msra.mxu2 %v3587_v34  ;;  %v4572_v54 = vld [vmem:[#allocation9 + $0x214] sm:$0xf]  ;;  %v3728_v55 = vld [vmem:[#allocation9 + $0x228] sm:$0xf0]  ;;  %v3727_v57 = vor.u32 %v4575_v51, %v3726_v49  ;;  %v3539_v58 = vor.u32 %v4524_v52, %v3536_v53  ;;  %v3510_v59 = vld [vmem:[#allocation9 + $0x60] sm:$0xf] }
  0x9d   : > { %1347 = vmatpush.bf16.msra.mxu3 %v3779_v38  ;;  %v4521_v60 = vld [vmem:[#allocation9 + $0x74] sm:$0xf0]  ;;  %v3702_v61 = vld [vmem:[#allocation9 + $0x1e0] sm:$0xf]  ;;  %v3731_v62 = vor.u32 %v4572_v54, %v3728_v55  ;;  %v4518_v0 = vld [vmem:[#allocation9 + $0x64] sm:$0xf] }
  0x9e   : > { %1306 = vmatpush.bf16.msra.mxu0 %v3559_v44  ;;  %v4569_v63 = vld [vmem:[#allocation9 + $0x1f4] sm:$0xf0]  ;;  %v3512_v1 = vld [vmem:[#allocation9 + $0x78] sm:$0xf0]  ;;  %v4566_v2 = vld [vmem:[#allocation9 + $0x1e4] sm:$0xf]  ;;  %v3511_v4 = vor.u32 %v4521_v60, %v3510_v59 }
  0x9f   : > { %1320 = vmatpush.bf16.msra.mxu1 %v3751_v45  ;;  %v3704_v3 = vld [vmem:[#allocation9 + $0x1f8] sm:$0xf0]  ;;  %v3703_v5 = vor.u32 %v4569_v63, %v3702_v61  ;;  %v3515_v6 = vor.u32 %v4518_v0, %v3512_v1  ;;  %v3486_v7 = vld [vmem:[#allocation9 + $0x30] sm:$0xf]  ;;  %v4515_v8 = vld [vmem:[#allocation9 + $0x44] sm:$0xf0] }
  0xa0   : > { %1334 = vmatpush.bf16.msra.mxu2 %v3563_v46  ;;  %v3678_v9 = vld [vmem:[#allocation9 + $0x1b0] sm:$0xf]  ;;  %v3707_v10 = vor.u32 %v4566_v2, %v3704_v3  ;;  %v4563_v11 = vld [vmem:[#allocation9 + $0x1c4] sm:$0xf0]  ;;  %v4512_v12 = vld [vmem:[#allocation9 + $0x34] sm:$0xf]  ;;  %v3487_v16 = vor.u32 %v4515_v8, %v3486_v7 }
  0xa1   : > { %1348 = vmatpush.bf16.msra.mxu3 %v3755_v50  ;;  %v3488_v13 = vld [vmem:[#allocation9 + $0x48] sm:$0xf0]  ;;  %v4560_v14 = vld [vmem:[#allocation9 + $0x1b4] sm:$0xf]  ;;  %v3462_v17 = vld [vmem:[#allocation9] sm:$0xf]  ;;  %v3679_v20 = vor.u32 %v4563_v11, %v3678_v9 }
  0xa2   : > { %1307 = vmatpush.bf16.msra.mxu0 %v3535_v56  ;;  %v3680_v15 = vld [vmem:[#allocation9 + $0x1c8] sm:$0xf0]  ;;  %v4509_v18 = vld [vmem:[#allocation9 + $0x14] sm:$0xf0]  ;;  %v3654_v19 = vld [vmem:[#allocation9 + $0x180] sm:$0xf]  ;;  %v3491_v21 = vor.u32 %v4512_v12, %v3488_v13 }
  0xa3   : > { %1321 = vmatpush.bf16.msra.mxu1 %v3727_v57  ;;  %v4557_v22 = vld [vmem:[#allocation9 + $0x194] sm:$0xf0]  ;;  %v4506_v23 = vld [vmem:[#allocation9 + $0x4] sm:$0xf]  ;;  %v3464_v24 = vld [vmem:[#allocation9 + $0x18] sm:$0xf0]  ;;  %v3683_v25 = vor.u32 %v4560_v14, %v3680_v15  ;;  %v3463_v32 = vor.u32 %v4509_v18, %v3462_v17 }
  0xa4   : > { %1335 = vmatpush.bf16.msra.mxu2 %v3539_v58  ;;  %v3638_v26 = vld [vmem:[#allocation9 + $0x158] sm:$0xf]  ;;  %v4552_v27 = vld [vmem:[#allocation9 + $0x16c] sm:$0xf0]  ;;  %v4549_v30 = vld [vmem:[#allocation9 + $0x15c] sm:$0xf]  ;;  %v3655_v36 = vor.u32 %v4557_v22, %v3654_v19  ;;  %v3467_v37 = vor.u32 %v4506_v23, %v3464_v24 }
  0xa5   : > { %1349 = vmatpush.bf16.msra.mxu3 %v3731_v62  ;;  %v3830_v28 = vld [vmem:[#allocation9 + $0x2d8] sm:$0xf]  ;;  %v4600_v29 = vld [vmem:[#allocation9 + $0x2ec] sm:$0xf0]  ;;  %v3640_v31 = vld [vmem:[#allocation9 + $0x170] sm:$0xf0]  ;;  %v3639_v41 = vor.u32 %v4552_v27, %v3638_v26 }
  0xa6   : > { %1308 = vmatpush.bf16.msra.mxu0 %v3511_v4  ;;  %v4554_v33 = vld [vmem:[#allocation9 + $0x184] sm:$0xf]  ;;  %v3656_v34 = vld [vmem:[#allocation9 + $0x198] sm:$0xf0]  ;;  %v3832_v38 = vld [vmem:[#allocation9 + $0x2f0] sm:$0xf0]  ;;  %v3831_v42 = vor.u32 %v4600_v29, %v3830_v28  ;;  %v3643_v46 = vor.u32 %v4549_v30, %v3640_v31 }
  0xa7   : > { %1322 = vmatpush.bf16.msra.mxu1 %v3703_v5  ;;  %v4597_v35 = vld [vmem:[#allocation9 + $0x2dc] sm:$0xf]  ;;  %v707_v39 = vld [vmem:[%s5628_s30] sm:$0xff]  ;;  %v709_v40 = vld [vmem:[%s5628_s30 + $0x10] sm:$0xff]  ;;  %v3659_v47 = vor.u32 %v4554_v33, %v3656_v34  ;;  %vm1482_vm0 = vcmask 523264   ;;  %s5348_s15 = smov 64  }
  0xa8   : > { %1336 = vmatpush.bf16.msra.mxu2 %v3515_v6  ;;  %v3614_v43 = vld [vmem:[#allocation9 + $0x128] sm:$0xf]  ;;  %v710_v45 = vld [vmem:[%s5628_s30 + $0x18] sm:$0xff]  ;;  %v4546_v48 = vld [vmem:[#allocation9 + $0x13c] sm:$0xf0]  ;;  %v3835_v51 = vor.u32 %v4597_v35, %v3832_v38  ;;  %v5665_v54 = vpack.c.bf16 %v709_v40, %v707_v39  ;;  %vm1505_vm2 = vcmask 130048  }
  0xa9   : > { %1350 = vmatpush.bf16.msra.mxu3 %v3707_v10  ;;  %v708_v44 = vld [vmem:[%s5628_s30 + $0x8] sm:$0xff]  ;;  %v4594_v50 = vld [vmem:[#allocation9 + $0x2bc] sm:$0xf0]  ;;  %v3616_v53 = vld [vmem:[#allocation9 + $0x140] sm:$0xf0]  ;;  %v3615_v58 = vor.u32 %v4546_v48, %v3614_v43  ;;  %vm1631_vm4 = vcmask 1048064  }
  0xaa   : > { %1309 = vmatpush.bf16.msra.mxu0 %v3487_v16  ;;  %v3806_v49 = vld [vmem:[#allocation9 + $0x2a8] sm:$0xf]  ;;  %v4543_v52 = vld [vmem:[#allocation9 + $0x12c] sm:$0xf]  ;;  %v3808_v56 = vld [vmem:[#allocation9 + $0x2c0] sm:$0xf0]  ;;  %v5667_v57 = vpack.c.bf16 %v710_v45, %v708_v44 }
  0xab   : > { %1323 = vmatpush.bf16.msra.mxu1 %v3679_v20  ;;  %v4591_v55 = vld [vmem:[#allocation9 + $0x2ac] sm:$0xf]  ;;  %v3807_v59 = vor.u32 %v4594_v50, %v3806_v49  ;;  %v3590_v60 = vld [vmem:[#allocation9 + $0xf8] sm:$0xf]  ;;  %v3619_v61 = vor.u32 %v4543_v52, %v3616_v53  ;;  %v4540_v62 = vld [vmem:[#allocation9 + $0x10c] sm:$0xf0] }
  0xac   : > { %1337 = vmatpush.bf16.msra.mxu2 %v3491_v21  ;;  %v3782_v63 = vld [vmem:[#allocation9 + $0x278] sm:$0xf]  ;;  %v4588_v0 = vld [vmem:[#allocation9 + $0x28c] sm:$0xf0]  ;;  %v3811_v1 = vor.u32 %v4591_v55, %v3808_v56  ;;  %v4537_v2 = vld [vmem:[#allocation9 + $0xfc] sm:$0xf]  ;;  %v3591_v6 = vor.u32 %v4540_v62, %v3590_v60 }
  0xad   : > { %1351 = vmatpush.bf16.msra.mxu3 %v3683_v25  ;;  %v3592_v3 = vld [vmem:[#allocation9 + $0x110] sm:$0xf0]  ;;  %v4585_v4 = vld [vmem:[#allocation9 + $0x27c] sm:$0xf]  ;;  %v3783_v7 = vor.u32 %v4588_v0, %v3782_v63  ;;  %v3566_v8 = vld [vmem:[#allocation9 + $0xc8] sm:$0xf] }
  0xae   : > { %1310 = vmatpush.bf16.msra.mxu0 %v3463_v32  ;;  %v3784_v5 = vld [vmem:[#allocation9 + $0x290] sm:$0xf0]  ;;  %v3595_v9 = vor.u32 %v4537_v2, %v3592_v3  ;;  %v4534_v10 = vld [vmem:[#allocation9 + $0xdc] sm:$0xf0]  ;;  %v3758_v11 = vld [vmem:[#allocation9 + $0x248] sm:$0xf] }
  0xaf   : > { %1324 = vmatpush.bf16.msra.mxu1 %v3655_v36  ;;  %v4582_v12 = vld [vmem:[#allocation9 + $0x25c] sm:$0xf0]  ;;  %v3787_v13 = vor.u32 %v4585_v4, %v3784_v5  ;;  %v4531_v14 = vld [vmem:[#allocation9 + $0xcc] sm:$0xf]  ;;  %v3568_v15 = vld [vmem:[#allocation9 + $0xe0] sm:$0xf0]  ;;  %v3567_v18 = vor.u32 %v4534_v10, %v3566_v8 }
  0xb0   : > { %1338 = vmatpush.bf16.msra.mxu2 %v3467_v37  ;;  %v4579_v16 = vld [vmem:[#allocation9 + $0x24c] sm:$0xf]  ;;  %v3760_v17 = vld [vmem:[#allocation9 + $0x260] sm:$0xf0]  ;;  %v3759_v19 = vor.u32 %v4582_v12, %v3758_v11  ;;  %v3542_v20 = vld [vmem:[#allocation9 + $0x98] sm:$0xf]  ;;  %v3571_v21 = vor.u32 %v4531_v14, %v3568_v15 }
  0xb1   : > { %1352 = vmatpush.bf16.msra.mxu3 %v3659_v47  ;;  %1311 = vmatmul.bf16.vlgmr.msra.gmra.mxu0 %v5665_v54  ;;  %v4528_v22 = vld [vmem:[#allocation9 + $0xac] sm:$0xf0]  ;;  %v3734_v23 = vld [vmem:[#allocation9 + $0x218] sm:$0xf]  ;;  %v3763_v25 = vor.u32 %v4579_v16, %v3760_v17  ;;  %v4525_v26 = vld [vmem:[#allocation9 + $0x9c] sm:$0xf] }
  0xb2   : > { %1359 = vmatpush.bf16.msrb.mxu0 %v3639_v41  ;;  %1325 = vmatmul.bf16.vlgmr.msra.gmra.mxu1 %v5667_v57  ;;  %v4576_v24 = vld [vmem:[#allocation9 + $0x22c] sm:$0xf0]  ;;  %v3544_v27 = vld [vmem:[#allocation9 + $0xb0] sm:$0xf0]  ;;  %v4573_v28 = vld [vmem:[#allocation9 + $0x21c] sm:$0xf]  ;;  %v3543_v30 = vor.u32 %v4528_v22, %v3542_v20 }
  0xb3   : > { %1373 = vmatpush.bf16.msrb.mxu1 %v3831_v42  ;;  %1339 = vmatmul.bf16.vlgmr.msra.gmra.mxu2 %v5665_v54  ;;  %v3736_v29 = vld [vmem:[#allocation9 + $0x230] sm:$0xf0]  ;;  %v3735_v31 = vor.u32 %v4576_v24, %v3734_v23  ;;  %v3518_v32 = vld [vmem:[#allocation9 + $0x68] sm:$0xf]  ;;  %v3547_v33 = vor.u32 %v4525_v26, %v3544_v27  ;;  %v4522_v34 = vld [vmem:[#allocation9 + $0x7c] sm:$0xf0] }
  0xb4   : > { %1387 = vmatpush.bf16.msrb.mxu2 %v3643_v46  ;;  %1353 = vmatmul.bf16.vlgmr.msra.gmra.mxu3 %v5667_v57  ;;  %v3710_v35 = vld [vmem:[#allocation9 + $0x1e8] sm:$0xf]  ;;  %v4570_v36 = vld [vmem:[#allocation9 + $0x1fc] sm:$0xf0]  ;;  %v3739_v37 = vor.u32 %v4573_v28, %v3736_v29  ;;  %v4519_v38 = vld [vmem:[#allocation9 + $0x6c] sm:$0xf]  ;;  %v3519_v42 = vor.u32 %v4522_v34, %v3518_v32 }
  0xb5   : > { %1401 = vmatpush.bf16.msrb.mxu3 %v3835_v51  ;;  %v3520_v39 = vld [vmem:[#allocation9 + $0x80] sm:$0xf0]  ;;  %v4567_v40 = vld [vmem:[#allocation9 + $0x1ec] sm:$0xf]  ;;  %v3711_v43 = vor.u32 %v4570_v36, %v3710_v35  ;;  %v3494_v44 = vld [vmem:[#allocation9 + $0x38] sm:$0xf] }
  0xb6   : > { %1360 = vmatpush.bf16.msrb.mxu0 %v3615_v58  ;;  %v3712_v41 = vld [vmem:[#allocation9 + $0x200] sm:$0xf0]  ;;  %v3523_v45 = vor.u32 %v4519_v38, %v3520_v39  ;;  %v4516_v46 = vld [vmem:[#allocation9 + $0x4c] sm:$0xf0]  ;;  %v3686_v47 = vld [vmem:[#allocation9 + $0x1b8] sm:$0xf] }
  0xb7   : > { %1374 = vmatpush.bf16.msrb.mxu1 %v3807_v59  ;;  %v4564_v48 = vld [vmem:[#allocation9 + $0x1cc] sm:$0xf0]  ;;  %v3715_v49 = vor.u32 %v4567_v40, %v3712_v41  ;;  %v4513_v50 = vld [vmem:[#allocation9 + $0x3c] sm:$0xf]  ;;  %v3496_v51 = vld [vmem:[#allocation9 + $0x50] sm:$0xf0]  ;;  %v3495_v55 = vor.u32 %v4516_v46, %v3494_v44 }
  0xb8   : > { %1388 = vmatpush.bf16.msrb.mxu2 %v3619_v61  ;;  %v4561_v52 = vld [vmem:[#allocation9 + $0x1bc] sm:$0xf]  ;;  %v3688_v53 = vld [vmem:[#allocation9 + $0x1d0] sm:$0xf0]  ;;  %v3687_v56 = vor.u32 %v4564_v48, %v3686_v47  ;;  %v3470_v58 = vld [vmem:[#allocation9 + $0x8] sm:$0xf]  ;;  %v3499_v59 = vor.u32 %v4513_v50, %v3496_v51 }
  0xb9   : > { %1402 = vmatpush.bf16.msrb.mxu3 %v3811_v1  ;;  %v4510_v60 = vld [vmem:[#allocation9 + $0x1c] sm:$0xf0]  ;;  %v3662_v61 = vld [vmem:[#allocation9 + $0x188] sm:$0xf]  ;;  %v3691_v63 = vor.u32 %v4561_v52, %v3688_v53  ;;  %v4507_v0 = vld [vmem:[#allocation9 + $0xc] sm:$0xf] }
  0xba   : > { %1361 = vmatpush.bf16.msrb.mxu0 %v3591_v6  ;;  %v4558_v62 = vld [vmem:[#allocation9 + $0x19c] sm:$0xf0]  ;;  %v3472_v1 = vld [vmem:[#allocation9 + $0x20] sm:$0xf0]  ;;  %v4555_v2 = vld [vmem:[#allocation9 + $0x18c] sm:$0xf]  ;;  %v3471_v4 = vor.u32 %v4510_v60, %v3470_v58 }
  0xbb   : > { %1375 = vmatpush.bf16.msrb.mxu1 %v3783_v7  ;;  %v3664_v3 = vld [vmem:[#allocation9 + $0x1a0] sm:$0xf0]  ;;  %v3663_v5 = vor.u32 %v4558_v62, %v3662_v61  ;;  %v3475_v6 = vor.u32 %v4507_v0, %v3472_v1  ;;  %v3646_v8 = vld [vmem:[#allocation9 + $0x160] sm:$0xf]  ;;  %v3622_v11 = vld [vmem:[#allocation9 + $0x130] sm:$0xf] }
  0xbc   : > { %1389 = vmatpush.bf16.msrb.mxu2 %v3595_v9  ;;  %v3667_v7 = vor.u32 %v4555_v2, %v3664_v3  ;;  %v4553_v9 = vld [vmem:[#allocation9 + $0x174] sm:$0xf0]  ;;  %v4547_v12 = vld [vmem:[#allocation9 + $0x144] sm:$0xf0]  ;;  %v3598_v14 = vld [vmem:[#allocation9 + $0x100] sm:$0xf] }
  0xbd   : > { %1403 = vmatpush.bf16.msrb.mxu3 %v3787_v13  ;;  %v3647_v10 = vor.u32 %v4553_v9, %v3646_v8  ;;  %v3623_v13 = vor.u32 %v4547_v12, %v3622_v11  ;;  %v4541_v15 = vld [vmem:[#allocation9 + $0x114] sm:$0xf0]  ;;  %v3574_v17 = vld [vmem:[#allocation9 + $0xd0] sm:$0xf]  ;;  %v3550_v20 = vld [vmem:[#allocation9 + $0xa0] sm:$0xf] }
  0xbe   : > { %1362 = vmatpush.bf16.msrb.mxu0 %v3567_v18  ;;  %v3599_v16 = vor.u32 %v4541_v15, %v3598_v14  ;;  %v4535_v18 = vld [vmem:[#allocation9 + $0xe4] sm:$0xf0]  ;;  %v3526_v23 = vld [vmem:[#allocation9 + $0x70] sm:$0xf]  ;;  %v3502_v26 = vld [vmem:[#allocation9 + $0x40] sm:$0xf] }
  0xbf   : > { %1376 = vmatpush.bf16.msrb.mxu1 %v3759_v19  ;;  %v3575_v19 = vor.u32 %v4535_v18, %v3574_v17  ;;  %v4523_v24 = vld [vmem:[#allocation9 + $0x84] sm:$0xf0]  ;;  %v4517_v27 = vld [vmem:[#allocation9 + $0x54] sm:$0xf0]  ;;  %v3478_v29 = vld [vmem:[#allocation9 + $0x10] sm:$0xf] }
  0xc0   : > { %1390 = vmatpush.bf16.msrb.mxu2 %v3571_v21  ;;  %v4529_v21 = vld [vmem:[#allocation9 + $0xb4] sm:$0xf0]  ;;  %v3503_v28 = vor.u32 %v4517_v27, %v3502_v26  ;;  %v4550_v48 = vld [vmem:[#allocation9 + $0x164] sm:$0xf]  ;;  %v3840_v53 = vld [vmem:[#allocation9 + $0x2f8] sm:$0xf0] }
  0xc1   : > { %1404 = vmatpush.bf16.msrb.mxu3 %v3763_v25  ;;  %v3551_v22 = vor.u32 %v4529_v21, %v3550_v20  ;;  %v3527_v25 = vor.u32 %v4523_v24, %v3526_v23  ;;  %v4598_v50 = vld [vmem:[#allocation9 + $0x2e4] sm:$0xf]  ;;  %v4592_v61 = vld [vmem:[#allocation9 + $0x2b4] sm:$0xf]  ;;  %v3816_v62 = vld [vmem:[#allocation9 + $0x2c8] sm:$0xf0] }
  0xc2   : > { %1363 = vmatpush.bf16.msrb.mxu0 %v3543_v30  ;;  %v4511_v30 = vld [vmem:[#allocation9 + $0x24] sm:$0xf0]  ;;  %v3843_v60 = vor.u32 %v4598_v50, %v3840_v53  ;;  %v4601_v2 = vld [vmem:[#allocation9 + $0x2f4] sm:$0xf0]  ;;  %v3600_v8 = vld [vmem:[#allocation9 + $0x118] sm:$0xf0] }
  0xc3   : > { %1377 = vmatpush.bf16.msrb.mxu1 %v3735_v31  ;;  %v3479_v31 = vor.u32 %v4511_v30, %v3478_v29  ;;  %v3814_v9 = vld [vmem:[#allocation9 + $0x2b0] sm:$0xf]  ;;  %v4586_v11 = vld [vmem:[#allocation9 + $0x284] sm:$0xf]  ;;  %v3792_v12 = vld [vmem:[#allocation9 + $0x298] sm:$0xf0] }
  0xc4   : > { %1391 = vmatpush.bf16.msrb.mxu2 %v3547_v33  ;;  %v4589_v20 = vld [vmem:[#allocation9 + $0x294] sm:$0xf0]  ;;  %v3795_v23 = vor.u32 %v4586_v11, %v3792_v12  ;;  %v4532_v24 = vld [vmem:[#allocation9 + $0xd4] sm:$0xf]  ;;  %v3694_v11 = vld [vmem:[#allocation9 + $0x1c0] sm:$0xf] }
  0xc5   : > { %1405 = vmatpush.bf16.msrb.mxu3 %v3739_v37  ;;  %v4565_v12 = vld [vmem:[#allocation9 + $0x1d4] sm:$0xf0]  ;;  %s5953_s29 = sld [smem:[#allocation39_spill]]  ;;  %s4762_s26 = sshll.u32 %s5457_s25, 5 }
  0xc6   : > { %1364 = vmatpush.bf16.msrb.mxu0 %v3519_v42  ;;  %v5690_v42 = vld [vmem:[#allocation11] sm:$0x3f]  ;;  %s5954_s3 = sld [smem:[#allocation40_spill]]  ;;  %s705_s23 = scalar_lea.vmem [#allocation20], %s3449_s0 }
  0xc7   : > { %1378 = vmatpush.bf16.msrb.mxu1 %v3711_v43  ;;  %v813_v43 = vperm.slane %v5690_v42, 2  ;;  %v811_v44 = vperm.slane %v5690_v42, 0  ;;  %v812_v26 = vperm.slane %v5690_v42, 1  ;;  %s5955_s16 = sld [smem:[#allocation41_spill]]  ;;  %s3243_s5 = sshll.u32 %s705_s23, 4  ;;  %s3244_s5 = int_to_ptr.vmem [resolvable:$true] %s3243_s5 }
  0xc8   : > { %1392 = vmatpush.bf16.msrb.mxu2 %v3523_v45  ;;  %v814_v45 = vperm.slane %v5690_v42, 3  ;;  %s5956_s13 = sld [smem:[#allocation42_spill]]  ;;  %s3231_s0 = scalar_lea.sflag [#allocation5], %s5622_s1 }
  0xc9   : > { %1406 = vmatpush.bf16.msrb.mxu3 %v3715_v49  ;;  %v3648_v49 = vld [vmem:[#allocation9 + $0x178] sm:$0xf0] }
  0xca   : > { %1365 = vmatpush.bf16.msrb.mxu0 %v3495_v55  ;;  %v3651_v52 = vor.u32 %v4550_v48, %v3648_v49  ;;  %v4544_v55 = vld [vmem:[#allocation9 + $0x134] sm:$0xf]  ;;  %v3552_v48 = vld [vmem:[#allocation9 + $0xb8] sm:$0xf0] }
  0xcb   : > { %1379 = vmatpush.bf16.msrb.mxu1 %v3687_v56  ;;  %v3624_v56 = vld [vmem:[#allocation9 + $0x148] sm:$0xf0] }
  0xcc   : > { %1393 = vmatpush.bf16.msrb.mxu2 %v3499_v59  ;;  %v3627_v1 = vor.u32 %v4544_v55, %v3624_v56 }
  0xcd   : > { %1407 = vmatpush.bf16.msrb.mxu3 %v3691_v63  ;;  %v3838_v63 = vld [vmem:[#allocation9 + $0x2e0] sm:$0xf] }
  0xce   : > { %1366 = vmatpush.bf16.msrb.mxu0 %v3471_v4 }
  0xcf   : > { %1380 = vmatpush.bf16.msrb.mxu1 %v3663_v5  ;;  %v3819_v5 = vor.u32 %v4592_v61, %v3816_v62 }
  0xd0   : > { %1394 = vmatpush.bf16.msrb.mxu2 %v3475_v6  ;;  %v3839_v6 = vor.u32 %v4601_v2, %v3838_v63  ;;  %v4568_v63 = vld [vmem:[#allocation9 + $0x1f4] sm:$0xf] }
  0xd1   : > { %1408 = vmatpush.bf16.msrb.mxu3 %v3667_v7  ;;  %1367 = vmatmul.bf16.vlgmr.msrb.gmra.mxu0 %v5665_v54  ;;  %v4538_v7 = vld [vmem:[#allocation9 + $0x104] sm:$0xf] }
  0xd2   : > { %1381 = vmatmul.bf16.vlgmr.msrb.gmra.mxu1 %v5667_v57  ;;  %1415 = vmatpush.bf16.msra.mxu0 %v3647_v10  ;;  %v3603_v18 = vor.u32 %v4538_v7, %v3600_v8 }
  0xd3   : > { %1395 = vmatmul.bf16.vlgmr.msrb.gmra.mxu2 %v5665_v54  ;;  %1429 = vmatpush.bf16.msra.mxu1 %v3839_v6  ;;  %v3504_v6 = vld [vmem:[#allocation9 + $0x58] sm:$0xf0] }
  0xd4   : > { %1409 = vmatmul.bf16.vlgmr.msrb.gmra.mxu3 %v5667_v57  ;;  %1443 = vmatpush.bf16.msra.mxu2 %v3651_v52  ;;  %v3744_v52 = vld [vmem:[#allocation9 + $0x238] sm:$0xf0] }
  0xd5   : > { %1457 = vmatpush.bf16.msra.mxu3 %v3843_v60 }
  0xd6   : > { %1416 = vmatpush.bf16.msra.mxu0 %v3623_v13  ;;  %v4595_v13 = vld [vmem:[#allocation9 + $0x2c4] sm:$0xf0] }
  0xd7   : > { %v3815_v17 = vor.u32 %v4595_v13, %v3814_v9  ;;  %v3696_v9 = vld [vmem:[#allocation9 + $0x1d8] sm:$0xf0]  ;;  %v4508_v13 = vld [vmem:[#allocation9 + $0x14] sm:$0xf] }
  0xd8   : > { %1444 = vmatpush.bf16.msra.mxu2 %v3627_v1 }
  0xd9   : > { %1458 = vmatpush.bf16.msra.mxu3 %v3819_v5  ;;  %1430 = vmatpush.bf16.msra.mxu1 %v3815_v17  ;;  %v4514_v5 = vld [vmem:[#allocation9 + $0x44] sm:$0xf]  ;;  %v3672_v17 = vld [vmem:[#allocation9 + $0x1a8] sm:$0xf0] }
  0xda   : > { %1417 = vmatpush.bf16.msra.mxu0 %v3599_v16 }
  0xdc   : > { %1445 = vmatpush.bf16.msra.mxu2 %v3603_v18  ;;  %v3695_v18 = vor.u32 %v4565_v12, %v3694_v11 }
  0xdd   : > { %1459 = vmatpush.bf16.msra.mxu3 %v3795_v23 }
  0xde   : > { %1418 = vmatpush.bf16.msra.mxu0 %v3575_v19  ;;  %v3790_v19 = vld [vmem:[#allocation9 + $0x280] sm:$0xf] }
  0xe2   : > { %1419 = vmatpush.bf16.msra.mxu0 %v3551_v22 }
  0xe6   : > { %1420 = vmatpush.bf16.msra.mxu0 %v3527_v25  ;;  %v3576_v25 = vld [vmem:[#allocation9 + $0xe8] sm:$0xf0] }
  0xea   : > { %1421 = vmatpush.bf16.msra.mxu0 %v3503_v28 }
  0xee   : > { %1422 = vmatpush.bf16.msra.mxu0 %v3479_v31 }
  0xf1   : > { %1423 = vmatmul.bf16.vlgmr.msra.gmra.mxu0 %v5665_v54 }
 0x12e   : > { %v1312_v32 = vpop.f32.mrf.mxu0 }
 0x12f   : > { %v5678_v33 = vpop.f32.mrf.mxu1  ;;  %v1313_v14 = vadd.f32 %v1312_v32, %v811_v44  ;;  %v4580_v32 = vld [vmem:[#allocation9 + $0x254] sm:$0xf] }
 0x131   : > { %v1327_v29 = vadd.f32 %v5678_v33, %v1313_v14  ;;  %v3480_v14 = vld [vmem:[#allocation9 + $0x28] sm:$0xf0] }
 0x136   : > { %v5680_v34 = vpop.f32.mrf.mxu2  ;;  %v1314_v36 = vpop.f32.mrf.mxu0 }
 0x137   : > { %v5682_v35 = vpop.f32.mrf.mxu3  ;;  %v5684_v37 = vpop.f32.mrf.mxu1  ;;  %v1315_v15 = vadd.f32 %v1314_v36, %v811_v44  ;;  %v3768_v36 = vld [vmem:[#allocation9 + $0x268] sm:$0xf0]  ;;  %v3766_v44 = vld [vmem:[#allocation9 + $0x250] sm:$0xf] }
 0x138   : > { %v3771_v50 = vor.u32 %v4580_v32, %v3768_v36 }
 0x139   : > { %v1329_v30 = vadd.f32 %v5684_v37, %v1315_v15 }
 0x13a   : > { %1460 = vmatpush.bf16.msra.mxu3 %v3771_v50 }
 0x13b   : > { %v1477_v37 = vpack.c.bf16 %v1329_v30, %v1327_v29  ;;  %v815_v30 = vperm.slane %v5690_v42, 4 }
 0x13e   : > { %v5686_v38 = vpop.f32.mrf.mxu2 }
 0x13f   : > { %v5688_v39 = vpop.f32.mrf.mxu3  ;;  %v1343_v49 = vadd.f32 %v5686_v38, %v812_v26  ;;  %v3528_v38 = vld [vmem:[#allocation9 + $0x88] sm:$0xf0] }
 0x141   : > { %v1357_v61 = vadd.f32 %v5688_v39, %v1343_v49 }
 0x14e   : > { %v1368_v40 = vpop.f32.mrf.mxu0 }
 0x14f   : > { %v1382_v41 = vpop.f32.mrf.mxu1  ;;  %v1369_v46 = vadd.f32 %v1368_v40, %v813_v43  ;;  %v3791_v40 = vor.u32 %v4589_v20, %v3790_v19  ;;  %v3483_v19 = vor.u32 %v4508_v13, %v3480_v14  ;;  %v3670_v20 = vld [vmem:[#allocation9 + $0x190] sm:$0xf]  ;;  %v3855_v14 = vld [vmem:[%s5643_s17 + $0x38] sm:$0xff] }
 0x151   : > { %v1383_v3 = vadd.f32 %v1382_v41, %v1369_v46  ;;  %v4583_v46 = vld [vmem:[#allocation9 + $0x264] sm:$0xf0]  ;;  %1431 = vmatpush.bf16.msra.mxu1 %v3791_v40  ;;  %v816_v40 = vperm.slane %v5690_v42, 5  ;;  %v1471_v42 = vld [vmem:[%s5636_s22] sm:$0xff] }
 0x152   : > { %v3767_v53 = vor.u32 %v4583_v46, %v3766_v44  ;;  %vm1473_vm1 = vcmp.ne.s32.totalorder %v1471_v42, 0 }
 0x155   : > { %1432 = vmatpush.bf16.msra.mxu1 %v3767_v53  ;;  %v3846_v53 = vld [vmem:[%s5643_s17 + $0x10] sm:$0xff] }
 0x156   : > { %v1396_v47 = vpop.f32.mrf.mxu2  ;;  %v1370_v51 = vpop.f32.mrf.mxu0 }
 0x157   : > { %v1371_v58 = vadd.f32 %v1370_v51, %v813_v43  ;;  %v1410_v59 = vpop.f32.mrf.mxu3  ;;  %v1384_v0 = vpop.f32.mrf.mxu1  ;;  %v1397_v10 = vadd.f32 %v1396_v47, %v814_v45  ;;  %v3579_v43 = vor.u32 %v4532_v24, %v3576_v25  ;;  %v4526_v47 = vld [vmem:[#allocation9 + $0xa4] sm:$0xf] }
 0x158   : > { %v4574_v51 = vld [vmem:[#allocation9 + $0x224] sm:$0xf]  ;;  %v3555_v56 = vor.u32 %v4526_v47, %v3552_v48 }
 0x159   : > { %v1385_v4 = vadd.f32 %v1384_v0, %v1371_v58  ;;  %v1411_v27 = vadd.f32 %v1410_v59, %v1397_v10  ;;  %1446 = vmatpush.bf16.msra.mxu2 %v3579_v43  ;;  %v3742_v58 = vld [vmem:[#allocation9 + $0x220] sm:$0xf]  ;;  %v4577_v59 = vld [vmem:[#allocation9 + $0x234] sm:$0xf0]  ;;  %v3747_v62 = vor.u32 %v4574_v51, %v3744_v52  ;;  %v3720_v0 = vld [vmem:[#allocation9 + $0x208] sm:$0xf0]  ;;  %v3507_v10 = vor.u32 %v4514_v5, %v3504_v6 }
 0x15a   : > { %v3743_v1 = vor.u32 %v4577_v59, %v3742_v58  ;;  %v3723_v8 = vor.u32 %v4568_v63, %v3720_v0  ;;  %v5349_v58 = vmov 0.0   ;;  %v3854_v6 = vld [vmem:[%s5643_s17 + $0x30] sm:$0xff] }
 0x15b   : > { %v1478_v16 = vpack.c.bf16 %v1385_v4, %v1383_v3  ;;  %v3718_v3 = vld [vmem:[#allocation9 + $0x1f0] sm:$0xf]  ;;  %v4571_v4 = vld [vmem:[#allocation9 + $0x204] sm:$0xf0]  ;;  %1461 = vmatpush.bf16.msra.mxu3 %v3747_v62  ;;  %v1475_v59 = vsel %vm1473_vm1, -1e+30, %v5349_v58 }
 0x15c   : > { %1433 = vmatpush.bf16.msra.mxu1 %v3743_v1  ;;  %v3719_v39 = vor.u32 %v4571_v4, %v3718_v3  ;;  %v3847_v62 = vld [vmem:[%s5643_s17 + $0x18] sm:$0xff]  ;;  %v1480_v1 = vld [vmem:[%s5643_s17] sm:$0xff] }
 0x15d   : > { %1555 = vrot.lane.b32.xlu0 %v1478_v16, %s5348_s15  ;;  %v1487_v22 = vsel %vm1482_vm0, %v1478_v16, 0  ;;  %1447 = vmatpush.bf16.msra.mxu2 %v3555_v56  ;;  %v4556_v16 = vld [vmem:[#allocation9 + $0x194] sm:$0xf] }
 0x15e   : > { %v1398_v21 = vpop.f32.mrf.mxu2  ;;  %1496 = vmatpush.bf16.xpose.msrb.mxu0 %v1487_v22  ;;  %v3675_v22 = vor.u32 %v4556_v16, %v3672_v17 }
 0x15f   : > { %v1399_v28 = vadd.f32 %v1398_v21, %v814_v45  ;;  %v1412_v31 = vpop.f32.mrf.mxu3  ;;  %v1341_v45 = vadd.f32 %v5680_v34, %v812_v26  ;;  %v4520_v34 = vld [vmem:[#allocation9 + $0x74] sm:$0xf]  ;;  %1462 = vmatpush.bf16.msra.mxu3 %v3723_v8  ;;  %v4559_v21 = vld [vmem:[#allocation9 + $0x1a4] sm:$0xf0] }
 0x160   : > { %v3531_v2 = vor.u32 %v4520_v34, %v3528_v38  ;;  %1434 = vmatpush.bf16.msra.mxu1 %v3719_v39  ;;  %v3671_v23 = vor.u32 %v4559_v21, %v3670_v20  ;;  %v1472_v38 = vld [vmem:[%s5636_s22 + $0x8] sm:$0xff] }
 0x161   : > { %v1413_v41 = vadd.f32 %v1412_v31, %v1399_v28  ;;  %v1355_v60 = vadd.f32 %v5682_v35, %v1341_v45  ;;  %v4562_v35 = vld [vmem:[#allocation9 + $0x1c4] sm:$0xf]  ;;  %vm1474_vm3 = vcmp.ne.s32.totalorder %v1472_v38, 0  ;;  %v1481_v39 = vld [vmem:[%s5643_s17 + $0x8] sm:$0xff] }
 0x162   : > { %1448 = vmatpush.bf16.msra.mxu2 %v3531_v2  ;;  %v3699_v15 = vor.u32 %v4562_v35, %v3696_v9  ;;  %v1476_v2 = vsel %vm1474_vm3, -1e+30, %v5349_v58 }
 0x163   : > { %v1635_v33 = vpack.c.bf16 %v1413_v41, %v1411_v27  ;;  %v1634_v7 = vpack.c.bf16 %v1357_v61, %v1355_v60 }
 0x164   : > { %1463 = vmatpush.bf16.msra.mxu3 %v3699_v15  ;;  %1435 = vmatpush.bf16.msra.mxu1 %v3695_v18  ;;  %v3850_v18 = vld [vmem:[%s5643_s17 + $0x20] sm:$0xff] }
 0x165   : > { %1711 = vrot.lane.b32.xlu1 %v1635_v33, %s5348_s15  ;;  %v1644_v55 = vsel %vm1482_vm0, %v1635_v33, 0  ;;  %1552 = vrot.lane.b32.xlu0 %v1477_v37, %s5348_s15 }
 0x166   : > { %3844 = vmatmul.msk.bf16.vlgmr.msrb.gmra.mxu0 %vm1482_vm0, %v1477_v37  ;;  %1449 = vmatpush.bf16.msra.mxu2 %v3507_v10 }
 0x167   : > { %1653 = vmatpush.bf16.xpose.msra.mxu0 %v1644_v55 }
 0x168   : > { %1464 = vmatpush.bf16.msra.mxu3 %v3675_v22  ;;  %1436 = vmatpush.bf16.msra.mxu1 %v3671_v23 }
 0x16a   : > { %1450 = vmatpush.bf16.msra.mxu2 %v3483_v19 }
 0x16b   : > { %1465 = vmatmul.bf16.vlgmr.msra.gmra.mxu3 %v5667_v57  ;;  %1437 = vmatmul.bf16.vlgmr.msra.gmra.mxu1 %v5667_v57 }
 0x16d   : > { %1708 = vrot.lane.b32.xlu1 %v1634_v7, %s5348_s15  ;;  %1451 = vmatmul.bf16.vlgmr.msra.gmra.mxu2 %v5665_v54 }
 0x16e   : > { %v1424_v54 = vpop.f32.mrf.mxu0 }
 0x16f   : > { %v1425_v32 = vadd.f32 %v1424_v54, %v815_v30 }
 0x176   : > { %3852 = vmatmul.msk.bf16.vlgmr.msra.gmra.mxu0 %vm1482_vm0, %v1634_v7  ;;  %v1426_v36 = vpop.f32.mrf.mxu0 }
 0x177   : > { %v1427_v41 = vadd.f32 %v1426_v36, %v815_v30 }
 0x1cf   : > { %v1556_v24 = vpop.permute.xlu0 %1555 }
 0x1d0   : > { %v1561_v25 = vsel %vm1482_vm0, %v1556_v24, 0 }
 0x1d1   : > { %1570 = vmatpush.bf16.xpose.msrb.mxu2 %v1561_v25 }
 0x1d7   : > { %v1712_v26 = vpop.permute.xlu1 %1711  ;;  %v1553_v28 = vpop.permute.xlu0 %1552 }
 0x1d8   : > { %v1717_v27 = vsel %vm1482_vm0, %v1712_v26, 0  ;;  %3848 = vmatmul.msk.bf16.vlgmr.msrb.gmra.mxu2 %vm1482_vm0, %v1553_v28 }
 0x1d9   : > { %1726 = vmatpush.bf16.xpose.msra.mxu2 %v1717_v27 }
 0x1df   : > { %v1709_v29 = vpop.permute.xlu1 %1708 }
 0x1e3   : > { %v1498_v61 = vpop.f32.mrf.mxu0 }
 0x1e4   : > { %v1499_v4 = vadd.f32 %v1498_v61, %v1480_v1 }
 0x1e6   : > { %v1503_v9 = vadd.f32 %v1499_v4, %v1475_v59 }
 0x1e8   : > { %3856 = vmatmul.msk.bf16.vlgmr.msra.gmra.mxu2 %vm1482_vm0, %v1709_v29  ;;  %v1438_v31 = vpop.f32.mrf.mxu1  ;;  %v1506_v13 = vsel %vm1505_vm2, %v1503_v9, -inf }
 0x1e9   : > { %v1439_v44 = vadd.f32 %v1438_v31, %v1425_v32 }
 0x1eb   : > { %v1500_v7 = vpop.f32.mrf.mxu0 }
 0x1ec   : > { %v1501_v11 = vadd.f32 %v1500_v7, %v1481_v39 }
 0x1ee   : > { %v1466_v43 = vpop.f32.mrf.mxu3  ;;  %v1504_v17 = vadd.f32 %v1501_v11, %v1476_v2 }
 0x1f0   : > { %v1452_v57 = vpop.f32.mrf.mxu2  ;;  %v1440_v47 = vpop.f32.mrf.mxu1  ;;  %v1509_v23 = vsel %vm1505_vm2, %v1504_v17, -inf }
 0x1f1   : > { %v1453_v46 = vadd.f32 %v1452_v57, %v816_v40  ;;  %v1441_v48 = vadd.f32 %v1440_v47, %v1427_v41 }
 0x1f3   : > { %v1479_v49 = vpack.c.bf16 %v1441_v48, %v1439_v44  ;;  %v1467_v33 = vadd.f32 %v1466_v43, %v1453_v46  ;;  %v1655_v19 = vpop.f32.mrf.mxu0 }
 0x1f4   : > { %v1656_v21 = vadd.f32 %v3850_v18, %v1655_v19 }
 0x1f5   : > { %1539 = vmatpush.bf16.msrb.mxu1 %v1479_v49 }
 0x1f6   : > { %v1468_v37 = vpop.f32.mrf.mxu3  ;;  %v1660_v24 = vadd.f32 %v1656_v21, %v1475_v59 }
 0x1f8   : > { %v1454_v45 = vpop.f32.mrf.mxu2  ;;  %v1662_v25 = vsel %vm1505_vm2, %v1660_v24, -inf }
 0x1f9   : > { %v1455_v50 = vadd.f32 %v1454_v45, %v816_v40  ;;  %v3851_v40 = vld [vmem:[%s5643_s17 + $0x28] sm:$0xff]  ;;  %s5957_s17 = sld [smem:[#allocation43_spill]] }
 0x1fb   : > { %v1469_v51 = vadd.f32 %v1468_v37, %v1455_v50  ;;  %v1657_v41 = vpop.f32.mrf.mxu0 }
 0x1fc   : > { %v1658_v47 = vadd.f32 %v3851_v40, %v1657_v41  ;;  %v3916_v41 = vld [vmem:[#allocation12 + $0x70] sm:$0xf] }
 0x1fd   : > { %v5719_v52 = vpack.c.bf16 %v1469_v51, %v1467_v33 }
 0x1fe   : > { %v1661_v33 = vadd.f32 %v1658_v47, %v1476_v2  ;;  %v3918_v47 = vld [vmem:[#allocation12 + $0x78] sm:$0xf0] }
 0x1ff   : > { %1695 = vmatpush.bf16.msra.mxu1 %v5719_v52  ;;  %s5267_s27 = scalar_lea.hbm %s5957_s17, 64 }
 0x200   : > { %v1665_v58 = vsel %vm1505_vm2, %v1661_v33, -inf }
 0x25b   : > { %v1572_v55 = vpop.f32.mrf.mxu2 }
 0x25c   : > { %v1573_v56 = vadd.f32 %v3846_v53, %v1572_v55 }
 0x25e   : > { %v1577_v34 = vadd.f32 %v1573_v56, %v1475_v59 }
 0x260   : > { %v1579_v60 = vsel %vm1505_vm2, %v1577_v34, -inf }
 0x261   : > { %1580 = vmax.xlane.f32.xlu2 %v1579_v60 }
 0x263   : > { %v1574_v63 = vpop.f32.mrf.mxu2 }
 0x264   : > { %v1575_v0 = vadd.f32 %v3847_v62, %v1574_v63 }
 0x266   : > { %v1578_v3 = vadd.f32 %v1575_v0, %v1476_v2 }
 0x268   : > { %v1582_v5 = vsel %vm1505_vm2, %v1578_v3, -inf }
 0x269   : > { %1583 = vmax.xlane.f32.xlu2 %v1582_v5 }
 0x26b   : > { %v1728_v8 = vpop.f32.mrf.mxu2 }
 0x26c   : > { %v1729_v35 = vadd.f32 %v3854_v6, %v1728_v8 }
 0x26e   : > { %v1733_v10 = vadd.f32 %v1729_v35, %v1475_v59 }
 0x270   : > { %v1735_v12 = vsel %vm1505_vm2, %v1733_v10, -inf }
 0x271   : > { %1736 = vmax.xlane.f32.xlu0 %v1735_v12  ;;  %1507 = vmax.xlane.f32.xlu2 %v1506_v13 }
 0x273   : > { %v1730_v15 = vpop.f32.mrf.mxu2 }
 0x274   : > { %v1731_v16 = vadd.f32 %v3855_v14, %v1730_v15 }
 0x276   : > { %v1734_v20 = vadd.f32 %v1731_v16, %v1476_v2 }
 0x278   : > { %v1738_v22 = vsel %vm1505_vm2, %v1734_v20, -inf }
 0x279   : > { %1739 = vmax.xlane.f32.xlu1 %v1738_v22  ;;  %1510 = vmax.xlane.f32.xlu2 %v1509_v23 }
 0x281   : > { %1663 = vmax.xlane.f32.xlu2 %v1662_v25 }
 0x285   : > { %1603 = vrot.lane.b32.xlu0 %v1479_v49, %s5348_s15 }
 0x2d4   : > { %v1581_v26 = vpop.xlane.xlu2 %1580 }
 0x2d5   : > { %v1585_v27 = vsub.f32 %v1577_v34, %v1581_v26 }
 0x2d7   : > { %v1587_v28 = vmul.f32 1.442695, %v1585_v27 }
 0x2d9   : > { %4901 = vpow2.f32 %v1587_v28 }
 0x2dc   : > { %v1584_v29 = vpop.xlane.xlu2 %1583 }
 0x2dd   : > { %v1586_v54 = vsub.f32 %v1578_v3, %v1584_v29 }
 0x2df   : > { %v4902_v30 = vpop.eup %4901  ;;  %v1589_v31 = vmul.f32 1.442695, %v1586_v54 }
 0x2e0   : > { %v1591_v32 = vsel %vm1505_vm2, %v4902_v30, 0.0 }
 0x2e1   : > { %4903 = vpow2.f32 %v1589_v31  ;;  %1592 = vadd.xlane.f32.xlu2 %v1591_v32 }
 0x2e4   : > { %v1737_v57 = vpop.xlane.xlu0 %1736  ;;  %v1508_v36 = vpop.xlane.xlu2 %1507 }
 0x2e5   : > { %v1741_v43 = vsub.f32 %v1733_v10, %v1737_v57  ;;  %v1512_v42 = vsub.f32 %v1503_v9, %v1508_v36 }
 0x2e7   : > { %v4904_v44 = vpop.eup %4903  ;;  %v1743_v46 = vmul.f32 1.442695, %v1741_v43  ;;  %v1514_v59 = vmul.f32 1.442695, %v1512_v42  ;;  %v4617_v43 = vld [vmem:[#allocation12 + $0x74] sm:$0xf0] }
 0x2e8   : > { %v1594_v48 = vsel %vm1505_vm2, %v4904_v44, 0.0 }
 0x2e9   : > { %4905 = vpow2.f32 %v1743_v46  ;;  %1595 = vadd.xlane.f32.xlu2 %v1594_v48  ;;  %v3917_v46 = vor.u32 %v4617_v43, %v3916_v41  ;;  %v3908_v48 = vld [vmem:[#allocation12 + $0x60] sm:$0xf]  ;;  %v3974_v41 = vld [vmem:[#allocation12 + $0xe8] sm:$0xf0] }
 0x2eb   : > { %1993 = vmatpush.bf16.msrb.mxu0 %v3917_v46  ;;  %v3964_v46 = vld [vmem:[#allocation12 + $0xd0] sm:$0xf] }
 0x2ec   : > { %v1740_v45 = vpop.xlane.xlu1 %1739  ;;  %v1511_v49 = vpop.xlane.xlu2 %1510 }
 0x2ed   : > { %v1742_v50 = vsub.f32 %v1734_v20, %v1740_v45  ;;  %v1513_v37 = vsub.f32 %v1504_v17, %v1511_v49  ;;  %v4615_v45 = vld [vmem:[#allocation12 + $0x64] sm:$0xf0] }
 0x2ef   : > { %v4906_v51 = vpop.eup %4905  ;;  %v1745_v53 = vmul.f32 1.442695, %v1742_v50  ;;  %v1516_v55 = vmul.f32 1.442695, %v1513_v37  ;;  %v4614_v50 = vld [vmem:[#allocation12 + $0x64] sm:$0xf] }
 0x2f0   : > { %v1747_v56 = vsel %vm1505_vm2, %v4906_v51, 0.0  ;;  %v3910_v37 = vld [vmem:[#allocation12 + $0x68] sm:$0xf0] }
 0x2f1   : > { %4907 = vpow2.f32 %v1745_v53  ;;  %1748 = vadd.xlane.f32.xlu1 %v1747_v56  ;;  %1666 = vmax.xlane.f32.xlu2 %v1665_v58  ;;  %v3913_v42 = vor.u32 %v4614_v50, %v3910_v37  ;;  %v4626_v50 = vld [vmem:[#allocation12 + $0xc4] sm:$0xf]  ;;  %v3958_v37 = vld [vmem:[#allocation12 + $0xc8] sm:$0xf0] }
 0x2f2   : > { %4909 = vpow2.f32 %v1516_v55 }
 0x2f3   : > { %4911 = vpow2.f32 %v1514_v59 }
 0x2f4   : > { %v1664_v34 = vpop.xlane.xlu2 %1663 }
 0x2f5   : > { %v1668_v60 = vsub.f32 %v1660_v24, %v1664_v34  ;;  %v3900_v34 = vld [vmem:[#allocation12 + $0x50] sm:$0xf] }
 0x2f7   : > { %v4908_v38 = vpop.eup %4907  ;;  %v1604_v61 = vpop.permute.xlu0 %1603  ;;  %v1670_v1 = vmul.f32 1.442695, %v1668_v60  ;;  %v4612_v60 = vld [vmem:[#allocation12 + $0x54] sm:$0xf] }
 0x2f8   : > { %v4910_v62 = vpop.eup %4909  ;;  %v1750_v63 = vsel %vm1505_vm2, %v4908_v38, 0.0  ;;  %1616 = vmatpush.bf16.msrb.mxu3 %v1604_v61 }
 0x2f9   : > { %1751 = vadd.xlane.f32.xlu2 %v1750_v63  ;;  %v1521_v0 = vsel %vm1505_vm2, %v4910_v62, 0.0  ;;  %v4912_v2 = vpop.eup %4911  ;;  %4913 = vpow2.f32 %v1670_v1  ;;  %v3892_v63 = vld [vmem:[#allocation12 + $0x40] sm:$0xf] }
 0x2fa   : > { %1522 = vadd.xlane.f32.xlu0 %v1521_v0  ;;  %v1518_v3 = vsel %vm1505_vm2, %v4912_v2, 0.0  ;;  %v4611_v0 = vld [vmem:[#allocation12 + $0x44] sm:$0xf0] }
 0x2ff   : > { %v4914_v4 = vpop.eup %4913 }
 0x300   : > { %v1674_v5 = vsel %vm1505_vm2, %v4914_v4, 0.0 }
 0x301   : > { %1519 = vadd.xlane.f32.xlu2 %v1518_v3  ;;  %v3894_v3 = vld [vmem:[#allocation12 + $0x48] sm:$0xf0] }
 0x309   : > { %1675 = vadd.xlane.f32.xlu2 %v1674_v5 }
 0x30a   : > { %1759 = vrot.lane.b32.xlu1 %v5719_v52, %s5348_s15 }
 0x354   : > { %v1593_v6 = vpop.xlane.xlu2 %1592 }
 0x355   : > { %4915 = vrcp.f32 %v1593_v6  ;;  %v3884_v6 = vld [vmem:[#allocation12 + $0x30] sm:$0xf] }
 0x35b   : > { %v4916_v8 = vpop.eup %4915 }
 0x35c   : > { %v1596_v7 = vpop.xlane.xlu2 %1595  ;;  %v1599_v9 = vmul.f32 %v4916_v8, %v4902_v30  ;;  %v4608_v8 = vld [vmem:[#allocation12 + $0x34] sm:$0xf] }
 0x35d   : > { %4917 = vrcp.f32 %v1596_v7  ;;  %v4609_v7 = vld [vmem:[#allocation12 + $0x34] sm:$0xf0] }
 0x363   : > { %v4918_v35 = vpop.eup %4917 }
 0x364   : > { %v1600_v39 = vmul.f32 %v4918_v35, %v4904_v44  ;;  %v1667_v10 = vpop.xlane.xlu2 %1666  ;;  %v1749_v16 = vpop.xlane.xlu1 %1748  ;;  %v4616_v44 = vld [vmem:[#allocation12 + $0x74] sm:$0xf]  ;;  %v3886_v35 = vld [vmem:[#allocation12 + $0x38] sm:$0xf0] }
 0x365   : > { %v1669_v11 = vsub.f32 %v1661_v33, %v1667_v10  ;;  %v3921_v33 = vor.u32 %v4616_v44, %v3918_v47  ;;  %v3876_v10 = vld [vmem:[#allocation12 + $0x20] sm:$0xf]  ;;  %v4629_v47 = vld [vmem:[#allocation12 + $0xd4] sm:$0xf0] }
 0x366   : > { %v1601_v12 = vpack.c.bf16 %v1600_v39, %v1599_v9  ;;  %v3885_v9 = vor.u32 %v4609_v7, %v3884_v6  ;;  %v3889_v39 = vor.u32 %v4608_v8, %v3886_v35  ;;  %v4620_v7 = vld [vmem:[#allocation12 + $0x94] sm:$0xf]  ;;  %v3934_v8 = vld [vmem:[#allocation12 + $0x98] sm:$0xf0]  ;;  %v3924_v35 = vld [vmem:[#allocation12 + $0x80] sm:$0xf] }
 0x367   : > { %v1672_v13 = vmul.f32 1.442695, %v1669_v11  ;;  %2021 = vmatpush.bf16.msrb.mxu2 %v3921_v33  ;;  %v4607_v11 = vld [vmem:[#allocation12 + $0x24] sm:$0xf0] }
 0x368   : > { %3849 = vmatmul.msk.bf16.vlgmr.msrb.gmra.mxu3 %vm1505_vm2, %v1601_v12  ;;  %v4606_v12 = vld [vmem:[#allocation12 + $0x24] sm:$0xf] }
 0x369   : > { %4919 = vpow2.f32 %v1672_v13  ;;  %v3878_v13 = vld [vmem:[#allocation12 + $0x28] sm:$0xf0] }
 0x36b   : > { %2022 = vmatpush.bf16.msrb.mxu2 %v3913_v42  ;;  %v3961_v42 = vor.u32 %v4626_v50, %v3958_v37  ;;  %v4945_v37 = vld [vmem:[%s5628_s30 + $0x10] sm:$0xff] }
 0x36c   : > { %v1752_v14 = vpop.xlane.xlu2 %1751 }
 0x36d   : > { %v1523_v17 = vpop.xlane.xlu0 %1522  ;;  %4921 = vrcp.f32 %v1752_v14  ;;  %v3877_v14 = vor.u32 %v4607_v11, %v3876_v10  ;;  %v4618_v10 = vld [vmem:[#allocation12 + $0x84] sm:$0xf]  ;;  %v3926_v11 = vld [vmem:[#allocation12 + $0x88] sm:$0xf0] }
 0x36e   : > { %4923 = vrcp.f32 %v1749_v16  ;;  %v3868_v16 = vld [vmem:[#allocation12 + $0x10] sm:$0xf] }
 0x36f   : > { %v4920_v15 = vpop.eup %4919  ;;  %4925 = vrcp.f32 %v1523_v17  ;;  %v4605_v17 = vld [vmem:[#allocation12 + $0x14] sm:$0xf0] }
 0x370   : > { %v1677_v52 = vsel %vm1505_vm2, %v4920_v15, 0.0 }
 0x371   : > { %1678 = vadd.xlane.f32.xlu2 %v1677_v52  ;;  %v4604_v52 = vld [vmem:[#allocation12 + $0x14] sm:$0xf] }
 0x373   : > { %v4922_v19 = vpop.eup %4921 }
 0x374   : > { %v1520_v18 = vpop.xlane.xlu2 %1519  ;;  %v4924_v20 = vpop.eup %4923  ;;  %v1756_v22 = vmul.f32 %v4922_v19, %v4908_v38  ;;  %v4613_v38 = vld [vmem:[#allocation12 + $0x54] sm:$0xf0]  ;;  %v3870_v19 = vld [vmem:[#allocation12 + $0x18] sm:$0xf0] }
 0x375   : > { %4927 = vrcp.f32 %v1520_v18  ;;  %v4926_v21 = vpop.eup %4925  ;;  %v1755_v24 = vmul.f32 %v4924_v20, %v4906_v51  ;;  %v3909_v51 = vor.u32 %v4615_v45, %v3908_v48  ;;  %v3901_v61 = vor.u32 %v4613_v38, %v3900_v34  ;;  %v3860_v20 = vld [vmem:[#allocation12] sm:$0xf]  ;;  %v4628_v48 = vld [vmem:[#allocation12 + $0xd4] sm:$0xf]  ;;  %v3950_v38 = vld [vmem:[#allocation12 + $0xb8] sm:$0xf0] }
 0x376   : > { %v1527_v25 = vmul.f32 %v4926_v21, %v4910_v62  ;;  %v3902_v62 = vld [vmem:[#allocation12 + $0x58] sm:$0xf0]  ;;  %v3869_v18 = vor.u32 %v4605_v17, %v3868_v16  ;;  %v4603_v21 = vld [vmem:[#allocation12 + $0x4] sm:$0xf0]  ;;  %v3965_v45 = vor.u32 %v4629_v47, %v3964_v46 }
 0x377   : > { %v1757_v28 = vpack.c.bf16 %v1756_v22, %v1755_v24  ;;  %1994 = vmatpush.bf16.msrb.mxu0 %v3909_v51  ;;  %v3905_v1 = vor.u32 %v4612_v60, %v3902_v62  ;;  %v3873_v22 = vor.u32 %v4604_v52, %v3870_v19  ;;  %v3862_v24 = vld [vmem:[#allocation12 + $0x8] sm:$0xf0]  ;;  %v3956_v51 = vld [vmem:[#allocation12 + $0xc0] sm:$0xf] }
 0x378   : > { %v3942_v62 = vld [vmem:[#allocation12 + $0xa8] sm:$0xf0] }
 0x379   : > { %2023 = vmatpush.bf16.msrb.mxu2 %v3905_v1  ;;  %v4623_v1 = vld [vmem:[#allocation12 + $0xa4] sm:$0xf0] }
 0x37b   : > { %v4928_v23 = vpop.eup %4927  ;;  %1995 = vmatpush.bf16.msrb.mxu0 %v3901_v61  ;;  %v4622_v61 = vld [vmem:[#allocation12 + $0xa4] sm:$0xf] }
 0x37c   : > { %v1526_v26 = vmul.f32 %v4928_v23, %v4912_v2  ;;  %v1760_v27 = vpop.permute.xlu1 %1759  ;;  %v1676_v54 = vpop.xlane.xlu2 %1675  ;;  %v4610_v2 = vld [vmem:[#allocation12 + $0x44] sm:$0xf] }
 0x37d   : > { %1772 = vmatpush.bf16.msra.mxu3 %v1760_v27  ;;  %4929 = vrcp.f32 %v1676_v54  ;;  %v3897_v5 = vor.u32 %v4610_v2, %v3894_v3  ;;  %v4602_v23 = vld [vmem:[#allocation12 + $0x4] sm:$0xf]  ;;  %v3980_v27 = vld [vmem:[#allocation12 + $0xf0] sm:$0xf] }
 0x37e   : > { %v1528_v29 = vpack.c.bf16 %v1527_v25, %v1526_v26  ;;  %v3861_v25 = vor.u32 %v4603_v21, %v3860_v20  ;;  %v3865_v26 = vor.u32 %v4602_v23, %v3862_v24  ;;  %v1827_v23 = vld [vmem:[%s5889_s6] sm:$0x3] }
 0x37f   : > { %2024 = vmatpush.bf16.msrb.mxu2 %v3897_v5  ;;  %v4621_v5 = vld [vmem:[#allocation12 + $0x94] sm:$0xf0] }
 0x380   : > { %3845 = vmatmul.msk.bf16.vlgmr.msrb.gmra.mxu1 %vm1505_vm2, %v1528_v29  ;;  %3857 = vmatmul.msk.bf16.vlgmr.msra.gmra.mxu3 %vm1505_vm2, %v1757_v28  ;;  %v4633_v28 = vld [vmem:[#allocation12 + $0xf4] sm:$0xf0]  ;;  %v4632_v29 = vld [vmem:[#allocation12 + $0xf4] sm:$0xf] }
 0x381   : > { %v3981_v54 = vor.u32 %v4633_v28, %v3980_v27  ;;  %v1830_v28 = vperm.slane %v1827_v23, 1 }
 0x383   : > { %v4930_v31 = vpop.eup %4929  ;;  %2025 = vmatpush.bf16.msrb.mxu2 %v3889_v39  ;;  %2007 = vmatpush.bf16.msrb.mxu1 %v3981_v54  ;;  %v4619_v39 = vld [vmem:[#allocation12 + $0x84] sm:$0xf0] }
 0x384   : > { %v1682_v36 = vmul.f32 %v4930_v31, %v4914_v4  ;;  %v3893_v4 = vor.u32 %v4611_v0, %v3892_v63  ;;  %v3945_v63 = vor.u32 %v4622_v61, %v3942_v62  ;;  %v3940_v0 = vld [vmem:[#allocation12 + $0xa0] sm:$0xf]  ;;  %v4228_v61 = vld [vmem:[#allocation17 + $0x1e0] sm:$0xf] }
 0x385   : > { %v3941_v2 = vor.u32 %v4623_v1, %v3940_v0  ;;  %v4662_v0 = vld [vmem:[#allocation17 + $0xe4] sm:$0xf]  ;;  %v4102_v1 = vld [vmem:[#allocation17 + $0xf0] sm:$0xf0] }
 0x386   : > { %1996 = vmatpush.bf16.msrb.mxu0 %v3893_v4  ;;  %v3932_v4 = vld [vmem:[#allocation12 + $0x90] sm:$0xf] }
 0x387   : > { %v3933_v6 = vor.u32 %v4621_v5, %v3932_v4  ;;  %v4694_v4 = vld [vmem:[#allocation17 + $0x1e4] sm:$0xf]  ;;  %v4230_v5 = vld [vmem:[#allocation17 + $0x1f0] sm:$0xf0] }
 0x38a   : > { %1997 = vmatpush.bf16.msrb.mxu0 %v3885_v9  ;;  %v3937_v9 = vor.u32 %v4620_v7, %v3934_v8  ;;  %v4233_v7 = vor.u32 %v4694_v4, %v4230_v5  ;;  %v4660_v8 = vld [vmem:[#allocation17 + $0xcc] sm:$0xf0]  ;;  %v4678_v5 = vld [vmem:[#allocation17 + $0x164] sm:$0xf] }
 0x38e   : > { %1998 = vmatpush.bf16.msrb.mxu0 %v3877_v14 }
 0x392   : > { %1999 = vmatpush.bf16.msrb.mxu0 %v3869_v18 }
 0x396   : > { %2000 = vmatpush.bf16.msrb.mxu0 %v3861_v25  ;;  %v1829_v25 = vperm.slane %v1827_v23, 0 }
 0x3e4   : > { %v1679_v30 = vpop.xlane.xlu2 %1678 }
 0x3e5   : > { %4931 = vrcp.f32 %v1679_v30  ;;  %v3982_v30 = vld [vmem:[#allocation12 + $0xf8] sm:$0xf0] }
 0x3e6   : > { %v3985_v31 = vor.u32 %v4632_v29, %v3982_v30 }
 0x3e8   : > { %2035 = vmatpush.bf16.msrb.mxu3 %v3985_v31 }
 0x3eb   : > { %v4932_v32 = vpop.eup %4931  ;;  %v1618_v57 = vpop.f32.mrf.mxu3 }
 0x3ec   : > { %v1683_v40 = vmul.f32 %v4932_v32, %v4920_v15  ;;  %1625 = vrot.lane.b32.xlu1 %v1618_v57, %s5348_s15  ;;  %v3881_v15 = vor.u32 %v4606_v12, %v3878_v13  ;;  %v3972_v32 = vld [vmem:[#allocation12 + $0xe0] sm:$0xf]  ;;  %v4631_v57 = vld [vmem:[#allocation12 + $0xe4] sm:$0xf0]  ;;  %v3925_v12 = vor.u32 %v4619_v39, %v3924_v35  ;;  %v3929_v13 = vor.u32 %v4618_v10, %v3926_v11  ;;  %v4212_v35 = vld [vmem:[#allocation17 + $0x1c0] sm:$0xf] }
 0x3ed   : > { %v4658_v11 = vld [vmem:[#allocation17 + $0xc4] sm:$0xf] }
 0x3ee   : > { %v1684_v49 = vpack.c.bf16 %v1683_v40, %v1682_v36  ;;  %2026 = vmatpush.bf16.msrb.mxu2 %v3881_v15  ;;  %v4630_v36 = vld [vmem:[#allocation12 + $0xe4] sm:$0xf]  ;;  %v3973_v40 = vor.u32 %v4631_v57, %v3972_v32 }
 0x3ef   : > { %v3977_v44 = vor.u32 %v4630_v36, %v3974_v41  ;;  %v4943_v36 = vld [vmem:[%s5628_s30] sm:$0xff]  ;;  %v4944_v41 = vld [vmem:[%s5628_s30 + $0x8] sm:$0xff] }
 0x3f0   : > { %3853 = vmatmul.msk.bf16.vlgmr.msra.gmra.mxu1 %vm1505_vm2, %v1684_v49  ;;  %v3966_v49 = vld [vmem:[#allocation12 + $0xd8] sm:$0xf0] }
 0x3f1   : > { %2008 = vmatpush.bf16.msrb.mxu1 %v3973_v40  ;;  %2036 = vmatpush.bf16.msrb.mxu3 %v3977_v44  ;;  %v3969_v33 = vor.u32 %v4628_v48, %v3966_v49 }
 0x3f2   : > { %2027 = vmatpush.bf16.msrb.mxu2 %v3873_v22 }
 0x3f3   : > { %v1620_v53 = vpop.f32.mrf.mxu3 }
 0x3f4   : > { %1627 = vrot.lane.b32.xlu2 %v1620_v53, %s5348_s15  ;;  %v4627_v53 = vld [vmem:[#allocation12 + $0xc4] sm:$0xf0] }
 0x3f5   : > { %2009 = vmatpush.bf16.msrb.mxu1 %v3965_v45  ;;  %2037 = vmatpush.bf16.msrb.mxu3 %v3969_v33 }
 0x3f6   : > { %2028 = vmatpush.bf16.msrb.mxu2 %v3865_v26 }
 0x3f9   : > { %2038 = vmatpush.bf16.msrb.mxu3 %v3961_v42  ;;  %v4946_v42 = vld [vmem:[%s5628_s30 + $0x18] sm:$0xff] }
 0x3fd   : > { %v1541_v55 = vpop.f32.mrf.mxu1 }
 0x3fe   : > { %1546 = vst.msk [vmem:[#allocation2] sm:$0xff] %vm1482_vm0, %v1541_v55  ;;  %v3957_v55 = vor.u32 %v4627_v53, %v3956_v51 }
 0x400   : > { %2010 = vmatpush.bf16.msrb.mxu1 %v3957_v55 }
 0x403   : > { %v1774_v56 = vpop.f32.mrf.mxu3 }
 0x404   : > { %1781 = vrot.lane.b32.xlu1 %v1774_v56, %s5348_s15  ;;  %v3948_v56 = vld [vmem:[#allocation12 + $0xb0] sm:$0xf] }
 0x405   : > { %v1543_v58 = vpop.f32.mrf.mxu1 }
 0x406   : > { %1547 = vst.msk [vmem:[#allocation2 + $0x10] sm:$0xff] %vm1482_vm0, %v1543_v58  ;;  %v4625_v58 = vld [vmem:[#allocation12 + $0xb4] sm:$0xf0] }
 0x407   : > { %v3949_v34 = vor.u32 %v4625_v58, %v3948_v56  ;;  %v5350_v56 = vmov 256.0  }
 0x408   : > { %4933 = vrcp.f32 %v5350_v56 }
 0x409   : > { %2011 = vmatpush.bf16.msrb.mxu1 %v3949_v34 }
 0x40b   : > { %v1776_v59 = vpop.f32.mrf.mxu3 }
 0x40c   : > { %1783 = vrot.lane.b32.xlu1 %v1776_v59, %s5348_s15  ;;  %v4624_v59 = vld [vmem:[#allocation12 + $0xb4] sm:$0xf]  ;;  %s3242_s15 = scalar_lea.hbm %s5957_s17, %s4762_s26 }
 0x40d   : > { %v3953_v60 = vor.u32 %v4624_v59, %v3950_v38  ;;  %2012 = vmatpush.bf16.msrb.mxu1 %v3941_v2  ;;  %v4100_v38 = vld [vmem:[#allocation17 + $0xe0] sm:$0xf]  ;;  %s3245_s25 = sshll.u32 %s3242_s15, 4  ;;  %s3246_s25 = int_to_ptr.hbm [resolvable:$true] %s3245_s25 }
 0x40e   : > { %v4934_v58 = vpop.eup %4933  ;;  %s5261_s12 = sshra.s32 %s3246_s25, 4  ;;  %s5262_s12 = int_to_ptr.hbm [resolvable:$true] %s5261_s12 }
 0x40f   : > { %2039 = vmatpush.bf16.msrb.mxu3 %v3953_v60  ;;  %v2062_v59 = vmul.f32 256.0, %v4934_v58  ;;  %v4664_v60 = vld [vmem:[#allocation17 + $0xec] sm:$0xf0]  ;;  %vm2066_vm5 = vweird.f32 %v4934_v58  ;;  %s5263_s8 = scalar_lea.hbm %s5262_s12, 32  ;;  %p5268_p12 = scmp.lt.s32.totalorder %s5262_s12, %s5957_s17 }
 0x410   : > { %v4101_v62 = vor.u32 %v4664_v60, %v4100_v38  ;;  %v4036_v60 = vld [vmem:[#allocation17 + $0x60] sm:$0xf]  ;;  %p5264_p6 = scmp.ne.s32.totalorder %s5262_s12, %s5263_s8  ;;  %p5269_p3 = scmp.lt.s32.totalorder %s5267_s27, %s5263_s8 }
 0x411   : > { %2013 = vmatpush.bf16.msrb.mxu1 %v3933_v6  ;;  %v2063_v34 = vsub.f32 1.0, %v2062_v59  ;;  %v4084_v6 = vld [vmem:[#allocation17 + $0xc0] sm:$0xf]  ;;  %v4682_v59 = vld [vmem:[#allocation17 + $0x184] sm:$0xf] }
 0x412   : > { %2526 = vmatpush.bf16.msra.mxu0 %v4101_v62  ;;  %v4085_v39 = vor.u32 %v4660_v8, %v4084_v6  ;;  %v4164_v62 = vld [vmem:[#allocation17 + $0x160] sm:$0xf]  ;;  %v4166_v6 = vld [vmem:[#allocation17 + $0x170] sm:$0xf0]  ;;  %p5265_p10 = pnand %p5264_p6, %p5512_p0  ;;  %p5270_p8 = por %p5269_p3, %p5268_p12 }
 0x413   : > { %2040 = vmatpush.bf16.msrb.mxu3 %v3945_v63  ;;  %v4696_v63 = vld [vmem:[#allocation17 + $0x1ec] sm:$0xf0]  ;;  %v4020_v8 = vld [vmem:[#allocation17 + $0x40] sm:$0xf] }
 0x414   : > { %v4229_v2 = vor.u32 %v4696_v63, %v4228_v61  ;;  %v4648_v61 = vld [vmem:[#allocation17 + $0x6c] sm:$0xf0]  ;;  %p5266_p11 = pneg %p5265_p10 }
 0x415   : > { %2014 = vmatpush.bf16.msrb.mxu1 %v3925_v12  ;;  %v4086_v12 = vld [vmem:[#allocation17 + $0xd0] sm:$0xf0]  ;;  %v4037_v63 = vor.u32 %v4648_v61, %v4036_v60  ;;  %v4092_v60 = vld [vmem:[#allocation17 + $0xc8] sm:$0xf]  ;;  %v4661_v61 = vld [vmem:[#allocation17 + $0xd4] sm:$0xf0] }
 0x416   : > { %2527 = vmatpush.bf16.msra.mxu0 %v4085_v39  ;;  %p5271_p9 = pnand %p5270_p8, %p5266_p11 }
 0x417   : > { %2041 = vmatpush.bf16.msrb.mxu3 %v3937_v9  ;;  %v4692_v9 = vld [vmem:[#allocation17 + $0x1cc] sm:$0xf0] }
 0x418   : > { %v4213_v10 = vor.u32 %v4692_v9, %v4212_v35  ;;  %v4644_v35 = vld [vmem:[#allocation17 + $0x4c] sm:$0xf0]  ;;  %v4148_v9 = vld [vmem:[#allocation17 + $0x140] sm:$0xf] }
 0x419   : > { %2540 = vmatpush.bf16.msra.mxu1 %v4229_v2  ;;  %v4038_v2 = vld [vmem:[#allocation17 + $0x70] sm:$0xf0]  ;;  %v4021_v39 = vor.u32 %v4644_v35, %v4020_v8  ;;  %v4076_v35 = vld [vmem:[#allocation17 + $0xa8] sm:$0xf] }
 0x41b   : > { %2042 = vmatpush.bf16.msrb.mxu3 %v3929_v13  ;;  %v4690_v13 = vld [vmem:[#allocation17 + $0x1c4] sm:$0xf] }
 0x41d   : > { %2541 = vmatpush.bf16.msra.mxu1 %v4213_v10  ;;  %v4676_v10 = vld [vmem:[#allocation17 + $0x14c] sm:$0xf0] }
 0x41f   : > { %2568 = vmatpush.bf16.msra.mxu3 %v4233_v7  ;;  %v4169_v7 = vor.u32 %v4678_v5, %v4166_v6  ;;  %v4691_v5 = vld [vmem:[#allocation17 + $0x1cc] sm:$0xf]  ;;  %v4222_v6 = vld [vmem:[#allocation17 + $0x1d8] sm:$0xf0] }
 0x420   : > { %v4225_v8 = vor.u32 %v4691_v5, %v4222_v6  ;;  %v4641_v6 = vld [vmem:[#allocation17 + $0x34] sm:$0xf0] }
 0x44e   : > { %v1628_v43 = vpop.permute.xlu2 %1627 }
 0x44f   : > { %1633 = vst.msk [vmem:[#allocation2 + $0x10] sm:$0xff] %vm1631_vm4, %v1628_v43 }
 0x456   : > { %v1791_v15 = vld [vmem:[#allocation2 + $0x10] sm:$0xff] }
 0x45e   : > { %v1626_v3 = vpop.permute.xlu1 %1625 }
 0x45f   : > { %1632 = vst.msk [vmem:[#allocation2] sm:$0xff] %vm1631_vm4, %v1626_v3  ;;  %v4105_v3 = vor.u32 %v4662_v0, %v4102_v1  ;;  %v4680_v0 = vld [vmem:[#allocation17 + $0x16c] sm:$0xf0]  ;;  %v4646_v1 = vld [vmem:[#allocation17 + $0x64] sm:$0xf] }
 0x460   : > { %v4041_v4 = vor.u32 %v4646_v1, %v4038_v2  ;;  %v4693_v1 = vld [vmem:[#allocation17 + $0x1d4] sm:$0xf0]  ;;  %v4659_v2 = vld [vmem:[#allocation17 + $0xcc] sm:$0xf] }
 0x461   : > { %2554 = vmatpush.bf16.msra.mxu2 %v4105_v3  ;;  %v4165_v3 = vor.u32 %v4680_v0, %v4164_v62  ;;  %v4220_v0 = vld [vmem:[#allocation17 + $0x1c8] sm:$0xf] }
 0x466   : > { %v1789_v14 = vld [vmem:[#allocation2] sm:$0xff] }
 0x467   : > { %v1793_v16 = vpack.c.bf16 %v1791_v15, %v1789_v14  ;;  %v2064_v14 = vmul.f32 %v4934_v58, %v2063_v34  ;;  %v4089_v15 = vor.u32 %v4658_v11, %v4086_v12  ;;  %v4182_v34 = vld [vmem:[#allocation17 + $0x190] sm:$0xf0]  ;;  %v4642_v11 = vld [vmem:[#allocation17 + $0x44] sm:$0xf] }
 0x468   : > { %v4185_v38 = vor.u32 %v4682_v59, %v4182_v34  ;;  %v4022_v12 = vld [vmem:[#allocation17 + $0x50] sm:$0xf0]  ;;  %v4695_v59 = vld [vmem:[#allocation17 + $0x1ec] sm:$0xf] }
 0x469   : > { %2001 = vmatmul.bf16.vlgmr.msrb.gmra.mxu0 %v1793_v16  ;;  %2029 = vmatmul.bf16.vlgmr.msrb.gmra.mxu2 %v1793_v16  ;;  %v4214_v16 = vld [vmem:[#allocation17 + $0x1d0] sm:$0xf0] }
 0x46a   : > { %2555 = vmatpush.bf16.msra.mxu2 %v4089_v15  ;;  %v4674_v15 = vld [vmem:[#allocation17 + $0x144] sm:$0xf] }
 0x46d   : > { %v1697_v17 = vpop.f32.mrf.mxu1 }
 0x46e   : > { %1702 = vst.msk [vmem:[#allocation2 + $0x8] sm:$0xff] %vm1482_vm0, %v1697_v17  ;;  %v4217_v17 = vor.u32 %v4690_v13, %v4214_v16  ;;  %v4149_v13 = vor.u32 %v4676_v10, %v4148_v9  ;;  %v4150_v16 = vld [vmem:[#allocation17 + $0x150] sm:$0xf0]  ;;  %v4657_v9 = vld [vmem:[#allocation17 + $0xb4] sm:$0xf0] }
 0x46f   : > { %v4077_v10 = vor.u32 %v4657_v9, %v4076_v35  ;;  %v4639_v9 = vld [vmem:[#allocation17 + $0x2c] sm:$0xf] }
 0x470   : > { %2569 = vmatpush.bf16.msra.mxu3 %v4217_v17  ;;  %v4153_v17 = vor.u32 %v4674_v15, %v4150_v16 }
 0x475   : > { %v1699_v52 = vpop.f32.mrf.mxu1 }
 0x476   : > { %1703 = vst.msk [vmem:[#allocation2 + $0x18] sm:$0xff] %vm1482_vm0, %v1699_v52  ;;  %v1782_v18 = vpop.permute.xlu1 %1781  ;;  %v2065_v52 = vadd.f32 %v4934_v58, %v2064_v14  ;;  %v4025_v14 = vor.u32 %v4642_v11, %v4022_v12  ;;  %v4689_v11 = vld [vmem:[#allocation17 + $0x1b4] sm:$0xf0]  ;;  %v4655_v12 = vld [vmem:[#allocation17 + $0xac] sm:$0xf] }
 0x477   : > { %1787 = vst.msk [vmem:[#allocation2 + $0x8] sm:$0xff] %vm1631_vm4, %v1782_v18 }
 0x478   : > { %v5774_v18 = vsel %vm2066_vm5, %v4934_v58, %v2065_v52  ;;  %v4004_v52 = vld [vmem:[#allocation17 + $0x20] sm:$0xf] }
 0x47e   : > { %v1784_v19 = vpop.permute.xlu1 %1783  ;;  %v1790_v20 = vld [vmem:[#allocation2 + $0x8] sm:$0xff] }
 0x47f   : > { %1788 = vst.msk [vmem:[#allocation2 + $0x18] sm:$0xff] %vm1631_vm4, %v1784_v19 }
 0x486   : > { %v1792_v21 = vld [vmem:[#allocation2 + $0x18] sm:$0xff] }
 0x487   : > { %v1794_v22 = vpack.c.bf16 %v1792_v21, %v1790_v20 }
 0x489   : > { %2015 = vmatmul.bf16.vlgmr.msrb.gmra.mxu1 %v1794_v22  ;;  %2043 = vmatmul.bf16.vlgmr.msrb.gmra.mxu3 %v1794_v22 }
 0x4e6   : > { %v2002_v24 = vpop.f32.mrf.mxu0 }
 0x4e7   : > { %v2003_v29 = vadd.f32 %v2002_v24, %v1829_v25 }
 0x4ec   : > { %v2030_v26 = vpop.f32.mrf.mxu2 }
 0x4ed   : > { %v2031_v54 = vadd.f32 %v2030_v26, %v1830_v28 }
 0x4ee   : > { %v2004_v57 = vpop.f32.mrf.mxu0 }
 0x4ef   : > { %v2005_v47 = vadd.f32 %v2004_v57, %v1829_v25  ;;  %v4656_v57 = vld [vmem:[#allocation17 + $0xac] sm:$0xf0] }
 0x4f4   : > { %v2032_v44 = vpop.f32.mrf.mxu2 }
 0x4f5   : > { %v2033_v45 = vadd.f32 %v2032_v44, %v1830_v28  ;;  %v4070_v44 = vld [vmem:[#allocation17 + $0xb0] sm:$0xf0] }
 0x506   : > { %v2016_v27 = vpop.f32.mrf.mxu1 }
 0x507   : > { %v2017_v30 = vadd.f32 %v2016_v27, %v2003_v29 }
 0x509   : > { %v2049_v40 = vadd.f32 %v4943_v36, %v2017_v30  ;;  %v4196_v36 = vld [vmem:[#allocation17 + $0x1a0] sm:$0xf] }
 0x50c   : > { %v2044_v31 = vpop.f32.mrf.mxu3 }
 0x50d   : > { %v2045_v32 = vadd.f32 %v2044_v31, %v2031_v54 }
 0x50e   : > { %v2018_v46 = vpop.f32.mrf.mxu1 }
 0x50f   : > { %v2050_v43 = vadd.f32 %v4944_v41, %v2045_v32  ;;  %v2019_v49 = vadd.f32 %v2018_v46, %v2005_v47  ;;  %v4068_v32 = vld [vmem:[#allocation17 + $0xa0] sm:$0xf]  ;;  %v4688_v41 = vld [vmem:[#allocation17 + $0x1ac] sm:$0xf0] }
 0x510   : > { %v4197_v46 = vor.u32 %v4688_v41, %v4196_v36  ;;  %v4636_v36 = vld [vmem:[#allocation17 + $0xc] sm:$0xf0] }
 0x511   : > { %v2055_v48 = vadd.f32 %v2050_v43, %v2049_v40  ;;  %v2051_v51 = vadd.f32 %v4945_v37, %v2019_v49  ;;  %v4180_v37 = vld [vmem:[#allocation17 + $0x180] sm:$0xf] }
 0x512   : > { %2542 = vmatpush.bf16.msra.mxu1 %v4197_v46  ;;  %v3990_v46 = vld [vmem:[#allocation17 + $0x10] sm:$0xf0] }
 0x513   : > { %2056 = vadd.xlane.f32.xlu1 %v2055_v48  ;;  %v4686_v48 = vld [vmem:[#allocation17 + $0x1a4] sm:$0xf] }
 0x514   : > { %v2046_v33 = vpop.f32.mrf.mxu3 }
 0x515   : > { %v2047_v50 = vadd.f32 %v2046_v33, %v2033_v45  ;;  %v4198_v45 = vld [vmem:[#allocation17 + $0x1b0] sm:$0xf0]  ;;  %v4052_v33 = vld [vmem:[#allocation17 + $0x80] sm:$0xf] }
 0x516   : > { %v4201_v49 = vor.u32 %v4686_v48, %v4198_v45  ;;  %v4666_v45 = vld [vmem:[#allocation17 + $0x104] sm:$0xf] }
 0x517   : > { %v2052_v53 = vadd.f32 %v4946_v42, %v2047_v50  ;;  %v4652_v50 = vld [vmem:[#allocation17 + $0x8c] sm:$0xf0] }
 0x518   : > { %2570 = vmatpush.bf16.msra.mxu3 %v4201_v49  ;;  %v4684_v42 = vld [vmem:[#allocation17 + $0x18c] sm:$0xf0]  ;;  %v4118_v49 = vld [vmem:[#allocation17 + $0x110] sm:$0xf0] }
 0x519   : > { %v2058_v55 = vadd.f32 %v2052_v53, %v2051_v51  ;;  %v4181_v56 = vor.u32 %v4684_v42, %v4180_v37  ;;  %v4665_v37 = vld [vmem:[#allocation17 + $0xf4] sm:$0xf0] }
 0x51a   : > { %v4697_v42 = vld [vmem:[#allocation17 + $0x1f4] sm:$0xf0] }
 0x51b   : > { %2059 = vadd.xlane.f32.xlu0 %v2058_v55  ;;  %v4054_v55 = vld [vmem:[#allocation17 + $0x90] sm:$0xf0]  ;;  %2543 = vmatpush.bf16.msra.mxu1 %v4181_v56  ;;  %v4663_v56 = vld [vmem:[#allocation17 + $0xec] sm:$0xf] }
 0x51c   : > { %2571 = vmatpush.bf16.msra.mxu3 %v4185_v38  ;;  %v4238_v38 = vld [vmem:[#allocation17 + $0x1f8] sm:$0xf0] }
 0x51d   : > { %v4241_v62 = vor.u32 %v4695_v59, %v4238_v38  ;;  %v4156_v59 = vld [vmem:[#allocation17 + $0x148] sm:$0xf]  ;;  %v4643_v38 = vld [vmem:[#allocation17 + $0x4c] sm:$0xf] }
 0x51f   : > { %2544 = vmatpush.bf16.msra.mxu1 %v4165_v3  ;;  %v4221_v3 = vor.u32 %v4693_v1, %v4220_v0 }
 0x520   : > { %2572 = vmatpush.bf16.msra.mxu3 %v4169_v7 }
 0x523   : > { %2545 = vmatpush.bf16.msra.mxu1 %v4149_v13  ;;  %v4078_v13 = vld [vmem:[#allocation17 + $0xb8] sm:$0xf0] }
 0x524   : > { %2573 = vmatpush.bf16.msra.mxu3 %v4153_v17  ;;  %v4081_v16 = vor.u32 %v4655_v12, %v4078_v13  ;;  %v4687_v17 = vld [vmem:[#allocation17 + $0x1ac] sm:$0xf]  ;;  %v4142_v12 = vld [vmem:[#allocation17 + $0x138] sm:$0xf0] }
 0x586   : > { %v2057_v19 = vpop.xlane.xlu1 %2056 }
 0x587   : > { %v2068_v20 = vmul.f32 %v5774_v18, %v2057_v19  ;;  %v4640_v19 = vld [vmem:[#allocation17 + $0x2c] sm:$0xf0] }
 0x589   : > { %v5777_v21 = vsub.f32 %v2049_v40, %v2068_v20  ;;  %v5779_v22 = vsub.f32 %v2050_v43, %v2068_v20  ;;  %v4069_v40 = vor.u32 %v4656_v57, %v4068_v32  ;;  %v4654_v43 = vld [vmem:[#allocation17 + $0xa4] sm:$0xf]  ;;  %v4132_v20 = vld [vmem:[#allocation17 + $0x120] sm:$0xf] }
 0x58a   : > { %v4073_v47 = vor.u32 %v4654_v43, %v4070_v44  ;;  %v3988_v57 = vld [vmem:[#allocation17] sm:$0xf]  ;;  %v4668_v43 = vld [vmem:[#allocation17 + $0x10c] sm:$0xf0]  ;;  %v4634_v44 = vld [vmem:[#allocation17 + $0x4] sm:$0xf] }
 0x58b   : > { %v2074_v23 = vmul.f32 %v5777_v21, %v5777_v21  ;;  %v2075_v24 = vmul.f32 %v5779_v22, %v5779_v22  ;;  %2528 = vmatpush.bf16.msra.mxu0 %v4069_v40  ;;  %v4116_v40 = vld [vmem:[#allocation17 + $0x100] sm:$0xf]  ;;  %v3989_v41 = vor.u32 %v4636_v36, %v3988_v57  ;;  %v3993_v48 = vor.u32 %v4634_v44, %v3990_v46  ;;  %v4190_v36 = vld [vmem:[#allocation17 + $0x198] sm:$0xf0]  ;;  %v4649_v44 = vld [vmem:[#allocation17 + $0x74] sm:$0xf0] }
 0x58c   : > { %2556 = vmatpush.bf16.msra.mxu2 %v4073_v47  ;;  %v4117_v47 = vor.u32 %v4668_v43, %v4116_v40  ;;  %v4044_v43 = vld [vmem:[#allocation17 + $0x68] sm:$0xf] }
 0x58d   : > { %v2078_v25 = vadd.f32 %v2075_v24, %v2074_v23  ;;  %v4005_v23 = vor.u32 %v4640_v19, %v4004_v52  ;;  %v4672_v24 = vld [vmem:[#allocation17 + $0x12c] sm:$0xf0]  ;;  %v4206_v52 = vld [vmem:[#allocation17 + $0x1b8] sm:$0xf0]  ;;  %v4060_v19 = vld [vmem:[#allocation17 + $0x88] sm:$0xf] }
 0x58e   : > { %v2060_v26 = vpop.xlane.xlu0 %2059  ;;  %v4172_v46 = vld [vmem:[#allocation17 + $0x168] sm:$0xf] }
 0x58f   : > { %v2069_v27 = vmul.f32 %v5774_v18, %v2060_v26  ;;  %2079 = vadd.xlane.f32.xlu2 %v2078_v25  ;;  %v4638_v25 = vld [vmem:[#allocation17 + $0x24] sm:$0xf]  ;;  %v4006_v26 = vld [vmem:[#allocation17 + $0x30] sm:$0xf0] }
 0x591   : > { %v5786_v28 = vsub.f32 %v2051_v51, %v2069_v27  ;;  %v5788_v29 = vsub.f32 %v2052_v53, %v2069_v27  ;;  %v4053_v51 = vor.u32 %v4652_v50, %v4052_v33  ;;  %v4650_v53 = vld [vmem:[#allocation17 + $0x84] sm:$0xf]  ;;  %v4133_v27 = vor.u32 %v4672_v24, %v4132_v20  ;;  %v4108_v33 = vld [vmem:[#allocation17 + $0xe8] sm:$0xf]  ;;  %v4653_v24 = vld [vmem:[#allocation17 + $0x94] sm:$0xf0] }
 0x592   : > { %v4057_v58 = vor.u32 %v4650_v53, %v4054_v55  ;;  %v4121_v50 = vor.u32 %v4666_v45, %v4118_v49  ;;  %v4109_v53 = vor.u32 %v4665_v37, %v4108_v33  ;;  %v4647_v45 = vld [vmem:[#allocation17 + $0x6c] sm:$0xf]  ;;  %v4046_v49 = vld [vmem:[#allocation17 + $0x78] sm:$0xf0] }
 0x593   : > { %v2076_v54 = vmul.f32 %v5786_v28, %v5786_v28  ;;  %v2077_v30 = vmul.f32 %v5788_v29, %v5788_v29  ;;  %2529 = vmatpush.bf16.msra.mxu0 %v4053_v51  ;;  %2546 = vmatpush.bf16.msra.mxu1 %v4133_v27  ;;  %v4236_v51 = vld [vmem:[#allocation17 + $0x1e8] sm:$0xf]  ;;  %v4651_v27 = vld [vmem:[#allocation17 + $0x8c] sm:$0xf]  ;;  %v4049_v37 = vor.u32 %v4647_v45, %v4046_v49 }
 0x594   : > { %2557 = vmatpush.bf16.msra.mxu2 %v4057_v58  ;;  %v4237_v55 = vor.u32 %v4697_v42, %v4236_v51  ;;  %v4110_v58 = vld [vmem:[#allocation17 + $0xf8] sm:$0xf0]  ;;  %v4679_v51 = vld [vmem:[#allocation17 + $0x16c] sm:$0xf] }
 0x595   : > { %v2081_v31 = vadd.f32 %v2077_v30, %v2076_v54  ;;  %v4009_v54 = vor.u32 %v4638_v25, %v4006_v26  ;;  %v4670_v30 = vld [vmem:[#allocation17 + $0x124] sm:$0xf]  ;;  %v4113_v34 = vor.u32 %v4663_v56, %v4110_v58  ;;  %v4188_v25 = vld [vmem:[#allocation17 + $0x188] sm:$0xf]  ;;  %v4685_v26 = vld [vmem:[#allocation17 + $0x194] sm:$0xf0] }
 0x596   : > { %v4189_v57 = vor.u32 %v4685_v26, %v4188_v25  ;;  %v4174_v42 = vld [vmem:[#allocation17 + $0x178] sm:$0xf0]  ;;  %v4645_v58 = vld [vmem:[#allocation17 + $0x54] sm:$0xf0] }
 0x597   : > { %2082 = vadd.xlane.f32.xlu0 %v2081_v31  ;;  %2530 = vmatpush.bf16.msra.mxu0 %v4037_v63  ;;  %v4134_v31 = vld [vmem:[#allocation17 + $0x130] sm:$0xf0]  ;;  %v4093_v63 = vor.u32 %v4661_v61, %v4092_v60  ;;  %v4177_v56 = vor.u32 %v4679_v51, %v4174_v42  ;;  %v4030_v60 = vld [vmem:[#allocation17 + $0x58] sm:$0xf0]  ;;  %v4675_v61 = vld [vmem:[#allocation17 + $0x14c] sm:$0xf] }
 0x598   : > { %2558 = vmatpush.bf16.msra.mxu2 %v4041_v4  ;;  %v4137_v32 = vor.u32 %v4670_v30, %v4134_v31  ;;  %2547 = vmatpush.bf16.msra.mxu1 %v4117_v47  ;;  %v4094_v4 = vld [vmem:[#allocation17 + $0xd8] sm:$0xf0]  ;;  %v4683_v30 = vld [vmem:[#allocation17 + $0x18c] sm:$0xf]  ;;  %v4045_v47 = vor.u32 %v4649_v44, %v4044_v43  ;;  %v4033_v5 = vor.u32 %v4643_v38, %v4030_v60  ;;  %v4300_v60 = vld [vmem:[#allocation18 + $0x70] sm:$0xf] }
 0x599   : > { %v4097_v7 = vor.u32 %v4659_v2, %v4094_v4  ;;  %v4158_v2 = vld [vmem:[#allocation17 + $0x158] sm:$0xf0] }
 0x59a   : > { %2574 = vmatpush.bf16.msra.mxu3 %v4137_v32  ;;  %v4061_v32 = vor.u32 %v4653_v24, %v4060_v19  ;;  %v4161_v35 = vor.u32 %v4675_v61, %v4158_v2  ;;  %v4124_v19 = vld [vmem:[#allocation17 + $0x108] sm:$0xf]  ;;  %v4635_v24 = vld [vmem:[#allocation17 + $0xc] sm:$0xf]  ;;  %v3998_v25 = vld [vmem:[#allocation17 + $0x18] sm:$0xf0] }
 0x59b   : > { %2531 = vmatpush.bf16.msra.mxu0 %v4021_v39  ;;  %v4204_v39 = vld [vmem:[#allocation17 + $0x1a8] sm:$0xf]  ;;  %v4364_v61 = vld [vmem:[#allocation18 + $0xf0] sm:$0xf] }
 0x59c   : > { %2559 = vmatpush.bf16.msra.mxu2 %v4025_v14  ;;  %2596 = vmatpush.bf16.msrb.mxu1 %v4237_v55  ;;  %v4205_v15 = vor.u32 %v4689_v11, %v4204_v39  ;;  %v4014_v39 = vld [vmem:[#allocation17 + $0x38] sm:$0xf0]  ;;  %v4671_v11 = vld [vmem:[#allocation17 + $0x12c] sm:$0xf] }
 0x59e   : > { %2575 = vmatpush.bf16.msra.mxu3 %v4121_v50 }
 0x59f   : > { %2532 = vmatpush.bf16.msra.mxu0 %v4005_v23  ;;  %v4209_v23 = vor.u32 %v4687_v17, %v4206_v52  ;;  %v4017_v52 = vor.u32 %v4639_v9, %v4014_v39  ;;  %v4356_v39 = vld [vmem:[#allocation18 + $0xe0] sm:$0xf] }
 0x5a0   : > { %2560 = vmatpush.bf16.msra.mxu2 %v4009_v54  ;;  %2597 = vmatpush.bf16.msrb.mxu1 %v4221_v3  ;;  %v4062_v54 = vld [vmem:[#allocation17 + $0x98] sm:$0xf0]  ;;  %v4012_v3 = vld [vmem:[#allocation17 + $0x28] sm:$0xf] }
 0x5a1   : > { %v4065_v40 = vor.u32 %v4651_v27, %v4062_v54  ;;  %v4013_v13 = vor.u32 %v4641_v6, %v4012_v3  ;;  %v4667_v27 = vld [vmem:[#allocation17 + $0x10c] sm:$0xf]  ;;  %v4126_v54 = vld [vmem:[#allocation17 + $0x118] sm:$0xf0] }
 0x5a2   : > { %2624 = vmatpush.bf16.msrb.mxu3 %v4241_v62  ;;  %v4129_v43 = vor.u32 %v4667_v27, %v4126_v54  ;;  %v4412_v27 = vld [vmem:[#allocation18 + $0x150] sm:$0xf]  ;;  %v4741_v54 = vld [vmem:[#allocation18 + $0x154] sm:$0xf0] }
 0x5a3   : > { %2533 = vmatpush.bf16.msra.mxu0 %v3989_v41  ;;  %v4193_v41 = vor.u32 %v4683_v30, %v4190_v36 }
 0x5a4   : > { %2561 = vmatpush.bf16.msra.mxu2 %v3993_v48  ;;  %2598 = vmatpush.bf16.msrb.mxu1 %v4205_v15  ;;  %v4681_v48 = vld [vmem:[#allocation17 + $0x174] sm:$0xf0]  ;;  %v3996_v15 = vld [vmem:[#allocation17 + $0x8] sm:$0xf] }
 0x5a5   : > { %v4173_v50 = vor.u32 %v4681_v48, %v4172_v46  ;;  %v2053_v48 = vld [vmem:[#allocation14] sm:$0x3] }
 0x5a6   : > { %2625 = vmatpush.bf16.msrb.mxu3 %v4225_v8  ;;  %v4673_v8 = vld [vmem:[#allocation17 + $0x134] sm:$0xf0]  ;;  %v2114_v51 = vperm.slane %v2053_v48, 1 }
 0x5a7   : > { %2582 = vmatpush.bf16.msrb.mxu0 %v4109_v53  ;;  %v4028_v53 = vld [vmem:[#allocation17 + $0x48] sm:$0xf] }
 0x5a8   : > { %2610 = vmatpush.bf16.msrb.mxu2 %v4113_v34  ;;  %2599 = vmatpush.bf16.msrb.mxu1 %v4189_v57  ;;  %v4677_v34 = vld [vmem:[#allocation17 + $0x154] sm:$0xf0]  ;;  %v4029_v0 = vor.u32 %v4645_v58, %v4028_v53 }
 0x5a9   : > { %v4157_v1 = vor.u32 %v4677_v34, %v4156_v59 }
 0x5aa   : > { %2626 = vmatpush.bf16.msrb.mxu3 %v4209_v23  ;;  %v4145_v23 = vor.u32 %v4671_v11, %v4142_v12  ;;  %v4420_v12 = vld [vmem:[#allocation18 + $0x160] sm:$0xf] }
 0x5ab   : > { %2583 = vmatpush.bf16.msrb.mxu0 %v4093_v63 }
 0x5ac   : > { %2611 = vmatpush.bf16.msrb.mxu2 %v4097_v7  ;;  %2600 = vmatpush.bf16.msrb.mxu1 %v4173_v50  ;;  %v4140_v7 = vld [vmem:[#allocation17 + $0x128] sm:$0xf]  ;;  %v2054_v50 = vld [vmem:[#allocation15] sm:$0x3] }
 0x5ad   : > { %v2122_v53 = vperm.slane %v2054_v50, 0 }
 0x5ae   : > { %2627 = vmatpush.bf16.msrb.mxu3 %v4193_v41  ;;  %v4001_v41 = vor.u32 %v4635_v24, %v3998_v25  ;;  %v4725_v24 = vld [vmem:[#allocation18 + $0xd4] sm:$0xf0] }
 0x5af   : > { %2584 = vmatpush.bf16.msrb.mxu0 %v4077_v10 }
 0x5b0   : > { %2612 = vmatpush.bf16.msrb.mxu2 %v4081_v16  ;;  %2601 = vmatpush.bf16.msrb.mxu1 %v4157_v1  ;;  %v4637_v16 = vld [vmem:[#allocation17 + $0x14] sm:$0xf0] }
 0x5b2   : > { %2628 = vmatpush.bf16.msrb.mxu3 %v4177_v56 }
 0x5b3   : > { %2585 = vmatpush.bf16.msrb.mxu0 %v4061_v32  ;;  %v3997_v32 = vor.u32 %v4637_v16, %v3996_v15  ;;  %v4484_v15 = vld [vmem:[#allocation18 + $0x1e0] sm:$0xf]  ;;  %v4759_v16 = vld [vmem:[#allocation18 + $0x1e4] sm:$0xf0] }
 0x5b4   : > { %2613 = vmatpush.bf16.msrb.mxu2 %v4065_v40 }
 0x5b6   : > { %2629 = vmatpush.bf16.msrb.mxu3 %v4161_v35  ;;  %v4711_v35 = vld [vmem:[#allocation18 + $0x64] sm:$0xf0] }
 0x5b7   : > { %2586 = vmatpush.bf16.msrb.mxu0 %v4045_v47 }
 0x5b8   : > { %2614 = vmatpush.bf16.msrb.mxu2 %v4049_v37  ;;  %v2113_v37 = vperm.slane %v2053_v48, 0  ;;  %v4705_v48 = vld [vmem:[#allocation18 + $0x34] sm:$0xf0] }
 0x5ba   : > { %2630 = vmatpush.bf16.msrb.mxu3 %v4145_v23  ;;  %v4348_v23 = vld [vmem:[#allocation18 + $0xd0] sm:$0xf] }
 0x5bb   : > { %2587 = vmatpush.bf16.msrb.mxu0 %v4029_v0  ;;  %v4428_v0 = vld [vmem:[#allocation18 + $0x170] sm:$0xf] }
 0x5bc   : > { %2615 = vmatpush.bf16.msrb.mxu2 %v4033_v5 }
 0x5be   : > { %2631 = vmatpush.bf16.msrb.mxu3 %v4129_v43  ;;  %v4413_v43 = vor.u32 %v4741_v54, %v4412_v27  ;;  %v4708_v27 = vld [vmem:[#allocation18 + $0x54] sm:$0xf]  ;;  %v4286_v54 = vld [vmem:[#allocation18 + $0x58] sm:$0xf0] }
 0x5bf   : > { %2588 = vmatpush.bf16.msrb.mxu0 %v4013_v13 }
 0x5c0   : > { %2616 = vmatpush.bf16.msrb.mxu2 %v4017_v52  ;;  %v4284_v52 = vld [vmem:[#allocation18 + $0x50] sm:$0xf] }
 0x5c3   : > { %2589 = vmatpush.bf16.msrb.mxu0 %v3997_v32  ;;  %v4276_v32 = vld [vmem:[#allocation18 + $0x40] sm:$0xf] }
 0x5c4   : > { %2617 = vmatpush.bf16.msrb.mxu2 %v4001_v41  ;;  %v4723_v41 = vld [vmem:[#allocation18 + $0xc4] sm:$0xf0] }
 0x602   : > { %v2080_v14 = vpop.xlane.xlu2 %2079 }
 0x603   : > { %v2084_v20 = vmul.f32 %v2080_v14, %v5774_v18  ;;  %v4141_v14 = vor.u32 %v4673_v8, %v4140_v7  ;;  %v4292_v8 = vld [vmem:[#allocation18 + $0x60] sm:$0xf] }
 0x605   : > { %v5795_v31 = vadd.f32 1e-06, %v2084_v20  ;;  %v4669_v20 = vld [vmem:[#allocation17 + $0x114] sm:$0xf0]  ;;  %2602 = vmatpush.bf16.msrb.mxu1 %v4141_v14  ;;  %v4743_v14 = vld [vmem:[#allocation18 + $0x164] sm:$0xf0] }
 0x606   : > { %v4125_v57 = vor.u32 %v4669_v20, %v4124_v19  ;;  %v4709_v20 = vld [vmem:[#allocation18 + $0x54] sm:$0xf0]  ;;  %v4421_v25 = vor.u32 %v4743_v14, %v4420_v12  ;;  %v4715_v14 = vld [vmem:[#allocation18 + $0x84] sm:$0xf0] }
 0x607   : > { %4935 = vrsqrt.f32 %v5795_v31  ;;  %vm2094_vm7 = vweird.f32 %v5795_v31 }
 0x609   : > { %2603 = vmatpush.bf16.msrb.mxu1 %v4125_v57  ;;  %v4349_v57 = vor.u32 %v4725_v24, %v4348_v23  ;;  %v4388_v23 = vld [vmem:[#allocation18 + $0x120] sm:$0xf]  ;;  %v4735_v24 = vld [vmem:[#allocation18 + $0x124] sm:$0xf0] }
 0x60a   : > { %v2083_v33 = vpop.xlane.xlu0 %2082 }
 0x60b   : > { %v2085_v55 = vmul.f32 %v2083_v33, %v5774_v18 }
 0x60d   : > { %v4936_v62 = vpop.eup %4935  ;;  %v5799_v63 = vadd.f32 1e-06, %v2085_v55  ;;  %v2123_v55 = vperm.slane %v2054_v50, 1  ;;  %v4260_v50 = vld [vmem:[#allocation18 + $0x20] sm:$0xf] }
 0x60e   : > { %v2089_v4 = vmul.f32 %v4936_v62, %v5795_v31  ;;  %vm2095_vm6 = vweird.f32 %v4936_v62 }
 0x60f   : > { %4937 = vrsqrt.f32 %v5799_v63  ;;  %vm2096_vm8 = vmor %vm2094_vm7, %vm2095_vm6  ;;  %vm2104_vm10 = vweird.f32 %v5799_v63 }
 0x610   : > { %v2090_v10 = vmul.f32 %v4936_v62, %v2089_v4  ;;  %v4492_v4 = vld [vmem:[#allocation18 + $0x1f0] sm:$0xf] }
 0x612   : > { %v2091_v17 = vmul.f32 0.5, %v2090_v10  ;;  %v4727_v10 = vld [vmem:[#allocation18 + $0xe4] sm:$0xf0] }
 0x613   : > { %v4357_v19 = vor.u32 %v4727_v10, %v4356_v39  ;;  %v4710_v10 = vld [vmem:[#allocation18 + $0x64] sm:$0xf] }
 0x614   : > { %v2092_v26 = vsub.f32 1.5, %v2091_v17  ;;  %v4293_v17 = vor.u32 %v4711_v35, %v4292_v8  ;;  %v4396_v35 = vld [vmem:[#allocation18 + $0x130] sm:$0xf] }
 0x615   : > { %v4938_v30 = vpop.eup %4937 }
 0x616   : > { %v2093_v36 = vmul.f32 %v4936_v62, %v2092_v26  ;;  %v2099_v40 = vmul.f32 %v4938_v30, %v5799_v63  ;;  %vm2105_vm9 = vweird.f32 %v4938_v30  ;;  %v4485_v26 = vor.u32 %v4759_v16, %v4484_v15  ;;  %v4468_v16 = vld [vmem:[#allocation18 + $0x1c0] sm:$0xf] }
 0x617   : > { %vm2106_vm11 = vmor %vm2104_vm10, %vm2105_vm9 }
 0x618   : > { %v2100_v44 = vmul.f32 %v4938_v30, %v2099_v40  ;;  %v2097_v46 = vsel %vm2096_vm8, %v4936_v62, %v2093_v36  ;;  %v4729_v62 = vld [vmem:[#allocation18 + $0xf4] sm:$0xf0]  ;;  %v4707_v36 = vld [vmem:[#allocation18 + $0x44] sm:$0xf0]  ;;  %v4340_v40 = vld [vmem:[#allocation18 + $0xc0] sm:$0xf] }
 0x619   : > { %v2108_v49 = vmul.f32 %v2097_v46, %v5777_v21  ;;  %v2109_v33 = vmul.f32 %v2097_v46, %v5779_v22  ;;  %v4713_v22 = vld [vmem:[#allocation18 + $0x74] sm:$0xf0]  ;;  %v4365_v9 = vor.u32 %v4729_v62, %v4364_v61  ;;  %v4268_v46 = vld [vmem:[#allocation18 + $0x30] sm:$0xf]  ;;  %v4712_v61 = vld [vmem:[#allocation18 + $0x74] sm:$0xf] }
 0x61a   : > { %v2101_v47 = vmul.f32 0.5, %v2100_v44  ;;  %v4301_v7 = vor.u32 %v4713_v22, %v4300_v60  ;;  %v4277_v44 = vor.u32 %v4707_v36, %v4276_v32  ;;  %v4739_v22 = vld [vmem:[#allocation18 + $0x144] sm:$0xf0]  ;;  %v4302_v62 = vld [vmem:[#allocation18 + $0x78] sm:$0xf0] }
 0x61b   : > { %v2117_v59 = vmul.f32 %v2113_v37, %v2108_v49  ;;  %v2118_v34 = vmul.f32 %v2114_v51, %v2109_v33  ;;  %v4721_v49 = vld [vmem:[#allocation18 + $0xb4] sm:$0xf0]  ;;  %v4269_v33 = vor.u32 %v4705_v48, %v4268_v46  ;;  %v4460_v32 = vld [vmem:[#allocation18 + $0x1b0] sm:$0xf]  ;;  %v4706_v48 = vld [vmem:[#allocation18 + $0x44] sm:$0xf] }
 0x61c   : > { %v2102_v45 = vsub.f32 1.5, %v2101_v47  ;;  %v4341_v47 = vor.u32 %v4723_v41, %v4340_v40  ;;  %v4726_v40 = vld [vmem:[#allocation18 + $0xe4] sm:$0xf]  ;;  %v4358_v41 = vld [vmem:[#allocation18 + $0xe8] sm:$0xf0] }
 0x61d   : > { %v5810_v1 = vadd.f32 %v2122_v53, %v2117_v59  ;;  %v5814_v2 = vadd.f32 %v2123_v55, %v2118_v34  ;;  %v4244_v34 = vld [vmem:[#allocation18] sm:$0xf]  ;;  %v4733_v46 = vld [vmem:[#allocation18 + $0x114] sm:$0xf0] }
 0x61e   : > { %v2103_v42 = vmul.f32 %v4938_v30, %v2102_v45  ;;  %v4332_v45 = vld [vmem:[#allocation18 + $0xb0] sm:$0xf] }
 0x620   : > { %v2107_v31 = vsel %vm2106_vm11, %v4938_v30, %v2103_v42  ;;  %v4285_v30 = vor.u32 %v4709_v20, %v4284_v52  ;;  %v4324_v42 = vld [vmem:[#allocation18 + $0xa0] sm:$0xf]  ;;  %v4728_v52 = vld [vmem:[#allocation18 + $0xf4] sm:$0xf]  ;;  %v4366_v20 = vld [vmem:[#allocation18 + $0xf8] sm:$0xf0] }
 0x621   : > { %v2110_v56 = vmul.f32 %v2107_v31, %v5786_v28  ;;  %v2111_v58 = vmul.f32 %v2107_v31, %v5788_v29  ;;  %v4745_v28 = vld [vmem:[#allocation18 + $0x174] sm:$0xf0]  ;;  %v4719_v31 = vld [vmem:[#allocation18 + $0xa4] sm:$0xf0] }
 0x622   : > { %v4761_v29 = vld [vmem:[#allocation18 + $0x1f4] sm:$0xf0]  ;;  %v4429_v11 = vor.u32 %v4745_v28, %v4428_v0  ;;  %v4305_v28 = vor.u32 %v4712_v61, %v4302_v62  ;;  %v4722_v62 = vld [vmem:[#allocation18 + $0xc4] sm:$0xf] }
 0x623   : > { %v2119_v38 = vmul.f32 %v2113_v37, %v2110_v56  ;;  %v2120_v21 = vmul.f32 %v2114_v51, %v2111_v58  ;;  %v4493_v13 = vor.u32 %v4761_v29, %v4492_v4  ;;  %v4333_v37 = vor.u32 %v4721_v49, %v4332_v45  ;;  %v4703_v51 = vld [vmem:[#allocation18 + $0x24] sm:$0xf0]  ;;  %v4252_v56 = vld [vmem:[#allocation18 + $0x10] sm:$0xf]  ;;  %v4701_v58 = vld [vmem:[#allocation18 + $0x14] sm:$0xf0] }
 0x624   : > { %v4253_v59 = vor.u32 %v4701_v58, %v4252_v56  ;;  %v4316_v4 = vld [vmem:[#allocation18 + $0x90] sm:$0xf]  ;;  %v4717_v29 = vld [vmem:[#allocation18 + $0x94] sm:$0xf0]  ;;  %v4278_v45 = vld [vmem:[#allocation18 + $0x48] sm:$0xf0] }
 0x625   : > { %v5812_v63 = vadd.f32 %v2122_v53, %v2119_v38  ;;  %v5816_v3 = vadd.f32 %v2123_v55, %v2120_v21  ;;  %v4261_v53 = vor.u32 %v4703_v51, %v4260_v50  ;;  %v4325_v55 = vor.u32 %v4719_v31, %v4324_v42  ;;  %v4699_v38 = vld [vmem:[#allocation18 + $0x4] sm:$0xf0]  ;;  %v4404_v21 = vld [vmem:[#allocation18 + $0x140] sm:$0xf]  ;;  %v4724_v51 = vld [vmem:[#allocation18 + $0xd4] sm:$0xf] }
 0x626   : > { %v4245_v60 = vor.u32 %v4699_v38, %v4244_v34  ;;  %v4405_v0 = vor.u32 %v4739_v22, %v4404_v21  ;;  %v4281_v49 = vor.u32 %v4706_v48, %v4278_v45  ;;  %v4751_v50 = vld [vmem:[#allocation18 + $0x1a4] sm:$0xf0]  ;;  %v4350_v42 = vld [vmem:[#allocation18 + $0xd8] sm:$0xf0]  ;;  %v4704_v58 = vld [vmem:[#allocation18 + $0x34] sm:$0xf] }
 0x627   : > { %v2130_v5 = vpack.c.bf16 %v5812_v63, %v5810_v1  ;;  %v2131_v6 = vpack.c.bf16 %v5816_v3, %v5814_v2  ;;  %v4353_v31 = vor.u32 %v4724_v51, %v4350_v42  ;;  %v4744_v38 = vld [vmem:[#allocation18 + $0x174] sm:$0xf]  ;;  %v4430_v21 = vld [vmem:[#allocation18 + $0x178] sm:$0xf0]  ;;  %v4749_v61 = vld [vmem:[#allocation18 + $0x194] sm:$0xf0] }
 0x628   : > { %v4433_v22 = vor.u32 %v4744_v38, %v4430_v21  ;;  %v4318_v48 = vld [vmem:[#allocation18 + $0x98] sm:$0xf0]  ;;  %v4756_v45 = vld [vmem:[#allocation18 + $0x1d4] sm:$0xf]  ;;  %v4470_v38 = vld [vmem:[#allocation18 + $0x1c8] sm:$0xf0] }
 0x629   : > { %2534 = vmatmul.bf16.vlgmr.msra.gmra.mxu0 %v2130_v5  ;;  %2548 = vmatmul.bf16.vlgmr.msra.gmra.mxu1 %v2131_v6  ;;  %v4736_v42 = vld [vmem:[#allocation18 + $0x134] sm:$0xf] }
 0x62a   : > { %2562 = vmatmul.bf16.vlgmr.msra.gmra.mxu2 %v2130_v5  ;;  %2576 = vmatmul.bf16.vlgmr.msra.gmra.mxu3 %v2131_v6 }
 0x62b   : > { %3040 = vmatpush.bf16.msra.mxu0 %v4301_v7  ;;  %3054 = vmatpush.bf16.msra.mxu1 %v4365_v9  ;;  %v4757_v7 = vld [vmem:[#allocation18 + $0x1d4] sm:$0xf0] }
 0x62c   : > { %3068 = vmatpush.bf16.msra.mxu2 %v4429_v11  ;;  %3082 = vmatpush.bf16.msra.mxu3 %v4493_v13  ;;  %v4737_v9 = vld [vmem:[#allocation18 + $0x134] sm:$0xf0]  ;;  %v4294_v11 = vld [vmem:[#allocation18 + $0x68] sm:$0xf0]  ;;  %v4308_v13 = vld [vmem:[#allocation18 + $0x80] sm:$0xf] }
 0x62d   : > { %v4397_v39 = vor.u32 %v4737_v9, %v4396_v35  ;;  %v4297_v12 = vor.u32 %v4710_v10, %v4294_v11  ;;  %v4309_v15 = vor.u32 %v4715_v14, %v4308_v13  ;;  %v4436_v35 = vld [vmem:[#allocation18 + $0x180] sm:$0xf]  ;;  %v4747_v9 = vld [vmem:[#allocation18 + $0x184] sm:$0xf0]  ;;  %v4720_v11 = vld [vmem:[#allocation18 + $0xb4] sm:$0xf] }
 0x62e   : > { %v4437_v10 = vor.u32 %v4747_v9, %v4436_v35  ;;  %v4760_v14 = vld [vmem:[#allocation18 + $0x1f4] sm:$0xf]  ;;  %v4382_v9 = vld [vmem:[#allocation18 + $0x118] sm:$0xf0] }
 0x62f   : > { %3041 = vmatpush.bf16.msra.mxu0 %v4293_v17  ;;  %3055 = vmatpush.bf16.msra.mxu1 %v4357_v19  ;;  %v4755_v17 = vld [vmem:[#allocation18 + $0x1c4] sm:$0xf0]  ;;  %v4732_v35 = vld [vmem:[#allocation18 + $0x114] sm:$0xf] }
 0x630   : > { %3069 = vmatpush.bf16.msra.mxu2 %v4421_v25  ;;  %3083 = vmatpush.bf16.msra.mxu3 %v4485_v26  ;;  %v4469_v19 = vor.u32 %v4755_v17, %v4468_v16  ;;  %v4369_v25 = vor.u32 %v4728_v52, %v4366_v20  ;;  %v4389_v26 = vor.u32 %v4735_v24, %v4388_v23  ;;  %v4700_v17 = vld [vmem:[#allocation18 + $0x14] sm:$0xf]  ;;  %v4254_v52 = vld [vmem:[#allocation18 + $0x18] sm:$0xf0] }
 0x631   : > { %v4257_v20 = vor.u32 %v4700_v17, %v4254_v52  ;;  %v4414_v23 = vld [vmem:[#allocation18 + $0x158] sm:$0xf0]  ;;  %v4748_v52 = vld [vmem:[#allocation18 + $0x194] sm:$0xf] }
 0x633   : > { %3042 = vmatpush.bf16.msra.mxu0 %v4285_v30  ;;  %3056 = vmatpush.bf16.msra.mxu1 %v4349_v57  ;;  %v4289_v30 = vor.u32 %v4708_v27, %v4286_v54  ;;  %v4753_v57 = vld [vmem:[#allocation18 + $0x1b4] sm:$0xf0]  ;;  %v4758_v27 = vld [vmem:[#allocation18 + $0x1e4] sm:$0xf] }
 0x634   : > { %3070 = vmatpush.bf16.msra.mxu2 %v4413_v43  ;;  %v4461_v36 = vor.u32 %v4753_v57, %v4460_v32  ;;  %v4361_v43 = vor.u32 %v4726_v40, %v4358_v41  ;;  %v4698_v57 = vld [vmem:[#allocation18 + $0x4] sm:$0xf]  ;;  %v5825_v41 = vld [vmem:[%s5953_s29] sm:$0xf] }
 0x635   : > { %v4738_v40 = vld [vmem:[#allocation18 + $0x144] sm:$0xf] }
 0x637   : > { %3043 = vmatpush.bf16.msra.mxu0 %v4277_v44  ;;  %3057 = vmatpush.bf16.msra.mxu1 %v4341_v47  ;;  %v4380_v44 = vld [vmem:[#allocation18 + $0x110] sm:$0xf] }
 0x638   : > { %3071 = vmatpush.bf16.msra.mxu2 %v4405_v0  ;;  %v4381_v47 = vor.u32 %v4733_v46, %v4380_v44  ;;  %v4342_v0 = vld [vmem:[#allocation18 + $0xc8] sm:$0xf0] }
 0x639   : > { %2590 = vmatmul.bf16.vlgmr.msrb.gmra.mxu0 %v2130_v5  ;;  %2604 = vmatmul.bf16.vlgmr.msrb.gmra.mxu1 %v2131_v6  ;;  %v4406_v44 = vld [vmem:[#allocation18 + $0x148] sm:$0xf0] }
 0x63a   : > { %2618 = vmatmul.bf16.vlgmr.msrb.gmra.mxu2 %v2130_v5  ;;  %2632 = vmatmul.bf16.vlgmr.msrb.gmra.mxu3 %v2131_v6  ;;  %v4476_v5 = vld [vmem:[#allocation18 + $0x1d0] sm:$0xf]  ;;  %v4317_v6 = vor.u32 %v4717_v29, %v4316_v4  ;;  %v4345_v4 = vor.u32 %v4722_v62, %v4342_v0  ;;  %v4702_v29 = vld [vmem:[#allocation18 + $0x24] sm:$0xf]  ;;  %v4409_v46 = vor.u32 %v4738_v40, %v4406_v44  ;;  %v4752_v0 = vld [vmem:[#allocation18 + $0x1b4] sm:$0xf] }
 0x63b   : > { %3044 = vmatpush.bf16.msra.mxu0 %v4269_v33  ;;  %3058 = vmatpush.bf16.msra.mxu1 %v4333_v37  ;;  %v4477_v8 = vor.u32 %v4757_v7, %v4476_v5  ;;  %v4452_v33 = vld [vmem:[#allocation18 + $0x1a0] sm:$0xf]  ;;  %v4262_v5 = vld [vmem:[#allocation18 + $0x28] sm:$0xf0]  ;;  %v4746_v44 = vld [vmem:[#allocation18 + $0x184] sm:$0xf] }
 0x63c   : > { %3072 = vmatpush.bf16.msra.mxu2 %v4397_v39  ;;  %v4453_v37 = vor.u32 %v4751_v50, %v4452_v33  ;;  %v4265_v7 = vor.u32 %v4702_v29, %v4262_v5  ;;  %v4478_v33 = vld [vmem:[#allocation18 + $0x1d8] sm:$0xf0] }
 0x63d   : > { %3084 = vmatpush.bf16.msra.mxu3 %v4477_v8  ;;  %v4422_v8 = vld [vmem:[#allocation18 + $0x168] sm:$0xf0]  ;;  %v4481_v51 = vor.u32 %v4756_v45, %v4478_v33 }
 0x63f   : > { %3045 = vmatpush.bf16.msra.mxu0 %v4261_v53  ;;  %3059 = vmatpush.bf16.msra.mxu1 %v4325_v55  ;;  %v4372_v53 = vld [vmem:[#allocation18 + $0x100] sm:$0xf]  ;;  %v4731_v55 = vld [vmem:[#allocation18 + $0x104] sm:$0xf0] }
 0x640   : > { %3073 = vmatpush.bf16.msra.mxu2 %v4389_v26  ;;  %v4373_v56 = vor.u32 %v4731_v55, %v4372_v53  ;;  %v4326_v26 = vld [vmem:[#allocation18 + $0xa8] sm:$0xf0]  ;;  %v2198_v53 = vperm.slane %v5825_v41, 0 }
 0x641   : > { %3085 = vmatpush.bf16.msra.mxu3 %v4469_v19  ;;  %v4740_v19 = vld [vmem:[#allocation18 + $0x154] sm:$0xf] }
 0x642   : > { %v4417_v24 = vor.u32 %v4740_v19, %v4414_v23  ;;  %v4446_v19 = vld [vmem:[#allocation18 + $0x198] sm:$0xf0] }
 0x643   : > { %3046 = vmatpush.bf16.msra.mxu0 %v4253_v59  ;;  %3060 = vmatpush.bf16.msra.mxu1 %v4317_v6  ;;  %v4270_v59 = vld [vmem:[#allocation18 + $0x38] sm:$0xf0]  ;;  %v4742_v6 = vld [vmem:[#allocation18 + $0x164] sm:$0xf] }
 0x644   : > { %3074 = vmatpush.bf16.msra.mxu2 %v4381_v47  ;;  %v4273_v34 = vor.u32 %v4704_v58, %v4270_v59  ;;  %v4425_v39 = vor.u32 %v4742_v6, %v4422_v8  ;;  %v4716_v47 = vld [vmem:[#allocation18 + $0x94] sm:$0xf]  ;;  %v4310_v58 = vld [vmem:[#allocation18 + $0x88] sm:$0xf0]  ;;  %v4754_v59 = vld [vmem:[#allocation18 + $0x1c4] sm:$0xf] }
 0x645   : > { %3086 = vmatpush.bf16.msra.mxu3 %v4461_v36  ;;  %v4246_v36 = vld [vmem:[#allocation18 + $0x8] sm:$0xf0]  ;;  %v4473_v21 = vor.u32 %v4754_v59, %v4470_v38 }
 0x647   : > { %3047 = vmatpush.bf16.msra.mxu0 %v4245_v60  ;;  %3061 = vmatpush.bf16.msra.mxu1 %v4309_v15  ;;  %v4444_v60 = vld [vmem:[#allocation18 + $0x190] sm:$0xf]  ;;  %v4494_v15 = vld [vmem:[#allocation18 + $0x1f8] sm:$0xf0] }
 0x648   : > { %3075 = vmatpush.bf16.msra.mxu2 %v4373_v56  ;;  %v4497_v16 = vor.u32 %v4760_v14, %v4494_v15  ;;  %v4714_v56 = vld [vmem:[#allocation18 + $0x84] sm:$0xf]  ;;  %v4374_v15 = vld [vmem:[#allocation18 + $0x108] sm:$0xf0] }
 0x649   : > { %3087 = vmatpush.bf16.msra.mxu3 %v4453_v37  ;;  %v4730_v14 = vld [vmem:[#allocation18 + $0x104] sm:$0xf] }
 0x64a   : > { %v4377_v23 = vor.u32 %v4730_v14, %v4374_v15 }
 0x64b   : > { %3096 = vmatpush.bf16.msrb.mxu0 %v4305_v28  ;;  %3110 = vmatpush.bf16.msrb.mxu1 %v4369_v25  ;;  %v4445_v28 = vor.u32 %v4749_v61, %v4444_v60  ;;  %v4718_v25 = vld [vmem:[#allocation18 + $0xa4] sm:$0xf] }
 0x64c   : > { %3124 = vmatpush.bf16.msrb.mxu2 %v4433_v22  ;;  %v4329_v54 = vor.u32 %v4718_v25, %v4326_v26  ;;  %v4734_v60 = vld [vmem:[#allocation18 + $0x124] sm:$0xf]  ;;  %v4390_v22 = vld [vmem:[#allocation18 + $0x128] sm:$0xf0]  ;;  %v4449_v26 = vor.u32 %v4748_v52, %v4446_v19 }
 0x64d   : > { %3088 = vmatpush.bf16.msra.mxu3 %v4445_v28  ;;  %v4393_v62 = vor.u32 %v4734_v60, %v4390_v22  ;;  %v4462_v28 = vld [vmem:[#allocation18 + $0x1b8] sm:$0xf0] }
 0x64e   : > { %v4465_v6 = vor.u32 %v4752_v0, %v4462_v28 }
 0x64f   : > { %3097 = vmatpush.bf16.msrb.mxu0 %v4297_v12  ;;  %3111 = vmatpush.bf16.msrb.mxu1 %v4361_v43  ;;  %v4334_v12 = vld [vmem:[#allocation18 + $0xb8] sm:$0xf0]  ;;  %v4249_v43 = vor.u32 %v4698_v57, %v4246_v36 }
 0x650   : > { %v4337_v13 = vor.u32 %v4720_v11, %v4334_v12  ;;  %3125 = vmatpush.bf16.msrb.mxu2 %v4425_v39  ;;  %v4750_v39 = vld [vmem:[#allocation18 + $0x1a4] sm:$0xf]  ;;  %v4385_v12 = vor.u32 %v4732_v35, %v4382_v9 }
 0x651   : > { %3089 = vmatpush.bf16.msra.mxu3 %v4437_v10 }
 0x653   : > { %3098 = vmatpush.bf16.msrb.mxu0 %v4289_v30  ;;  %3112 = vmatpush.bf16.msrb.mxu1 %v4353_v31  ;;  %v4486_v30 = vld [vmem:[#allocation18 + $0x1e8] sm:$0xf0]  ;;  %v4398_v31 = vld [vmem:[#allocation18 + $0x138] sm:$0xf0] }
 0x654   : > { %3126 = vmatpush.bf16.msrb.mxu2 %v4417_v24  ;;  %v4489_v32 = vor.u32 %v4758_v27, %v4486_v30  ;;  %v4401_v55 = vor.u32 %v4736_v42, %v4398_v31  ;;  %v2201_v42 = vperm.slane %v5825_v41, 3 }
 0x655   : > { %3138 = vmatpush.bf16.msrb.mxu3 %v4497_v16 }
 0x657   : > { %3099 = vmatpush.bf16.msrb.mxu0 %v4281_v49  ;;  %3113 = vmatpush.bf16.msrb.mxu1 %v4345_v4  ;;  %v4321_v49 = vor.u32 %v4716_v47, %v4318_v48  ;;  %v2199_v4 = vperm.slane %v5825_v41, 1 }
 0x658   : > { %3127 = vmatpush.bf16.msrb.mxu2 %v4409_v46  ;;  %v4438_v46 = vld [vmem:[#allocation18 + $0x188] sm:$0xf0] }
 0x659   : > { %3139 = vmatpush.bf16.msrb.mxu3 %v4489_v32  ;;  %v4441_v48 = vor.u32 %v4746_v44, %v4438_v46 }
 0x65b   : > { %3100 = vmatpush.bf16.msrb.mxu0 %v4273_v34  ;;  %3114 = vmatpush.bf16.msrb.mxu1 %v4337_v13  ;;  %v4313_v34 = vor.u32 %v4714_v56, %v4310_v58  ;;  %v4454_v13 = vld [vmem:[#allocation18 + $0x1a8] sm:$0xf0] }
 0x65c   : > { %3128 = vmatpush.bf16.msrb.mxu2 %v4401_v55  ;;  %v4457_v16 = vor.u32 %v4750_v39, %v4454_v13  ;;  %v2714_v39 = vld [vmem:[%s5954_s3] sm:$0x3] }
 0x65d   : > { %3140 = vmatpush.bf16.msrb.mxu3 %v4481_v51 }
 0x65f   : > { %3101 = vmatpush.bf16.msrb.mxu0 %v4265_v7  ;;  %3115 = vmatpush.bf16.msrb.mxu1 %v4329_v54 }
 0x660   : > { %3129 = vmatpush.bf16.msrb.mxu2 %v4393_v62 }
 0x661   : > { %3141 = vmatpush.bf16.msrb.mxu3 %v4473_v21 }
 0x663   : > { %3102 = vmatpush.bf16.msrb.mxu0 %v4257_v20  ;;  %3116 = vmatpush.bf16.msrb.mxu1 %v4321_v49 }
 0x664   : > { %3130 = vmatpush.bf16.msrb.mxu2 %v4385_v12  ;;  %v2717_v12 = vperm.slane %v2714_v39, 1 }
 0x665   : > { %3142 = vmatpush.bf16.msrb.mxu3 %v4465_v6 }
 0x667   : > { %3103 = vmatpush.bf16.msrb.mxu0 %v4249_v43  ;;  %3117 = vmatpush.bf16.msrb.mxu1 %v4313_v34  ;;  %v2200_v43 = vperm.slane %v5825_v41, 2 }
 0x668   : > { %3131 = vmatpush.bf16.msrb.mxu2 %v4377_v23 }
 0x669   : > { %3143 = vmatpush.bf16.msrb.mxu3 %v4457_v16 }
 0x66d   : > { %3144 = vmatpush.bf16.msrb.mxu3 %v4449_v26 }
 0x671   : > { %3145 = vmatpush.bf16.msrb.mxu3 %v4441_v48 }
 0x6a6   : > { %v2535_v50 = vpop.f32.mrf.mxu0  ;;  %v2549_v37 = vpop.f32.mrf.mxu1 }
 0x6a7   : > { %v2536_v61 = vadd.f32 %v2535_v50, %v2198_v53 }
 0x6a9   : > { %v2550_v10 = vadd.f32 %v2549_v37, %v2536_v61 }
 0x6ab   : > { %v2638_v24 = vmax.f32 %v2550_v10, 0.0  ;;  %v2716_v10 = vperm.slane %v2714_v39, 0 }
 0x6ad   : > { %v2563_v29 = vpop.f32.mrf.mxu2  ;;  %v2577_v5 = vpop.f32.mrf.mxu3 }
 0x6ae   : > { %v2537_v7 = vpop.f32.mrf.mxu0  ;;  %v2551_v8 = vpop.f32.mrf.mxu1  ;;  %v2564_v20 = vadd.f32 %v2563_v29, %v2199_v4 }
 0x6af   : > { %v2538_v11 = vadd.f32 %v2537_v7, %v2198_v53 }
 0x6b0   : > { %v2578_v32 = vadd.f32 %v2577_v5, %v2564_v20 }
 0x6b1   : > { %v2552_v17 = vadd.f32 %v2551_v8, %v2538_v11 }
 0x6b2   : > { %v2639_v45 = vmax.f32 %v2578_v32, 0.0 }
 0x6b3   : > { %v2642_v25 = vmax.f32 %v2552_v17, 0.0 }
 0x6b5   : > { %v2646_v27 = vpack.c.bf16 %v2642_v25, %v2638_v24  ;;  %v2565_v54 = vpop.f32.mrf.mxu2  ;;  %v2579_v30 = vpop.f32.mrf.mxu3 }
 0x6b6   : > { %v2566_v57 = vadd.f32 %v2565_v54, %v2199_v4  ;;  %v2591_v36 = vpop.f32.mrf.mxu0  ;;  %v2605_v40 = vpop.f32.mrf.mxu1 }
 0x6b7   : > { %3048 = vmatmul.bf16.vlgmr.msra.gmra.mxu0 %v2646_v27  ;;  %v2592_v33 = vadd.f32 %v2591_v36, %v2200_v43 }
 0x6b8   : > { %v2580_v47 = vadd.f32 %v2579_v30, %v2566_v57 }
 0x6b9   : > { %v2606_v53 = vadd.f32 %v2605_v40, %v2592_v33 }
 0x6ba   : > { %v2643_v49 = vmax.f32 %v2580_v47, 0.0 }
 0x6bb   : > { %v2640_v34 = vmax.f32 %v2606_v53, 0.0 }
 0x6bc   : > { %v2647_v50 = vpack.c.bf16 %v2643_v49, %v2639_v45 }
 0x6bd   : > { %v2619_v37 = vpop.f32.mrf.mxu2  ;;  %v2633_v51 = vpop.f32.mrf.mxu3 }
 0x6be   : > { %3062 = vmatmul.bf16.vlgmr.msra.gmra.mxu1 %v2647_v50  ;;  %v2593_v31 = vpop.f32.mrf.mxu0  ;;  %v2607_v56 = vpop.f32.mrf.mxu1  ;;  %v2620_v59 = vadd.f32 %v2619_v37, %v2201_v42 }
 0x6bf   : > { %v2594_v55 = vadd.f32 %v2593_v31, %v2200_v43 }
 0x6c0   : > { %v2634_v22 = vadd.f32 %v2633_v51, %v2620_v59 }
 0x6c1   : > { %v2608_v58 = vadd.f32 %v2607_v56, %v2594_v55 }
 0x6c2   : > { %v2641_v28 = vmax.f32 %v2634_v22, 0.0 }
 0x6c3   : > { %v2644_v38 = vmax.f32 %v2608_v58, 0.0 }
 0x6c5   : > { %v2648_v21 = vpack.c.bf16 %v2644_v38, %v2640_v34  ;;  %v2621_v60 = vpop.f32.mrf.mxu2  ;;  %v2635_v62 = vpop.f32.mrf.mxu3 }
 0x6c6   : > { %v2622_v61 = vadd.f32 %v2621_v60, %v2201_v42 }
 0x6c7   : > { %3076 = vmatmul.bf16.vlgmr.msra.gmra.mxu2 %v2648_v21  ;;  %3104 = vmatmul.bf16.vlgmr.msrb.gmra.mxu0 %v2646_v27 }
 0x6c8   : > { %v2636_v0 = vadd.f32 %v2635_v62, %v2622_v61 }
 0x6ca   : > { %v2645_v4 = vmax.f32 %v2636_v0, 0.0 }
 0x6cc   : > { %v2649_v41 = vpack.c.bf16 %v2645_v4, %v2641_v28 }
 0x6ce   : > { %3090 = vmatmul.bf16.vlgmr.msra.gmra.mxu3 %v2649_v41  ;;  %3118 = vmatmul.bf16.vlgmr.msrb.gmra.mxu1 %v2647_v50 }
 0x6d7   : > { %3132 = vmatmul.bf16.vlgmr.msrb.gmra.mxu2 %v2648_v21 }
 0x6de   : > { %3146 = vmatmul.bf16.vlgmr.msrb.gmra.mxu3 %v2649_v41 }
 0x734   : > { %v3049_v29 = vpop.f32.mrf.mxu0 }
 0x735   : > { %v3050_v15 = vadd.f32 %v3049_v29, %v2716_v10 }
 0x73b   : > { %v3063_v5 = vpop.f32.mrf.mxu1 }
 0x73c   : > { %v3051_v7 = vpop.f32.mrf.mxu0  ;;  %v3064_v17 = vadd.f32 %v3063_v5, %v3050_v15 }
 0x73d   : > { %v3052_v27 = vadd.f32 %v3051_v7, %v2716_v10 }
 0x743   : > { %v3065_v8 = vpop.f32.mrf.mxu1 }
 0x744   : > { %v3105_v11 = vpop.f32.mrf.mxu0  ;;  %v3066_v32 = vadd.f32 %v3065_v8, %v3052_v27 }
 0x745   : > { %v3106_v52 = vadd.f32 %v3105_v11, %v2717_v12 }
 0x74a   : > { %v3077_v6 = vpop.f32.mrf.mxu2 }
 0x74b   : > { %v3119_v13 = vpop.f32.mrf.mxu1  ;;  %v3078_v19 = vadd.f32 %v3077_v6, %v3064_v17  ;;  %v3156_v6 = vld [vmem:[%s5955_s16] sm:$0x3] }
 0x74c   : > { %v3120_v20 = vadd.f32 %v3119_v13, %v3106_v52  ;;  %v3107_v25 = vpop.f32.mrf.mxu0  ;;  %v3209_v39 = vperm.slane %v3156_v6, 0  ;;  %v3210_v10 = vperm.slane %v3156_v6, 1 }
 0x74d   : > { %v3108_v57 = vadd.f32 %v3107_v25, %v2717_v12 }
 0x751   : > { %v3091_v35 = vpop.f32.mrf.mxu3 }
 0x752   : > { %v3079_v9 = vpop.f32.mrf.mxu2  ;;  %v3092_v23 = vadd.f32 %v3091_v35, %v3078_v19  ;;  %v3157_v35 = vld [vmem:[%s5956_s13] sm:$0x3] }
 0x753   : > { %v3121_v30 = vpop.f32.mrf.mxu1  ;;  %v3080_v44 = vadd.f32 %v3079_v9, %v3066_v32  ;;  %v3218_v13 = vperm.slane %v3157_v35, 0 }
 0x754   : > { %v3152_v36 = vadd.f32 %v3092_v23, %v5810_v1  ;;  %v3122_v46 = vadd.f32 %v3121_v30, %v3108_v57 }
 0x759   : > { %v3093_v14 = vpop.f32.mrf.mxu3 }
 0x75a   : > { %v3133_v16 = vpop.f32.mrf.mxu2  ;;  %v3094_v48 = vadd.f32 %v3093_v14, %v3080_v44  ;;  %v3219_v14 = vperm.slane %v3157_v35, 1 }
 0x75b   : > { %v3134_v24 = vadd.f32 %v3133_v16, %v3120_v20 }
 0x75c   : > { %v3154_v50 = vadd.f32 %v3094_v48, %v5812_v63 }
 0x761   : > { %v3147_v26 = vpop.f32.mrf.mxu3 }
 0x762   : > { %v3148_v54 = vadd.f32 %v3147_v26, %v3134_v24  ;;  %v3135_v43 = vpop.f32.mrf.mxu2 }
 0x763   : > { %v3136_v45 = vadd.f32 %v3135_v43, %v3122_v46 }
 0x764   : > { %v3153_v40 = vadd.f32 %v3148_v54, %v5814_v2 }
 0x766   : > { %v3158_v47 = vadd.f32 %v3153_v40, %v3152_v36 }
 0x768   : > { %3159 = vadd.xlane.f32.xlu0 %v3158_v47 }
 0x769   : > { %v3149_v49 = vpop.f32.mrf.mxu3 }
 0x76a   : > { %v3150_v33 = vadd.f32 %v3149_v49, %v3136_v45 }
 0x76c   : > { %v3155_v37 = vadd.f32 %v3150_v33, %v5816_v3 }
 0x76e   : > { %v3161_v51 = vadd.f32 %v3155_v37, %v3154_v50 }
 0x770   : > { %3162 = vadd.xlane.f32.xlu0 %v3161_v51 }
 0x7db   : > { %v3160_v42 = vpop.xlane.xlu0 %3159 }
 0x7dc   : > { %v3164_v1 = vmul.f32 %v3160_v42, %v5774_v18 }
 0x7de   : > { %v3166_v31 = vsub.f32 %v3152_v36, %v3164_v1  ;;  %v3167_v2 = vsub.f32 %v3153_v40, %v3164_v1 }
 0x7e0   : > { %v3170_v53 = vmul.f32 %v3166_v31, %v3166_v31  ;;  %v3171_v55 = vmul.f32 %v3167_v2, %v3167_v2 }
 0x7e2   : > { %v3174_v56 = vadd.f32 %v3171_v55, %v3170_v53 }
 0x7e3   : > { %v3163_v58 = vpop.xlane.xlu0 %3162 }
 0x7e4   : > { %v3165_v59 = vmul.f32 %v3163_v58, %v5774_v18  ;;  %3175 = vadd.xlane.f32.xlu0 %v3174_v56 }
 0x7e6   : > { %v3168_v34 = vsub.f32 %v3154_v50, %v3165_v59  ;;  %v3169_v38 = vsub.f32 %v3155_v37, %v3165_v59 }
 0x7e8   : > { %v3172_v21 = vmul.f32 %v3168_v34, %v3168_v34  ;;  %v3173_v63 = vmul.f32 %v3169_v38, %v3169_v38 }
 0x7ea   : > { %v3177_v60 = vadd.f32 %v3173_v63, %v3172_v21 }
 0x7ec   : > { %3178 = vadd.xlane.f32.xlu1 %v3177_v60 }
 0x857   : > { %v3176_v3 = vpop.xlane.xlu0 %3175 }
 0x858   : > { %v3180_v22 = vmul.f32 %v3176_v3, %v5774_v18 }
 0x85a   : > { %v3182_v61 = vadd.f32 1e-06, %v3180_v22 }
 0x85c   : > { %4939 = vrsqrt.f32 %v3182_v61  ;;  %vm3190_vm13 = vweird.f32 %v3182_v61 }
 0x85f   : > { %v3179_v62 = vpop.xlane.xlu1 %3178 }
 0x860   : > { %v3181_v0 = vmul.f32 %v3179_v62, %v5774_v18 }
 0x862   : > { %v4940_v28 = vpop.eup %4939  ;;  %v3183_v4 = vadd.f32 1e-06, %v3181_v0 }
 0x863   : > { %v3185_v41 = vmul.f32 %v4940_v28, %v3182_v61  ;;  %vm3191_vm12 = vweird.f32 %v4940_v28 }
 0x864   : > { %4941 = vrsqrt.f32 %v3183_v4  ;;  %vm3192_vm14 = vmor %vm3190_vm13, %vm3191_vm12  ;;  %vm3200_vm0 = vweird.f32 %v3183_v4 }
 0x865   : > { %v3186_v29 = vmul.f32 %v4940_v28, %v3185_v41 }
 0x867   : > { %v3187_v5 = vmul.f32 0.5, %v3186_v29 }
 0x869   : > { %v3188_v7 = vsub.f32 1.5, %v3187_v5 }
 0x86a   : > { %v4942_v8 = vpop.eup %4941 }
 0x86b   : > { %v3189_v9 = vmul.f32 %v4940_v28, %v3188_v7  ;;  %v3195_v18 = vmul.f32 %v4942_v8, %v3183_v4  ;;  %vm3201_vm15 = vweird.f32 %v4942_v8 }
 0x86c   : > { %vm3202_vm1 = vmor %vm3200_vm0, %vm3201_vm15 }
 0x86d   : > { %v3193_v11 = vsel %vm3192_vm14, %v4940_v28, %v3189_v9  ;;  %v3196_v12 = vmul.f32 %v4942_v8, %v3195_v18 }
 0x86e   : > { %v3204_v15 = vmul.f32 %v3193_v11, %v3166_v31  ;;  %v3205_v16 = vmul.f32 %v3193_v11, %v3167_v2 }
 0x86f   : > { %v3197_v17 = vmul.f32 0.5, %v3196_v12 }
 0x870   : > { %v3213_v52 = vmul.f32 %v3209_v39, %v3204_v15  ;;  %v3214_v19 = vmul.f32 %v3210_v10, %v3205_v16 }
 0x871   : > { %v3198_v20 = vsub.f32 1.5, %v3197_v17 }
 0x872   : > { %v3222_v23 = vadd.f32 %v3218_v13, %v3213_v52  ;;  %v3223_v24 = vadd.f32 %v3219_v14, %v3214_v19 }
 0x873   : > { %v3199_v25 = vmul.f32 %v4942_v8, %v3198_v20 }
 0x874   : > { %3226 = vst [vmem:[%s705_s23] sm:$0xff] %v3222_v23 }
 0x875   : > { %3227 = vst [vmem:[%s705_s23 + $0x8] sm:$0xff] %v3223_v24  ;;  %v3203_v26 = vsel %vm3202_vm1, %v4942_v8, %v3199_v25 }
 0x876   : > { %v3206_v27 = vmul.f32 %v3203_v26, %v3168_v34  ;;  %v3207_v54 = vmul.f32 %v3203_v26, %v3169_v38 }
 0x878   : > { %v3215_v30 = vmul.f32 %v3209_v39, %v3206_v27  ;;  %v3216_v32 = vmul.f32 %v3210_v10, %v3207_v54 }
 0x87a   : > { %v3224_v57 = vadd.f32 %v3218_v13, %v3215_v30  ;;  %v3225_v36 = vadd.f32 %v3219_v14, %v3216_v32 }
 0x87c   : > { %3228 = vst [vmem:[%s705_s23 + $0x10] sm:$0xff] %v3224_v57 }
 0x87d   : > { %3229 = vst [vmem:[%s705_s23 + $0x18] sm:$0xff] %v3225_v36 }
 0x87e   : > { %5274 = shalt.err (!%p5271_p9)
}
 0x87f   : > { %s5351_s1 = smov 256   ;;  %s5352_s28 = smov 16  }
 0x880   : > { %4797 = dma.vmem_to_hbm [thread:$0]  (%p5512_p0), %s3244_s5, 512, %s3246_s25, %s3231_s0, %s5351_s1, %s5351_s1, %s5352_s28  }
 0x881 PF: > { %s5959_s16 = sld [smem:[#allocation28_spill]]  ;;  %p5961_p2 = scmp.ge.s32.totalorder %s5333_s21, 2 }
 0x883   : > { %p4832_p4 = pnand %p5961_p2, %p5520_p5 }
 0x885   : > { %p4833_p13 = pneg %p4832_p4 }
 0x887   : > { %s3260_s30 = sand.u32 1, %s5959_s16  }
 0x888   : > { %s3261_s13 = scalar_lea.sflag [#allocation5], %s3260_s30 }
 0x889   : > { %5316 = dma.done.wait (%p4833_p13), %s3261_s13, 512  }
 0x88a   : > { %5318 = vsyncadd (%p4833_p13), %s3261_s13, 4294966784  ;;  %s5962_s21 = sld [smem:[#allocation30_spill]]  ;;  %s5965_s18 = smov %s5325_s19 }
 0x88b   : > { %s5963_s26 = sld [smem:[#allocation29_spill]] }
 0x88c   : > { %s5964_s20 = sld [smem:[#allocation31_spill]] }
 0x890   : > { %p35_p1 = scmp.ge.s32.totalorder %s5962_s21, 4  }
 0x891   : > { %s5966_s19 = smov %s5963_s26 }
 0x892   :  { %37 = sbr.rel (!%p35_p1) target bundleno = 22 (0x16), region = 180 }
 0x897   :  { %3267 = vsyncpa [#allocation4], 1 }
 0x898   :  { %3269 = vsyncpa [#allocation4 + $0x1], 1 }
 0x899   :  { %3270 = vsyncpa [#allocation7], 1 }
 0x89a   :  { %3272 = vsyncpa [#allocation7 + $0x1], 1 }
 0x89b   :  { %3273 = vsyncpa [#allocation10], 1 }
 0x89c   :  { %3274 = vsyncpa [#allocation13], 1 }
 0x89d   :  { %3275 = vsyncpa [#allocation16], 1 }
 0x89e   :  { %3276 = vsyncpa [#allocation19], 1 }
 0x89f   :  { %3277 = vsyncpa [#allocation5], 1 }
 0x8a0   :  { %3279 = vsyncpa [#allocation5 + $0x1], 1 }

// kernel: tpu_custom_call.1
= control target key start
LH: loop header
LB: loop body
LE: loop exit
PB: predicated region body
PF: predicated region fallthrough
CT: control target
= control target key end

     0   :  { %s5883_s0 = inlined_call_operand.hbm [shape: f32[2,16,256], index: 0, kind: input, shape index: {}]   ;;  %s5884_s1 = inlined_call_operand.hbm [shape: s32[2,1,16,16], index: 1, kind: input, shape index: {}]   ;;  %s5885_s2 = inlined_call_operand.hbm [shape: f32[2,4,16,16], index: 2, kind: input, shape index: {}]   ;;  %s5886_s3 = inlined_call_operand.hbm [shape: bf16[256,768], index: 3, kind: input, shape index: {}]   ;;  %s5887_s4 = inlined_call_operand.hbm [shape: f32[1,768], index: 4, kind: input, shape index: {}]   ;;  %s5888_s5 = inlined_call_operand.hbm [shape: bf16[256,256], index: 5, kind: input, shape index: {}]   ;;  %s5889_s6 = inlined_call_operand.vmem [shape: f32[1,256], index: 6, kind: input, shape index: {}]   ;;  %s5890_s7 = inlined_call_operand.hbm [shape: f32[1,256], index: 7, kind: input, shape index: {}]   ;;  %s5891_s8 = inlined_call_operand.hbm [shape: f32[1,256], index: 8, kind: input, shape index: {}]   ;;  %s5892_s9 = inlined_call_operand.hbm [shape: bf16[256,512], index: 9, kind: input, shape index: {}]   ;;  %s5893_s10 = inlined_call_operand.vmem [shape: f32[1,512], index: 10, kind: input, shape index: {}]   ;;  %s5894_s11 = inlined_call_operand.hbm [shape: bf16[512,256], index: 11, kind: input, shape index: {}]   ;;  %s5895_s12 = inlined_call_operand.vmem [shape: f32[1,256], index: 12, kind: input, shape index: {}]   ;;  %s5896_s13 = inlined_call_operand.vmem [shape: f32[1,256], index: 13, kind: input, shape index: {}]   ;;  %s5897_s14 = inlined_call_operand.vmem [shape: f32[1,256], index: 14, kind: input, shape index: {}]   ;;  %s5898_s15 = inlined_call_operand.hbm [shape: f32[2,16,256], index: 15, kind: output, shape index: {}]  }
   0x1   :  { %5914 = sst [smem:[#allocation34_spill]] %s5883_s0 }
   0x2   :  { %5915 = sst [smem:[#allocation35_spill]] %s5884_s1 }
   0x3   :  { %5916 = sst [smem:[#allocation36_spill]] %s5886_s3 }
   0x4   :  { %5917 = sst [smem:[#allocation37_spill]] %s5888_s5 }
   0x5   :  { %5918 = sst [smem:[#allocation38_spill]] %s5891_s8 }
   0x6   :  { %5919 = sst [smem:[#allocation39_spill]] %s5893_s10 }
   0x7   :  { %5920 = sst [smem:[#allocation40_spill]] %s5895_s12 }
   0x8   :  { %5921 = sst [smem:[#allocation41_spill]] %s5896_s13 }
   0x9   :  { %5922 = sst [smem:[#allocation42_spill]] %s5897_s14 }
   0xa   :  { %5923 = sst [smem:[#allocation43_spill]] %s5898_s15 }
   0xb   :  { %20 = vsyncpa [#allocation4], 0 }
   0xc   :  { %22 = vsyncpa [#allocation4 + $0x1], 0 }
   0xd   :  { %23 = vsyncpa [#allocation7], 0 }
   0xe   :  { %25 = vsyncpa [#allocation7 + $0x1], 0 }
   0xf   :  { %26 = vsyncpa [#allocation10], 0 }
  0x10   :  { %27 = vsyncpa [#allocation13], 0 }
  0x11   :  { %28 = vsyncpa [#allocation16], 0 }
  0x12   :  { %29 = vsyncpa [#allocation19], 0 }
  0x13   :  { %30 = vsyncpa [#allocation5], 0 }
  0x14   :  { %32 = vsyncpa [#allocation5 + $0x1], 0  ;;  %s5433_s18 = smov 0   ;;  %s5435_s19 = smov 0  }
  0x15   :  { %s5437_s20 = smov 0   ;;  %s5439_s21 = smov 0  }
  0x16 LB: > { %5924 = sst [smem:[#allocation28_spill]] %s5321_s18  ;;  %s5457_s25 = sadd.s32 4294967295, %s5333_s21   ;;  %s5333_s21 = sphi %s5439_s21, %s5962_s21   ;;  %s5329_s20 = sphi %s5437_s20, %s5964_s20   ;;  %s5325_s19 = sphi %s5435_s19, %s5966_s19   ;;  %s5321_s18 = sphi %s5433_s18, %s5965_s18  }
  0x17   : > { %5925 = sst [smem:[#allocation29_spill]] %s5329_s20  ;;  %p3430_p0 = scmp.ge.s32.totalorder %s5333_s21, 1 }
  0x18   : > { %s5926_s3 = sld [smem:[#allocation36_spill]]  ;;  %p5911_p1 = scmp.eq.s32.totalorder %s5457_s25, 0 }
  0x19   : > { %p399_p2 = scmp.lt.s32.totalorder %s5333_s21, 3  ;;  %s5335_s27 = smov [#allocation9]  }
  0x1a   : > { %s412_s28 = sshll.u32 %s5335_s27, 4  ;;  %s5928_s5 = sld [smem:[#allocation37_spill]]  ;;  %s413_s28 = int_to_ptr.vmem [resolvable:$true] %s412_s28 }
  0x1b   : > { %p5462_p3 = pnand %p3430_p0, %p399_p2  ;;  %s5336_s22 = smov [#allocation12]  }
  0x1c   : > { %s438_s23 = sshll.u32 %s5336_s22, 4  ;;  %s5337_s27 = smov 384   ;;  %s439_s23 = int_to_ptr.vmem [resolvable:$true] %s438_s23 }
  0x1d   : > { %p4799_p4 = pneg %p5462_p3  ;;  %s5900_s29 = smov 128  }
  0x1e   : > { %s410_s24 = sshll.u32 %s5926_s3, 4  ;;  %s5338_s3 = smov 24   ;;  %s411_s24 = int_to_ptr.hbm [resolvable:$true] %s410_s24 }
  0x1f   : > { %p5474_p6 = pnand %p4799_p4, %p5911_p1  ;;  %s5902_s30 = smov 8  }
  0x20   : > { %s436_s16 = sshll.u32 %s5928_s5, 4  ;;  %s5930_s8 = sld [smem:[#allocation38_spill]]  ;;  %s437_s16 = int_to_ptr.hbm [resolvable:$true] %s436_s16 }
  0x21   : > { %4802 = dma.hbm_to_vmem [thread:$0]  (!%p5474_p6), %s411_s24, 12288, %s413_s28, [#allocation10], %s5337_s27, %s5337_s27, %s5338_s3  }
  0x22   : > { %4808 = dma.hbm_to_vmem [thread:$0]  (!%p5474_p6), %s437_s16, 4096, %s439_s23, [#allocation13], %s5900_s29, %s5900_s29, %s5902_s30  }
  0x23   : > { %s5341_s3 = smov [#allocation15]   ;;  %s3429_s28 = sadd.s32 4294967294, %s5333_s21  }
  0x24   : > { %s468_s24 = sshll.u32 %s5341_s3, 4  ;;  %s5492_s27 = sadd.s32 1, %s5333_s21   ;;  %s469_s24 = int_to_ptr.vmem [resolvable:$true] %s468_s24 }
  0x25   : > { %5931 = sst [smem:[#allocation30_spill]] %s5492_s27  ;;  %s45_s16 = sadd.s32 1, %s5329_s20 }
  0x26   : > { %s466_s15 = sshll.u32 %s5930_s8, 4  ;;  %s42_s23 = ssub.s32 %s5333_s21, %s5492_s27  ;;  %s467_s15 = int_to_ptr.hbm [resolvable:$true] %s466_s15 }
  0x27   : > { %4814 = dma.hbm_to_vmem [thread:$0]  (!%p5474_p6), %s467_s15, 32, %s469_s24, [#allocation16]  }
  0x28   : > { %p52_p7 = scmp.ne.s32.totalorder %s5329_s20, %s5325_s19  ;;  %p43_p8 = scmp.eq.s32.totalorder %s42_s23, 0 }
  0x29   : > { %p53_p9 = scmp.eq.s32.totalorder %s5333_s21, 0  ;;  %p58_p10 = scmp.ne.s32.totalorder %s5325_s19, %s5321_s18 }
  0x2a   : > { %p386_p11 = scmp.eq.s32.totalorder %s5457_s25, 1  ;;  %p392_p2 = scmp.eq.s32.totalorder %s3429_s28, 1 }
  0x2b   : > { %s5504_s5 = scalar_select %p43_p8, %s5329_s20, %s45_s16  }
  0x2c   : > { %p54_p12 = por %p53_p9, %p52_p7  ;;  %p5508_p13 = por %p5911_p1, %p58_p10 }
  0x2d   : > { %5932 = sst [smem:[#allocation31_spill]] %s5504_s5  ;;  %p5512_p0 = por %p386_p11, %p52_p7 }
  0x2e   : > { %p4842_p4 = scmp.lt.s32.totalorder %s5333_s21, 2  ;;  %s5518_s3 = sand.u32 1, %s5329_s20  }
  0x2f   : > { %s5934_s22 = scalar_select %p5512_p0, 1, 0 }
  0x30   : > { %p5520_p5 = por %p392_p2, %p58_p10  ;;  %s541_s16 = sand.u32 1, %s5333_s21  }
  0x31   : > { %5935 = sst [smem:[#allocation32_spill]] %s5934_s22  ;;  %p5525_p8 = pnand %p4842_p4, %p54_p12 }
  0x32   : > { %s5936_s24 = scalar_select %p5520_p5, 1, 0 }
  0x33   : > { %s3442_s29 = sshll.u32 %s5518_s3, 4  ;;  %s4504_s30 = sshll.u32 %s5333_s21, 4 }
  0x34   : > { %5937 = sst [smem:[#allocation33_spill]] %s5936_s24  ;;  %s545_s20 = scalar_lea.vmem [#allocation6], %s3442_s29 }
  0x35   : > { %s5939_s1 = sld [smem:[#allocation35_spill]]  ;;  %s553_s27 = sshll.u32 %s545_s20, 4  ;;  %s554_s27 = int_to_ptr.vmem [resolvable:$true] %s553_s27 }
  0x36   : > { %s425_s14 = sshll.u32 %s5887_s4, 4  ;;  %s5537_s13 = scalar_lea.sflag [#allocation7], %s541_s16  ;;  %s426_s14 = int_to_ptr.hbm [resolvable:$true] %s425_s14 }
  0x37   : > { %p5041_p9 = pneg %p5525_p8 }
  0x3b   : > { %s550_s28 = scalar_lea.hbm %s5939_s1, %s4504_s30  ;;  %s5044_s29 = scalar_lea.hbm %s5939_s1, 32 }
  0x3c   : > { %s551_s18 = sshll.u32 %s550_s28, 4  ;;  %s552_s18 = int_to_ptr.hbm [resolvable:$true] %s551_s18 }
  0x3d   : > { %s5037_s12 = sshra.s32 %s552_s18, 4  ;;  %s5038_s12 = int_to_ptr.hbm [resolvable:$true] %s5037_s12 }
  0x3e   : > { %s5039_s10 = scalar_lea.hbm %s5038_s12, 16  ;;  %p5045_p12 = scmp.lt.s32.totalorder %s5038_s12, %s5939_s1 }
  0x3f   : > { %p5040_p7 = scmp.ne.s32.totalorder %s5038_s12, %s5039_s10  ;;  %p5046_p2 = scmp.lt.s32.totalorder %s5044_s29, %s5039_s10 }
  0x41   : > { %p5042_p10 = pnand %p5041_p9, %p5040_p7  ;;  %p5047_p4 = por %p5046_p2, %p5045_p12 }
  0x43   : > { %p5043_p11 = pneg %p5042_p10 }
  0x45   : > { %p5048_p1 = pnand %p5047_p4, %p5043_p11 }
  0x47   : > { %5051 = shalt.err (!%p5048_p1)
}
  0x48   : > { %s5940_s22 = smov 8   ;;  %s5941_s24 = smov 128  }
  0x49   : > { %4827 = dma.hbm_to_vmem [thread:$0]  (!%p5525_p8), %s552_s18, 256, %s554_s27, %s5537_s13, %s5941_s24, %s5941_s24, %s5940_s22  }
  0x4a   : > { %s5342_s16 = smov [#allocation11]   ;;  %s454_s10 = sshll.u32 %s5890_s7, 4  ;;  %s455_s10 = int_to_ptr.hbm [resolvable:$true] %s454_s10 }
  0x4b   : > { %s427_s28 = sshll.u32 %s5342_s16, 4  ;;  %s477_s30 = sshll.u32 %s5892_s9, 4  ;;  %s428_s28 = int_to_ptr.vmem [resolvable:$true] %s427_s28  ;;  %s478_s30 = int_to_ptr.hbm [resolvable:$true] %s477_s30 }
  0x4c   : > { %4805 = dma.hbm_to_vmem [thread:$0]  (!%p5474_p6), %s426_s14, 96, %s428_s28, [#allocation10]  }
  0x4d   : > { %s5343_s5 = smov [#allocation14]   ;;  %s5344_s18 = smov [#allocation17]  }
  0x4e   : > { %s456_s1 = sshll.u32 %s5343_s5, 4  ;;  %s479_s27 = sshll.u32 %s5344_s18, 4  ;;  %s457_s1 = int_to_ptr.vmem [resolvable:$true] %s456_s1  ;;  %s480_s27 = int_to_ptr.vmem [resolvable:$true] %s479_s27 }
  0x4f   : > { %4811 = dma.hbm_to_vmem [thread:$0]  (!%p5474_p6), %s455_s10, 32, %s457_s1, [#allocation13]  }
  0x50   : > { %s5912_s16 = smov 256   ;;  %s5913_s8 = smov 16  }
  0x51   : > { %4817 = dma.hbm_to_vmem [thread:$0]  (!%p5474_p6), %s478_s30, 8192, %s480_s27, [#allocation16], %s5912_s16, %s5912_s16, %s5913_s8  }
  0x52   : > { %s494_s20 = sshll.u32 %s5894_s11, 4  ;;  %s5347_s12 = smov [#allocation18]   ;;  %s495_s20 = int_to_ptr.hbm [resolvable:$true] %s494_s20 }
  0x53   : > { %s496_s29 = sshll.u32 %s5347_s12, 4  ;;  %s3439_s1 = sshll.u32 %s5518_s3, 5  ;;  %s497_s29 = int_to_ptr.vmem [resolvable:$true] %s496_s29 }
  0x54   : > { %4820 = dma.hbm_to_vmem [thread:$0]  (!%p5474_p6), %s495_s20, 8192, %s497_s29, [#allocation19], %s5941_s24, %s5941_s24, %s5940_s22  }
  0x55   : > { %s4503_s10 = sshll.u32 %s5333_s21, 5  ;;  %s5942_s0 = sld [smem:[#allocation34_spill]] }
  0x56   : > { %s523_s16 = scalar_lea.vmem [#allocation3], %s3439_s1  ;;  %s520_s28 = scalar_lea.sflag [#allocation4], %s5518_s3 }
  0x57   : > { %s531_s14 = sshll.u32 %s523_s16, 4  ;;  %s532_s14 = int_to_ptr.vmem [resolvable:$true] %s531_s14 }
  0x5b   : > { %s528_s30 = scalar_lea.hbm %s5942_s0, %s4503_s10  ;;  %s5194_s29 = scalar_lea.hbm %s5942_s0, 64 }
  0x5c   : > { %s529_s27 = sshll.u32 %s528_s30, 4  ;;  %s530_s27 = int_to_ptr.hbm [resolvable:$true] %s529_s27 }
  0x5d   : > { %s5187_s12 = sshra.s32 %s530_s27, 4  ;;  %s5188_s12 = int_to_ptr.hbm [resolvable:$true] %s5187_s12 }
  0x5e   : > { %s5189_s8 = scalar_lea.hbm %s5188_s12, 32  ;;  %p5195_p10 = scmp.lt.s32.totalorder %s5188_s12, %s5942_s0 }
  0x5f   : > { %p5190_p1 = scmp.ne.s32.totalorder %s5188_s12, %s5189_s8  ;;  %p5196_p11 = scmp.lt.s32.totalorder %s5194_s29, %s5189_s8 }
  0x61   : > { %p5192_p7 = pnand %p5190_p1, %p5041_p9  ;;  %p5197_p12 = por %p5196_p11, %p5195_p10 }
  0x63   : > { %p5193_p6 = pneg %p5192_p7 }
  0x65   : > { %p5198_p2 = pnand %p5197_p12, %p5193_p6 }
  0x67   : > { %5201 = shalt.err (!%p5198_p2)
}
  0x68   : > { %s5943_s16 = smov 16   ;;  %s5944_s1 = smov 256  }
  0x69   : > { %4824 = dma.hbm_to_vmem [thread:$0]  (!%p5525_p8), %s530_s27, 512, %s532_s14, %s520_s28, %s5944_s1, %s5944_s1, %s5943_s16  }
  0x6a   : > { %s3445_s18 = sshll.u32 %s5518_s3, 6  ;;  %s4505_s30 = sshll.u32 %s5333_s21, 6 }
  0x6b   : > { %s572_s5 = scalar_lea.hbm %s5885_s2, %s4505_s30  ;;  %s567_s8 = scalar_lea.vmem [#allocation8], %s3445_s18 }
  0x6c   : > { %s573_s12 = sshll.u32 %s572_s5, 4  ;;  %s575_s29 = sshll.u32 %s567_s8, 4  ;;  %s574_s12 = int_to_ptr.hbm [resolvable:$true] %s573_s12  ;;  %s576_s29 = int_to_ptr.vmem [resolvable:$true] %s575_s29 }
  0x6d   : > { %s5217_s10 = sshra.s32 %s574_s12, 4  ;;  %s5224_s14 = scalar_lea.hbm %s5885_s2, 128  ;;  %s5218_s10 = int_to_ptr.hbm [resolvable:$true] %s5217_s10 }
  0x6e   : > { %s5219_s0 = scalar_lea.hbm %s5218_s10, 64  ;;  %p5225_p6 = scmp.lt.s32.totalorder %s5218_s10, %s5885_s2 }
  0x6f   : > { %p5220_p4 = scmp.ne.s32.totalorder %s5218_s10, %s5219_s0  ;;  %p5226_p10 = scmp.lt.s32.totalorder %s5224_s14, %s5219_s0 }
  0x71   : > { %p5222_p1 = pnand %p5220_p4, %p5041_p9  ;;  %p5227_p11 = por %p5226_p10, %p5225_p6 }
  0x73   : > { %p5223_p7 = pneg %p5222_p1 }
  0x75   : > { %p5228_p12 = pnand %p5227_p11, %p5223_p7 }
  0x77   : > { %5231 = shalt.err (!%p5228_p12)
}
  0x78   : > { %4830 = dma.hbm_to_vmem [thread:$0]  (!%p5525_p8), %s574_s12, 1024, %s576_s29, %s5537_s13, %s5941_s24, %s5941_s24, %s5940_s22  }
  0x79   : > { %587 = sbr.rel (%p5462_p3) target bundleno = 2177 (0x881), region = 80  ;;  %s5622_s1 = sand.u32 (!%p5462_p3), 1, %s5325_s19  }
  0x7a   : > { %s3449_s0 = sshll.u32 (!%p5462_p3), %s5622_s1, 5  ;;  %s590_s18 = scalar_lea.sflag (!%p5462_p3), [#allocation4], %s5622_s1 }
  0x7b   : > { %s5628_s30 = scalar_lea.vmem (!%p5462_p3), [#allocation3], %s3449_s0 }
  0x7e   : > { %5292 = dma.done.wait (%p5508_p13), %s590_s18, 512  }
  0x7f   : > { %5294 = vsyncadd (%p5508_p13), %s590_s18, 4294966784  ;;  %s599_s13 = sand.u32 1, %s5457_s25   ;;  %s3450_s26 = sshll.u32 %s5622_s1, 4 }
  0x80   : > { %s600_s23 = scalar_lea.sflag [#allocation7], %s599_s13  ;;  %s5636_s22 = scalar_lea.vmem [#allocation6], %s3450_s26 }
  0x81   : > { %5296 = dma.done.wait (%p5508_p13), %s600_s23, 1280  }
  0x82   : > { %5298 = vsyncadd (%p5508_p13), %s600_s23, 4294966016  ;;  %s3451_s24 = sshll.u32 %s5622_s1, 6  ;;  %p5945_p3 = scmp.eq.s32.totalorder %s5457_s25, 0 }
  0x83   : > { %s5643_s17 = scalar_lea.vmem [#allocation8], %s3451_s24 }
  0x84   : > { %5300 = dma.done.wait (%p5945_p3), [#allocation10], 12384   ;;  %p5946_p8 = pmov %p5945_p3 }
  0x85   : > { %p5947_p9 = pmov %p5945_p3 }
  0x86   : > { %5302 = vsyncadd (%p5946_p8), [#allocation10], 4294954912 }
  0x87   : > { %5304 = dma.done.wait (%p5947_p9), [#allocation13], 4128   ;;  %p5948_p2 = pmov %p5945_p3 }
  0x89   : > { %5306 = vsyncadd (%p5948_p2), [#allocation13], 4294963168  ;;  %p5949_p4 = pmov %p5948_p2 }
  0x8a   : > { %p5950_p13 = pmov %p5948_p2 }
  0x8b   : > { %5308 = dma.done.wait (%p5949_p4), [#allocation16], 8224  }
  0x8c   : > { %5310 = vsyncadd (%p5950_p13), [#allocation16], 4294959072  ;;  %p5951_p1 = pmov %p5948_p2 }
  0x8e   : > { %5312 = dma.done.wait (%p5951_p1), [#allocation19], 8192   ;;  %p5952_p7 = pmov %p5951_p1 }
  0x8f   : > { %v3630_v0 = vld [vmem:[#allocation9 + $0x150] sm:$0xf]  ;;  %v4551_v1 = vld [vmem:[#allocation9 + $0x164] sm:$0xf0]  ;;  %v4548_v5 = vld [vmem:[#allocation9 + $0x154] sm:$0xf] }
  0x90   : > { %5314 = vsyncadd (%p5952_p7), [#allocation19], 4294959104  ;;  %v3822_v2 = vld [vmem:[#allocation9 + $0x2d0] sm:$0xf]  ;;  %v3631_v3 = vor.u32 %v4551_v1, %v3630_v0  ;;  %v4599_v4 = vld [vmem:[#allocation9 + $0x2e4] sm:$0xf0] }
  0x91   : > { %v3632_v6 = vld [vmem:[#allocation9 + $0x168] sm:$0xf0]  ;;  %v3823_v7 = vor.u32 %v4599_v4, %v3822_v2  ;;  %v4596_v9 = vld [vmem:[#allocation9 + $0x2d4] sm:$0xf]  ;;  %v3606_v11 = vld [vmem:[#allocation9 + $0x120] sm:$0xf] }
  0x92   : > { %v3635_v8 = vor.u32 %v4548_v5, %v3632_v6  ;;  %v3824_v10 = vld [vmem:[#allocation9 + $0x2e8] sm:$0xf0]  ;;  %1303 = vmatpush.bf16.msra.mxu0 %v3631_v3  ;;  %v4545_v13 = vld [vmem:[#allocation9 + $0x134] sm:$0xf0]  ;;  %v3798_v14 = vld [vmem:[#allocation9 + $0x2a0] sm:$0xf] }
  0x93   : > { %v3827_v12 = vor.u32 %v4596_v9, %v3824_v10  ;;  %v4593_v15 = vld [vmem:[#allocation9 + $0x2b4] sm:$0xf0]  ;;  %1317 = vmatpush.bf16.msra.mxu1 %v3823_v7  ;;  %v3607_v16 = vor.u32 %v4545_v13, %v3606_v11  ;;  %v4542_v18 = vld [vmem:[#allocation9 + $0x124] sm:$0xf]  ;;  %v3608_v19 = vld [vmem:[#allocation9 + $0x138] sm:$0xf0] }
  0x94   : > { %1331 = vmatpush.bf16.msra.mxu2 %v3635_v8  ;;  %v3799_v17 = vor.u32 %v4593_v15, %v3798_v14  ;;  %v4590_v20 = vld [vmem:[#allocation9 + $0x2a4] sm:$0xf]  ;;  %v3611_v21 = vor.u32 %v4542_v18, %v3608_v19  ;;  %v3800_v22 = vld [vmem:[#allocation9 + $0x2b8] sm:$0xf0]  ;;  %v3582_v23 = vld [vmem:[#allocation9 + $0xf0] sm:$0xf] }
  0x95   : > { %1345 = vmatpush.bf16.msra.mxu3 %v3827_v12  ;;  %v4539_v24 = vld [vmem:[#allocation9 + $0x104] sm:$0xf0]  ;;  %v3803_v25 = vor.u32 %v4590_v20, %v3800_v22  ;;  %v3774_v26 = vld [vmem:[#allocation9 + $0x270] sm:$0xf]  ;;  %v4536_v28 = vld [vmem:[#allocation9 + $0xf4] sm:$0xf] }
  0x96   : > { %v4587_v27 = vld [vmem:[#allocation9 + $0x284] sm:$0xf0]  ;;  %1304 = vmatpush.bf16.msra.mxu0 %v3607_v16  ;;  %v3583_v29 = vor.u32 %v4539_v24, %v3582_v23  ;;  %v3584_v30 = vld [vmem:[#allocation9 + $0x108] sm:$0xf0]  ;;  %v4584_v31 = vld [vmem:[#allocation9 + $0x274] sm:$0xf] }
  0x97   : > { %v3776_v32 = vld [vmem:[#allocation9 + $0x288] sm:$0xf0]  ;;  %1318 = vmatpush.bf16.msra.mxu1 %v3799_v17  ;;  %v3775_v33 = vor.u32 %v4587_v27, %v3774_v26  ;;  %v3587_v34 = vor.u32 %v4536_v28, %v3584_v30  ;;  %v3558_v35 = vld [vmem:[#allocation9 + $0xc0] sm:$0xf]  ;;  %v4533_v36 = vld [vmem:[#allocation9 + $0xd4] sm:$0xf0] }
  0x98   : > { %1332 = vmatpush.bf16.msra.mxu2 %v3611_v21  ;;  %v3750_v37 = vld [vmem:[#allocation9 + $0x240] sm:$0xf]  ;;  %v3779_v38 = vor.u32 %v4584_v31, %v3776_v32  ;;  %v4581_v39 = vld [vmem:[#allocation9 + $0x254] sm:$0xf0]  ;;  %v4530_v40 = vld [vmem:[#allocation9 + $0xc4] sm:$0xf]  ;;  %v3559_v44 = vor.u32 %v4533_v36, %v3558_v35 }
  0x99   : > { %1346 = vmatpush.bf16.msra.mxu3 %v3803_v25  ;;  %v3560_v41 = vld [vmem:[#allocation9 + $0xd8] sm:$0xf0]  ;;  %v4578_v42 = vld [vmem:[#allocation9 + $0x244] sm:$0xf]  ;;  %v3751_v45 = vor.u32 %v4581_v39, %v3750_v37  ;;  %v3534_v47 = vld [vmem:[#allocation9 + $0x90] sm:$0xf] }
  0x9a   : > { %v3752_v43 = vld [vmem:[#allocation9 + $0x258] sm:$0xf0]  ;;  %1305 = vmatpush.bf16.msra.mxu0 %v3583_v29  ;;  %v3563_v46 = vor.u32 %v4530_v40, %v3560_v41  ;;  %v4527_v48 = vld [vmem:[#allocation9 + $0xa4] sm:$0xf0]  ;;  %v3726_v49 = vld [vmem:[#allocation9 + $0x210] sm:$0xf] }
  0x9b   : > { %1319 = vmatpush.bf16.msra.mxu1 %v3775_v33  ;;  %v3755_v50 = vor.u32 %v4578_v42, %v3752_v43  ;;  %v4575_v51 = vld [vmem:[#allocation9 + $0x224] sm:$0xf0]  ;;  %v4524_v52 = vld [vmem:[#allocation9 + $0x94] sm:$0xf]  ;;  %v3536_v53 = vld [vmem:[#allocation9 + $0xa8] sm:$0xf0]  ;;  %v3535_v56 = vor.u32 %v4527_v48, %v3534_v47 }
  0x9c   : > { %1333 = vmatpush.bf16.msra.mxu2 %v3587_v34  ;;  %v4572_v54 = vld [vmem:[#allocation9 + $0x214] sm:$0xf]  ;;  %v3728_v55 = vld [vmem:[#allocation9 + $0x228] sm:$0xf0]  ;;  %v3727_v57 = vor.u32 %v4575_v51, %v3726_v49  ;;  %v3539_v58 = vor.u32 %v4524_v52, %v3536_v53  ;;  %v3510_v59 = vld [vmem:[#allocation9 + $0x60] sm:$0xf] }
  0x9d   : > { %1347 = vmatpush.bf16.msra.mxu3 %v3779_v38  ;;  %v4521_v60 = vld [vmem:[#allocation9 + $0x74] sm:$0xf0]  ;;  %v3702_v61 = vld [vmem:[#allocation9 + $0x1e0] sm:$0xf]  ;;  %v3731_v62 = vor.u32 %v4572_v54, %v3728_v55  ;;  %v4518_v0 = vld [vmem:[#allocation9 + $0x64] sm:$0xf] }
  0x9e   : > { %1306 = vmatpush.bf16.msra.mxu0 %v3559_v44  ;;  %v4569_v63 = vld [vmem:[#allocation9 + $0x1f4] sm:$0xf0]  ;;  %v3512_v1 = vld [vmem:[#allocation9 + $0x78] sm:$0xf0]  ;;  %v4566_v2 = vld [vmem:[#allocation9 + $0x1e4] sm:$0xf]  ;;  %v3511_v4 = vor.u32 %v4521_v60, %v3510_v59 }
  0x9f   : > { %1320 = vmatpush.bf16.msra.mxu1 %v3751_v45  ;;  %v3704_v3 = vld [vmem:[#allocation9 + $0x1f8] sm:$0xf0]  ;;  %v3703_v5 = vor.u32 %v4569_v63, %v3702_v61  ;;  %v3515_v6 = vor.u32 %v4518_v0, %v3512_v1  ;;  %v3486_v7 = vld [vmem:[#allocation9 + $0x30] sm:$0xf]  ;;  %v4515_v8 = vld [vmem:[#allocation9 + $0x44] sm:$0xf0] }
  0xa0   : > { %1334 = vmatpush.bf16.msra.mxu2 %v3563_v46  ;;  %v3678_v9 = vld [vmem:[#allocation9 + $0x1b0] sm:$0xf]  ;;  %v3707_v10 = vor.u32 %v4566_v2, %v3704_v3  ;;  %v4563_v11 = vld [vmem:[#allocation9 + $0x1c4] sm:$0xf0]  ;;  %v4512_v12 = vld [vmem:[#allocation9 + $0x34] sm:$0xf]  ;;  %v3487_v16 = vor.u32 %v4515_v8, %v3486_v7 }
  0xa1   : > { %1348 = vmatpush.bf16.msra.mxu3 %v3755_v50  ;;  %v3488_v13 = vld [vmem:[#allocation9 + $0x48] sm:$0xf0]  ;;  %v4560_v14 = vld [vmem:[#allocation9 + $0x1b4] sm:$0xf]  ;;  %v3462_v17 = vld [vmem:[#allocation9] sm:$0xf]  ;;  %v3679_v20 = vor.u32 %v4563_v11, %v3678_v9 }
  0xa2   : > { %1307 = vmatpush.bf16.msra.mxu0 %v3535_v56  ;;  %v3680_v15 = vld [vmem:[#allocation9 + $0x1c8] sm:$0xf0]  ;;  %v4509_v18 = vld [vmem:[#allocation9 + $0x14] sm:$0xf0]  ;;  %v3654_v19 = vld [vmem:[#allocation9 + $0x180] sm:$0xf]  ;;  %v3491_v21 = vor.u32 %v4512_v12, %v3488_v13 }
  0xa3   : > { %1321 = vmatpush.bf16.msra.mxu1 %v3727_v57  ;;  %v4557_v22 = vld [vmem:[#allocation9 + $0x194] sm:$0xf0]  ;;  %v4506_v23 = vld [vmem:[#allocation9 + $0x4] sm:$0xf]  ;;  %v3464_v24 = vld [vmem:[#allocation9 + $0x18] sm:$0xf0]  ;;  %v3683_v25 = vor.u32 %v4560_v14, %v3680_v15  ;;  %v3463_v32 = vor.u32 %v4509_v18, %v3462_v17 }
  0xa4   : > { %1335 = vmatpush.bf16.msra.mxu2 %v3539_v58  ;;  %v3638_v26 = vld [vmem:[#allocation9 + $0x158] sm:$0xf]  ;;  %v4552_v27 = vld [vmem:[#allocation9 + $0x16c] sm:$0xf0]  ;;  %v4549_v30 = vld [vmem:[#allocation9 + $0x15c] sm:$0xf]  ;;  %v3655_v36 = vor.u32 %v4557_v22, %v3654_v19  ;;  %v3467_v37 = vor.u32 %v4506_v23, %v3464_v24 }
  0xa5   : > { %1349 = vmatpush.bf16.msra.mxu3 %v3731_v62  ;;  %v3830_v28 = vld [vmem:[#allocation9 + $0x2d8] sm:$0xf]  ;;  %v4600_v29 = vld [vmem:[#allocation9 + $0x2ec] sm:$0xf0]  ;;  %v3640_v31 = vld [vmem:[#allocation9 + $0x170] sm:$0xf0]  ;;  %v3639_v41 = vor.u32 %v4552_v27, %v3638_v26 }
  0xa6   : > { %1308 = vmatpush.bf16.msra.mxu0 %v3511_v4  ;;  %v4554_v33 = vld [vmem:[#allocation9 + $0x184] sm:$0xf]  ;;  %v3656_v34 = vld [vmem:[#allocation9 + $0x198] sm:$0xf0]  ;;  %v3832_v38 = vld [vmem:[#allocation9 + $0x2f0] sm:$0xf0]  ;;  %v3831_v42 = vor.u32 %v4600_v29, %v3830_v28  ;;  %v3643_v46 = vor.u32 %v4549_v30, %v3640_v31 }
  0xa7   : > { %1322 = vmatpush.bf16.msra.mxu1 %v3703_v5  ;;  %v4597_v35 = vld [vmem:[#allocation9 + $0x2dc] sm:$0xf]  ;;  %v707_v39 = vld [vmem:[%s5628_s30] sm:$0xff]  ;;  %v709_v40 = vld [vmem:[%s5628_s30 + $0x10] sm:$0xff]  ;;  %v3659_v47 = vor.u32 %v4554_v33, %v3656_v34  ;;  %vm1482_vm0 = vcmask 523264   ;;  %s5348_s15 = smov 64  }
  0xa8   : > { %1336 = vmatpush.bf16.msra.mxu2 %v3515_v6  ;;  %v3614_v43 = vld [vmem:[#allocation9 + $0x128] sm:$0xf]  ;;  %v710_v45 = vld [vmem:[%s5628_s30 + $0x18] sm:$0xff]  ;;  %v4546_v48 = vld [vmem:[#allocation9 + $0x13c] sm:$0xf0]  ;;  %v3835_v51 = vor.u32 %v4597_v35, %v3832_v38  ;;  %v5665_v54 = vpack.c.bf16 %v709_v40, %v707_v39  ;;  %vm1505_vm2 = vcmask 130048  }
  0xa9   : > { %1350 = vmatpush.bf16.msra.mxu3 %v3707_v10  ;;  %v708_v44 = vld [vmem:[%s5628_s30 + $0x8] sm:$0xff]  ;;  %v4594_v50 = vld [vmem:[#allocation9 + $0x2bc] sm:$0xf0]  ;;  %v3616_v53 = vld [vmem:[#allocation9 + $0x140] sm:$0xf0]  ;;  %v3615_v58 = vor.u32 %v4546_v48, %v3614_v43  ;;  %vm1631_vm4 = vcmask 1048064  }
  0xaa   : > { %1309 = vmatpush.bf16.msra.mxu0 %v3487_v16  ;;  %v3806_v49 = vld [vmem:[#allocation9 + $0x2a8] sm:$0xf]  ;;  %v4543_v52 = vld [vmem:[#allocation9 + $0x12c] sm:$0xf]  ;;  %v3808_v56 = vld [vmem:[#allocation9 + $0x2c0] sm:$0xf0]  ;;  %v5667_v57 = vpack.c.bf16 %v710_v45, %v708_v44 }
  0xab   : > { %1323 = vmatpush.bf16.msra.mxu1 %v3679_v20  ;;  %v4591_v55 = vld [vmem:[#allocation9 + $0x2ac] sm:$0xf]  ;;  %v3807_v59 = vor.u32 %v4594_v50, %v3806_v49  ;;  %v3590_v60 = vld [vmem:[#allocation9 + $0xf8] sm:$0xf]  ;;  %v3619_v61 = vor.u32 %v4543_v52, %v3616_v53  ;;  %v4540_v62 = vld [vmem:[#allocation9 + $0x10c] sm:$0xf0] }
  0xac   : > { %1337 = vmatpush.bf16.msra.mxu2 %v3491_v21  ;;  %v3782_v63 = vld [vmem:[#allocation9 + $0x278] sm:$0xf]  ;;  %v4588_v0 = vld [vmem:[#allocation9 + $0x28c] sm:$0xf0]  ;;  %v3811_v1 = vor.u32 %v4591_v55, %v3808_v56  ;;  %v4537_v2 = vld [vmem:[#allocation9 + $0xfc] sm:$0xf]  ;;  %v3591_v6 = vor.u32 %v4540_v62, %v3590_v60 }
  0xad   : > { %1351 = vmatpush.bf16.msra.mxu3 %v3683_v25  ;;  %v3592_v3 = vld [vmem:[#allocation9 + $0x110] sm:$0xf0]  ;;  %v4585_v4 = vld [vmem:[#allocation9 + $0x27c] sm:$0xf]  ;;  %v3783_v7 = vor.u32 %v4588_v0, %v3782_v63  ;;  %v3566_v8 = vld [vmem:[#allocation9 + $0xc8] sm:$0xf] }
  0xae   : > { %1310 = vmatpush.bf16.msra.mxu0 %v3463_v32  ;;  %v3784_v5 = vld [vmem:[#allocation9 + $0x290] sm:$0xf0]  ;;  %v3595_v9 = vor.u32 %v4537_v2, %v3592_v3  ;;  %v4534_v10 = vld [vmem:[#allocation9 + $0xdc] sm:$0xf0]  ;;  %v3758_v11 = vld [vmem:[#allocation9 + $0x248] sm:$0xf] }
  0xaf   : > { %1324 = vmatpush.bf16.msra.mxu1 %v3655_v36  ;;  %v4582_v12 = vld [vmem:[#allocation9 + $0x25c] sm:$0xf0]  ;;  %v3787_v13 = vor.u32 %v4585_v4, %v3784_v5  ;;  %v4531_v14 = vld [vmem:[#allocation9 + $0xcc] sm:$0xf]  ;;  %v3568_v15 = vld [vmem:[#allocation9 + $0xe0] sm:$0xf0]  ;;  %v3567_v18 = vor.u32 %v4534_v10, %v3566_v8 }
  0xb0   : > { %1338 = vmatpush.bf16.msra.mxu2 %v3467_v37  ;;  %v4579_v16 = vld [vmem:[#allocation9 + $0x24c] sm:$0xf]  ;;  %v3760_v17 = vld [vmem:[#allocation9 + $0x260] sm:$0xf0]  ;;  %v3759_v19 = vor.u32 %v4582_v12, %v3758_v11  ;;  %v3542_v20 = vld [vmem:[#allocation9 + $0x98] sm:$0xf]  ;;  %v3571_v21 = vor.u32 %v4531_v14, %v3568_v15 }
  0xb1   : > { %1352 = vmatpush.bf16.msra.mxu3 %v3659_v47  ;;  %1311 = vmatmul.bf16.vlgmr.msra.gmra.mxu0 %v5665_v54  ;;  %v4528_v22 = vld [vmem:[#allocation9 + $0xac] sm:$0xf0]  ;;  %v3734_v23 = vld [vmem:[#allocation9 + $0x218] sm:$0xf]  ;;  %v3763_v25 = vor.u32 %v4579_v16, %v3760_v17  ;;  %v4525_v26 = vld [vmem:[#allocation9 + $0x9c] sm:$0xf] }
  0xb2   : > { %1359 = vmatpush.bf16.msrb.mxu0 %v3639_v41  ;;  %1325 = vmatmul.bf16.vlgmr.msra.gmra.mxu1 %v5667_v57  ;;  %v4576_v24 = vld [vmem:[#allocation9 + $0x22c] sm:$0xf0]  ;;  %v3544_v27 = vld [vmem:[#allocation9 + $0xb0] sm:$0xf0]  ;;  %v4573_v28 = vld [vmem:[#allocation9 + $0x21c] sm:$0xf]  ;;  %v3543_v30 = vor.u32 %v4528_v22, %v3542_v20 }
  0xb3   : > { %1373 = vmatpush.bf16.msrb.mxu1 %v3831_v42  ;;  %1339 = vmatmul.bf16.vlgmr.msra.gmra.mxu2 %v5665_v54  ;;  %v3736_v29 = vld [vmem:[#allocation9 + $0x230] sm:$0xf0]  ;;  %v3735_v31 = vor.u32 %v4576_v24, %v3734_v23  ;;  %v3518_v32 = vld [vmem:[#allocation9 + $0x68] sm:$0xf]  ;;  %v3547_v33 = vor.u32 %v4525_v26, %v3544_v27  ;;  %v4522_v34 = vld [vmem:[#allocation9 + $0x7c] sm:$0xf0] }
  0xb4   : > { %1387 = vmatpush.bf16.msrb.mxu2 %v3643_v46  ;;  %1353 = vmatmul.bf16.vlgmr.msra.gmra.mxu3 %v5667_v57  ;;  %v3710_v35 = vld [vmem:[#allocation9 + $0x1e8] sm:$0xf]  ;;  %v4570_v36 = vld [vmem:[#allocation9 + $0x1fc] sm:$0xf0]  ;;  %v3739_v37 = vor.u32 %v4573_v28, %v3736_v29  ;;  %v4519_v38 = vld [vmem:[#allocation9 + $0x6c] sm:$0xf]  ;;  %v3519_v42 = vor.u32 %v4522_v34, %v3518_v32 }
  0xb5   : > { %1401 = vmatpush.bf16.msrb.mxu3 %v3835_v51  ;;  %v3520_v39 = vld [vmem:[#allocation9 + $0x80] sm:$0xf0]  ;;  %v4567_v40 = vld [vmem:[#allocation9 + $0x1ec] sm:$0xf]  ;;  %v3711_v43 = vor.u32 %v4570_v36, %v3710_v35  ;;  %v3494_v44 = vld [vmem:[#allocation9 + $0x38] sm:$0xf] }
  0xb6   : > { %1360 = vmatpush.bf16.msrb.mxu0 %v3615_v58  ;;  %v3712_v41 = vld [vmem:[#allocation9 + $0x200] sm:$0xf0]  ;;  %v3523_v45 = vor.u32 %v4519_v38, %v3520_v39  ;;  %v4516_v46 = vld [vmem:[#allocation9 + $0x4c] sm:$0xf0]  ;;  %v3686_v47 = vld [vmem:[#allocation9 + $0x1b8] sm:$0xf] }
  0xb7   : > { %1374 = vmatpush.bf16.msrb.mxu1 %v3807_v59  ;;  %v4564_v48 = vld [vmem:[#allocation9 + $0x1cc] sm:$0xf0]  ;;  %v3715_v49 = vor.u32 %v4567_v40, %v3712_v41  ;;  %v4513_v50 = vld [vmem:[#allocation9 + $0x3c] sm:$0xf]  ;;  %v3496_v51 = vld [vmem:[#allocation9 + $0x50] sm:$0xf0]  ;;  %v3495_v55 = vor.u32 %v4516_v46, %v3494_v44 }
  0xb8   : > { %1388 = vmatpush.bf16.msrb.mxu2 %v3619_v61  ;;  %v4561_v52 = vld [vmem:[#allocation9 + $0x1bc] sm:$0xf]  ;;  %v3688_v53 = vld [vmem:[#allocation9 + $0x1d0] sm:$0xf0]  ;;  %v3687_v56 = vor.u32 %v4564_v48, %v3686_v47  ;;  %v3470_v58 = vld [vmem:[#allocation9 + $0x8] sm:$0xf]  ;;  %v3499_v59 = vor.u32 %v4513_v50, %v3496_v51 }
  0xb9   : > { %1402 = vmatpush.bf16.msrb.mxu3 %v3811_v1  ;;  %v4510_v60 = vld [vmem:[#allocation9 + $0x1c] sm:$0xf0]  ;;  %v3662_v61 = vld [vmem:[#allocation9 + $0x188] sm:$0xf]  ;;  %v3691_v63 = vor.u32 %v4561_v52, %v3688_v53  ;;  %v4507_v0 = vld [vmem:[#allocation9 + $0xc] sm:$0xf] }
  0xba   : > { %1361 = vmatpush.bf16.msrb.mxu0 %v3591_v6  ;;  %v4558_v62 = vld [vmem:[#allocation9 + $0x19c] sm:$0xf0]  ;;  %v3472_v1 = vld [vmem:[#allocation9 + $0x20] sm:$0xf0]  ;;  %v4555_v2 = vld [vmem:[#allocation9 + $0x18c] sm:$0xf]  ;;  %v3471_v4 = vor.u32 %v4510_v60, %v3470_v58 }
  0xbb   : > { %1375 = vmatpush.bf16.msrb.mxu1 %v3783_v7  ;;  %v3664_v3 = vld [vmem:[#allocation9 + $0x1a0] sm:$0xf0]  ;;  %v3663_v5 = vor.u32 %v4558_v62, %v3662_v61  ;;  %v3475_v6 = vor.u32 %v4507_v0, %v3472_v1  ;;  %v3646_v8 = vld [vmem:[#allocation9 + $0x160] sm:$0xf]  ;;  %v3622_v11 = vld [vmem:[#allocation9 + $0x130] sm:$0xf] }
  0xbc   : > { %1389 = vmatpush.bf16.msrb.mxu2 %v3595_v9  ;;  %v3667_v7 = vor.u32 %v4555_v2, %v3664_v3  ;;  %v4553_v9 = vld [vmem:[#allocation9 + $0x174] sm:$0xf0]  ;;  %v4547_v12 = vld [vmem:[#allocation9 + $0x144] sm:$0xf0]  ;;  %v3598_v14 = vld [vmem:[#allocation9 + $0x100] sm:$0xf] }
  0xbd   : > { %1403 = vmatpush.bf16.msrb.mxu3 %v3787_v13  ;;  %v3647_v10 = vor.u32 %v4553_v9, %v3646_v8  ;;  %v3623_v13 = vor.u32 %v4547_v12, %v3622_v11  ;;  %v4541_v15 = vld [vmem:[#allocation9 + $0x114] sm:$0xf0]  ;;  %v3574_v17 = vld [vmem:[#allocation9 + $0xd0] sm:$0xf]  ;;  %v3550_v20 = vld [vmem:[#allocation9 + $0xa0] sm:$0xf] }
  0xbe   : > { %1362 = vmatpush.bf16.msrb.mxu0 %v3567_v18  ;;  %v3599_v16 = vor.u32 %v4541_v15, %v3598_v14  ;;  %v4535_v18 = vld [vmem:[#allocation9 + $0xe4] sm:$0xf0]  ;;  %v3526_v23 = vld [vmem:[#allocation9 + $0x70] sm:$0xf]  ;;  %v3502_v26 = vld [vmem:[#allocation9 + $0x40] sm:$0xf] }
  0xbf   : > { %1376 = vmatpush.bf16.msrb.mxu1 %v3759_v19  ;;  %v3575_v19 = vor.u32 %v4535_v18, %v3574_v17  ;;  %v4523_v24 = vld [vmem:[#allocation9 + $0x84] sm:$0xf0]  ;;  %v4517_v27 = vld [vmem:[#allocation9 + $0x54] sm:$0xf0]  ;;  %v3478_v29 = vld [vmem:[#allocation9 + $0x10] sm:$0xf] }
  0xc0   : > { %1390 = vmatpush.bf16.msrb.mxu2 %v3571_v21  ;;  %v4529_v21 = vld [vmem:[#allocation9 + $0xb4] sm:$0xf0]  ;;  %v3503_v28 = vor.u32 %v4517_v27, %v3502_v26  ;;  %v4550_v48 = vld [vmem:[#allocation9 + $0x164] sm:$0xf]  ;;  %v3840_v53 = vld [vmem:[#allocation9 + $0x2f8] sm:$0xf0] }
  0xc1   : > { %1404 = vmatpush.bf16.msrb.mxu3 %v3763_v25  ;;  %v3551_v22 = vor.u32 %v4529_v21, %v3550_v20  ;;  %v3527_v25 = vor.u32 %v4523_v24, %v3526_v23  ;;  %v4598_v50 = vld [vmem:[#allocation9 + $0x2e4] sm:$0xf]  ;;  %v4592_v61 = vld [vmem:[#allocation9 + $0x2b4] sm:$0xf]  ;;  %v3816_v62 = vld [vmem:[#allocation9 + $0x2c8] sm:$0xf0] }
  0xc2   : > { %1363 = vmatpush.bf16.msrb.mxu0 %v3543_v30  ;;  %v4511_v30 = vld [vmem:[#allocation9 + $0x24] sm:$0xf0]  ;;  %v3843_v60 = vor.u32 %v4598_v50, %v3840_v53  ;;  %v4601_v2 = vld [vmem:[#allocation9 + $0x2f4] sm:$0xf0]  ;;  %v3600_v8 = vld [vmem:[#allocation9 + $0x118] sm:$0xf0] }
  0xc3   : > { %1377 = vmatpush.bf16.msrb.mxu1 %v3735_v31  ;;  %v3479_v31 = vor.u32 %v4511_v30, %v3478_v29  ;;  %v3814_v9 = vld [vmem:[#allocation9 + $0x2b0] sm:$0xf]  ;;  %v4586_v11 = vld [vmem:[#allocation9 + $0x284] sm:$0xf]  ;;  %v3792_v12 = vld [vmem:[#allocation9 + $0x298] sm:$0xf0] }
  0xc4   : > { %1391 = vmatpush.bf16.msrb.mxu2 %v3547_v33  ;;  %v4589_v20 = vld [vmem:[#allocation9 + $0x294] sm:$0xf0]  ;;  %v3795_v23 = vor.u32 %v4586_v11, %v3792_v12  ;;  %v4532_v24 = vld [vmem:[#allocation9 + $0xd4] sm:$0xf]  ;;  %v3694_v11 = vld [vmem:[#allocation9 + $0x1c0] sm:$0xf] }
  0xc5   : > { %1405 = vmatpush.bf16.msrb.mxu3 %v3739_v37  ;;  %v4565_v12 = vld [vmem:[#allocation9 + $0x1d4] sm:$0xf0]  ;;  %s5953_s29 = sld [smem:[#allocation39_spill]]  ;;  %s4762_s26 = sshll.u32 %s5457_s25, 5 }
  0xc6   : > { %1364 = vmatpush.bf16.msrb.mxu0 %v3519_v42  ;;  %v5690_v42 = vld [vmem:[#allocation11] sm:$0x3f]  ;;  %s5954_s3 = sld [smem:[#allocation40_spill]]  ;;  %s705_s23 = scalar_lea.vmem [#allocation20], %s3449_s0 }
  0xc7   : > { %1378 = vmatpush.bf16.msrb.mxu1 %v3711_v43  ;;  %v813_v43 = vperm.slane %v5690_v42, 2  ;;  %v811_v44 = vperm.slane %v5690_v42, 0  ;;  %v812_v26 = vperm.slane %v5690_v42, 1  ;;  %s5955_s16 = sld [smem:[#allocation41_spill]]  ;;  %s3243_s5 = sshll.u32 %s705_s23, 4  ;;  %s3244_s5 = int_to_ptr.vmem [resolvable:$true] %s3243_s5 }
  0xc8   : > { %1392 = vmatpush.bf16.msrb.mxu2 %v3523_v45  ;;  %v814_v45 = vperm.slane %v5690_v42, 3  ;;  %s5956_s13 = sld [smem:[#allocation42_spill]]  ;;  %s3231_s0 = scalar_lea.sflag [#allocation5], %s5622_s1 }
  0xc9   : > { %1406 = vmatpush.bf16.msrb.mxu3 %v3715_v49  ;;  %v3648_v49 = vld [vmem:[#allocation9 + $0x178] sm:$0xf0] }
  0xca   : > { %1365 = vmatpush.bf16.msrb.mxu0 %v3495_v55  ;;  %v3651_v52 = vor.u32 %v4550_v48, %v3648_v49  ;;  %v4544_v55 = vld [vmem:[#allocation9 + $0x134] sm:$0xf]  ;;  %v3552_v48 = vld [vmem:[#allocation9 + $0xb8] sm:$0xf0] }
  0xcb   : > { %1379 = vmatpush.bf16.msrb.mxu1 %v3687_v56  ;;  %v3624_v56 = vld [vmem:[#allocation9 + $0x148] sm:$0xf0] }
  0xcc   : > { %1393 = vmatpush.bf16.msrb.mxu2 %v3499_v59  ;;  %v3627_v1 = vor.u32 %v4544_v55, %v3624_v56 }
  0xcd   : > { %1407 = vmatpush.bf16.msrb.mxu3 %v3691_v63  ;;  %v3838_v63 = vld [vmem:[#allocation9 + $0x2e0] sm:$0xf] }
  0xce   : > { %1366 = vmatpush.bf16.msrb.mxu0 %v3471_v4 }
  0xcf   : > { %1380 = vmatpush.bf16.msrb.mxu1 %v3663_v5  ;;  %v3819_v5 = vor.u32 %v4592_v61, %v3816_v62 }
  0xd0   : > { %1394 = vmatpush.bf16.msrb.mxu2 %v3475_v6  ;;  %v3839_v6 = vor.u32 %v4601_v2, %v3838_v63  ;;  %v4568_v63 = vld [vmem:[#allocation9 + $0x1f4] sm:$0xf] }
  0xd1   : > { %1408 = vmatpush.bf16.msrb.mxu3 %v3667_v7  ;;  %1367 = vmatmul.bf16.vlgmr.msrb.gmra.mxu0 %v5665_v54  ;;  %v4538_v7 = vld [vmem:[#allocation9 + $0x104] sm:$0xf] }
  0xd2   : > { %1381 = vmatmul.bf16.vlgmr.msrb.gmra.mxu1 %v5667_v57  ;;  %1415 = vmatpush.bf16.msra.mxu0 %v3647_v10  ;;  %v3603_v18 = vor.u32 %v4538_v7, %v3600_v8 }
  0xd3   : > { %1395 = vmatmul.bf16.vlgmr.msrb.gmra.mxu2 %v5665_v54  ;;  %1429 = vmatpush.bf16.msra.mxu1 %v3839_v6  ;;  %v3504_v6 = vld [vmem:[#allocation9 + $0x58] sm:$0xf0] }
  0xd4   : > { %1409 = vmatmul.bf16.vlgmr.msrb.gmra.mxu3 %v5667_v57  ;;  %1443 = vmatpush.bf16.msra.mxu2 %v3651_v52  ;;  %v3744_v52 = vld [vmem:[#allocation9 + $0x238] sm:$0xf0] }
  0xd5   : > { %1457 = vmatpush.bf16.msra.mxu3 %v3843_v60 }
  0xd6   : > { %1416 = vmatpush.bf16.msra.mxu0 %v3623_v13  ;;  %v4595_v13 = vld [vmem:[#allocation9 + $0x2c4] sm:$0xf0] }
  0xd7   : > { %v3815_v17 = vor.u32 %v4595_v13, %v3814_v9  ;;  %v3696_v9 = vld [vmem:[#allocation9 + $0x1d8] sm:$0xf0]  ;;  %v4508_v13 = vld [vmem:[#allocation9 + $0x14] sm:$0xf] }
  0xd8   : > { %1444 = vmatpush.bf16.msra.mxu2 %v3627_v1 }
  0xd9   : > { %1458 = vmatpush.bf16.msra.mxu3 %v3819_v5  ;;  %1430 = vmatpush.bf16.msra.mxu1 %v3815_v17  ;;  %v4514_v5 = vld [vmem:[#allocation9 + $0x44] sm:$0xf]  ;;  %v3672_v17 = vld [vmem:[#allocation9 + $0x1a8] sm:$0xf0] }
  0xda   : > { %1417 = vmatpush.bf16.msra.mxu0 %v3599_v16 }
  0xdc   : > { %1445 = vmatpush.bf16.msra.mxu2 %v3603_v18  ;;  %v3695_v18 = vor.u32 %v4565_v12, %v3694_v11 }
  0xdd   : > { %1459 = vmatpush.bf16.msra.mxu3 %v3795_v23 }
  0xde   : > { %1418 = vmatpush.bf16.msra.mxu0 %v3575_v19  ;;  %v3790_v19 = vld [vmem:[#allocation9 + $0x280] sm:$0xf] }
  0xe2   : > { %1419 = vmatpush.bf16.msra.mxu0 %v3551_v22 }
  0xe6   : > { %1420 = vmatpush.bf16.msra.mxu0 %v3527_v25  ;;  %v3576_v25 = vld [vmem:[#allocation9 + $0xe8] sm:$0xf0] }
  0xea   : > { %1421 = vmatpush.bf16.msra.mxu0 %v3503_v28 }
  0xee   : > { %1422 = vmatpush.bf16.msra.mxu0 %v3479_v31 }
  0xf1   : > { %1423 = vmatmul.bf16.vlgmr.msra.gmra.mxu0 %v5665_v54 }
 0x12e   : > { %v1312_v32 = vpop.f32.mrf.mxu0 }
 0x12f   : > { %v5678_v33 = vpop.f32.mrf.mxu1  ;;  %v1313_v14 = vadd.f32 %v1312_v32, %v811_v44  ;;  %v4580_v32 = vld [vmem:[#allocation9 + $0x254] sm:$0xf] }
 0x131   : > { %v1327_v29 = vadd.f32 %v5678_v33, %v1313_v14  ;;  %v3480_v14 = vld [vmem:[#allocation9 + $0x28] sm:$0xf0] }
 0x136   : > { %v5680_v34 = vpop.f32.mrf.mxu2  ;;  %v1314_v36 = vpop.f32.mrf.mxu0 }
 0x137   : > { %v5682_v35 = vpop.f32.mrf.mxu3  ;;  %v5684_v37 = vpop.f32.mrf.mxu1  ;;  %v1315_v15 = vadd.f32 %v1314_v36, %v811_v44  ;;  %v3768_v36 = vld [vmem:[#allocation9 + $0x268] sm:$0xf0]  ;;  %v3766_v44 = vld [vmem:[#allocation9 + $0x250] sm:$0xf] }
 0x138   : > { %v3771_v50 = vor.u32 %v4580_v32, %v3768_v36 }
 0x139   : > { %v1329_v30 = vadd.f32 %v5684_v37, %v1315_v15 }
 0x13a   : > { %1460 = vmatpush.bf16.msra.mxu3 %v3771_v50 }
 0x13b   : > { %v1477_v37 = vpack.c.bf16 %v1329_v30, %v1327_v29  ;;  %v815_v30 = vperm.slane %v5690_v42, 4 }
 0x13e   : > { %v5686_v38 = vpop.f32.mrf.mxu2 }
 0x13f   : > { %v5688_v39 = vpop.f32.mrf.mxu3  ;;  %v1343_v49 = vadd.f32 %v5686_v38, %v812_v26  ;;  %v3528_v38 = vld [vmem:[#allocation9 + $0x88] sm:$0xf0] }
 0x141   : > { %v1357_v61 = vadd.f32 %v5688_v39, %v1343_v49 }
 0x14e   : > { %v1368_v40 = vpop.f32.mrf.mxu0 }
 0x14f   : > { %v1382_v41 = vpop.f32.mrf.mxu1  ;;  %v1369_v46 = vadd.f32 %v1368_v40, %v813_v43  ;;  %v3791_v40 = vor.u32 %v4589_v20, %v3790_v19  ;;  %v3483_v19 = vor.u32 %v4508_v13, %v3480_v14  ;;  %v3670_v20 = vld [vmem:[#allocation9 + $0x190] sm:$0xf]  ;;  %v3855_v14 = vld [vmem:[%s5643_s17 + $0x38] sm:$0xff] }
 0x151   : > { %v1383_v3 = vadd.f32 %v1382_v41, %v1369_v46  ;;  %v4583_v46 = vld [vmem:[#allocation9 + $0x264] sm:$0xf0]  ;;  %1431 = vmatpush.bf16.msra.mxu1 %v3791_v40  ;;  %v816_v40 = vperm.slane %v5690_v42, 5  ;;  %v1471_v42 = vld [vmem:[%s5636_s22] sm:$0xff] }
 0x152   : > { %v3767_v53 = vor.u32 %v4583_v46, %v3766_v44  ;;  %vm1473_vm1 = vcmp.ne.s32.totalorder %v1471_v42, 0 }
 0x155   : > { %1432 = vmatpush.bf16.msra.mxu1 %v3767_v53  ;;  %v3846_v53 = vld [vmem:[%s5643_s17 + $0x10] sm:$0xff] }
 0x156   : > { %v1396_v47 = vpop.f32.mrf.mxu2  ;;  %v1370_v51 = vpop.f32.mrf.mxu0 }
 0x157   : > { %v1371_v58 = vadd.f32 %v1370_v51, %v813_v43  ;;  %v1410_v59 = vpop.f32.mrf.mxu3  ;;  %v1384_v0 = vpop.f32.mrf.mxu1  ;;  %v1397_v10 = vadd.f32 %v1396_v47, %v814_v45  ;;  %v3579_v43 = vor.u32 %v4532_v24, %v3576_v25  ;;  %v4526_v47 = vld [vmem:[#allocation9 + $0xa4] sm:$0xf] }
 0x158   : > { %v4574_v51 = vld [vmem:[#allocation9 + $0x224] sm:$0xf]  ;;  %v3555_v56 = vor.u32 %v4526_v47, %v3552_v48 }
 0x159   : > { %v1385_v4 = vadd.f32 %v1384_v0, %v1371_v58  ;;  %v1411_v27 = vadd.f32 %v1410_v59, %v1397_v10  ;;  %1446 = vmatpush.bf16.msra.mxu2 %v3579_v43  ;;  %v3742_v58 = vld [vmem:[#allocation9 + $0x220] sm:$0xf]  ;;  %v4577_v59 = vld [vmem:[#allocation9 + $0x234] sm:$0xf0]  ;;  %v3747_v62 = vor.u32 %v4574_v51, %v3744_v52  ;;  %v3720_v0 = vld [vmem:[#allocation9 + $0x208] sm:$0xf0]  ;;  %v3507_v10 = vor.u32 %v4514_v5, %v3504_v6 }
 0x15a   : > { %v3743_v1 = vor.u32 %v4577_v59, %v3742_v58  ;;  %v3723_v8 = vor.u32 %v4568_v63, %v3720_v0  ;;  %v5349_v58 = vmov 0.0   ;;  %v3854_v6 = vld [vmem:[%s5643_s17 + $0x30] sm:$0xff] }
 0x15b   : > { %v1478_v16 = vpack.c.bf16 %v1385_v4, %v1383_v3  ;;  %v3718_v3 = vld [vmem:[#allocation9 + $0x1f0] sm:$0xf]  ;;  %v4571_v4 = vld [vmem:[#allocation9 + $0x204] sm:$0xf0]  ;;  %1461 = vmatpush.bf16.msra.mxu3 %v3747_v62  ;;  %v1475_v59 = vsel %vm1473_vm1, -1e+30, %v5349_v58 }
 0x15c   : > { %1433 = vmatpush.bf16.msra.mxu1 %v3743_v1  ;;  %v3719_v39 = vor.u32 %v4571_v4, %v3718_v3  ;;  %v3847_v62 = vld [vmem:[%s5643_s17 + $0x18] sm:$0xff]  ;;  %v1480_v1 = vld [vmem:[%s5643_s17] sm:$0xff] }
 0x15d   : > { %1555 = vrot.lane.b32.xlu0 %v1478_v16, %s5348_s15  ;;  %v1487_v22 = vsel %vm1482_vm0, %v1478_v16, 0  ;;  %1447 = vmatpush.bf16.msra.mxu2 %v3555_v56  ;;  %v4556_v16 = vld [vmem:[#allocation9 + $0x194] sm:$0xf] }
 0x15e   : > { %v1398_v21 = vpop.f32.mrf.mxu2  ;;  %1496 = vmatpush.bf16.xpose.msrb.mxu0 %v1487_v22  ;;  %v3675_v22 = vor.u32 %v4556_v16, %v3672_v17 }
 0x15f   : > { %v1399_v28 = vadd.f32 %v1398_v21, %v814_v45  ;;  %v1412_v31 = vpop.f32.mrf.mxu3  ;;  %v1341_v45 = vadd.f32 %v5680_v34, %v812_v26  ;;  %v4520_v34 = vld [vmem:[#allocation9 + $0x74] sm:$0xf]  ;;  %1462 = vmatpush.bf16.msra.mxu3 %v3723_v8  ;;  %v4559_v21 = vld [vmem:[#allocation9 + $0x1a4] sm:$0xf0] }
 0x160   : > { %v3531_v2 = vor.u32 %v4520_v34, %v3528_v38  ;;  %1434 = vmatpush.bf16.msra.mxu1 %v3719_v39  ;;  %v3671_v23 = vor.u32 %v4559_v21, %v3670_v20  ;;  %v1472_v38 = vld [vmem:[%s5636_s22 + $0x8] sm:$0xff] }
 0x161   : > { %v1413_v41 = vadd.f32 %v1412_v31, %v1399_v28  ;;  %v1355_v60 = vadd.f32 %v5682_v35, %v1341_v45  ;;  %v4562_v35 = vld [vmem:[#allocation9 + $0x1c4] sm:$0xf]  ;;  %vm1474_vm3 = vcmp.ne.s32.totalorder %v1472_v38, 0  ;;  %v1481_v39 = vld [vmem:[%s5643_s17 + $0x8] sm:$0xff] }
 0x162   : > { %1448 = vmatpush.bf16.msra.mxu2 %v3531_v2  ;;  %v3699_v15 = vor.u32 %v4562_v35, %v3696_v9  ;;  %v1476_v2 = vsel %vm1474_vm3, -1e+30, %v5349_v58 }
 0x163   : > { %v1635_v33 = vpack.c.bf16 %v1413_v41, %v1411_v27  ;;  %v1634_v7 = vpack.c.bf16 %v1357_v61, %v1355_v60 }
 0x164   : > { %1463 = vmatpush.bf16.msra.mxu3 %v3699_v15  ;;  %1435 = vmatpush.bf16.msra.mxu1 %v3695_v18  ;;  %v3850_v18 = vld [vmem:[%s5643_s17 + $0x20] sm:$0xff] }
 0x165   : > { %1711 = vrot.lane.b32.xlu1 %v1635_v33, %s5348_s15  ;;  %v1644_v55 = vsel %vm1482_vm0, %v1635_v33, 0  ;;  %1552 = vrot.lane.b32.xlu0 %v1477_v37, %s5348_s15 }
 0x166   : > { %3844 = vmatmul.msk.bf16.vlgmr.msrb.gmra.mxu0 %vm1482_vm0, %v1477_v37  ;;  %1449 = vmatpush.bf16.msra.mxu2 %v3507_v10 }
 0x167   : > { %1653 = vmatpush.bf16.xpose.msra.mxu0 %v1644_v55 }
 0x168   : > { %1464 = vmatpush.bf16.msra.mxu3 %v3675_v22  ;;  %1436 = vmatpush.bf16.msra.mxu1 %v3671_v23 }
 0x16a   : > { %1450 = vmatpush.bf16.msra.mxu2 %v3483_v19 }
 0x16b   : > { %1465 = vmatmul.bf16.vlgmr.msra.gmra.mxu3 %v5667_v57  ;;  %1437 = vmatmul.bf16.vlgmr.msra.gmra.mxu1 %v5667_v57 }
 0x16d   : > { %1708 = vrot.lane.b32.xlu1 %v1634_v7, %s5348_s15  ;;  %1451 = vmatmul.bf16.vlgmr.msra.gmra.mxu2 %v5665_v54 }
 0x16e   : > { %v1424_v54 = vpop.f32.mrf.mxu0 }
 0x16f   : > { %v1425_v32 = vadd.f32 %v1424_v54, %v815_v30 }
 0x176   : > { %3852 = vmatmul.msk.bf16.vlgmr.msra.gmra.mxu0 %vm1482_vm0, %v1634_v7  ;;  %v1426_v36 = vpop.f32.mrf.mxu0 }
 0x177   : > { %v1427_v41 = vadd.f32 %v1426_v36, %v815_v30 }
 0x1cf   : > { %v1556_v24 = vpop.permute.xlu0 %1555 }
 0x1d0   : > { %v1561_v25 = vsel %vm1482_vm0, %v1556_v24, 0 }
 0x1d1   : > { %1570 = vmatpush.bf16.xpose.msrb.mxu2 %v1561_v25 }
 0x1d7   : > { %v1712_v26 = vpop.permute.xlu1 %1711  ;;  %v1553_v28 = vpop.permute.xlu0 %1552 }
 0x1d8   : > { %v1717_v27 = vsel %vm1482_vm0, %v1712_v26, 0  ;;  %3848 = vmatmul.msk.bf16.vlgmr.msrb.gmra.mxu2 %vm1482_vm0, %v1553_v28 }
 0x1d9   : > { %1726 = vmatpush.bf16.xpose.msra.mxu2 %v1717_v27 }
 0x1df   : > { %v1709_v29 = vpop.permute.xlu1 %1708 }
 0x1e3   : > { %v1498_v61 = vpop.f32.mrf.mxu0 }
 0x1e4   : > { %v1499_v4 = vadd.f32 %v1498_v61, %v1480_v1 }
 0x1e6   : > { %v1503_v9 = vadd.f32 %v1499_v4, %v1475_v59 }
 0x1e8   : > { %3856 = vmatmul.msk.bf16.vlgmr.msra.gmra.mxu2 %vm1482_vm0, %v1709_v29  ;;  %v1438_v31 = vpop.f32.mrf.mxu1  ;;  %v1506_v13 = vsel %vm1505_vm2, %v1503_v9, -inf }
 0x1e9   : > { %v1439_v44 = vadd.f32 %v1438_v31, %v1425_v32 }
 0x1eb   : > { %v1500_v7 = vpop.f32.mrf.mxu0 }
 0x1ec   : > { %v1501_v11 = vadd.f32 %v1500_v7, %v1481_v39 }
 0x1ee   : > { %v1466_v43 = vpop.f32.mrf.mxu3  ;;  %v1504_v17 = vadd.f32 %v1501_v11, %v1476_v2 }
 0x1f0   : > { %v1452_v57 = vpop.f32.mrf.mxu2  ;;  %v1440_v47 = vpop.f32.mrf.mxu1  ;;  %v1509_v23 = vsel %vm1505_vm2, %v1504_v17, -inf }
 0x1f1   : > { %v1453_v46 = vadd.f32 %v1452_v57, %v816_v40  ;;  %v1441_v48 = vadd.f32 %v1440_v47, %v1427_v41 }
 0x1f3   : > { %v1479_v49 = vpack.c.bf16 %v1441_v48, %v1439_v44  ;;  %v1467_v33 = vadd.f32 %v1466_v43, %v1453_v46  ;;  %v1655_v19 = vpop.f32.mrf.mxu0 }
 0x1f4   : > { %v1656_v21 = vadd.f32 %v3850_v18, %v1655_v19 }
 0x1f5   : > { %1539 = vmatpush.bf16.msrb.mxu1 %v1479_v49 }
 0x1f6   : > { %v1468_v37 = vpop.f32.mrf.mxu3  ;;  %v1660_v24 = vadd.f32 %v1656_v21, %v1475_v59 }
 0x1f8   : > { %v1454_v45 = vpop.f32.mrf.mxu2  ;;  %v1662_v25 = vsel %vm1505_vm2, %v1660_v24, -inf }
 0x1f9   : > { %v1455_v50 = vadd.f32 %v1454_v45, %v816_v40  ;;  %v3851_v40 = vld [vmem:[%s5643_s17 + $0x28] sm:$0xff]  ;;  %s5957_s17 = sld [smem:[#allocation43_spill]] }
 0x1fb   : > { %v1469_v51 = vadd.f32 %v1468_v37, %v1455_v50  ;;  %v1657_v41 = vpop.f32.mrf.mxu0 }
 0x1fc   : > { %v1658_v47 = vadd.f32 %v3851_v40, %v1657_v41  ;;  %v3916_v41 = vld [vmem:[#allocation12 + $0x70] sm:$0xf] }
 0x1fd   : > { %v5719_v52 = vpack.c.bf16 %v1469_v51, %v1467_v33 }
 0x1fe   : > { %v1661_v33 = vadd.f32 %v1658_v47, %v1476_v2  ;;  %v3918_v47 = vld [vmem:[#allocation12 + $0x78] sm:$0xf0] }
 0x1ff   : > { %1695 = vmatpush.bf16.msra.mxu1 %v5719_v52  ;;  %s5267_s27 = scalar_lea.hbm %s5957_s17, 64 }
 0x200   : > { %v1665_v58 = vsel %vm1505_vm2, %v1661_v33, -inf }
 0x25b   : > { %v1572_v55 = vpop.f32.mrf.mxu2 }
 0x25c   : > { %v1573_v56 = vadd.f32 %v3846_v53, %v1572_v55 }
 0x25e   : > { %v1577_v34 = vadd.f32 %v1573_v56, %v1475_v59 }
 0x260   : > { %v1579_v60 = vsel %vm1505_vm2, %v1577_v34, -inf }
 0x261   : > { %1580 = vmax.xlane.f32.xlu2 %v1579_v60 }
 0x263   : > { %v1574_v63 = vpop.f32.mrf.mxu2 }
 0x264   : > { %v1575_v0 = vadd.f32 %v3847_v62, %v1574_v63 }
 0x266   : > { %v1578_v3 = vadd.f32 %v1575_v0, %v1476_v2 }
 0x268   : > { %v1582_v5 = vsel %vm1505_vm2, %v1578_v3, -inf }
 0x269   : > { %1583 = vmax.xlane.f32.xlu2 %v1582_v5 }
 0x26b   : > { %v1728_v8 = vpop.f32.mrf.mxu2 }
 0x26c   : > { %v1729_v35 = vadd.f32 %v3854_v6, %v1728_v8 }
 0x26e   : > { %v1733_v10 = vadd.f32 %v1729_v35, %v1475_v59 }
 0x270   : > { %v1735_v12 = vsel %vm1505_vm2, %v1733_v10, -inf }
 0x271   : > { %1736 = vmax.xlane.f32.xlu0 %v1735_v12  ;;  %1507 = vmax.xlane.f32.xlu2 %v1506_v13 }
 0x273   : > { %v1730_v15 = vpop.f32.mrf.mxu2 }
 0x274   : > { %v1731_v16 = vadd.f32 %v3855_v14, %v1730_v15 }
 0x276   : > { %v1734_v20 = vadd.f32 %v1731_v16, %v1476_v2 }
 0x278   : > { %v1738_v22 = vsel %vm1505_vm2, %v1734_v20, -inf }
 0x279   : > { %1739 = vmax.xlane.f32.xlu1 %v1738_v22  ;;  %1510 = vmax.xlane.f32.xlu2 %v1509_v23 }
 0x281   : > { %1663 = vmax.xlane.f32.xlu2 %v1662_v25 }
 0x285   : > { %1603 = vrot.lane.b32.xlu0 %v1479_v49, %s5348_s15 }
 0x2d4   : > { %v1581_v26 = vpop.xlane.xlu2 %1580 }
 0x2d5   : > { %v1585_v27 = vsub.f32 %v1577_v34, %v1581_v26 }
 0x2d7   : > { %v1587_v28 = vmul.f32 1.442695, %v1585_v27 }
 0x2d9   : > { %4901 = vpow2.f32 %v1587_v28 }
 0x2dc   : > { %v1584_v29 = vpop.xlane.xlu2 %1583 }
 0x2dd   : > { %v1586_v54 = vsub.f32 %v1578_v3, %v1584_v29 }
 0x2df   : > { %v4902_v30 = vpop.eup %4901  ;;  %v1589_v31 = vmul.f32 1.442695, %v1586_v54 }
 0x2e0   : > { %v1591_v32 = vsel %vm1505_vm2, %v4902_v30, 0.0 }
 0x2e1   : > { %4903 = vpow2.f32 %v1589_v31  ;;  %1592 = vadd.xlane.f32.xlu2 %v1591_v32 }
 0x2e4   : > { %v1737_v57 = vpop.xlane.xlu0 %1736  ;;  %v1508_v36 = vpop.xlane.xlu2 %1507 }
 0x2e5   : > { %v1741_v43 = vsub.f32 %v1733_v10, %v1737_v57  ;;  %v1512_v42 = vsub.f32 %v1503_v9, %v1508_v36 }
 0x2e7   : > { %v4904_v44 = vpop.eup %4903  ;;  %v1743_v46 = vmul.f32 1.442695, %v1741_v43  ;;  %v1514_v59 = vmul.f32 1.442695, %v1512_v42  ;;  %v4617_v43 = vld [vmem:[#allocation12 + $0x74] sm:$0xf0] }
 0x2e8   : > { %v1594_v48 = vsel %vm1505_vm2, %v4904_v44, 0.0 }
 0x2e9   : > { %4905 = vpow2.f32 %v1743_v46  ;;  %1595 = vadd.xlane.f32.xlu2 %v1594_v48  ;;  %v3917_v46 = vor.u32 %v4617_v43, %v3916_v41  ;;  %v3908_v48 = vld [vmem:[#allocation12 + $0x60] sm:$0xf]  ;;  %v3974_v41 = vld [vmem:[#allocation12 + $0xe8] sm:$0xf0] }
 0x2eb   : > { %1993 = vmatpush.bf16.msrb.mxu0 %v3917_v46  ;;  %v3964_v46 = vld [vmem:[#allocation12 + $0xd0] sm:$0xf] }
 0x2ec   : > { %v1740_v45 = vpop.xlane.xlu1 %1739  ;;  %v1511_v49 = vpop.xlane.xlu2 %1510 }
 0x2ed   : > { %v1742_v50 = vsub.f32 %v1734_v20, %v1740_v45  ;;  %v1513_v37 = vsub.f32 %v1504_v17, %v1511_v49  ;;  %v4615_v45 = vld [vmem:[#allocation12 + $0x64] sm:$0xf0] }
 0x2ef   : > { %v4906_v51 = vpop.eup %4905  ;;  %v1745_v53 = vmul.f32 1.442695, %v1742_v50  ;;  %v1516_v55 = vmul.f32 1.442695, %v1513_v37  ;;  %v4614_v50 = vld [vmem:[#allocation12 + $0x64] sm:$0xf] }
 0x2f0   : > { %v1747_v56 = vsel %vm1505_vm2, %v4906_v51, 0.0  ;;  %v3910_v37 = vld [vmem:[#allocation12 + $0x68] sm:$0xf0] }
 0x2f1   : > { %4907 = vpow2.f32 %v1745_v53  ;;  %1748 = vadd.xlane.f32.xlu1 %v1747_v56  ;;  %1666 = vmax.xlane.f32.xlu2 %v1665_v58  ;;  %v3913_v42 = vor.u32 %v4614_v50, %v3910_v37  ;;  %v4626_v50 = vld [vmem:[#allocation12 + $0xc4] sm:$0xf]  ;;  %v3958_v37 = vld [vmem:[#allocation12 + $0xc8] sm:$0xf0] }
 0x2f2   : > { %4909 = vpow2.f32 %v1516_v55 }
 0x2f3   : > { %4911 = vpow2.f32 %v1514_v59 }
 0x2f4   : > { %v1664_v34 = vpop.xlane.xlu2 %1663 }
 0x2f5   : > { %v1668_v60 = vsub.f32 %v1660_v24, %v1664_v34  ;;  %v3900_v34 = vld [vmem:[#allocation12 + $0x50] sm:$0xf] }
 0x2f7   : > { %v4908_v38 = vpop.eup %4907  ;;  %v1604_v61 = vpop.permute.xlu0 %1603  ;;  %v1670_v1 = vmul.f32 1.442695, %v1668_v60  ;;  %v4612_v60 = vld [vmem:[#allocation12 + $0x54] sm:$0xf] }
 0x2f8   : > { %v4910_v62 = vpop.eup %4909  ;;  %v1750_v63 = vsel %vm1505_vm2, %v4908_v38, 0.0  ;;  %1616 = vmatpush.bf16.msrb.mxu3 %v1604_v61 }
 0x2f9   : > { %1751 = vadd.xlane.f32.xlu2 %v1750_v63  ;;  %v1521_v0 = vsel %vm1505_vm2, %v4910_v62, 0.0  ;;  %v4912_v2 = vpop.eup %4911  ;;  %4913 = vpow2.f32 %v1670_v1  ;;  %v3892_v63 = vld [vmem:[#allocation12 + $0x40] sm:$0xf] }
 0x2fa   : > { %1522 = vadd.xlane.f32.xlu0 %v1521_v0  ;;  %v1518_v3 = vsel %vm1505_vm2, %v4912_v2, 0.0  ;;  %v4611_v0 = vld [vmem:[#allocation12 + $0x44] sm:$0xf0] }
 0x2ff   : > { %v4914_v4 = vpop.eup %4913 }
 0x300   : > { %v1674_v5 = vsel %vm1505_vm2, %v4914_v4, 0.0 }
 0x301   : > { %1519 = vadd.xlane.f32.xlu2 %v1518_v3  ;;  %v3894_v3 = vld [vmem:[#allocation12 + $0x48] sm:$0xf0] }
 0x309   : > { %1675 = vadd.xlane.f32.xlu2 %v1674_v5 }
 0x30a   : > { %1759 = vrot.lane.b32.xlu1 %v5719_v52, %s5348_s15 }
 0x354   : > { %v1593_v6 = vpop.xlane.xlu2 %1592 }
 0x355   : > { %4915 = vrcp.f32 %v1593_v6  ;;  %v3884_v6 = vld [vmem:[#allocation12 + $0x30] sm:$0xf] }
 0x35b   : > { %v4916_v8 = vpop.eup %4915 }
 0x35c   : > { %v1596_v7 = vpop.xlane.xlu2 %1595  ;;  %v1599_v9 = vmul.f32 %v4916_v8, %v4902_v30  ;;  %v4608_v8 = vld [vmem:[#allocation12 + $0x34] sm:$0xf] }
 0x35d   : > { %4917 = vrcp.f32 %v1596_v7  ;;  %v4609_v7 = vld [vmem:[#allocation12 + $0x34] sm:$0xf0] }
 0x363   : > { %v4918_v35 = vpop.eup %4917 }
 0x364   : > { %v1600_v39 = vmul.f32 %v4918_v35, %v4904_v44  ;;  %v1667_v10 = vpop.xlane.xlu2 %1666  ;;  %v1749_v16 = vpop.xlane.xlu1 %1748  ;;  %v4616_v44 = vld [vmem:[#allocation12 + $0x74] sm:$0xf]  ;;  %v3886_v35 = vld [vmem:[#allocation12 + $0x38] sm:$0xf0] }
 0x365   : > { %v1669_v11 = vsub.f32 %v1661_v33, %v1667_v10  ;;  %v3921_v33 = vor.u32 %v4616_v44, %v3918_v47  ;;  %v3876_v10 = vld [vmem:[#allocation12 + $0x20] sm:$0xf]  ;;  %v4629_v47 = vld [vmem:[#allocation12 + $0xd4] sm:$0xf0] }
 0x366   : > { %v1601_v12 = vpack.c.bf16 %v1600_v39, %v1599_v9  ;;  %v3885_v9 = vor.u32 %v4609_v7, %v3884_v6  ;;  %v3889_v39 = vor.u32 %v4608_v8, %v3886_v35  ;;  %v4620_v7 = vld [vmem:[#allocation12 + $0x94] sm:$0xf]  ;;  %v3934_v8 = vld [vmem:[#allocation12 + $0x98] sm:$0xf0]  ;;  %v3924_v35 = vld [vmem:[#allocation12 + $0x80] sm:$0xf] }
 0x367   : > { %v1672_v13 = vmul.f32 1.442695, %v1669_v11  ;;  %2021 = vmatpush.bf16.msrb.mxu2 %v3921_v33  ;;  %v4607_v11 = vld [vmem:[#allocation12 + $0x24] sm:$0xf0] }
 0x368   : > { %3849 = vmatmul.msk.bf16.vlgmr.msrb.gmra.mxu3 %vm1505_vm2, %v1601_v12  ;;  %v4606_v12 = vld [vmem:[#allocation12 + $0x24] sm:$0xf] }
 0x369   : > { %4919 = vpow2.f32 %v1672_v13  ;;  %v3878_v13 = vld [vmem:[#allocation12 + $0x28] sm:$0xf0] }
 0x36b   : > { %2022 = vmatpush.bf16.msrb.mxu2 %v3913_v42  ;;  %v3961_v42 = vor.u32 %v4626_v50, %v3958_v37  ;;  %v4945_v37 = vld [vmem:[%s5628_s30 + $0x10] sm:$0xff] }
 0x36c   : > { %v1752_v14 = vpop.xlane.xlu2 %1751 }
 0x36d   : > { %v1523_v17 = vpop.xlane.xlu0 %1522  ;;  %4921 = vrcp.f32 %v1752_v14  ;;  %v3877_v14 = vor.u32 %v4607_v11, %v3876_v10  ;;  %v4618_v10 = vld [vmem:[#allocation12 + $0x84] sm:$0xf]  ;;  %v3926_v11 = vld [vmem:[#allocation12 + $0x88] sm:$0xf0] }
 0x36e   : > { %4923 = vrcp.f32 %v1749_v16  ;;  %v3868_v16 = vld [vmem:[#allocation12 + $0x10] sm:$0xf] }
 0x36f   : > { %v4920_v15 = vpop.eup %4919  ;;  %4925 = vrcp.f32 %v1523_v17  ;;  %v4605_v17 = vld [vmem:[#allocation12 + $0x14] sm:$0xf0] }
 0x370   : > { %v1677_v52 = vsel %vm1505_vm2, %v4920_v15, 0.0 }
 0x371   : > { %1678 = vadd.xlane.f32.xlu2 %v1677_v52  ;;  %v4604_v52 = vld [vmem:[#allocation12 + $0x14] sm:$0xf] }
 0x373   : > { %v4922_v19 = vpop.eup %4921 }
 0x374   : > { %v1520_v18 = vpop.xlane.xlu2 %1519  ;;  %v4924_v20 = vpop.eup %4923  ;;  %v1756_v22 = vmul.f32 %v4922_v19, %v4908_v38  ;;  %v4613_v38 = vld [vmem:[#allocation12 + $0x54] sm:$0xf0]  ;;  %v3870_v19 = vld [vmem:[#allocation12 + $0x18] sm:$0xf0] }
 0x375   : > { %4927 = vrcp.f32 %v1520_v18  ;;  %v4926_v21 = vpop.eup %4925  ;;  %v1755_v24 = vmul.f32 %v4924_v20, %v4906_v51  ;;  %v3909_v51 = vor.u32 %v4615_v45, %v3908_v48  ;;  %v3901_v61 = vor.u32 %v4613_v38, %v3900_v34  ;;  %v3860_v20 = vld [vmem:[#allocation12] sm:$0xf]  ;;  %v4628_v48 = vld [vmem:[#allocation12 + $0xd4] sm:$0xf]  ;;  %v3950_v38 = vld [vmem:[#allocation12 + $0xb8] sm:$0xf0] }
 0x376   : > { %v1527_v25 = vmul.f32 %v4926_v21, %v4910_v62  ;;  %v3902_v62 = vld [vmem:[#allocation12 + $0x58] sm:$0xf0]  ;;  %v3869_v18 = vor.u32 %v4605_v17, %v3868_v16  ;;  %v4603_v21 = vld [vmem:[#allocation12 + $0x4] sm:$0xf0]  ;;  %v3965_v45 = vor.u32 %v4629_v47, %v3964_v46 }
 0x377   : > { %v1757_v28 = vpack.c.bf16 %v1756_v22, %v1755_v24  ;;  %1994 = vmatpush.bf16.msrb.mxu0 %v3909_v51  ;;  %v3905_v1 = vor.u32 %v4612_v60, %v3902_v62  ;;  %v3873_v22 = vor.u32 %v4604_v52, %v3870_v19  ;;  %v3862_v24 = vld [vmem:[#allocation12 + $0x8] sm:$0xf0]  ;;  %v3956_v51 = vld [vmem:[#allocation12 + $0xc0] sm:$0xf] }
 0x378   : > { %v3942_v62 = vld [vmem:[#allocation12 + $0xa8] sm:$0xf0] }
 0x379   : > { %2023 = vmatpush.bf16.msrb.mxu2 %v3905_v1  ;;  %v4623_v1 = vld [vmem:[#allocation12 + $0xa4] sm:$0xf0] }
 0x37b   : > { %v4928_v23 = vpop.eup %4927  ;;  %1995 = vmatpush.bf16.msrb.mxu0 %v3901_v61  ;;  %v4622_v61 = vld [vmem:[#allocation12 + $0xa4] sm:$0xf] }
 0x37c   : > { %v1526_v26 = vmul.f32 %v4928_v23, %v4912_v2  ;;  %v1760_v27 = vpop.permute.xlu1 %1759  ;;  %v1676_v54 = vpop.xlane.xlu2 %1675  ;;  %v4610_v2 = vld [vmem:[#allocation12 + $0x44] sm:$0xf] }
 0x37d   : > { %1772 = vmatpush.bf16.msra.mxu3 %v1760_v27  ;;  %4929 = vrcp.f32 %v1676_v54  ;;  %v3897_v5 = vor.u32 %v4610_v2, %v3894_v3  ;;  %v4602_v23 = vld [vmem:[#allocation12 + $0x4] sm:$0xf]  ;;  %v3980_v27 = vld [vmem:[#allocation12 + $0xf0] sm:$0xf] }
 0x37e   : > { %v1528_v29 = vpack.c.bf16 %v1527_v25, %v1526_v26  ;;  %v3861_v25 = vor.u32 %v4603_v21, %v3860_v20  ;;  %v3865_v26 = vor.u32 %v4602_v23, %v3862_v24  ;;  %v1827_v23 = vld [vmem:[%s5889_s6] sm:$0x3] }
 0x37f   : > { %2024 = vmatpush.bf16.msrb.mxu2 %v3897_v5  ;;  %v4621_v5 = vld [vmem:[#allocation12 + $0x94] sm:$0xf0] }
 0x380   : > { %3845 = vmatmul.msk.bf16.vlgmr.msrb.gmra.mxu1 %vm1505_vm2, %v1528_v29  ;;  %3857 = vmatmul.msk.bf16.vlgmr.msra.gmra.mxu3 %vm1505_vm2, %v1757_v28  ;;  %v4633_v28 = vld [vmem:[#allocation12 + $0xf4] sm:$0xf0]  ;;  %v4632_v29 = vld [vmem:[#allocation12 + $0xf4] sm:$0xf] }
 0x381   : > { %v3981_v54 = vor.u32 %v4633_v28, %v3980_v27  ;;  %v1830_v28 = vperm.slane %v1827_v23, 1 }
 0x383   : > { %v4930_v31 = vpop.eup %4929  ;;  %2025 = vmatpush.bf16.msrb.mxu2 %v3889_v39  ;;  %2007 = vmatpush.bf16.msrb.mxu1 %v3981_v54  ;;  %v4619_v39 = vld [vmem:[#allocation12 + $0x84] sm:$0xf0] }
 0x384   : > { %v1682_v36 = vmul.f32 %v4930_v31, %v4914_v4  ;;  %v3893_v4 = vor.u32 %v4611_v0, %v3892_v63  ;;  %v3945_v63 = vor.u32 %v4622_v61, %v3942_v62  ;;  %v3940_v0 = vld [vmem:[#allocation12 + $0xa0] sm:$0xf]  ;;  %v4228_v61 = vld [vmem:[#allocation17 + $0x1e0] sm:$0xf] }
 0x385   : > { %v3941_v2 = vor.u32 %v4623_v1, %v3940_v0  ;;  %v4662_v0 = vld [vmem:[#allocation17 + $0xe4] sm:$0xf]  ;;  %v4102_v1 = vld [vmem:[#allocation17 + $0xf0] sm:$0xf0] }
 0x386   : > { %1996 = vmatpush.bf16.msrb.mxu0 %v3893_v4  ;;  %v3932_v4 = vld [vmem:[#allocation12 + $0x90] sm:$0xf] }
 0x387   : > { %v3933_v6 = vor.u32 %v4621_v5, %v3932_v4  ;;  %v4694_v4 = vld [vmem:[#allocation17 + $0x1e4] sm:$0xf]  ;;  %v4230_v5 = vld [vmem:[#allocation17 + $0x1f0] sm:$0xf0] }
 0x38a   : > { %1997 = vmatpush.bf16.msrb.mxu0 %v3885_v9  ;;  %v3937_v9 = vor.u32 %v4620_v7, %v3934_v8  ;;  %v4233_v7 = vor.u32 %v4694_v4, %v4230_v5  ;;  %v4660_v8 = vld [vmem:[#allocation17 + $0xcc] sm:$0xf0]  ;;  %v4678_v5 = vld [vmem:[#allocation17 + $0x164] sm:$0xf] }
 0x38e   : > { %1998 = vmatpush.bf16.msrb.mxu0 %v3877_v14 }
 0x392   : > { %1999 = vmatpush.bf16.msrb.mxu0 %v3869_v18 }
 0x396   : > { %2000 = vmatpush.bf16.msrb.mxu0 %v3861_v25  ;;  %v1829_v25 = vperm.slane %v1827_v23, 0 }
 0x3e4   : > { %v1679_v30 = vpop.xlane.xlu2 %1678 }
 0x3e5   : > { %4931 = vrcp.f32 %v1679_v30  ;;  %v3982_v30 = vld [vmem:[#allocation12 + $0xf8] sm:$0xf0] }
 0x3e6   : > { %v3985_v31 = vor.u32 %v4632_v29, %v3982_v30 }
 0x3e8   : > { %2035 = vmatpush.bf16.msrb.mxu3 %v3985_v31 }
 0x3eb   : > { %v4932_v32 = vpop.eup %4931  ;;  %v1618_v57 = vpop.f32.mrf.mxu3 }
 0x3ec   : > { %v1683_v40 = vmul.f32 %v4932_v32, %v4920_v15  ;;  %1625 = vrot.lane.b32.xlu1 %v1618_v57, %s5348_s15  ;;  %v3881_v15 = vor.u32 %v4606_v12, %v3878_v13  ;;  %v3972_v32 = vld [vmem:[#allocation12 + $0xe0] sm:$0xf]  ;;  %v4631_v57 = vld [vmem:[#allocation12 + $0xe4] sm:$0xf0]  ;;  %v3925_v12 = vor.u32 %v4619_v39, %v3924_v35  ;;  %v3929_v13 = vor.u32 %v4618_v10, %v3926_v11  ;;  %v4212_v35 = vld [vmem:[#allocation17 + $0x1c0] sm:$0xf] }
 0x3ed   : > { %v4658_v11 = vld [vmem:[#allocation17 + $0xc4] sm:$0xf] }
 0x3ee   : > { %v1684_v49 = vpack.c.bf16 %v1683_v40, %v1682_v36  ;;  %2026 = vmatpush.bf16.msrb.mxu2 %v3881_v15  ;;  %v4630_v36 = vld [vmem:[#allocation12 + $0xe4] sm:$0xf]  ;;  %v3973_v40 = vor.u32 %v4631_v57, %v3972_v32 }
 0x3ef   : > { %v3977_v44 = vor.u32 %v4630_v36, %v3974_v41  ;;  %v4943_v36 = vld [vmem:[%s5628_s30] sm:$0xff]  ;;  %v4944_v41 = vld [vmem:[%s5628_s30 + $0x8] sm:$0xff] }
 0x3f0   : > { %3853 = vmatmul.msk.bf16.vlgmr.msra.gmra.mxu1 %vm1505_vm2, %v1684_v49  ;;  %v3966_v49 = vld [vmem:[#allocation12 + $0xd8] sm:$0xf0] }
 0x3f1   : > { %2008 = vmatpush.bf16.msrb.mxu1 %v3973_v40  ;;  %2036 = vmatpush.bf16.msrb.mxu3 %v3977_v44  ;;  %v3969_v33 = vor.u32 %v4628_v48, %v3966_v49 }
 0x3f2   : > { %2027 = vmatpush.bf16.msrb.mxu2 %v3873_v22 }
 0x3f3   : > { %v1620_v53 = vpop.f32.mrf.mxu3 }
 0x3f4   : > { %1627 = vrot.lane.b32.xlu2 %v1620_v53, %s5348_s15  ;;  %v4627_v53 = vld [vmem:[#allocation12 + $0xc4] sm:$0xf0] }
 0x3f5   : > { %2009 = vmatpush.bf16.msrb.mxu1 %v3965_v45  ;;  %2037 = vmatpush.bf16.msrb.mxu3 %v3969_v33 }
 0x3f6   : > { %2028 = vmatpush.bf16.msrb.mxu2 %v3865_v26 }
 0x3f9   : > { %2038 = vmatpush.bf16.msrb.mxu3 %v3961_v42  ;;  %v4946_v42 = vld [vmem:[%s5628_s30 + $0x18] sm:$0xff] }
 0x3fd   : > { %v1541_v55 = vpop.f32.mrf.mxu1 }
 0x3fe   : > { %1546 = vst.msk [vmem:[#allocation2] sm:$0xff] %vm1482_vm0, %v1541_v55  ;;  %v3957_v55 = vor.u32 %v4627_v53, %v3956_v51 }
 0x400   : > { %2010 = vmatpush.bf16.msrb.mxu1 %v3957_v55 }
 0x403   : > { %v1774_v56 = vpop.f32.mrf.mxu3 }
 0x404   : > { %1781 = vrot.lane.b32.xlu1 %v1774_v56, %s5348_s15  ;;  %v3948_v56 = vld [vmem:[#allocation12 + $0xb0] sm:$0xf] }
 0x405   : > { %v1543_v58 = vpop.f32.mrf.mxu1 }
 0x406   : > { %1547 = vst.msk [vmem:[#allocation2 + $0x10] sm:$0xff] %vm1482_vm0, %v1543_v58  ;;  %v4625_v58 = vld [vmem:[#allocation12 + $0xb4] sm:$0xf0] }
 0x407   : > { %v3949_v34 = vor.u32 %v4625_v58, %v3948_v56  ;;  %v5350_v56 = vmov 256.0  }
 0x408   : > { %4933 = vrcp.f32 %v5350_v56 }
 0x409   : > { %2011 = vmatpush.bf16.msrb.mxu1 %v3949_v34 }
 0x40b   : > { %v1776_v59 = vpop.f32.mrf.mxu3 }
 0x40c   : > { %1783 = vrot.lane.b32.xlu1 %v1776_v59, %s5348_s15  ;;  %v4624_v59 = vld [vmem:[#allocation12 + $0xb4] sm:$0xf]  ;;  %s3242_s15 = scalar_lea.hbm %s5957_s17, %s4762_s26 }
 0x40d   : > { %v3953_v60 = vor.u32 %v4624_v59, %v3950_v38  ;;  %2012 = vmatpush.bf16.msrb.mxu1 %v3941_v2  ;;  %v4100_v38 = vld [vmem:[#allocation17 + $0xe0] sm:$0xf]  ;;  %s3245_s25 = sshll.u32 %s3242_s15, 4  ;;  %s3246_s25 = int_to_ptr.hbm [resolvable:$true] %s3245_s25 }
 0x40e   : > { %v4934_v58 = vpop.eup %4933  ;;  %s5261_s12 = sshra.s32 %s3246_s25, 4  ;;  %s5262_s12 = int_to_ptr.hbm [resolvable:$true] %s5261_s12 }
 0x40f   : > { %2039 = vmatpush.bf16.msrb.mxu3 %v3953_v60  ;;  %v2062_v59 = vmul.f32 256.0, %v4934_v58  ;;  %v4664_v60 = vld [vmem:[#allocation17 + $0xec] sm:$0xf0]  ;;  %vm2066_vm5 = vweird.f32 %v4934_v58  ;;  %s5263_s8 = scalar_lea.hbm %s5262_s12, 32  ;;  %p5268_p12 = scmp.lt.s32.totalorder %s5262_s12, %s5957_s17 }
 0x410   : > { %v4101_v62 = vor.u32 %v4664_v60, %v4100_v38  ;;  %v4036_v60 = vld [vmem:[#allocation17 + $0x60] sm:$0xf]  ;;  %p5264_p6 = scmp.ne.s32.totalorder %s5262_s12, %s5263_s8  ;;  %p5269_p3 = scmp.lt.s32.totalorder %s5267_s27, %s5263_s8 }
 0x411   : > { %2013 = vmatpush.bf16.msrb.mxu1 %v3933_v6  ;;  %v2063_v34 = vsub.f32 1.0, %v2062_v59  ;;  %v4084_v6 = vld [vmem:[#allocation17 + $0xc0] sm:$0xf]  ;;  %v4682_v59 = vld [vmem:[#allocation17 + $0x184] sm:$0xf] }
 0x412   : > { %2526 = vmatpush.bf16.msra.mxu0 %v4101_v62  ;;  %v4085_v39 = vor.u32 %v4660_v8, %v4084_v6  ;;  %v4164_v62 = vld [vmem:[#allocation17 + $0x160] sm:$0xf]  ;;  %v4166_v6 = vld [vmem:[#allocation17 + $0x170] sm:$0xf0]  ;;  %p5265_p10 = pnand %p5264_p6, %p5512_p0  ;;  %p5270_p8 = por %p5269_p3, %p5268_p12 }
 0x413   : > { %2040 = vmatpush.bf16.msrb.mxu3 %v3945_v63  ;;  %v4696_v63 = vld [vmem:[#allocation17 + $0x1ec] sm:$0xf0]  ;;  %v4020_v8 = vld [vmem:[#allocation17 + $0x40] sm:$0xf] }
 0x414   : > { %v4229_v2 = vor.u32 %v4696_v63, %v4228_v61  ;;  %v4648_v61 = vld [vmem:[#allocation17 + $0x6c] sm:$0xf0]  ;;  %p5266_p11 = pneg %p5265_p10 }
 0x415   : > { %2014 = vmatpush.bf16.msrb.mxu1 %v3925_v12  ;;  %v4086_v12 = vld [vmem:[#allocation17 + $0xd0] sm:$0xf0]  ;;  %v4037_v63 = vor.u32 %v4648_v61, %v4036_v60  ;;  %v4092_v60 = vld [vmem:[#allocation17 + $0xc8] sm:$0xf]  ;;  %v4661_v61 = vld [vmem:[#allocation17 + $0xd4] sm:$0xf0] }
 0x416   : > { %2527 = vmatpush.bf16.msra.mxu0 %v4085_v39  ;;  %p5271_p9 = pnand %p5270_p8, %p5266_p11 }
 0x417   : > { %2041 = vmatpush.bf16.msrb.mxu3 %v3937_v9  ;;  %v4692_v9 = vld [vmem:[#allocation17 + $0x1cc] sm:$0xf0] }
 0x418   : > { %v4213_v10 = vor.u32 %v4692_v9, %v4212_v35  ;;  %v4644_v35 = vld [vmem:[#allocation17 + $0x4c] sm:$0xf0]  ;;  %v4148_v9 = vld [vmem:[#allocation17 + $0x140] sm:$0xf] }
 0x419   : > { %2540 = vmatpush.bf16.msra.mxu1 %v4229_v2  ;;  %v4038_v2 = vld [vmem:[#allocation17 + $0x70] sm:$0xf0]  ;;  %v4021_v39 = vor.u32 %v4644_v35, %v4020_v8  ;;  %v4076_v35 = vld [vmem:[#allocation17 + $0xa8] sm:$0xf] }
 0x41b   : > { %2042 = vmatpush.bf16.msrb.mxu3 %v3929_v13  ;;  %v4690_v13 = vld [vmem:[#allocation17 + $0x1c4] sm:$0xf] }
 0x41d   : > { %2541 = vmatpush.bf16.msra.mxu1 %v4213_v10  ;;  %v4676_v10 = vld [vmem:[#allocation17 + $0x14c] sm:$0xf0] }
 0x41f   : > { %2568 = vmatpush.bf16.msra.mxu3 %v4233_v7  ;;  %v4169_v7 = vor.u32 %v4678_v5, %v4166_v6  ;;  %v4691_v5 = vld [vmem:[#allocation17 + $0x1cc] sm:$0xf]  ;;  %v4222_v6 = vld [vmem:[#allocation17 + $0x1d8] sm:$0xf0] }
 0x420   : > { %v4225_v8 = vor.u32 %v4691_v5, %v4222_v6  ;;  %v4641_v6 = vld [vmem:[#allocation17 + $0x34] sm:$0xf0] }
 0x44e   : > { %v1628_v43 = vpop.permute.xlu2 %1627 }
 0x44f   : > { %1633 = vst.msk [vmem:[#allocation2 + $0x10] sm:$0xff] %vm1631_vm4, %v1628_v43 }
 0x456   : > { %v1791_v15 = vld [vmem:[#allocation2 + $0x10] sm:$0xff] }
 0x45e   : > { %v1626_v3 = vpop.permute.xlu1 %1625 }
 0x45f   : > { %1632 = vst.msk [vmem:[#allocation2] sm:$0xff] %vm1631_vm4, %v1626_v3  ;;  %v4105_v3 = vor.u32 %v4662_v0, %v4102_v1  ;;  %v4680_v0 = vld [vmem:[#allocation17 + $0x16c] sm:$0xf0]  ;;  %v4646_v1 = vld [vmem:[#allocation17 + $0x64] sm:$0xf] }
 0x460   : > { %v4041_v4 = vor.u32 %v4646_v1, %v4038_v2  ;;  %v4693_v1 = vld [vmem:[#allocation17 + $0x1d4] sm:$0xf0]  ;;  %v4659_v2 = vld [vmem:[#allocation17 + $0xcc] sm:$0xf] }
 0x461   : > { %2554 = vmatpush.bf16.msra.mxu2 %v4105_v3  ;;  %v4165_v3 = vor.u32 %v4680_v0, %v4164_v62  ;;  %v4220_v0 = vld [vmem:[#allocation17 + $0x1c8] sm:$0xf] }
 0x466   : > { %v1789_v14 = vld [vmem:[#allocation2] sm:$0xff] }
 0x467   : > { %v1793_v16 = vpack.c.bf16 %v1791_v15, %v1789_v14  ;;  %v2064_v14 = vmul.f32 %v4934_v58, %v2063_v34  ;;  %v4089_v15 = vor.u32 %v4658_v11, %v4086_v12  ;;  %v4182_v34 = vld [vmem:[#allocation17 + $0x190] sm:$0xf0]  ;;  %v4642_v11 = vld [vmem:[#allocation17 + $0x44] sm:$0xf] }
 0x468   : > { %v4185_v38 = vor.u32 %v4682_v59, %v4182_v34  ;;  %v4022_v12 = vld [vmem:[#allocation17 + $0x50] sm:$0xf0]  ;;  %v4695_v59 = vld [vmem:[#allocation17 + $0x1ec] sm:$0xf] }
 0x469   : > { %2001 = vmatmul.bf16.vlgmr.msrb.gmra.mxu0 %v1793_v16  ;;  %2029 = vmatmul.bf16.vlgmr.msrb.gmra.mxu2 %v1793_v16  ;;  %v4214_v16 = vld [vmem:[#allocation17 + $0x1d0] sm:$0xf0] }
 0x46a   : > { %2555 = vmatpush.bf16.msra.mxu2 %v4089_v15  ;;  %v4674_v15 = vld [vmem:[#allocation17 + $0x144] sm:$0xf] }
 0x46d   : > { %v1697_v17 = vpop.f32.mrf.mxu1 }
 0x46e   : > { %1702 = vst.msk [vmem:[#allocation2 + $0x8] sm:$0xff] %vm1482_vm0, %v1697_v17  ;;  %v4217_v17 = vor.u32 %v4690_v13, %v4214_v16  ;;  %v4149_v13 = vor.u32 %v4676_v10, %v4148_v9  ;;  %v4150_v16 = vld [vmem:[#allocation17 + $0x150] sm:$0xf0]  ;;  %v4657_v9 = vld [vmem:[#allocation17 + $0xb4] sm:$0xf0] }
 0x46f   : > { %v4077_v10 = vor.u32 %v4657_v9, %v4076_v35  ;;  %v4639_v9 = vld [vmem:[#allocation17 + $0x2c] sm:$0xf] }
 0x470   : > { %2569 = vmatpush.bf16.msra.mxu3 %v4217_v17  ;;  %v4153_v17 = vor.u32 %v4674_v15, %v4150_v16 }
 0x475   : > { %v1699_v52 = vpop.f32.mrf.mxu1 }
 0x476   : > { %1703 = vst.msk [vmem:[#allocation2 + $0x18] sm:$0xff] %vm1482_vm0, %v1699_v52  ;;  %v1782_v18 = vpop.permute.xlu1 %1781  ;;  %v2065_v52 = vadd.f32 %v4934_v58, %v2064_v14  ;;  %v4025_v14 = vor.u32 %v4642_v11, %v4022_v12  ;;  %v4689_v11 = vld [vmem:[#allocation17 + $0x1b4] sm:$0xf0]  ;;  %v4655_v12 = vld [vmem:[#allocation17 + $0xac] sm:$0xf] }
 0x477   : > { %1787 = vst.msk [vmem:[#allocation2 + $0x8] sm:$0xff] %vm1631_vm4, %v1782_v18 }
 0x478   : > { %v5774_v18 = vsel %vm2066_vm5, %v4934_v58, %v2065_v52  ;;  %v4004_v52 = vld [vmem:[#allocation17 + $0x20] sm:$0xf] }
 0x47e   : > { %v1784_v19 = vpop.permute.xlu1 %1783  ;;  %v1790_v20 = vld [vmem:[#allocation2 + $0x8] sm:$0xff] }
 0x47f   : > { %1788 = vst.msk [vmem:[#allocation2 + $0x18] sm:$0xff] %vm1631_vm4, %v1784_v19 }
 0x486   : > { %v1792_v21 = vld [vmem:[#allocation2 + $0x18] sm:$0xff] }
 0x487   : > { %v1794_v22 = vpack.c.bf16 %v1792_v21, %v1790_v20 }
 0x489   : > { %2015 = vmatmul.bf16.vlgmr.msrb.gmra.mxu1 %v1794_v22  ;;  %2043 = vmatmul.bf16.vlgmr.msrb.gmra.mxu3 %v1794_v22 }
 0x4e6   : > { %v2002_v24 = vpop.f32.mrf.mxu0 }
 0x4e7   : > { %v2003_v29 = vadd.f32 %v2002_v24, %v1829_v25 }
 0x4ec   : > { %v2030_v26 = vpop.f32.mrf.mxu2 }
 0x4ed   : > { %v2031_v54 = vadd.f32 %v2030_v26, %v1830_v28 }
 0x4ee   : > { %v2004_v57 = vpop.f32.mrf.mxu0 }
 0x4ef   : > { %v2005_v47 = vadd.f32 %v2004_v57, %v1829_v25  ;;  %v4656_v57 = vld [vmem:[#allocation17 + $0xac] sm:$0xf0] }
 0x4f4   : > { %v2032_v44 = vpop.f32.mrf.mxu2 }
 0x4f5   : > { %v2033_v45 = vadd.f32 %v2032_v44, %v1830_v28  ;;  %v4070_v44 = vld [vmem:[#allocation17 + $0xb0] sm:$0xf0] }
 0x506   : > { %v2016_v27 = vpop.f32.mrf.mxu1 }
 0x507   : > { %v2017_v30 = vadd.f32 %v2016_v27, %v2003_v29 }
 0x509   : > { %v2049_v40 = vadd.f32 %v4943_v36, %v2017_v30  ;;  %v4196_v36 = vld [vmem:[#allocation17 + $0x1a0] sm:$0xf] }
 0x50c   : > { %v2044_v31 = vpop.f32.mrf.mxu3 }
 0x50d   : > { %v2045_v32 = vadd.f32 %v2044_v31, %v2031_v54 }
 0x50e   : > { %v2018_v46 = vpop.f32.mrf.mxu1 }
 0x50f   : > { %v2050_v43 = vadd.f32 %v4944_v41, %v2045_v32  ;;  %v2019_v49 = vadd.f32 %v2018_v46, %v2005_v47  ;;  %v4068_v32 = vld [vmem:[#allocation17 + $0xa0] sm:$0xf]  ;;  %v4688_v41 = vld [vmem:[#allocation17 + $0x1ac] sm:$0xf0] }
 0x510   : > { %v4197_v46 = vor.u32 %v4688_v41, %v4196_v36  ;;  %v4636_v36 = vld [vmem:[#allocation17 + $0xc] sm:$0xf0] }
 0x511   : > { %v2055_v48 = vadd.f32 %v2050_v43, %v2049_v40  ;;  %v2051_v51 = vadd.f32 %v4945_v37, %v2019_v49  ;;  %v4180_v37 = vld [vmem:[#allocation17 + $0x180] sm:$0xf] }
 0x512   : > { %2542 = vmatpush.bf16.msra.mxu1 %v4197_v46  ;;  %v3990_v46 = vld [vmem:[#allocation17 + $0x10] sm:$0xf0] }
 0x513   : > { %2056 = vadd.xlane.f32.xlu1 %v2055_v48  ;;  %v4686_v48 = vld [vmem:[#allocation17 + $0x1a4] sm:$0xf] }
 0x514   : > { %v2046_v33 = vpop.f32.mrf.mxu3 }
 0x515   : > { %v2047_v50 = vadd.f32 %v2046_v33, %v2033_v45  ;;  %v4198_v45 = vld [vmem:[#allocation17 + $0x1b0] sm:$0xf0]  ;;  %v4052_v33 = vld [vmem:[#allocation17 + $0x80] sm:$0xf] }
 0x516   : > { %v4201_v49 = vor.u32 %v4686_v48, %v4198_v45  ;;  %v4666_v45 = vld [vmem:[#allocation17 + $0x104] sm:$0xf] }
 0x517   : > { %v2052_v53 = vadd.f32 %v4946_v42, %v2047_v50  ;;  %v4652_v50 = vld [vmem:[#allocation17 + $0x8c] sm:$0xf0] }
 0x518   : > { %2570 = vmatpush.bf16.msra.mxu3 %v4201_v49  ;;  %v4684_v42 = vld [vmem:[#allocation17 + $0x18c] sm:$0xf0]  ;;  %v4118_v49 = vld [vmem:[#allocation17 + $0x110] sm:$0xf0] }
 0x519   : > { %v2058_v55 = vadd.f32 %v2052_v53, %v2051_v51  ;;  %v4181_v56 = vor.u32 %v4684_v42, %v4180_v37  ;;  %v4665_v37 = vld [vmem:[#allocation17 + $0xf4] sm:$0xf0] }
 0x51a   : > { %v4697_v42 = vld [vmem:[#allocation17 + $0x1f4] sm:$0xf0] }
 0x51b   : > { %2059 = vadd.xlane.f32.xlu0 %v2058_v55  ;;  %v4054_v55 = vld [vmem:[#allocation17 + $0x90] sm:$0xf0]  ;;  %2543 = vmatpush.bf16.msra.mxu1 %v4181_v56  ;;  %v4663_v56 = vld [vmem:[#allocation17 + $0xec] sm:$0xf] }
 0x51c   : > { %2571 = vmatpush.bf16.msra.mxu3 %v4185_v38  ;;  %v4238_v38 = vld [vmem:[#allocation17 + $0x1f8] sm:$0xf0] }
 0x51d   : > { %v4241_v62 = vor.u32 %v4695_v59, %v4238_v38  ;;  %v4156_v59 = vld [vmem:[#allocation17 + $0x148] sm:$0xf]  ;;  %v4643_v38 = vld [vmem:[#allocation17 + $0x4c] sm:$0xf] }
 0x51f   : > { %2544 = vmatpush.bf16.msra.mxu1 %v4165_v3  ;;  %v4221_v3 = vor.u32 %v4693_v1, %v4220_v0 }
 0x520   : > { %2572 = vmatpush.bf16.msra.mxu3 %v4169_v7 }
 0x523   : > { %2545 = vmatpush.bf16.msra.mxu1 %v4149_v13  ;;  %v4078_v13 = vld [vmem:[#allocation17 + $0xb8] sm:$0xf0] }
 0x524   : > { %2573 = vmatpush.bf16.msra.mxu3 %v4153_v17  ;;  %v4081_v16 = vor.u32 %v4655_v12, %v4078_v13  ;;  %v4687_v17 = vld [vmem:[#allocation17 + $0x1ac] sm:$0xf]  ;;  %v4142_v12 = vld [vmem:[#allocation17 + $0x138] sm:$0xf0] }
 0x586   : > { %v2057_v19 = vpop.xlane.xlu1 %2056 }
 0x587   : > { %v2068_v20 = vmul.f32 %v5774_v18, %v2057_v19  ;;  %v4640_v19 = vld [vmem:[#allocation17 + $0x2c] sm:$0xf0] }
 0x589   : > { %v5777_v21 = vsub.f32 %v2049_v40, %v2068_v20  ;;  %v5779_v22 = vsub.f32 %v2050_v43, %v2068_v20  ;;  %v4069_v40 = vor.u32 %v4656_v57, %v4068_v32  ;;  %v4654_v43 = vld [vmem:[#allocation17 + $0xa4] sm:$0xf]  ;;  %v4132_v20 = vld [vmem:[#allocation17 + $0x120] sm:$0xf] }
 0x58a   : > { %v4073_v47 = vor.u32 %v4654_v43, %v4070_v44  ;;  %v3988_v57 = vld [vmem:[#allocation17] sm:$0xf]  ;;  %v4668_v43 = vld [vmem:[#allocation17 + $0x10c] sm:$0xf0]  ;;  %v4634_v44 = vld [vmem:[#allocation17 + $0x4] sm:$0xf] }
 0x58b   : > { %v2074_v23 = vmul.f32 %v5777_v21, %v5777_v21  ;;  %v2075_v24 = vmul.f32 %v5779_v22, %v5779_v22  ;;  %2528 = vmatpush.bf16.msra.mxu0 %v4069_v40  ;;  %v4116_v40 = vld [vmem:[#allocation17 + $0x100] sm:$0xf]  ;;  %v3989_v41 = vor.u32 %v4636_v36, %v3988_v57  ;;  %v3993_v48 = vor.u32 %v4634_v44, %v3990_v46  ;;  %v4190_v36 = vld [vmem:[#allocation17 + $0x198] sm:$0xf0]  ;;  %v4649_v44 = vld [vmem:[#allocation17 + $0x74] sm:$0xf0] }
 0x58c   : > { %2556 = vmatpush.bf16.msra.mxu2 %v4073_v47  ;;  %v4117_v47 = vor.u32 %v4668_v43, %v4116_v40  ;;  %v4044_v43 = vld [vmem:[#allocation17 + $0x68] sm:$0xf] }
 0x58d   : > { %v2078_v25 = vadd.f32 %v2075_v24, %v2074_v23  ;;  %v4005_v23 = vor.u32 %v4640_v19, %v4004_v52  ;;  %v4672_v24 = vld [vmem:[#allocation17 + $0x12c] sm:$0xf0]  ;;  %v4206_v52 = vld [vmem:[#allocation17 + $0x1b8] sm:$0xf0]  ;;  %v4060_v19 = vld [vmem:[#allocation17 + $0x88] sm:$0xf] }
 0x58e   : > { %v2060_v26 = vpop.xlane.xlu0 %2059  ;;  %v4172_v46 = vld [vmem:[#allocation17 + $0x168] sm:$0xf] }
 0x58f   : > { %v2069_v27 = vmul.f32 %v5774_v18, %v2060_v26  ;;  %2079 = vadd.xlane.f32.xlu2 %v2078_v25  ;;  %v4638_v25 = vld [vmem:[#allocation17 + $0x24] sm:$0xf]  ;;  %v4006_v26 = vld [vmem:[#allocation17 + $0x30] sm:$0xf0] }
 0x591   : > { %v5786_v28 = vsub.f32 %v2051_v51, %v2069_v27  ;;  %v5788_v29 = vsub.f32 %v2052_v53, %v2069_v27  ;;  %v4053_v51 = vor.u32 %v4652_v50, %v4052_v33  ;;  %v4650_v53 = vld [vmem:[#allocation17 + $0x84] sm:$0xf]  ;;  %v4133_v27 = vor.u32 %v4672_v24, %v4132_v20  ;;  %v4108_v33 = vld [vmem:[#allocation17 + $0xe8] sm:$0xf]  ;;  %v4653_v24 = vld [vmem:[#allocation17 + $0x94] sm:$0xf0] }
 0x592   : > { %v4057_v58 = vor.u32 %v4650_v53, %v4054_v55  ;;  %v4121_v50 = vor.u32 %v4666_v45, %v4118_v49  ;;  %v4109_v53 = vor.u32 %v4665_v37, %v4108_v33  ;;  %v4647_v45 = vld [vmem:[#allocation17 + $0x6c] sm:$0xf]  ;;  %v4046_v49 = vld [vmem:[#allocation17 + $0x78] sm:$0xf0] }
 0x593   : > { %v2076_v54 = vmul.f32 %v5786_v28, %v5786_v28  ;;  %v2077_v30 = vmul.f32 %v5788_v29, %v5788_v29  ;;  %2529 = vmatpush.bf16.msra.mxu0 %v4053_v51  ;;  %2546 = vmatpush.bf16.msra.mxu1 %v4133_v27  ;;  %v4236_v51 = vld [vmem:[#allocation17 + $0x1e8] sm:$0xf]  ;;  %v4651_v27 = vld [vmem:[#allocation17 + $0x8c] sm:$0xf]  ;;  %v4049_v37 = vor.u32 %v4647_v45, %v4046_v49 }
 0x594   : > { %2557 = vmatpush.bf16.msra.mxu2 %v4057_v58  ;;  %v4237_v55 = vor.u32 %v4697_v42, %v4236_v51  ;;  %v4110_v58 = vld [vmem:[#allocation17 + $0xf8] sm:$0xf0]  ;;  %v4679_v51 = vld [vmem:[#allocation17 + $0x16c] sm:$0xf] }
 0x595   : > { %v2081_v31 = vadd.f32 %v2077_v30, %v2076_v54  ;;  %v4009_v54 = vor.u32 %v4638_v25, %v4006_v26  ;;  %v4670_v30 = vld [vmem:[#allocation17 + $0x124] sm:$0xf]  ;;  %v4113_v34 = vor.u32 %v4663_v56, %v4110_v58  ;;  %v4188_v25 = vld [vmem:[#allocation17 + $0x188] sm:$0xf]  ;;  %v4685_v26 = vld [vmem:[#allocation17 + $0x194] sm:$0xf0] }
 0x596   : > { %v4189_v57 = vor.u32 %v4685_v26, %v4188_v25  ;;  %v4174_v42 = vld [vmem:[#allocation17 + $0x178] sm:$0xf0]  ;;  %v4645_v58 = vld [vmem:[#allocation17 + $0x54] sm:$0xf0] }
 0x597   : > { %2082 = vadd.xlane.f32.xlu0 %v2081_v31  ;;  %2530 = vmatpush.bf16.msra.mxu0 %v4037_v63  ;;  %v4134_v31 = vld [vmem:[#allocation17 + $0x130] sm:$0xf0]  ;;  %v4093_v63 = vor.u32 %v4661_v61, %v4092_v60  ;;  %v4177_v56 = vor.u32 %v4679_v51, %v4174_v42  ;;  %v4030_v60 = vld [vmem:[#allocation17 + $0x58] sm:$0xf0]  ;;  %v4675_v61 = vld [vmem:[#allocation17 + $0x14c] sm:$0xf] }
 0x598   : > { %2558 = vmatpush.bf16.msra.mxu2 %v4041_v4  ;;  %v4137_v32 = vor.u32 %v4670_v30, %v4134_v31  ;;  %2547 = vmatpush.bf16.msra.mxu1 %v4117_v47  ;;  %v4094_v4 = vld [vmem:[#allocation17 + $0xd8] sm:$0xf0]  ;;  %v4683_v30 = vld [vmem:[#allocation17 + $0x18c] sm:$0xf]  ;;  %v4045_v47 = vor.u32 %v4649_v44, %v4044_v43  ;;  %v4033_v5 = vor.u32 %v4643_v38, %v4030_v60  ;;  %v4300_v60 = vld [vmem:[#allocation18 + $0x70] sm:$0xf] }
 0x599   : > { %v4097_v7 = vor.u32 %v4659_v2, %v4094_v4  ;;  %v4158_v2 = vld [vmem:[#allocation17 + $0x158] sm:$0xf0] }
 0x59a   : > { %2574 = vmatpush.bf16.msra.mxu3 %v4137_v32  ;;  %v4061_v32 = vor.u32 %v4653_v24, %v4060_v19  ;;  %v4161_v35 = vor.u32 %v4675_v61, %v4158_v2  ;;  %v4124_v19 = vld [vmem:[#allocation17 + $0x108] sm:$0xf]  ;;  %v4635_v24 = vld [vmem:[#allocation17 + $0xc] sm:$0xf]  ;;  %v3998_v25 = vld [vmem:[#allocation17 + $0x18] sm:$0xf0] }
 0x59b   : > { %2531 = vmatpush.bf16.msra.mxu0 %v4021_v39  ;;  %v4204_v39 = vld [vmem:[#allocation17 + $0x1a8] sm:$0xf]  ;;  %v4364_v61 = vld [vmem:[#allocation18 + $0xf0] sm:$0xf] }
 0x59c   : > { %2559 = vmatpush.bf16.msra.mxu2 %v4025_v14  ;;  %2596 = vmatpush.bf16.msrb.mxu1 %v4237_v55  ;;  %v4205_v15 = vor.u32 %v4689_v11, %v4204_v39  ;;  %v4014_v39 = vld [vmem:[#allocation17 + $0x38] sm:$0xf0]  ;;  %v4671_v11 = vld [vmem:[#allocation17 + $0x12c] sm:$0xf] }
 0x59e   : > { %2575 = vmatpush.bf16.msra.mxu3 %v4121_v50 }
 0x59f   : > { %2532 = vmatpush.bf16.msra.mxu0 %v4005_v23  ;;  %v4209_v23 = vor.u32 %v4687_v17, %v4206_v52  ;;  %v4017_v52 = vor.u32 %v4639_v9, %v4014_v39  ;;  %v4356_v39 = vld [vmem:[#allocation18 + $0xe0] sm:$0xf] }
 0x5a0   : > { %2560 = vmatpush.bf16.msra.mxu2 %v4009_v54  ;;  %2597 = vmatpush.bf16.msrb.mxu1 %v4221_v3  ;;  %v4062_v54 = vld [vmem:[#allocation17 + $0x98] sm:$0xf0]  ;;  %v4012_v3 = vld [vmem:[#allocation17 + $0x28] sm:$0xf] }
 0x5a1   : > { %v4065_v40 = vor.u32 %v4651_v27, %v4062_v54  ;;  %v4013_v13 = vor.u32 %v4641_v6, %v4012_v3  ;;  %v4667_v27 = vld [vmem:[#allocation17 + $0x10c] sm:$0xf]  ;;  %v4126_v54 = vld [vmem:[#allocation17 + $0x118] sm:$0xf0] }
 0x5a2   : > { %2624 = vmatpush.bf16.msrb.mxu3 %v4241_v62  ;;  %v4129_v43 = vor.u32 %v4667_v27, %v4126_v54  ;;  %v4412_v27 = vld [vmem:[#allocation18 + $0x150] sm:$0xf]  ;;  %v4741_v54 = vld [vmem:[#allocation18 + $0x154] sm:$0xf0] }
 0x5a3   : > { %2533 = vmatpush.bf16.msra.mxu0 %v3989_v41  ;;  %v4193_v41 = vor.u32 %v4683_v30, %v4190_v36 }
 0x5a4   : > { %2561 = vmatpush.bf16.msra.mxu2 %v3993_v48  ;;  %2598 = vmatpush.bf16.msrb.mxu1 %v4205_v15  ;;  %v4681_v48 = vld [vmem:[#allocation17 + $0x174] sm:$0xf0]  ;;  %v3996_v15 = vld [vmem:[#allocation17 + $0x8] sm:$0xf] }
 0x5a5   : > { %v4173_v50 = vor.u32 %v4681_v48, %v4172_v46  ;;  %v2053_v48 = vld [vmem:[#allocation14] sm:$0x3] }
 0x5a6   : > { %2625 = vmatpush.bf16.msrb.mxu3 %v4225_v8  ;;  %v4673_v8 = vld [vmem:[#allocation17 + $0x134] sm:$0xf0]  ;;  %v2114_v51 = vperm.slane %v2053_v48, 1 }
 0x5a7   : > { %2582 = vmatpush.bf16.msrb.mxu0 %v4109_v53  ;;  %v4028_v53 = vld [vmem:[#allocation17 + $0x48] sm:$0xf] }
 0x5a8   : > { %2610 = vmatpush.bf16.msrb.mxu2 %v4113_v34  ;;  %2599 = vmatpush.bf16.msrb.mxu1 %v4189_v57  ;;  %v4677_v34 = vld [vmem:[#allocation17 + $0x154] sm:$0xf0]  ;;  %v4029_v0 = vor.u32 %v4645_v58, %v4028_v53 }
 0x5a9   : > { %v4157_v1 = vor.u32 %v4677_v34, %v4156_v59 }
 0x5aa   : > { %2626 = vmatpush.bf16.msrb.mxu3 %v4209_v23  ;;  %v4145_v23 = vor.u32 %v4671_v11, %v4142_v12  ;;  %v4420_v12 = vld [vmem:[#allocation18 + $0x160] sm:$0xf] }
 0x5ab   : > { %2583 = vmatpush.bf16.msrb.mxu0 %v4093_v63 }
 0x5ac   : > { %2611 = vmatpush.bf16.msrb.mxu2 %v4097_v7  ;;  %2600 = vmatpush.bf16.msrb.mxu1 %v4173_v50  ;;  %v4140_v7 = vld [vmem:[#allocation17 + $0x128] sm:$0xf]  ;;  %v2054_v50 = vld [vmem:[#allocation15] sm:$0x3] }
 0x5ad   : > { %v2122_v53 = vperm.slane %v2054_v50, 0 }
 0x5ae   : > { %2627 = vmatpush.bf16.msrb.mxu3 %v4193_v41  ;;  %v4001_v41 = vor.u32 %v4635_v24, %v3998_v25  ;;  %v4725_v24 = vld [vmem:[#allocation18 + $0xd4] sm:$0xf0] }
 0x5af   : > { %2584 = vmatpush.bf16.msrb.mxu0 %v4077_v10 }
 0x5b0   : > { %2612 = vmatpush.bf16.msrb.mxu2 %v4081_v16  ;;  %2601 = vmatpush.bf16.msrb.mxu1 %v4157_v1  ;;  %v4637_v16 = vld [vmem:[#allocation17 + $0x14] sm:$0xf0] }
 0x5b2   : > { %2628 = vmatpush.bf16.msrb.mxu3 %v4177_v56 }
 0x5b3   : > { %2585 = vmatpush.bf16.msrb.mxu0 %v4061_v32  ;;  %v3997_v32 = vor.u32 %v4637_v16, %v3996_v15  ;;  %v4484_v15 = vld [vmem:[#allocation18 + $0x1e0] sm:$0xf]  ;;  %v4759_v16 = vld [vmem:[#allocation18 + $0x1e4] sm:$0xf0] }
 0x5b4   : > { %2613 = vmatpush.bf16.msrb.mxu2 %v4065_v40 }
 0x5b6   : > { %2629 = vmatpush.bf16.msrb.mxu3 %v4161_v35  ;;  %v4711_v35 = vld [vmem:[#allocation18 + $0x64] sm:$0xf0] }
 0x5b7   : > { %2586 = vmatpush.bf16.msrb.mxu0 %v4045_v47 }
 0x5b8   : > { %2614 = vmatpush.bf16.msrb.mxu2 %v4049_v37  ;;  %v2113_v37 = vperm.slane %v2053_v48, 0  ;;  %v4705_v48 = vld [vmem:[#allocation18 + $0x34] sm:$0xf0] }
 0x5ba   : > { %2630 = vmatpush.bf16.msrb.mxu3 %v4145_v23  ;;  %v4348_v23 = vld [vmem:[#allocation18 + $0xd0] sm:$0xf] }
 0x5bb   : > { %2587 = vmatpush.bf16.msrb.mxu0 %v4029_v0  ;;  %v4428_v0 = vld [vmem:[#allocation18 + $0x170] sm:$0xf] }
 0x5bc   : > { %2615 = vmatpush.bf16.msrb.mxu2 %v4033_v5 }
 0x5be   : > { %2631 = vmatpush.bf16.msrb.mxu3 %v4129_v43  ;;  %v4413_v43 = vor.u32 %v4741_v54, %v4412_v27  ;;  %v4708_v27 = vld [vmem:[#allocation18 + $0x54] sm:$0xf]  ;;  %v4286_v54 = vld [vmem:[#allocation18 + $0x58] sm:$0xf0] }
 0x5bf   : > { %2588 = vmatpush.bf16.msrb.mxu0 %v4013_v13 }
 0x5c0   : > { %2616 = vmatpush.bf16.msrb.mxu2 %v4017_v52  ;;  %v4284_v52 = vld [vmem:[#allocation18 + $0x50] sm:$0xf] }
 0x5c3   : > { %2589 = vmatpush.bf16.msrb.mxu0 %v3997_v32  ;;  %v4276_v32 = vld [vmem:[#allocation18 + $0x40] sm:$0xf] }
 0x5c4   : > { %2617 = vmatpush.bf16.msrb.mxu2 %v4001_v41  ;;  %v4723_v41 = vld [vmem:[#allocation18 + $0xc4] sm:$0xf0] }
 0x602   : > { %v2080_v14 = vpop.xlane.xlu2 %2079 }
 0x603   : > { %v2084_v20 = vmul.f32 %v2080_v14, %v5774_v18  ;;  %v4141_v14 = vor.u32 %v4673_v8, %v4140_v7  ;;  %v4292_v8 = vld [vmem:[#allocation18 + $0x60] sm:$0xf] }
 0x605   : > { %v5795_v31 = vadd.f32 1e-06, %v2084_v20  ;;  %v4669_v20 = vld [vmem:[#allocation17 + $0x114] sm:$0xf0]  ;;  %2602 = vmatpush.bf16.msrb.mxu1 %v4141_v14  ;;  %v4743_v14 = vld [vmem:[#allocation18 + $0x164] sm:$0xf0] }
 0x606   : > { %v4125_v57 = vor.u32 %v4669_v20, %v4124_v19  ;;  %v4709_v20 = vld [vmem:[#allocation18 + $0x54] sm:$0xf0]  ;;  %v4421_v25 = vor.u32 %v4743_v14, %v4420_v12  ;;  %v4715_v14 = vld [vmem:[#allocation18 + $0x84] sm:$0xf0] }
 0x607   : > { %4935 = vrsqrt.f32 %v5795_v31  ;;  %vm2094_vm7 = vweird.f32 %v5795_v31 }
 0x609   : > { %2603 = vmatpush.bf16.msrb.mxu1 %v4125_v57  ;;  %v4349_v57 = vor.u32 %v4725_v24, %v4348_v23  ;;  %v4388_v23 = vld [vmem:[#allocation18 + $0x120] sm:$0xf]  ;;  %v4735_v24 = vld [vmem:[#allocation18 + $0x124] sm:$0xf0] }
 0x60a   : > { %v2083_v33 = vpop.xlane.xlu0 %2082 }
 0x60b   : > { %v2085_v55 = vmul.f32 %v2083_v33, %v5774_v18 }
 0x60d   : > { %v4936_v62 = vpop.eup %4935  ;;  %v5799_v63 = vadd.f32 1e-06, %v2085_v55  ;;  %v2123_v55 = vperm.slane %v2054_v50, 1  ;;  %v4260_v50 = vld [vmem:[#allocation18 + $0x20] sm:$0xf] }
 0x60e   : > { %v2089_v4 = vmul.f32 %v4936_v62, %v5795_v31  ;;  %vm2095_vm6 = vweird.f32 %v4936_v62 }
 0x60f   : > { %4937 = vrsqrt.f32 %v5799_v63  ;;  %vm2096_vm8 = vmor %vm2094_vm7, %vm2095_vm6  ;;  %vm2104_vm10 = vweird.f32 %v5799_v63 }
 0x610   : > { %v2090_v10 = vmul.f32 %v4936_v62, %v2089_v4  ;;  %v4492_v4 = vld [vmem:[#allocation18 + $0x1f0] sm:$0xf] }
 0x612   : > { %v2091_v17 = vmul.f32 0.5, %v2090_v10  ;;  %v4727_v10 = vld [vmem:[#allocation18 + $0xe4] sm:$0xf0] }
 0x613   : > { %v4357_v19 = vor.u32 %v4727_v10, %v4356_v39  ;;  %v4710_v10 = vld [vmem:[#allocation18 + $0x64] sm:$0xf] }
 0x614   : > { %v2092_v26 = vsub.f32 1.5, %v2091_v17  ;;  %v4293_v17 = vor.u32 %v4711_v35, %v4292_v8  ;;  %v4396_v35 = vld [vmem:[#allocation18 + $0x130] sm:$0xf] }
 0x615   : > { %v4938_v30 = vpop.eup %4937 }
 0x616   : > { %v2093_v36 = vmul.f32 %v4936_v62, %v2092_v26  ;;  %v2099_v40 = vmul.f32 %v4938_v30, %v5799_v63  ;;  %vm2105_vm9 = vweird.f32 %v4938_v30  ;;  %v4485_v26 = vor.u32 %v4759_v16, %v4484_v15  ;;  %v4468_v16 = vld [vmem:[#allocation18 + $0x1c0] sm:$0xf] }
 0x617   : > { %vm2106_vm11 = vmor %vm2104_vm10, %vm2105_vm9 }
 0x618   : > { %v2100_v44 = vmul.f32 %v4938_v30, %v2099_v40  ;;  %v2097_v46 = vsel %vm2096_vm8, %v4936_v62, %v2093_v36  ;;  %v4729_v62 = vld [vmem:[#allocation18 + $0xf4] sm:$0xf0]  ;;  %v4707_v36 = vld [vmem:[#allocation18 + $0x44] sm:$0xf0]  ;;  %v4340_v40 = vld [vmem:[#allocation18 + $0xc0] sm:$0xf] }
 0x619   : > { %v2108_v49 = vmul.f32 %v2097_v46, %v5777_v21  ;;  %v2109_v33 = vmul.f32 %v2097_v46, %v5779_v22  ;;  %v4713_v22 = vld [vmem:[#allocation18 + $0x74] sm:$0xf0]  ;;  %v4365_v9 = vor.u32 %v4729_v62, %v4364_v61  ;;  %v4268_v46 = vld [vmem:[#allocation18 + $0x30] sm:$0xf]  ;;  %v4712_v61 = vld [vmem:[#allocation18 + $0x74] sm:$0xf] }
 0x61a   : > { %v2101_v47 = vmul.f32 0.5, %v2100_v44  ;;  %v4301_v7 = vor.u32 %v4713_v22, %v4300_v60  ;;  %v4277_v44 = vor.u32 %v4707_v36, %v4276_v32  ;;  %v4739_v22 = vld [vmem:[#allocation18 + $0x144] sm:$0xf0]  ;;  %v4302_v62 = vld [vmem:[#allocation18 + $0x78] sm:$0xf0] }
 0x61b   : > { %v2117_v59 = vmul.f32 %v2113_v37, %v2108_v49  ;;  %v2118_v34 = vmul.f32 %v2114_v51, %v2109_v33  ;;  %v4721_v49 = vld [vmem:[#allocation18 + $0xb4] sm:$0xf0]  ;;  %v4269_v33 = vor.u32 %v4705_v48, %v4268_v46  ;;  %v4460_v32 = vld [vmem:[#allocation18 + $0x1b0] sm:$0xf]  ;;  %v4706_v48 = vld [vmem:[#allocation18 + $0x44] sm:$0xf] }
 0x61c   : > { %v2102_v45 = vsub.f32 1.5, %v2101_v47  ;;  %v4341_v47 = vor.u32 %v4723_v41, %v4340_v40  ;;  %v4726_v40 = vld [vmem:[#allocation18 + $0xe4] sm:$0xf]  ;;  %v4358_v41 = vld [vmem:[#allocation18 + $0xe8] sm:$0xf0] }
 0x61d   : > { %v5810_v1 = vadd.f32 %v2122_v53, %v2117_v59  ;;  %v5814_v2 = vadd.f32 %v2123_v55, %v2118_v34  ;;  %v4244_v34 = vld [vmem:[#allocation18] sm:$0xf]  ;;  %v4733_v46 = vld [vmem:[#allocation18 + $0x114] sm:$0xf0] }
 0x61e   : > { %v2103_v42 = vmul.f32 %v4938_v30, %v2102_v45  ;;  %v4332_v45 = vld [vmem:[#allocation18 + $0xb0] sm:$0xf] }
 0x620   : > { %v2107_v31 = vsel %vm2106_vm11, %v4938_v30, %v2103_v42  ;;  %v4285_v30 = vor.u32 %v4709_v20, %v4284_v52  ;;  %v4324_v42 = vld [vmem:[#allocation18 + $0xa0] sm:$0xf]  ;;  %v4728_v52 = vld [vmem:[#allocation18 + $0xf4] sm:$0xf]  ;;  %v4366_v20 = vld [vmem:[#allocation18 + $0xf8] sm:$0xf0] }
 0x621   : > { %v2110_v56 = vmul.f32 %v2107_v31, %v5786_v28  ;;  %v2111_v58 = vmul.f32 %v2107_v31, %v5788_v29  ;;  %v4745_v28 = vld [vmem:[#allocation18 + $0x174] sm:$0xf0]  ;;  %v4719_v31 = vld [vmem:[#allocation18 + $0xa4] sm:$0xf0] }
 0x622   : > { %v4761_v29 = vld [vmem:[#allocation18 + $0x1f4] sm:$0xf0]  ;;  %v4429_v11 = vor.u32 %v4745_v28, %v4428_v0  ;;  %v4305_v28 = vor.u32 %v4712_v61, %v4302_v62  ;;  %v4722_v62 = vld [vmem:[#allocation18 + $0xc4] sm:$0xf] }
 0x623   : > { %v2119_v38 = vmul.f32 %v2113_v37, %v2110_v56  ;;  %v2120_v21 = vmul.f32 %v2114_v51, %v2111_v58  ;;  %v4493_v13 = vor.u32 %v4761_v29, %v4492_v4  ;;  %v4333_v37 = vor.u32 %v4721_v49, %v4332_v45  ;;  %v4703_v51 = vld [vmem:[#allocation18 + $0x24] sm:$0xf0]  ;;  %v4252_v56 = vld [vmem:[#allocation18 + $0x10] sm:$0xf]  ;;  %v4701_v58 = vld [vmem:[#allocation18 + $0x14] sm:$0xf0] }
 0x624   : > { %v4253_v59 = vor.u32 %v4701_v58, %v4252_v56  ;;  %v4316_v4 = vld [vmem:[#allocation18 + $0x90] sm:$0xf]  ;;  %v4717_v29 = vld [vmem:[#allocation18 + $0x94] sm:$0xf0]  ;;  %v4278_v45 = vld [vmem:[#allocation18 + $0x48] sm:$0xf0] }
 0x625   : > { %v5812_v63 = vadd.f32 %v2122_v53, %v2119_v38  ;;  %v5816_v3 = vadd.f32 %v2123_v55, %v2120_v21  ;;  %v4261_v53 = vor.u32 %v4703_v51, %v4260_v50  ;;  %v4325_v55 = vor.u32 %v4719_v31, %v4324_v42  ;;  %v4699_v38 = vld [vmem:[#allocation18 + $0x4] sm:$0xf0]  ;;  %v4404_v21 = vld [vmem:[#allocation18 + $0x140] sm:$0xf]  ;;  %v4724_v51 = vld [vmem:[#allocation18 + $0xd4] sm:$0xf] }
 0x626   : > { %v4245_v60 = vor.u32 %v4699_v38, %v4244_v34  ;;  %v4405_v0 = vor.u32 %v4739_v22, %v4404_v21  ;;  %v4281_v49 = vor.u32 %v4706_v48, %v4278_v45  ;;  %v4751_v50 = vld [vmem:[#allocation18 + $0x1a4] sm:$0xf0]  ;;  %v4350_v42 = vld [vmem:[#allocation18 + $0xd8] sm:$0xf0]  ;;  %v4704_v58 = vld [vmem:[#allocation18 + $0x34] sm:$0xf] }
 0x627   : > { %v2130_v5 = vpack.c.bf16 %v5812_v63, %v5810_v1  ;;  %v2131_v6 = vpack.c.bf16 %v5816_v3, %v5814_v2  ;;  %v4353_v31 = vor.u32 %v4724_v51, %v4350_v42  ;;  %v4744_v38 = vld [vmem:[#allocation18 + $0x174] sm:$0xf]  ;;  %v4430_v21 = vld [vmem:[#allocation18 + $0x178] sm:$0xf0]  ;;  %v4749_v61 = vld [vmem:[#allocation18 + $0x194] sm:$0xf0] }
 0x628   : > { %v4433_v22 = vor.u32 %v4744_v38, %v4430_v21  ;;  %v4318_v48 = vld [vmem:[#allocation18 + $0x98] sm:$0xf0]  ;;  %v4756_v45 = vld [vmem:[#allocation18 + $0x1d4] sm:$0xf]  ;;  %v4470_v38 = vld [vmem:[#allocation18 + $0x1c8] sm:$0xf0] }
 0x629   : > { %2534 = vmatmul.bf16.vlgmr.msra.gmra.mxu0 %v2130_v5  ;;  %2548 = vmatmul.bf16.vlgmr.msra.gmra.mxu1 %v2131_v6  ;;  %v4736_v42 = vld [vmem:[#allocation18 + $0x134] sm:$0xf] }
 0x62a   : > { %2562 = vmatmul.bf16.vlgmr.msra.gmra.mxu2 %v2130_v5  ;;  %2576 = vmatmul.bf16.vlgmr.msra.gmra.mxu3 %v2131_v6 }
 0x62b   : > { %3040 = vmatpush.bf16.msra.mxu0 %v4301_v7  ;;  %3054 = vmatpush.bf16.msra.mxu1 %v4365_v9  ;;  %v4757_v7 = vld [vmem:[#allocation18 + $0x1d4] sm:$0xf0] }
 0x62c   : > { %3068 = vmatpush.bf16.msra.mxu2 %v4429_v11  ;;  %3082 = vmatpush.bf16.msra.mxu3 %v4493_v13  ;;  %v4737_v9 = vld [vmem:[#allocation18 + $0x134] sm:$0xf0]  ;;  %v4294_v11 = vld [vmem:[#allocation18 + $0x68] sm:$0xf0]  ;;  %v4308_v13 = vld [vmem:[#allocation18 + $0x80] sm:$0xf] }
 0x62d   : > { %v4397_v39 = vor.u32 %v4737_v9, %v4396_v35  ;;  %v4297_v12 = vor.u32 %v4710_v10, %v4294_v11  ;;  %v4309_v15 = vor.u32 %v4715_v14, %v4308_v13  ;;  %v4436_v35 = vld [vmem:[#allocation18 + $0x180] sm:$0xf]  ;;  %v4747_v9 = vld [vmem:[#allocation18 + $0x184] sm:$0xf0]  ;;  %v4720_v11 = vld [vmem:[#allocation18 + $0xb4] sm:$0xf] }
 0x62e   : > { %v4437_v10 = vor.u32 %v4747_v9, %v4436_v35  ;;  %v4760_v14 = vld [vmem:[#allocation18 + $0x1f4] sm:$0xf]  ;;  %v4382_v9 = vld [vmem:[#allocation18 + $0x118] sm:$0xf0] }
 0x62f   : > { %3041 = vmatpush.bf16.msra.mxu0 %v4293_v17  ;;  %3055 = vmatpush.bf16.msra.mxu1 %v4357_v19  ;;  %v4755_v17 = vld [vmem:[#allocation18 + $0x1c4] sm:$0xf0]  ;;  %v4732_v35 = vld [vmem:[#allocation18 + $0x114] sm:$0xf] }
 0x630   : > { %3069 = vmatpush.bf16.msra.mxu2 %v4421_v25  ;;  %3083 = vmatpush.bf16.msra.mxu3 %v4485_v26  ;;  %v4469_v19 = vor.u32 %v4755_v17, %v4468_v16  ;;  %v4369_v25 = vor.u32 %v4728_v52, %v4366_v20  ;;  %v4389_v26 = vor.u32 %v4735_v24, %v4388_v23  ;;  %v4700_v17 = vld [vmem:[#allocation18 + $0x14] sm:$0xf]  ;;  %v4254_v52 = vld [vmem:[#allocation18 + $0x18] sm:$0xf0] }
 0x631   : > { %v4257_v20 = vor.u32 %v4700_v17, %v4254_v52  ;;  %v4414_v23 = vld [vmem:[#allocation18 + $0x158] sm:$0xf0]  ;;  %v4748_v52 = vld [vmem:[#allocation18 + $0x194] sm:$0xf] }
 0x633   : > { %3042 = vmatpush.bf16.msra.mxu0 %v4285_v30  ;;  %3056 = vmatpush.bf16.msra.mxu1 %v4349_v57  ;;  %v4289_v30 = vor.u32 %v4708_v27, %v4286_v54  ;;  %v4753_v57 = vld [vmem:[#allocation18 + $0x1b4] sm:$0xf0]  ;;  %v4758_v27 = vld [vmem:[#allocation18 + $0x1e4] sm:$0xf] }
 0x634   : > { %3070 = vmatpush.bf16.msra.mxu2 %v4413_v43  ;;  %v4461_v36 = vor.u32 %v4753_v57, %v4460_v32  ;;  %v4361_v43 = vor.u32 %v4726_v40, %v4358_v41  ;;  %v4698_v57 = vld [vmem:[#allocation18 + $0x4] sm:$0xf]  ;;  %v5825_v41 = vld [vmem:[%s5953_s29] sm:$0xf] }
 0x635   : > { %v4738_v40 = vld [vmem:[#allocation18 + $0x144] sm:$0xf] }
 0x637   : > { %3043 = vmatpush.bf16.msra.mxu0 %v4277_v44  ;;  %3057 = vmatpush.bf16.msra.mxu1 %v4341_v47  ;;  %v4380_v44 = vld [vmem:[#allocation18 + $0x110] sm:$0xf] }
 0x638   : > { %3071 = vmatpush.bf16.msra.mxu2 %v4405_v0  ;;  %v4381_v47 = vor.u32 %v4733_v46, %v4380_v44  ;;  %v4342_v0 = vld [vmem:[#allocation18 + $0xc8] sm:$0xf0] }
 0x639   : > { %2590 = vmatmul.bf16.vlgmr.msrb.gmra.mxu0 %v2130_v5  ;;  %2604 = vmatmul.bf16.vlgmr.msrb.gmra.mxu1 %v2131_v6  ;;  %v4406_v44 = vld [vmem:[#allocation18 + $0x148] sm:$0xf0] }
 0x63a   : > { %2618 = vmatmul.bf16.vlgmr.msrb.gmra.mxu2 %v2130_v5  ;;  %2632 = vmatmul.bf16.vlgmr.msrb.gmra.mxu3 %v2131_v6  ;;  %v4476_v5 = vld [vmem:[#allocation18 + $0x1d0] sm:$0xf]  ;;  %v4317_v6 = vor.u32 %v4717_v29, %v4316_v4  ;;  %v4345_v4 = vor.u32 %v4722_v62, %v4342_v0  ;;  %v4702_v29 = vld [vmem:[#allocation18 + $0x24] sm:$0xf]  ;;  %v4409_v46 = vor.u32 %v4738_v40, %v4406_v44  ;;  %v4752_v0 = vld [vmem:[#allocation18 + $0x1b4] sm:$0xf] }
 0x63b   : > { %3044 = vmatpush.bf16.msra.mxu0 %v4269_v33  ;;  %3058 = vmatpush.bf16.msra.mxu1 %v4333_v37  ;;  %v4477_v8 = vor.u32 %v4757_v7, %v4476_v5  ;;  %v4452_v33 = vld [vmem:[#allocation18 + $0x1a0] sm:$0xf]  ;;  %v4262_v5 = vld [vmem:[#allocation18 + $0x28] sm:$0xf0]  ;;  %v4746_v44 = vld [vmem:[#allocation18 + $0x184] sm:$0xf] }
 0x63c   : > { %3072 = vmatpush.bf16.msra.mxu2 %v4397_v39  ;;  %v4453_v37 = vor.u32 %v4751_v50, %v4452_v33  ;;  %v4265_v7 = vor.u32 %v4702_v29, %v4262_v5  ;;  %v4478_v33 = vld [vmem:[#allocation18 + $0x1d8] sm:$0xf0] }
 0x63d   : > { %3084 = vmatpush.bf16.msra.mxu3 %v4477_v8  ;;  %v4422_v8 = vld [vmem:[#allocation18 + $0x168] sm:$0xf0]  ;;  %v4481_v51 = vor.u32 %v4756_v45, %v4478_v33 }
 0x63f   : > { %3045 = vmatpush.bf16.msra.mxu0 %v4261_v53  ;;  %3059 = vmatpush.bf16.msra.mxu1 %v4325_v55  ;;  %v4372_v53 = vld [vmem:[#allocation18 + $0x100] sm:$0xf]  ;;  %v4731_v55 = vld [vmem:[#allocation18 + $0x104] sm:$0xf0] }
 0x640   : > { %3073 = vmatpush.bf16.msra.mxu2 %v4389_v26  ;;  %v4373_v56 = vor.u32 %v4731_v55, %v4372_v53  ;;  %v4326_v26 = vld [vmem:[#allocation18 + $0xa8] sm:$0xf0]  ;;  %v2198_v53 = vperm.slane %v5825_v41, 0 }
 0x641   : > { %3085 = vmatpush.bf16.msra.mxu3 %v4469_v19  ;;  %v4740_v19 = vld [vmem:[#allocation18 + $0x154] sm:$0xf] }
 0x642   : > { %v4417_v24 = vor.u32 %v4740_v19, %v4414_v23  ;;  %v4446_v19 = vld [vmem:[#allocation18 + $0x198] sm:$0xf0] }
 0x643   : > { %3046 = vmatpush.bf16.msra.mxu0 %v4253_v59  ;;  %3060 = vmatpush.bf16.msra.mxu1 %v4317_v6  ;;  %v4270_v59 = vld [vmem:[#allocation18 + $0x38] sm:$0xf0]  ;;  %v4742_v6 = vld [vmem:[#allocation18 + $0x164] sm:$0xf] }
 0x644   : > { %3074 = vmatpush.bf16.msra.mxu2 %v4381_v47  ;;  %v4273_v34 = vor.u32 %v4704_v58, %v4270_v59  ;;  %v4425_v39 = vor.u32 %v4742_v6, %v4422_v8  ;;  %v4716_v47 = vld [vmem:[#allocation18 + $0x94] sm:$0xf]  ;;  %v4310_v58 = vld [vmem:[#allocation18 + $0x88] sm:$0xf0]  ;;  %v4754_v59 = vld [vmem:[#allocation18 + $0x1c4] sm:$0xf] }
 0x645   : > { %3086 = vmatpush.bf16.msra.mxu3 %v4461_v36  ;;  %v4246_v36 = vld [vmem:[#allocation18 + $0x8] sm:$0xf0]  ;;  %v4473_v21 = vor.u32 %v4754_v59, %v4470_v38 }
 0x647   : > { %3047 = vmatpush.bf16.msra.mxu0 %v4245_v60  ;;  %3061 = vmatpush.bf16.msra.mxu1 %v4309_v15  ;;  %v4444_v60 = vld [vmem:[#allocation18 + $0x190] sm:$0xf]  ;;  %v4494_v15 = vld [vmem:[#allocation18 + $0x1f8] sm:$0xf0] }
 0x648   : > { %3075 = vmatpush.bf16.msra.mxu2 %v4373_v56  ;;  %v4497_v16 = vor.u32 %v4760_v14, %v4494_v15  ;;  %v4714_v56 = vld [vmem:[#allocation18 + $0x84] sm:$0xf]  ;;  %v4374_v15 = vld [vmem:[#allocation18 + $0x108] sm:$0xf0] }
 0x649   : > { %3087 = vmatpush.bf16.msra.mxu3 %v4453_v37  ;;  %v4730_v14 = vld [vmem:[#allocation18 + $0x104] sm:$0xf] }
 0x64a   : > { %v4377_v23 = vor.u32 %v4730_v14, %v4374_v15 }
 0x64b   : > { %3096 = vmatpush.bf16.msrb.mxu0 %v4305_v28  ;;  %3110 = vmatpush.bf16.msrb.mxu1 %v4369_v25  ;;  %v4445_v28 = vor.u32 %v4749_v61, %v4444_v60  ;;  %v4718_v25 = vld [vmem:[#allocation18 + $0xa4] sm:$0xf] }
 0x64c   : > { %3124 = vmatpush.bf16.msrb.mxu2 %v4433_v22  ;;  %v4329_v54 = vor.u32 %v4718_v25, %v4326_v26  ;;  %v4734_v60 = vld [vmem:[#allocation18 + $0x124] sm:$0xf]  ;;  %v4390_v22 = vld [vmem:[#allocation18 + $0x128] sm:$0xf0]  ;;  %v4449_v26 = vor.u32 %v4748_v52, %v4446_v19 }
 0x64d   : > { %3088 = vmatpush.bf16.msra.mxu3 %v4445_v28  ;;  %v4393_v62 = vor.u32 %v4734_v60, %v4390_v22  ;;  %v4462_v28 = vld [vmem:[#allocation18 + $0x1b8] sm:$0xf0] }
 0x64e   : > { %v4465_v6 = vor.u32 %v4752_v0, %v4462_v28 }
 0x64f   : > { %3097 = vmatpush.bf16.msrb.mxu0 %v4297_v12  ;;  %3111 = vmatpush.bf16.msrb.mxu1 %v4361_v43  ;;  %v4334_v12 = vld [vmem:[#allocation18 + $0xb8] sm:$0xf0]  ;;  %v4249_v43 = vor.u32 %v4698_v57, %v4246_v36 }
 0x650   : > { %v4337_v13 = vor.u32 %v4720_v11, %v4334_v12  ;;  %3125 = vmatpush.bf16.msrb.mxu2 %v4425_v39  ;;  %v4750_v39 = vld [vmem:[#allocation18 + $0x1a4] sm:$0xf]  ;;  %v4385_v12 = vor.u32 %v4732_v35, %v4382_v9 }
 0x651   : > { %3089 = vmatpush.bf16.msra.mxu3 %v4437_v10 }
 0x653   : > { %3098 = vmatpush.bf16.msrb.mxu0 %v4289_v30  ;;  %3112 = vmatpush.bf16.msrb.mxu1 %v4353_v31  ;;  %v4486_v30 = vld [vmem:[#allocation18 + $0x1e8] sm:$0xf0]  ;;  %v4398_v31 = vld [vmem:[#allocation18 + $0x138] sm:$0xf0] }
 0x654   : > { %3126 = vmatpush.bf16.msrb.mxu2 %v4417_v24  ;;  %v4489_v32 = vor.u32 %v4758_v27, %v4486_v30  ;;  %v4401_v55 = vor.u32 %v4736_v42, %v4398_v31  ;;  %v2201_v42 = vperm.slane %v5825_v41, 3 }
 0x655   : > { %3138 = vmatpush.bf16.msrb.mxu3 %v4497_v16 }
 0x657   : > { %3099 = vmatpush.bf16.msrb.mxu0 %v4281_v49  ;;  %3113 = vmatpush.bf16.msrb.mxu1 %v4345_v4  ;;  %v4321_v49 = vor.u32 %v4716_v47, %v4318_v48  ;;  %v2199_v4 = vperm.slane %v5825_v41, 1 }
 0x658   : > { %3127 = vmatpush.bf16.msrb.mxu2 %v4409_v46  ;;  %v4438_v46 = vld [vmem:[#allocation18 + $0x188] sm:$0xf0] }
 0x659   : > { %3139 = vmatpush.bf16.msrb.mxu3 %v4489_v32  ;;  %v4441_v48 = vor.u32 %v4746_v44, %v4438_v46 }
 0x65b   : > { %3100 = vmatpush.bf16.msrb.mxu0 %v4273_v34  ;;  %3114 = vmatpush.bf16.msrb.mxu1 %v4337_v13  ;;  %v4313_v34 = vor.u32 %v4714_v56, %v4310_v58  ;;  %v4454_v13 = vld [vmem:[#allocation18 + $0x1a8] sm:$0xf0] }
 0x65c   : > { %3128 = vmatpush.bf16.msrb.mxu2 %v4401_v55  ;;  %v4457_v16 = vor.u32 %v4750_v39, %v4454_v13  ;;  %v2714_v39 = vld [vmem:[%s5954_s3] sm:$0x3] }
 0x65d   : > { %3140 = vmatpush.bf16.msrb.mxu3 %v4481_v51 }
 0x65f   : > { %3101 = vmatpush.bf16.msrb.mxu0 %v4265_v7  ;;  %3115 = vmatpush.bf16.msrb.mxu1 %v4329_v54 }
 0x660   : > { %3129 = vmatpush.bf16.msrb.mxu2 %v4393_v62 }
 0x661   : > { %3141 = vmatpush.bf16.msrb.mxu3 %v4473_v21 }
 0x663   : > { %3102 = vmatpush.bf16.msrb.mxu0 %v4257_v20  ;;  %3116 = vmatpush.bf16.msrb.mxu1 %v4321_v49 }
 0x664   : > { %3130 = vmatpush.bf16.msrb.mxu2 %v4385_v12  ;;  %v2717_v12 = vperm.slane %v2714_v39, 1 }
 0x665   : > { %3142 = vmatpush.bf16.msrb.mxu3 %v4465_v6 }
 0x667   : > { %3103 = vmatpush.bf16.msrb.mxu0 %v4249_v43  ;;  %3117 = vmatpush.bf16.msrb.mxu1 %v4313_v34  ;;  %v2200_v43 = vperm.slane %v5825_v41, 2 }
 0x668   : > { %3131 = vmatpush.bf16.msrb.mxu2 %v4377_v23 }
 0x669   : > { %3143 = vmatpush.bf16.msrb.mxu3 %v4457_v16 }
 0x66d   : > { %3144 = vmatpush.bf16.msrb.mxu3 %v4449_v26 }
 0x671   : > { %3145 = vmatpush.bf16.msrb.mxu3 %v4441_v48 }
 0x6a6   : > { %v2535_v50 = vpop.f32.mrf.mxu0  ;;  %v2549_v37 = vpop.f32.mrf.mxu1 }
 0x6a7   : > { %v2536_v61 = vadd.f32 %v2535_v50, %v2198_v53 }
 0x6a9   : > { %v2550_v10 = vadd.f32 %v2549_v37, %v2536_v61 }
 0x6ab   : > { %v2638_v24 = vmax.f32 %v2550_v10, 0.0  ;;  %v2716_v10 = vperm.slane %v2714_v39, 0 }
 0x6ad   : > { %v2563_v29 = vpop.f32.mrf.mxu2  ;;  %v2577_v5 = vpop.f32.mrf.mxu3 }
 0x6ae   : > { %v2537_v7 = vpop.f32.mrf.mxu0  ;;  %v2551_v8 = vpop.f32.mrf.mxu1  ;;  %v2564_v20 = vadd.f32 %v2563_v29, %v2199_v4 }
 0x6af   : > { %v2538_v11 = vadd.f32 %v2537_v7, %v2198_v53 }
 0x6b0   : > { %v2578_v32 = vadd.f32 %v2577_v5, %v2564_v20 }
 0x6b1   : > { %v2552_v17 = vadd.f32 %v2551_v8, %v2538_v11 }
 0x6b2   : > { %v2639_v45 = vmax.f32 %v2578_v32, 0.0 }
 0x6b3   : > { %v2642_v25 = vmax.f32 %v2552_v17, 0.0 }
 0x6b5   : > { %v2646_v27 = vpack.c.bf16 %v2642_v25, %v2638_v24  ;;  %v2565_v54 = vpop.f32.mrf.mxu2  ;;  %v2579_v30 = vpop.f32.mrf.mxu3 }
 0x6b6   : > { %v2566_v57 = vadd.f32 %v2565_v54, %v2199_v4  ;;  %v2591_v36 = vpop.f32.mrf.mxu0  ;;  %v2605_v40 = vpop.f32.mrf.mxu1 }
 0x6b7   : > { %3048 = vmatmul.bf16.vlgmr.msra.gmra.mxu0 %v2646_v27  ;;  %v2592_v33 = vadd.f32 %v2591_v36, %v2200_v43 }
 0x6b8   : > { %v2580_v47 = vadd.f32 %v2579_v30, %v2566_v57 }
 0x6b9   : > { %v2606_v53 = vadd.f32 %v2605_v40, %v2592_v33 }
 0x6ba   : > { %v2643_v49 = vmax.f32 %v2580_v47, 0.0 }
 0x6bb   : > { %v2640_v34 = vmax.f32 %v2606_v53, 0.0 }
 0x6bc   : > { %v2647_v50 = vpack.c.bf16 %v2643_v49, %v2639_v45 }
 0x6bd   : > { %v2619_v37 = vpop.f32.mrf.mxu2  ;;  %v2633_v51 = vpop.f32.mrf.mxu3 }
 0x6be   : > { %3062 = vmatmul.bf16.vlgmr.msra.gmra.mxu1 %v2647_v50  ;;  %v2593_v31 = vpop.f32.mrf.mxu0  ;;  %v2607_v56 = vpop.f32.mrf.mxu1  ;;  %v2620_v59 = vadd.f32 %v2619_v37, %v2201_v42 }
 0x6bf   : > { %v2594_v55 = vadd.f32 %v2593_v31, %v2200_v43 }
 0x6c0   : > { %v2634_v22 = vadd.f32 %v2633_v51, %v2620_v59 }
 0x6c1   : > { %v2608_v58 = vadd.f32 %v2607_v56, %v2594_v55 }
 0x6c2   : > { %v2641_v28 = vmax.f32 %v2634_v22, 0.0 }
 0x6c3   : > { %v2644_v38 = vmax.f32 %v2608_v58, 0.0 }
 0x6c5   : > { %v2648_v21 = vpack.c.bf16 %v2644_v38, %v2640_v34  ;;  %v2621_v60 = vpop.f32.mrf.mxu2  ;;  %v2635_v62 = vpop.f32.mrf.mxu3 }
 0x6c6   : > { %v2622_v61 = vadd.f32 %v2621_v60, %v2201_v42 }
 0x6c7   : > { %3076 = vmatmul.bf16.vlgmr.msra.gmra.mxu2 %v2648_v21  ;;  %3104 = vmatmul.bf16.vlgmr.msrb.gmra.mxu0 %v2646_v27 }
 0x6c8   : > { %v2636_v0 = vadd.f32 %v2635_v62, %v2622_v61 }
 0x6ca   : > { %v2645_v4 = vmax.f32 %v2636_v0, 0.0 }
 0x6cc   : > { %v2649_v41 = vpack.c.bf16 %v2645_v4, %v2641_v28 }
 0x6ce   : > { %3090 = vmatmul.bf16.vlgmr.msra.gmra.mxu3 %v2649_v41  ;;  %3118 = vmatmul.bf16.vlgmr.msrb.gmra.mxu1 %v2647_v50 }
 0x6d7   : > { %3132 = vmatmul.bf16.vlgmr.msrb.gmra.mxu2 %v2648_v21 }
 0x6de   : > { %3146 = vmatmul.bf16.vlgmr.msrb.gmra.mxu3 %v2649_v41 }
 0x734   : > { %v3049_v29 = vpop.f32.mrf.mxu0 }
 0x735   : > { %v3050_v15 = vadd.f32 %v3049_v29, %v2716_v10 }
 0x73b   : > { %v3063_v5 = vpop.f32.mrf.mxu1 }
 0x73c   : > { %v3051_v7 = vpop.f32.mrf.mxu0  ;;  %v3064_v17 = vadd.f32 %v3063_v5, %v3050_v15 }
 0x73d   : > { %v3052_v27 = vadd.f32 %v3051_v7, %v2716_v10 }
 0x743   : > { %v3065_v8 = vpop.f32.mrf.mxu1 }
 0x744   : > { %v3105_v11 = vpop.f32.mrf.mxu0  ;;  %v3066_v32 = vadd.f32 %v3065_v8, %v3052_v27 }
 0x745   : > { %v3106_v52 = vadd.f32 %v3105_v11, %v2717_v12 }
 0x74a   : > { %v3077_v6 = vpop.f32.mrf.mxu2 }
 0x74b   : > { %v3119_v13 = vpop.f32.mrf.mxu1  ;;  %v3078_v19 = vadd.f32 %v3077_v6, %v3064_v17  ;;  %v3156_v6 = vld [vmem:[%s5955_s16] sm:$0x3] }
 0x74c   : > { %v3120_v20 = vadd.f32 %v3119_v13, %v3106_v52  ;;  %v3107_v25 = vpop.f32.mrf.mxu0  ;;  %v3209_v39 = vperm.slane %v3156_v6, 0  ;;  %v3210_v10 = vperm.slane %v3156_v6, 1 }
 0x74d   : > { %v3108_v57 = vadd.f32 %v3107_v25, %v2717_v12 }
 0x751   : > { %v3091_v35 = vpop.f32.mrf.mxu3 }
 0x752   : > { %v3079_v9 = vpop.f32.mrf.mxu2  ;;  %v3092_v23 = vadd.f32 %v3091_v35, %v3078_v19  ;;  %v3157_v35 = vld [vmem:[%s5956_s13] sm:$0x3] }
 0x753   : > { %v3121_v30 = vpop.f32.mrf.mxu1  ;;  %v3080_v44 = vadd.f32 %v3079_v9, %v3066_v32  ;;  %v3218_v13 = vperm.slane %v3157_v35, 0 }
 0x754   : > { %v3152_v36 = vadd.f32 %v3092_v23, %v5810_v1  ;;  %v3122_v46 = vadd.f32 %v3121_v30, %v3108_v57 }
 0x759   : > { %v3093_v14 = vpop.f32.mrf.mxu3 }
 0x75a   : > { %v3133_v16 = vpop.f32.mrf.mxu2  ;;  %v3094_v48 = vadd.f32 %v3093_v14, %v3080_v44  ;;  %v3219_v14 = vperm.slane %v3157_v35, 1 }
 0x75b   : > { %v3134_v24 = vadd.f32 %v3133_v16, %v3120_v20 }
 0x75c   : > { %v3154_v50 = vadd.f32 %v3094_v48, %v5812_v63 }
 0x761   : > { %v3147_v26 = vpop.f32.mrf.mxu3 }
 0x762   : > { %v3148_v54 = vadd.f32 %v3147_v26, %v3134_v24  ;;  %v3135_v43 = vpop.f32.mrf.mxu2 }
 0x763   : > { %v3136_v45 = vadd.f32 %v3135_v43, %v3122_v46 }
 0x764   : > { %v3153_v40 = vadd.f32 %v3148_v54, %v5814_v2 }
 0x766   : > { %v3158_v47 = vadd.f32 %v3153_v40, %v3152_v36 }
 0x768   : > { %3159 = vadd.xlane.f32.xlu0 %v3158_v47 }
 0x769   : > { %v3149_v49 = vpop.f32.mrf.mxu3 }
 0x76a   : > { %v3150_v33 = vadd.f32 %v3149_v49, %v3136_v45 }
 0x76c   : > { %v3155_v37 = vadd.f32 %v3150_v33, %v5816_v3 }
 0x76e   : > { %v3161_v51 = vadd.f32 %v3155_v37, %v3154_v50 }
 0x770   : > { %3162 = vadd.xlane.f32.xlu0 %v3161_v51 }
 0x7db   : > { %v3160_v42 = vpop.xlane.xlu0 %3159 }
 0x7dc   : > { %v3164_v1 = vmul.f32 %v3160_v42, %v5774_v18 }
 0x7de   : > { %v3166_v31 = vsub.f32 %v3152_v36, %v3164_v1  ;;  %v3167_v2 = vsub.f32 %v3153_v40, %v3164_v1 }
 0x7e0   : > { %v3170_v53 = vmul.f32 %v3166_v31, %v3166_v31  ;;  %v3171_v55 = vmul.f32 %v3167_v2, %v3167_v2 }
 0x7e2   : > { %v3174_v56 = vadd.f32 %v3171_v55, %v3170_v53 }
 0x7e3   : > { %v3163_v58 = vpop.xlane.xlu0 %3162 }
 0x7e4   : > { %v3165_v59 = vmul.f32 %v3163_v58, %v5774_v18  ;;  %3175 = vadd.xlane.f32.xlu0 %v3174_v56 }
 0x7e6   : > { %v3168_v34 = vsub.f32 %v3154_v50, %v3165_v59  ;;  %v3169_v38 = vsub.f32 %v3155_v37, %v3165_v59 }
 0x7e8   : > { %v3172_v21 = vmul.f32 %v3168_v34, %v3168_v34  ;;  %v3173_v63 = vmul.f32 %v3169_v38, %v3169_v38 }
 0x7ea   : > { %v3177_v60 = vadd.f32 %v3173_v63, %v3172_v21 }
 0x7ec   : > { %3178 = vadd.xlane.f32.xlu1 %v3177_v60 }
 0x857   : > { %v3176_v3 = vpop.xlane.xlu0 %3175 }
 0x858   : > { %v3180_v22 = vmul.f32 %v3176_v3, %v5774_v18 }
 0x85a   : > { %v3182_v61 = vadd.f32 1e-06, %v3180_v22 }
 0x85c   : > { %4939 = vrsqrt.f32 %v3182_v61  ;;  %vm3190_vm13 = vweird.f32 %v3182_v61 }
 0x85f   : > { %v3179_v62 = vpop.xlane.xlu1 %3178 }
 0x860   : > { %v3181_v0 = vmul.f32 %v3179_v62, %v5774_v18 }
 0x862   : > { %v4940_v28 = vpop.eup %4939  ;;  %v3183_v4 = vadd.f32 1e-06, %v3181_v0 }
 0x863   : > { %v3185_v41 = vmul.f32 %v4940_v28, %v3182_v61  ;;  %vm3191_vm12 = vweird.f32 %v4940_v28 }
 0x864   : > { %4941 = vrsqrt.f32 %v3183_v4  ;;  %vm3192_vm14 = vmor %vm3190_vm13, %vm3191_vm12  ;;  %vm3200_vm0 = vweird.f32 %v3183_v4 }
 0x865   : > { %v3186_v29 = vmul.f32 %v4940_v28, %v3185_v41 }
 0x867   : > { %v3187_v5 = vmul.f32 0.5, %v3186_v29 }
 0x869   : > { %v3188_v7 = vsub.f32 1.5, %v3187_v5 }
 0x86a   : > { %v4942_v8 = vpop.eup %4941 }
 0x86b   : > { %v3189_v9 = vmul.f32 %v4940_v28, %v3188_v7  ;;  %v3195_v18 = vmul.f32 %v4942_v8, %v3183_v4  ;;  %vm3201_vm15 = vweird.f32 %v4942_v8 }
 0x86c   : > { %vm3202_vm1 = vmor %vm3200_vm0, %vm3201_vm15 }
 0x86d   : > { %v3193_v11 = vsel %vm3192_vm14, %v4940_v28, %v3189_v9  ;;  %v3196_v12 = vmul.f32 %v4942_v8, %v3195_v18 }
 0x86e   : > { %v3204_v15 = vmul.f32 %v3193_v11, %v3166_v31  ;;  %v3205_v16 = vmul.f32 %v3193_v11, %v3167_v2 }
 0x86f   : > { %v3197_v17 = vmul.f32 0.5, %v3196_v12 }
 0x870   : > { %v3213_v52 = vmul.f32 %v3209_v39, %v3204_v15  ;;  %v3214_v19 = vmul.f32 %v3210_v10, %v3205_v16 }
 0x871   : > { %v3198_v20 = vsub.f32 1.5, %v3197_v17 }
 0x872   : > { %v3222_v23 = vadd.f32 %v3218_v13, %v3213_v52  ;;  %v3223_v24 = vadd.f32 %v3219_v14, %v3214_v19 }
 0x873   : > { %v3199_v25 = vmul.f32 %v4942_v8, %v3198_v20 }
 0x874   : > { %3226 = vst [vmem:[%s705_s23] sm:$0xff] %v3222_v23 }
 0x875   : > { %3227 = vst [vmem:[%s705_s23 + $0x8] sm:$0xff] %v3223_v24  ;;  %v3203_v26 = vsel %vm3202_vm1, %v4942_v8, %v3199_v25 }
 0x876   : > { %v3206_v27 = vmul.f32 %v3203_v26, %v3168_v34  ;;  %v3207_v54 = vmul.f32 %v3203_v26, %v3169_v38 }
 0x878   : > { %v3215_v30 = vmul.f32 %v3209_v39, %v3206_v27  ;;  %v3216_v32 = vmul.f32 %v3210_v10, %v3207_v54 }
 0x87a   : > { %v3224_v57 = vadd.f32 %v3218_v13, %v3215_v30  ;;  %v3225_v36 = vadd.f32 %v3219_v14, %v3216_v32 }
 0x87c   : > { %3228 = vst [vmem:[%s705_s23 + $0x10] sm:$0xff] %v3224_v57 }
 0x87d   : > { %3229 = vst [vmem:[%s705_s23 + $0x18] sm:$0xff] %v3225_v36 }
 0x87e   : > { %5274 = shalt.err (!%p5271_p9)
}
 0x87f   : > { %s5351_s1 = smov 256   ;;  %s5352_s28 = smov 16  }
 0x880   : > { %4797 = dma.vmem_to_hbm [thread:$0]  (%p5512_p0), %s3244_s5, 512, %s3246_s25, %s3231_s0, %s5351_s1, %s5351_s1, %s5352_s28  }
 0x881 PF: > { %s5959_s16 = sld [smem:[#allocation28_spill]]  ;;  %p5961_p2 = scmp.ge.s32.totalorder %s5333_s21, 2 }
 0x883   : > { %p4832_p4 = pnand %p5961_p2, %p5520_p5 }
 0x885   : > { %p4833_p13 = pneg %p4832_p4 }
 0x887   : > { %s3260_s30 = sand.u32 1, %s5959_s16  }
 0x888   : > { %s3261_s13 = scalar_lea.sflag [#allocation5], %s3260_s30 }
 0x889   : > { %5316 = dma.done.wait (%p4833_p13), %s3261_s13, 512  }
 0x88a   : > { %5318 = vsyncadd (%p4833_p13), %s3261_s13, 4294966784  ;;  %s5962_s21 = sld [smem:[#allocation30_spill]]  ;;  %s5965_s18 = smov %s5325_s19 }
 0x88b   : > { %s5963_s26 = sld [smem:[#allocation29_spill]] }
 0x88c   : > { %s5964_s20 = sld [smem:[#allocation31_spill]] }
 0x890   : > { %p35_p1 = scmp.ge.s32.totalorder %s5962_s21, 4  }
 0x891   : > { %s5966_s19 = smov %s5963_s26 }
 0x892   :  { %37 = sbr.rel (!%p35_p1) target bundleno = 22 (0x16), region = 180 }
 0x897   :  { %3267 = vsyncpa [#allocation4], 1 }
 0x898   :  { %3269 = vsyncpa [#allocation4 + $0x1], 1 }
 0x899   :  { %3270 = vsyncpa [#allocation7], 1 }
 0x89a   :  { %3272 = vsyncpa [#allocation7 + $0x1], 1 }
 0x89b   :  { %3273 = vsyncpa [#allocation10], 1 }
 0x89c   :  { %3274 = vsyncpa [#allocation13], 1 }
 0x89d   :  { %3275 = vsyncpa [#allocation16], 1 }
 0x89e   :  { %3276 = vsyncpa [#allocation19], 1 }
 0x89f   :  { %3277 = vsyncpa [#allocation5], 1 }
 0x8a0   :  { %3279 = vsyncpa [#allocation5 + $0x1], 1 }

</bundles_post_ra>
